<compile_context>
chip_gen: v7x
topology: tpu7x:2x2x1
jax: 0.10.0
libtpu: 0.0.40
codegen_flags: <defaults>
</compile_context>

<pallas_src>
import jax
import jax.numpy as jnp
import numpy as np
from jax.experimental import pallas as pl
from jax.experimental.pallas import tpu as pltpu

LEAK = 0.2            # leakyReluLeak
EPS = 1e-8            # AdaIN / NormalizationLayer epsilon
PHI_TRUNCATION = 0.5  # phiTruncation (GNet default)

# Small, module-consistent configuration (dimInput == dimMapping as in the default 512/512).
B = 2                 # batch
D = 32                # dimInput == dimMapping
N_MAP_LAYERS = 2      # nMappingLayers (small)
SCALE_DIMS = (32, 32) # two addScale() calls -> output side = 2**(2+2) = 16
DIM_OUT = 3           # dimOutput

SIDES = tuple(4 * (2 ** i) for i in range(len(SCALE_DIMS) + 1))   # (4, 8, 16)
SIDE = SIDES[-1]
FINAL_R = SIDE * SIDE                                             # 256
TAP_OFFSETS = tuple((dy, dx) for dy in (-1, 0, 1) for dx in (-1, 0, 1))


def _cols_for(side):
    # lane width used for a scale: batch-stacked rows rounded up to a 128-lane multiple
    return ((B * side * side + 127) // 128) * 128


COLS_LIST = tuple(_cols_for(s) for s in SIDES)    # (128, 128, 512)
MAX_COLS = COLS_LIST[-1]

# per-AdaIN output dims (adain00, adain01, then [a, b] per scale) and style-slab row offsets.
ADAIN_DIMS = (D, D, SCALE_DIMS[0], SCALE_DIMS[0], SCALE_DIMS[1], SCALE_DIMS[1])
_offs, _acc = [], 0
for _c in ADAIN_DIMS:
    _offs.append(_acc)
    _acc += 2 * _c
STYLE_OFFS = tuple(_offs)
N_STYLE = _acc                                    # 384

# per-layer noise slab layout (each segment padded to that scale's lane width -> 128-aligned)
NOISE_SCALE = tuple(i // 2 for i in range(2 * len(SIDES)))         # (0,0,1,1,2,2)
_noff, _nacc = [], 0
for _s in NOISE_SCALE:
    _noff.append(_nacc)
    _nacc += COLS_LIST[_s]
NOISE_OFFS = tuple(_noff)
NOISE_TOTAL = _nacc                               # 1536


def _leaky(x):
    return jnp.where(x > 0.0, x, LEAK * x)


# --------------------------------------------------------------------------------------
# The single fused kernel (whole batch, single invocation).
# Feature layout everywhere: (C, cols) with cols = batch-stacked flattened spatial rows
# (col = b*side*side + y*side + x), zero/ignored padding up to a 128-lane multiple.
# --------------------------------------------------------------------------------------
def gnet_kernel(xT_ref, map_w_ref, map_b_ref, style_w_ref, style_b_ref,
                conv_w_ref, conv_b_ref, rgb_w_ref, rgb_b_ref, base_ref,
                noise_ref, mask_ref, s_ref, p_ref, g_ref,
                o_ref, col_scr):
    # ---- mapping network (transposed: columns = samples), pixel-norm + equalized FC chain ----
    h = xT_ref[...]                                                     # (D, B)
    h = h * jax.lax.rsqrt(jnp.mean(h * h, axis=0, keepdims=True) + EPS)
    for i in range(N_MAP_LAYERS):
        h = _leaky(jnp.dot(map_w_ref[i], h, preferred_element_type=jnp.float32)
                   + map_b_ref[i])

    # ---- all AdaIN styles in one matmul; phi-truncation/mean_w folded in at pack time ----
    styles = (jnp.dot(style_w_ref[...], h, preferred_element_type=jnp.float32)
              + style_b_ref[...])                                       # (N_STYLE, B)

    def noise_act(t, layer_idx, cols):
        # NoiseMultiplier output (weight folded into the noise slab) + LeakyReLU.
        off = NOISE_OFFS[layer_idx]
        return _leaky(t + noise_ref[:, off:off + cols])

    def adain(t, a_idx, sc, cols):
        c = ADAIN_DIMS[a_idx]
        off = STYLE_OFFS[a_idx]
        s_mat = s_ref[sc, :cols, :]                                     # (cols, B): per-sample mean
        p_mat = p_ref[sc, :, :cols]                                     # (B, cols): broadcast back
        mu = jnp.dot(t, s_mat, preferred_element_type=jnp.float32)      # (C, B)
        m2 = jnp.dot(t * t, s_mat, preferred_element_type=jnp.float32)  # (C, B)
        inv = jax.lax.rsqrt(jnp.maximum(m2 - mu * mu, 0.0) + EPS)
        ya = styles[off:off + c, :]                                     # (C, B)
        yb = styles[off + c:off + 2 * c, :]
        sc_col = ya * inv
        sh_col = yb - sc_col * mu
        sb = jnp.dot(jnp.concatenate([sc_col, sh_col], axis=0), p_mat,
                     preferred_element_type=jnp.float32)                # (2C, cols)
        return sb[:c, :] * t + sb[c:, :]

    def conv3x3(t, side, sc, conv_idx, cols):
        # Equalized 3x3 conv (padding=1) as one K=9*Cin im2col matmul.  Taps are lane
        # shifts (pltpu.roll); validity masks kill out-of-image / cross-sample / wrapped
        # positions; each masked tap is cast to bf16 and staged into the VMEM col scratch.
        cin = t.shape[0]
        for tap_i, (dy, dx) in enumerate(TAP_OFFSETS):
            delta = dy * side + dx
            rolled = t if delta == 0 else pltpu.roll(t, shift=(-delta) % cols, axis=1)
            m = mask_ref[sc, tap_i:tap_i + 1, :cols]                    # (1, cols)
            col_scr[tap_i * cin:(tap_i + 1) * cin, :cols] = (
                jnp.where(m > 0.0, rolled, 0.0).astype(jnp.bfloat16))
        out = jnp.dot(conv_w_ref[conv_idx], col_scr[:, :cols],
                      preferred_element_type=jnp.float32)               # (Cout, cols)
        return out + conv_b_ref[conv_idx]

    def upsample(t, sc_out, cols_in, cols_out):
        # Nearest-neighbour x2 Upscale2d as a bf16 0/1 column-selection matmul (exact).
        g = g_ref[sc_out - 1, :cols_in, :cols_out]                      # (cols_in, cols_out) bf16
        return jnp.dot(t.astype(jnp.bfloat16), g, preferred_element_type=jnp.float32)

    # ---- scale 0 : 4x4 ----
    cols = COLS_LIST[0]
    feat = base_ref[...]                                                # (D, cols)
    feat = adain(noise_act(feat, 0, cols), 0, 0, cols)
    feat = conv3x3(feat, SIDES[0], 0, 0, cols)
    feat = adain(noise_act(feat, 1, cols), 1, 0, cols)

    # ---- added scales ----
    idx = 2       # running AdaIN / noise-layer index
    conv_i = 1
    for k in range(len(SCALE_DIMS)):
        sc = k + 1
        cols_in, cols = COLS_LIST[sc - 1], COLS_LIST[sc]
        feat = upsample(feat, sc, cols_in, cols)
        for _ in range(2):
            feat = conv3x3(feat, SIDES[sc], sc, conv_i, cols)
            feat = adain(noise_act(feat, idx, cols), idx, sc, cols)
            conv_i += 1
            idx += 1

    # ---- toRGB (1x1 conv): (3, C) @ (C, cols) -> lane-dense (3, rows) stores per sample ----
    rgb = (jnp.dot(rgb_w_ref[...], feat, preferred_element_type=jnp.float32)
           + rgb_b_ref[...])                                            # (3, cols)
    for b in range(B):
        o_ref[b] = rgb[:, b * FINAL_R:(b + 1) * FINAL_R]
    # TODO(synk): alpha-blend branch (self.alpha > 0) and training-time mean_w EMA not exercised.


# --------------------------------------------------------------------------------------
# Static helper tables (built once, outside the kernel).
# --------------------------------------------------------------------------------------
def make_conv_masks(side, cols):
    # mask[tap, col] = 1 iff col is a valid (sample, y, x) position and the tap's source
    # (y+dy, x+dx) lies inside the image (this also blocks cross-sample / roll-wrap bleed).
    rr = side * side
    m = np.zeros((9, cols), np.float32)
    for ti, (dy, dx) in enumerate(TAP_OFFSETS):
        for b in range(B):
            for y in range(side):
                for x in range(side):
                    if 0 <= y + dy < side and 0 <= x + dx < side:
                        m[ti, b * rr + y * side + x] = 1.0
    return m


def make_stat_matrices(side, cols):
    # S: (cols, B) with 1/R on each sample's valid columns (segmented mean);
    # P: (B, cols) 0/1 broadcast-back selector (zero on padding columns).
    rr = side * side
    s = np.zeros((cols, B), np.float32)
    p = np.zeros((B, cols), np.float32)
    for b in range(B):
        s[b * rr:(b + 1) * rr, b] = 1.0 / rr
        p[b, b * rr:(b + 1) * rr] = 1.0
    return s, p


def make_upsample_matrix(s_out, cols_in, cols_out):
    s_in = s_out // 2
    r_in, r_out = s_in * s_in, s_out * s_out
    g = np.zeros((cols_in, cols_out), np.float32)
    for b in range(B):
        for y in range(s_out):
            for x in range(s_out):
                g[b * r_in + (y // 2) * s_in + (x // 2), b * r_out + y * s_out + x] = 1.0
    return g


# --------------------------------------------------------------------------------------
# Wrapper: one pallas_call for the whole network, whole batch.
# --------------------------------------------------------------------------------------
def gnet_forward(x, kp, noises):
    bsz = x.shape[0]
    assert bsz == B

    # Consolidate per-layer noise into one 128-aligned slab; fold the (zero-init in the
    # module) NoiseMultiplier weights in so the kernel only adds.
    nw = kp['nw']
    segs = []
    for i, n in enumerate(noises):
        cols = COLS_LIST[NOISE_SCALE[i]]
        flat = (n * nw[i]).reshape(-1)                      # (B * side * side,)  b-major
        segs.append(jnp.pad(flat, (0, cols - flat.shape[0])))
    noise_slab = jnp.concatenate(segs)[None, :]             # (1, NOISE_TOTAL)

    inputs = (x.T, kp['map_wT'], kp['map_bT'], kp['style_wT'], kp['style_bT'],
              kp['conv_wT'], kp['conv_bT'], kp['rgb_wT'], kp['rgb_bT'],
              kp['base_cols'], noise_slab, kp['masks'], kp['s_all'], kp['p_all'],
              kp['g_all'])

    out = pl.pallas_call(
        gnet_kernel,
        out_shape=jax.ShapeDtypeStruct((bsz, DIM_OUT, FINAL_R), jnp.float32),
        in_specs=[pl.BlockSpec(memory_space=pltpu.MemorySpace.VMEM)] * len(inputs),
        out_specs=pl.BlockSpec(memory_space=pltpu.MemorySpace.VMEM),
        scratch_shapes=[pltpu.VMEM((9 * D, MAX_COLS), jnp.bfloat16)],   # im2col staging
    )(*inputs)
    return out.reshape(bsz, DIM_OUT, SIDE, SIDE)             # NCHW, free reshape


# --------------------------------------------------------------------------------------
# Parameters (effective equalized-LR weights) + pack into the fused-kernel layout.
# --------------------------------------------------------------------------------------
def init_params(key):
    keys = iter(jax.random.split(key, 64))

    def adain_params(k, c_out):
        # EqualizedLinear(D, 2*c_out): effective W = N(0,1)*sqrt(2/D), bias = 0.
        ws = jax.random.normal(k, (D, 2 * c_out), jnp.float32) * jnp.sqrt(2.0 / D)
        zeros = jnp.zeros((1, c_out), jnp.float32)
        return (ws[:, :c_out], zeros, ws[:, c_out:], zeros)

    def conv_params(k, c_in, c_out, ksize):
        # EqualizedConv2d: effective W = N(0,1)*sqrt(2/(c_in*k*k)), bias = 0.
        scale = jnp.sqrt(2.0 / (c_in * ksize * ksize))
        w = jax.random.normal(k, (ksize * ksize, c_in, c_out), jnp.float32) * scale
        return (w, jnp.zeros((1, c_out), jnp.float32))

    p = {}
    map_w = [jax.random.normal(next(keys), (D, D), jnp.float32) * jnp.sqrt(2.0 / D)
             for _ in range(N_MAP_LAYERS)]
    p['map_w'] = jnp.stack(map_w)                                  # (L, D, D)
    p['map_b'] = jnp.zeros((N_MAP_LAYERS, 1, D), jnp.float32)      # initBiasToZero
    p['mean_w'] = jax.random.normal(next(keys), (1, D), jnp.float32)
    p['base'] = jnp.ones((1, SIDES[0], SIDES[0], D), jnp.float32)  # baseScale0 (NHWC)
    p['adain00'] = adain_params(next(keys), D)
    p['adain01'] = adain_params(next(keys), D)
    p['conv0'] = conv_params(next(keys), D, D, 3)
    # NoiseMultiplier weights are 0 in the module __init__; use small non-zero values here
    # so the noise path is actually exercised by the numerical check.
    p['nw00'] = jnp.full((1,), 0.08, jnp.float32)
    p['nw01'] = jnp.full((1,), -0.05, jnp.float32)

    scales = []
    last = D
    for si, c in enumerate(SCALE_DIMS):
        scales.append({
            'conv_a': conv_params(next(keys), last, c, 3),
            'adain_a': adain_params(next(keys), c),
            'conv_b': conv_params(next(keys), c, c, 3),
            'adain_b': adain_params(next(keys), c),
            'nw_a': jnp.full((1,), 0.03 * (si + 1), jnp.float32),
            'nw_b': jnp.full((1,), -0.02 * (si + 1), jnp.float32),
        })
        last = c
    p['scales'] = scales
    p['to_rgb'] = conv_params(next(keys), last, DIM_OUT, 1)
    return p


def pack_params(p):
    """Pack per-layer parameters into the fused-kernel layout (done once, outside jit)."""
    hi = jax.lax.Precision.HIGHEST
    adains = [p['adain00'], p['adain01']]
    convs = [p['conv0']]
    nws = [p['nw00'], p['nw01']]
    for g in p['scales']:
        convs += [g['conv_a'], g['conv_b']]
        adains += [g['adain_a'], g['adain_b']]
        nws += [g['nw_a'], g['nw_b']]

    style_w = jnp.concatenate([jnp.concatenate([wa, wb], axis=1)
                               for (wa, _, wb, _) in adains], axis=1)       # (D, N_STYLE)
    style_b = jnp.concatenate([jnp.concatenate([ba, bb], axis=1)
                               for (_, ba, _, bb) in adains], axis=1)       # (1, N_STYLE)
    # Fold mean_w + phi-truncation into the style projection (exact algebraic rewrite):
    #   styles = (mean + phi*(h - mean)) @ W + b = h @ (phi*W) + (b + (1-phi)*mean @ W)
    style_w_eff = PHI_TRUNCATION * style_w
    style_b_eff = style_b + (1.0 - PHI_TRUNCATION) * jnp.dot(p['mean_w'], style_w,
                                                             precision=hi)

    conv_wT = jnp.stack([w.reshape(-1, w.shape[-1]).T
                         for (w, _) in convs]).astype(jnp.bfloat16)          # (5, 32, 288)
    conv_bT = jnp.stack([b.T for (_, b) in convs])                           # (5, 32, 1)
    rgb_w, rgb_b = p['to_rgb']                                               # (1,32,3), (1,3)

    base = p['base'].reshape(SIDES[0] * SIDES[0], D).T                       # (D, 16)
    base_cols = jnp.pad(jnp.tile(base, (1, B)),
                        ((0, 0), (0, COLS_LIST[0] - B * SIDES[0] * SIDES[0])))

    masks = np.zeros((len(SIDES), 9, MAX_COLS), np.float32)
    s_all = np.zeros((len(SIDES), MAX_COLS, B), np.float32)
    p_all = np.zeros((len(SIDES), B, MAX_COLS), np.float32)
    for sc, side in enumerate(SIDES):
        cols = COLS_LIST[sc]
        masks[sc, :, :cols] = make_conv_masks(side, cols)
        s_m, p_m = make_stat_matrices(side, cols)
        s_all[sc, :cols, :] = s_m
        p_all[sc, :, :cols] = p_m

    g_rows = max(COLS_LIST[:-1])
    g_all = np.zeros((len(SIDES) - 1, g_rows, MAX_COLS), np.float32)
    for k in range(len(SIDES) - 1):
        g_all[k, :COLS_LIST[k], :COLS_LIST[k + 1]] = make_upsample_matrix(
            SIDES[k + 1], COLS_LIST[k], COLS_LIST[k + 1])

    return {
        'map_wT': jnp.transpose(p['map_w'], (0, 2, 1)),      # (L, D, D)
        'map_bT': jnp.transpose(p['map_b'], (0, 2, 1)),      # (L, D, 1)
        'style_wT': style_w_eff.T,                           # (N_STYLE, D)
        'style_bT': style_b_eff.T,                           # (N_STYLE, 1)
        'conv_wT': conv_wT,
        'conv_bT': conv_bT,
        'rgb_wT': rgb_w[0].T,                                # (DIM_OUT, C)
        'rgb_bT': rgb_b.T,                                   # (DIM_OUT, 1)
        'base_cols': base_cols,                              # (D, COLS_LIST[0])
        'masks': jnp.asarray(masks),
        's_all': jnp.asarray(s_all),
        'p_all': jnp.asarray(p_all),
        'g_all': jnp.asarray(g_all).astype(jnp.bfloat16),    # 0/1 selectors: exact in bf16
        'nw': jnp.concatenate(nws),                          # (6,)
    }


# --------------------------------------------------------------------------------------
# Pure-JAX reference (NHWC, high precision) for a sanity check.
# --------------------------------------------------------------------------------------
def upscale2d(x, factor=2):
    x = jnp.repeat(x, factor, axis=1)
    return jnp.repeat(x, factor, axis=2)


def ref_forward(x, p, noises):
    hi = jax.lax.Precision.HIGHEST
    h = x * jax.lax.rsqrt(jnp.mean(x * x, axis=1, keepdims=True) + EPS)
    for i in range(p['map_w'].shape[0]):
        h = _leaky(jnp.dot(h, p['map_w'][i], precision=hi) + p['map_b'][i, 0])
    w = p['mean_w'] + PHI_TRUNCATION * (h - p['mean_w'])

    def adain(feat, prm):
        wa, ba, wb, bb = prm
        b_, hh, ww, c = feat.shape
        t = feat.reshape(b_, hh * ww, c)
        mu = jnp.mean(t, axis=1, keepdims=True)
        var = jnp.maximum(jnp.mean(t * t, axis=1, keepdims=True) - mu * mu, 0.0)
        tn = (t - mu) * jax.lax.rsqrt(var + EPS)
        ya = (jnp.dot(w, wa, precision=hi) + ba)[:, None, :]
        yb = (jnp.dot(w, wb, precision=hi) + bb)[:, None, :]
        return (ya * tn + yb).reshape(b_, hh, ww, c)

    def conv(feat, prm, k, pad):
        cw, cb = prm
        hwio = cw.reshape(k, k, cw.shape[1], cw.shape[2])
        out = jax.lax.conv_general_dilated(
            feat, hwio, (1, 1), [(pad, pad), (pad, pad)],
            dimension_numbers=('NHWC', 'HWIO', 'NHWC'), precision=hi)
        return out + cb[0]

    bsz = x.shape[0]
    feat = jnp.broadcast_to(p['base'], (bsz, SIDES[0], SIDES[0], D))
    feat = adain(_leaky(feat + noises[0] * p['nw00'][0]), p['adain00'])
    feat = conv(feat, p['conv0'], 3, 1)
    feat = adain(_leaky(feat + noises[1] * p['nw01'][0]), p['adain01'])
    ni = 2
    for g in p['scales']:
        feat = upscale2d(feat)
        feat = conv(feat, g['conv_a'], 3, 1)
        feat = adain(_leaky(feat + noises[ni] * g['nw_a'][0]), g['adain_a']); ni += 1
        feat = conv(feat, g['conv_b'], 3, 1)
        feat = adain(_leaky(feat + noises[ni] * g['nw_b'][0]), g['adain_b']); ni += 1
    out = conv(feat, p['to_rgb'], 1, 0)
    return jnp.transpose(out, (0, 3, 1, 2))


if __name__ == "__main__":
    key = jax.random.PRNGKey(0)
    kp_key, kx, kn = jax.random.split(key, 3)
    params = init_params(kp_key)
    packed = pack_params(params)
    x = jax.random.normal(kx, (B, D), jnp.float32)           # latent input (B, dimInput)

    # Per-layer noise tensors (same shapes the module samples internally).
    sizes = [SIDES[0], SIDES[0]]
    for s in SIDES[1:]:
        sizes += [s, s]
    noise_keys = jax.random.split(kn, len(sizes))
    noises = [jax.random.normal(noise_keys[i], (B, sz, sz, 1), jnp.float32)
              for i, sz in enumerate(sizes)]

    out = jax.jit(gnet_forward)(x, packed, noises)
    out = jax.block_until_ready(out)

    assert out.shape == (B, DIM_OUT, SIDE, SIDE)
    assert bool(jnp.all(jnp.isfinite(out)))
    ref = ref_forward(x, params, noises)
    # bf16 MXU inputs (f32 accumulation) introduce ~1% deviation vs the f32 HIGHEST reference.
    assert bool(jnp.allclose(out, ref, atol=1e-1, rtol=1e-1)), \
        float(jnp.max(jnp.abs(out - ref)))
    print("KERNEL_OK")
</pallas_src>

<mosaic_0001>
module attributes {stable_mosaic.version = 11 : i64} {
  func.func @gnet_kernel(%arg0: memref<32x2xf32, #tpu.memory_space<vmem>>, %arg1: memref<2x32x32xf32, #tpu.memory_space<vmem>>, %arg2: memref<2x32x1xf32, #tpu.memory_space<vmem>>, %arg3: memref<384x32xf32, #tpu.memory_space<vmem>>, %arg4: memref<384x1xf32, #tpu.memory_space<vmem>>, %arg5: memref<5x32x288xbf16, #tpu.memory_space<vmem>>, %arg6: memref<5x32x1xf32, #tpu.memory_space<vmem>>, %arg7: memref<3x32xf32, #tpu.memory_space<vmem>>, %arg8: memref<3x1xf32, #tpu.memory_space<vmem>>, %arg9: memref<32x128xf32, #tpu.memory_space<vmem>>, %arg10: memref<1x1536xf32, #tpu.memory_space<vmem>>, %arg11: memref<3x9x512xf32, #tpu.memory_space<vmem>>, %arg12: memref<3x512x2xf32, #tpu.memory_space<vmem>>, %arg13: memref<3x2x512xf32, #tpu.memory_space<vmem>>, %arg14: memref<2x128x512xbf16, #tpu.memory_space<vmem>>, %arg15: memref<2x3x256xf32, #tpu.memory_space<vmem>>, %arg16: memref<288x512xbf16, #tpu.memory_space<vmem>>) attributes {dimension_semantics = [], scalar_prefetch = 0 : i64, scratch_operands = 1 : i64, tpu.core_type = #tpu.core_type<tc>} {
    %c0 = arith.constant 0 : index
    %c0_0 = arith.constant 0 : index
    %0 = vector.load %arg0[%c0, %c0_0] : memref<32x2xf32, #tpu.memory_space<vmem>>, vector<32x2xf32>
    %1 = arith.mulf %0, %0 : vector<32x2xf32>
    %cst = arith.constant dense<0.000000e+00> : vector<2xf32>
    %2 = vector.multi_reduction <add>, %1, %cst [0] : vector<32x2xf32> to vector<2xf32>
    %3 = vector.shape_cast %2 : vector<2xf32> to vector<1x2xf32>
    %cst_1 = arith.constant 3.200000e+01 : f32
    %4 = vector.broadcast %cst_1 : f32 to vector<1x2xf32>
    %5 = arith.divf %3, %4 : vector<1x2xf32>
    %cst_2 = arith.constant 9.99999993E-9 : f32
    %6 = vector.broadcast %cst_2 : f32 to vector<1x2xf32>
    %7 = arith.addf %5, %6 : vector<1x2xf32>
    %8 = math.rsqrt %7 : vector<1x2xf32>
    %9 = vector.broadcast %8 : vector<1x2xf32> to vector<32x2xf32>
    %10 = arith.mulf %0, %9 : vector<32x2xf32>
    %c0_3 = arith.constant 0 : index
    %c0_4 = arith.constant 0 : index
    %c0_5 = arith.constant 0 : index
    %11 = vector.load %arg1[%c0_3, %c0_4, %c0_5] : memref<2x32x32xf32, #tpu.memory_space<vmem>>, vector<1x32x32xf32>
    %12 = vector.shape_cast %11 : vector<1x32x32xf32> to vector<32x32xf32>
    %cst_6 = arith.constant dense<0.000000e+00> : vector<32x2xf32>
    %13 = tpu.matmul %12, %10, %cst_6 {dimension_numbers = #tpu.dot_dimension_numbers<[1], [0], [0], [1], [0, 0, 1, 1], [], []>} : vector<32x32xf32>, vector<32x2xf32>, vector<32x2xf32> -> vector<32x2xf32>
    %c0_7 = arith.constant 0 : index
    %c0_8 = arith.constant 0 : index
    %c0_9 = arith.constant 0 : index
    %14 = vector.load %arg2[%c0_7, %c0_8, %c0_9] : memref<2x32x1xf32, #tpu.memory_space<vmem>>, vector<1x32x1xf32>
    %15 = vector.shape_cast %14 : vector<1x32x1xf32> to vector<32x1xf32>
    %16 = vector.broadcast %15 : vector<32x1xf32> to vector<32x2xf32>
    %17 = arith.addf %13, %16 : vector<32x2xf32>
    %cst_10 = arith.constant 0.000000e+00 : f32
    %18 = vector.broadcast %cst_10 : f32 to vector<32x2xf32>
    %19 = arith.cmpf ogt, %17, %18 : vector<32x2xf32>
    %cst_11 = arith.constant 2.000000e-01 : f32
    %20 = vector.broadcast %cst_11 : f32 to vector<32x2xf32>
    %21 = arith.mulf %20, %17 : vector<32x2xf32>
    %22 = arith.select %19, %17, %21 : vector<32x2xi1>, vector<32x2xf32>
    %c1 = arith.constant 1 : index
    %c0_12 = arith.constant 0 : index
    %c0_13 = arith.constant 0 : index
    %23 = vector.load %arg1[%c1, %c0_12, %c0_13] : memref<2x32x32xf32, #tpu.memory_space<vmem>>, vector<1x32x32xf32>
    %24 = vector.shape_cast %23 : vector<1x32x32xf32> to vector<32x32xf32>
    %cst_14 = arith.constant dense<0.000000e+00> : vector<32x2xf32>
    %25 = tpu.matmul %24, %22, %cst_14 {dimension_numbers = #tpu.dot_dimension_numbers<[1], [0], [0], [1], [0, 0, 1, 1], [], []>} : vector<32x32xf32>, vector<32x2xf32>, vector<32x2xf32> -> vector<32x2xf32>
    %c1_15 = arith.constant 1 : index
    %c0_16 = arith.constant 0 : index
    %c0_17 = arith.constant 0 : index
    %26 = vector.load %arg2[%c1_15, %c0_16, %c0_17] : memref<2x32x1xf32, #tpu.memory_space<vmem>>, vector<1x32x1xf32>
    %27 = vector.shape_cast %26 : vector<1x32x1xf32> to vector<32x1xf32>
    %28 = vector.broadcast %27 : vector<32x1xf32> to vector<32x2xf32>
    %29 = arith.addf %25, %28 : vector<32x2xf32>
    %cst_18 = arith.constant 0.000000e+00 : f32
    %30 = vector.broadcast %cst_18 : f32 to vector<32x2xf32>
    %31 = arith.cmpf ogt, %29, %30 : vector<32x2xf32>
    %cst_19 = arith.constant 2.000000e-01 : f32
    %32 = vector.broadcast %cst_19 : f32 to vector<32x2xf32>
    %33 = arith.mulf %32, %29 : vector<32x2xf32>
    %34 = arith.select %31, %29, %33 : vector<32x2xi1>, vector<32x2xf32>
    %c0_20 = arith.constant 0 : index
    %c0_21 = arith.constant 0 : index
    %35 = vector.load %arg3[%c0_20, %c0_21] : memref<384x32xf32, #tpu.memory_space<vmem>>, vector<384x32xf32>
    %cst_22 = arith.constant dense<0.000000e+00> : vector<384x2xf32>
    %36 = tpu.matmul %35, %34, %cst_22 {dimension_numbers = #tpu.dot_dimension_numbers<[1], [0], [0], [1], [0, 0, 1, 1], [], []>} : vector<384x32xf32>, vector<32x2xf32>, vector<384x2xf32> -> vector<384x2xf32>
    %c0_23 = arith.constant 0 : index
    %c0_24 = arith.constant 0 : index
    %37 = vector.load %arg4[%c0_23, %c0_24] : memref<384x1xf32, #tpu.memory_space<vmem>>, vector<384x1xf32>
    %38 = vector.broadcast %37 : vector<384x1xf32> to vector<384x2xf32>
    %39 = arith.addf %36, %38 : vector<384x2xf32>
    %c0_25 = arith.constant 0 : index
    %c0_26 = arith.constant 0 : index
    %40 = vector.load %arg9[%c0_25, %c0_26] : memref<32x128xf32, #tpu.memory_space<vmem>>, vector<32x128xf32>
    %c0_27 = arith.constant 0 : index
    %c0_28 = arith.constant 0 : index
    %41 = vector.load %arg10[%c0_27, %c0_28] : memref<1x1536xf32, #tpu.memory_space<vmem>>, vector<1x128xf32>
    %42 = vector.broadcast %41 : vector<1x128xf32> to vector<32x128xf32>
    %43 = arith.addf %40, %42 : vector<32x128xf32>
    %cst_29 = arith.constant 0.000000e+00 : f32
    %44 = vector.broadcast %cst_29 : f32 to vector<32x128xf32>
    %45 = arith.cmpf ogt, %43, %44 : vector<32x128xf32>
    %cst_30 = arith.constant 2.000000e-01 : f32
    %46 = vector.broadcast %cst_30 : f32 to vector<32x128xf32>
    %47 = arith.mulf %46, %43 : vector<32x128xf32>
    %48 = arith.select %45, %43, %47 : vector<32x128xi1>, vector<32x128xf32>
    %c0_31 = arith.constant 0 : index
    %c0_32 = arith.constant 0 : index
    %c0_33 = arith.constant 0 : index
    %49 = vector.load %arg12[%c0_31, %c0_32, %c0_33] : memref<3x512x2xf32, #tpu.memory_space<vmem>>, vector<1x128x2xf32>
    %50 = vector.shape_cast %49 : vector<1x128x2xf32> to vector<128x2xf32>
    %c0_34 = arith.constant 0 : index
    %c0_35 = arith.constant 0 : index
    %c0_36 = arith.constant 0 : index
    %51 = vector.load %arg13[%c0_34, %c0_35, %c0_36] : memref<3x2x512xf32, #tpu.memory_space<vmem>>, vector<1x2x128xf32>
    %52 = vector.shape_cast %51 : vector<1x2x128xf32> to vector<2x128xf32>
    %cst_37 = arith.constant dense<0.000000e+00> : vector<32x2xf32>
    %53 = tpu.matmul %48, %50, %cst_37 {dimension_numbers = #tpu.dot_dimension_numbers<[1], [0], [0], [1], [0, 0, 1, 1], [], []>} : vector<32x128xf32>, vector<128x2xf32>, vector<32x2xf32> -> vector<32x2xf32>
    %54 = arith.mulf %48, %48 : vector<32x128xf32>
    %cst_38 = arith.constant dense<0.000000e+00> : vector<32x2xf32>
    %55 = tpu.matmul %54, %50, %cst_38 {dimension_numbers = #tpu.dot_dimension_numbers<[1], [0], [0], [1], [0, 0, 1, 1], [], []>} : vector<32x128xf32>, vector<128x2xf32>, vector<32x2xf32> -> vector<32x2xf32>
    %56 = arith.mulf %53, %53 : vector<32x2xf32>
    %57 = arith.subf %55, %56 : vector<32x2xf32>
    %cst_39 = arith.constant 0.000000e+00 : f32
    %58 = vector.broadcast %cst_39 : f32 to vector<32x2xf32>
    %59 = arith.maximumf %57, %58 : vector<32x2xf32>
    %cst_40 = arith.constant 9.99999993E-9 : f32
    %60 = vector.broadcast %cst_40 : f32 to vector<32x2xf32>
    %61 = arith.addf %59, %60 : vector<32x2xf32>
    %62 = math.rsqrt %61 : vector<32x2xf32>
    %63 = vector.extract_strided_slice %39 {offsets = [0, 0], sizes = [32, 2], strides = [1, 1]} : vector<384x2xf32> to vector<32x2xf32>
    %64 = vector.extract_strided_slice %39 {offsets = [32, 0], sizes = [32, 2], strides = [1, 1]} : vector<384x2xf32> to vector<32x2xf32>
    %65 = arith.mulf %63, %62 : vector<32x2xf32>
    %66 = arith.mulf %65, %53 : vector<32x2xf32>
    %67 = arith.subf %64, %66 : vector<32x2xf32>
    %68 = tpu.concatenate %65, %67 in 0 : vector<32x2xf32>, vector<32x2xf32> -> vector<64x2xf32>
    %cst_41 = arith.constant dense<0.000000e+00> : vector<64x128xf32>
    %69 = tpu.matmul %68, %52, %cst_41 {dimension_numbers = #tpu.dot_dimension_numbers<[1], [0], [0], [1], [0, 0, 1, 1], [], []>} : vector<64x2xf32>, vector<2x128xf32>, vector<64x128xf32> -> vector<64x128xf32>
    %70 = vector.extract_strided_slice %69 {offsets = [0, 0], sizes = [32, 128], strides = [1, 1]} : vector<64x128xf32> to vector<32x128xf32>
    %71 = arith.mulf %70, %48 : vector<32x128xf32>
    %72 = vector.extract_strided_slice %69 {offsets = [32, 0], sizes = [32, 128], strides = [1, 1]} : vector<64x128xf32> to vector<32x128xf32>
    %73 = arith.addf %71, %72 : vector<32x128xf32>
    %c5_i32 = arith.constant 5 : i32
    %74 = tpu.dynamic_rotate %73 by %c5_i32 dim 1 : vector<32x128xf32>, i32 -> vector<32x128xf32>
    %c0_42 = arith.constant 0 : index
    %c0_43 = arith.constant 0 : index
    %c0_44 = arith.constant 0 : index
    %75 = vector.load %arg11[%c0_42, %c0_43, %c0_44] : memref<3x9x512xf32, #tpu.memory_space<vmem>>, vector<1x1x128xf32>
    %76 = vector.shape_cast %75 : vector<1x1x128xf32> to vector<1x128xf32>
    %cst_45 = arith.constant 0.000000e+00 : f32
    %77 = vector.broadcast %cst_45 : f32 to vector<1x128xf32>
    %78 = arith.cmpf ogt, %76, %77 : vector<1x128xf32>
    %cst_46 = arith.constant 0.000000e+00 : f32
    %79 = vector.shape_cast %78 : vector<1x128xi1> to vector<1x128xi1>
    %80 = vector.broadcast %79 : vector<1x128xi1> to vector<32x128xi1>
    %81 = vector.broadcast %cst_46 : f32 to vector<32x128xf32>
    %82 = arith.select %80, %74, %81 : vector<32x128xi1>, vector<32x128xf32>
    %83 = arith.truncf %82 : vector<32x128xf32> to vector<32x128xbf16>
    %c0_47 = arith.constant 0 : index
    %c0_48 = arith.constant 0 : index
    %84 = vector.load %arg16[%c0_47, %c0_48] : memref<288x512xbf16, #tpu.memory_space<vmem>>, vector<32x128xbf16>
    tpu.vector_store %arg16[%c0_47, %c0_48], %83 {strides = array<i32>} : memref<288x512xbf16, #tpu.memory_space<vmem>>, vector<32x128xbf16>,
    %c4_i32 = arith.constant 4 : i32
    %85 = tpu.dynamic_rotate %73 by %c4_i32 dim 1 : vector<32x128xf32>, i32 -> vector<32x128xf32>
    %c0_49 = arith.constant 0 : index
    %c1_50 = arith.constant 1 : index
    %c0_51 = arith.constant 0 : index
    %86 = vector.load %arg11[%c0_49, %c1_50, %c0_51] : memref<3x9x512xf32, #tpu.memory_space<vmem>>, vector<1x1x128xf32>
    %87 = vector.shape_cast %86 : vector<1x1x128xf32> to vector<1x128xf32>
    %cst_52 = arith.constant 0.000000e+00 : f32
    %88 = vector.broadcast %cst_52 : f32 to vector<1x128xf32>
    %89 = arith.cmpf ogt, %87, %88 : vector<1x128xf32>
    %cst_53 = arith.constant 0.000000e+00 : f32
    %90 = vector.shape_cast %89 : vector<1x128xi1> to vector<1x128xi1>
    %91 = vector.broadcast %90 : vector<1x128xi1> to vector<32x128xi1>
    %92 = vector.broadcast %cst_53 : f32 to vector<32x128xf32>
    %93 = arith.select %91, %85, %92 : vector<32x128xi1>, vector<32x128xf32>
    %94 = arith.truncf %93 : vector<32x128xf32> to vector<32x128xbf16>
    %c32 = arith.constant 32 : index
    %c0_54 = arith.constant 0 : index
    %95 = vector.load %arg16[%c32, %c0_54] : memref<288x512xbf16, #tpu.memory_space<vmem>>, vector<32x128xbf16>
    tpu.vector_store %arg16[%c32, %c0_54], %94 {strides = array<i32>} : memref<288x512xbf16, #tpu.memory_space<vmem>>, vector<32x128xbf16>,
    %c3_i32 = arith.constant 3 : i32
    %96 = tpu.dynamic_rotate %73 by %c3_i32 dim 1 : vector<32x128xf32>, i32 -> vector<32x128xf32>
    %c0_55 = arith.constant 0 : index
    %c2 = arith.constant 2 : index
    %c0_56 = arith.constant 0 : index
    %97 = vector.load %arg11[%c0_55, %c2, %c0_56] : memref<3x9x512xf32, #tpu.memory_space<vmem>>, vector<1x1x128xf32>
    %98 = vector.shape_cast %97 : vector<1x1x128xf32> to vector<1x128xf32>
    %cst_57 = arith.constant 0.000000e+00 : f32
    %99 = vector.broadcast %cst_57 : f32 to vector<1x128xf32>
    %100 = arith.cmpf ogt, %98, %99 : vector<1x128xf32>
    %cst_58 = arith.constant 0.000000e+00 : f32
    %101 = vector.shape_cast %100 : vector<1x128xi1> to vector<1x128xi1>
    %102 = vector.broadcast %101 : vector<1x128xi1> to vector<32x128xi1>
    %103 = vector.broadcast %cst_58 : f32 to vector<32x128xf32>
    %104 = arith.select %102, %96, %103 : vector<32x128xi1>, vector<32x128xf32>
    %105 = arith.truncf %104 : vector<32x128xf32> to vector<32x128xbf16>
    %c64 = arith.constant 64 : index
    %c0_59 = arith.constant 0 : index
    %106 = vector.load %arg16[%c64, %c0_59] : memref<288x512xbf16, #tpu.memory_space<vmem>>, vector<32x128xbf16>
    tpu.vector_store %arg16[%c64, %c0_59], %105 {strides = array<i32>} : memref<288x512xbf16, #tpu.memory_space<vmem>>, vector<32x128xbf16>,
    %c1_i32 = arith.constant 1 : i32
    %107 = tpu.dynamic_rotate %73 by %c1_i32 dim 1 : vector<32x128xf32>, i32 -> vector<32x128xf32>
    %c0_60 = arith.constant 0 : index
    %c3 = arith.constant 3 : index
    %c0_61 = arith.constant 0 : index
    %108 = vector.load %arg11[%c0_60, %c3, %c0_61] : memref<3x9x512xf32, #tpu.memory_space<vmem>>, vector<1x1x128xf32>
    %109 = vector.shape_cast %108 : vector<1x1x128xf32> to vector<1x128xf32>
    %cst_62 = arith.constant 0.000000e+00 : f32
    %110 = vector.broadcast %cst_62 : f32 to vector<1x128xf32>
    %111 = arith.cmpf ogt, %109, %110 : vector<1x128xf32>
    %cst_63 = arith.constant 0.000000e+00 : f32
    %112 = vector.shape_cast %111 : vector<1x128xi1> to vector<1x128xi1>
    %113 = vector.broadcast %112 : vector<1x128xi1> to vector<32x128xi1>
    %114 = vector.broadcast %cst_63 : f32 to vector<32x128xf32>
    %115 = arith.select %113, %107, %114 : vector<32x128xi1>, vector<32x128xf32>
    %116 = arith.truncf %115 : vector<32x128xf32> to vector<32x128xbf16>
    %c96 = arith.constant 96 : index
    %c0_64 = arith.constant 0 : index
    %117 = vector.load %arg16[%c96, %c0_64] : memref<288x512xbf16, #tpu.memory_space<vmem>>, vector<32x128xbf16>
    tpu.vector_store %arg16[%c96, %c0_64], %116 {strides = array<i32>} : memref<288x512xbf16, #tpu.memory_space<vmem>>, vector<32x128xbf16>,
    %c0_65 = arith.constant 0 : index
    %c4 = arith.constant 4 : index
    %c0_66 = arith.constant 0 : index
    %118 = vector.load %arg11[%c0_65, %c4, %c0_66] : memref<3x9x512xf32, #tpu.memory_space<vmem>>, vector<1x1x128xf32>
    %119 = vector.shape_cast %118 : vector<1x1x128xf32> to vector<1x128xf32>
    %cst_67 = arith.constant 0.000000e+00 : f32
    %120 = vector.broadcast %cst_67 : f32 to vector<1x128xf32>
    %121 = arith.cmpf ogt, %119, %120 : vector<1x128xf32>
    %cst_68 = arith.constant 0.000000e+00 : f32
    %122 = vector.shape_cast %121 : vector<1x128xi1> to vector<1x128xi1>
    %123 = vector.broadcast %122 : vector<1x128xi1> to vector<32x128xi1>
    %124 = vector.broadcast %cst_68 : f32 to vector<32x128xf32>
    %125 = arith.select %123, %73, %124 : vector<32x128xi1>, vector<32x128xf32>
    %126 = arith.truncf %125 : vector<32x128xf32> to vector<32x128xbf16>
    %c128 = arith.constant 128 : index
    %c0_69 = arith.constant 0 : index
    %127 = vector.load %arg16[%c128, %c0_69] : memref<288x512xbf16, #tpu.memory_space<vmem>>, vector<32x128xbf16>
    tpu.vector_store %arg16[%c128, %c0_69], %126 {strides = array<i32>} : memref<288x512xbf16, #tpu.memory_space<vmem>>, vector<32x128xbf16>,
    %c127_i32 = arith.constant 127 : i32
    %128 = tpu.dynamic_rotate %73 by %c127_i32 dim 1 : vector<32x128xf32>, i32 -> vector<32x128xf32>
    %c0_70 = arith.constant 0 : index
    %c5 = arith.constant 5 : index
    %c0_71 = arith.constant 0 : index
    %129 = vector.load %arg11[%c0_70, %c5, %c0_71] : memref<3x9x512xf32, #tpu.memory_space<vmem>>, vector<1x1x128xf32>
    %130 = vector.shape_cast %129 : vector<1x1x128xf32> to vector<1x128xf32>
    %cst_72 = arith.constant 0.000000e+00 : f32
    %131 = vector.broadcast %cst_72 : f32 to vector<1x128xf32>
    %132 = arith.cmpf ogt, %130, %131 : vector<1x128xf32>
    %cst_73 = arith.constant 0.000000e+00 : f32
    %133 = vector.shape_cast %132 : vector<1x128xi1> to vector<1x128xi1>
    %134 = vector.broadcast %133 : vector<1x128xi1> to vector<32x128xi1>
    %135 = vector.broadcast %cst_73 : f32 to vector<32x128xf32>
    %136 = arith.select %134, %128, %135 : vector<32x128xi1>, vector<32x128xf32>
    %137 = arith.truncf %136 : vector<32x128xf32> to vector<32x128xbf16>
    %c160 = arith.constant 160 : index
    %c0_74 = arith.constant 0 : index
    %138 = vector.load %arg16[%c160, %c0_74] : memref<288x512xbf16, #tpu.memory_space<vmem>>, vector<32x128xbf16>
    tpu.vector_store %arg16[%c160, %c0_74], %137 {strides = array<i32>} : memref<288x512xbf16, #tpu.memory_space<vmem>>, vector<32x128xbf16>,
    %c125_i32 = arith.constant 125 : i32
    %139 = tpu.dynamic_rotate %73 by %c125_i32 dim 1 : vector<32x128xf32>, i32 -> vector<32x128xf32>
    %c0_75 = arith.constant 0 : index
    %c6 = arith.constant 6 : index
    %c0_76 = arith.constant 0 : index
    %140 = vector.load %arg11[%c0_75, %c6, %c0_76] : memref<3x9x512xf32, #tpu.memory_space<vmem>>, vector<1x1x128xf32>
    %141 = vector.shape_cast %140 : vector<1x1x128xf32> to vector<1x128xf32>
    %cst_77 = arith.constant 0.000000e+00 : f32
    %142 = vector.broadcast %cst_77 : f32 to vector<1x128xf32>
    %143 = arith.cmpf ogt, %141, %142 : vector<1x128xf32>
    %cst_78 = arith.constant 0.000000e+00 : f32
    %144 = vector.shape_cast %143 : vector<1x128xi1> to vector<1x128xi1>
    %145 = vector.broadcast %144 : vector<1x128xi1> to vector<32x128xi1>
    %146 = vector.broadcast %cst_78 : f32 to vector<32x128xf32>
    %147 = arith.select %145, %139, %146 : vector<32x128xi1>, vector<32x128xf32>
    %148 = arith.truncf %147 : vector<32x128xf32> to vector<32x128xbf16>
    %c192 = arith.constant 192 : index
    %c0_79 = arith.constant 0 : index
    %149 = vector.load %arg16[%c192, %c0_79] : memref<288x512xbf16, #tpu.memory_space<vmem>>, vector<32x128xbf16>
    tpu.vector_store %arg16[%c192, %c0_79], %148 {strides = array<i32>} : memref<288x512xbf16, #tpu.memory_space<vmem>>, vector<32x128xbf16>,
    %c124_i32 = arith.constant 124 : i32
    %150 = tpu.dynamic_rotate %73 by %c124_i32 dim 1 : vector<32x128xf32>, i32 -> vector<32x128xf32>
    %c0_80 = arith.constant 0 : index
    %c7 = arith.constant 7 : index
    %c0_81 = arith.constant 0 : index
    %151 = vector.load %arg11[%c0_80, %c7, %c0_81] : memref<3x9x512xf32, #tpu.memory_space<vmem>>, vector<1x1x128xf32>
    %152 = vector.shape_cast %151 : vector<1x1x128xf32> to vector<1x128xf32>
    %cst_82 = arith.constant 0.000000e+00 : f32
    %153 = vector.broadcast %cst_82 : f32 to vector<1x128xf32>
    %154 = arith.cmpf ogt, %152, %153 : vector<1x128xf32>
    %cst_83 = arith.constant 0.000000e+00 : f32
    %155 = vector.shape_cast %154 : vector<1x128xi1> to vector<1x128xi1>
    %156 = vector.broadcast %155 : vector<1x128xi1> to vector<32x128xi1>
    %157 = vector.broadcast %cst_83 : f32 to vector<32x128xf32>
    %158 = arith.select %156, %150, %157 : vector<32x128xi1>, vector<32x128xf32>
    %159 = arith.truncf %158 : vector<32x128xf32> to vector<32x128xbf16>
    %c224 = arith.constant 224 : index
    %c0_84 = arith.constant 0 : index
    %160 = vector.load %arg16[%c224, %c0_84] : memref<288x512xbf16, #tpu.memory_space<vmem>>, vector<32x128xbf16>
    tpu.vector_store %arg16[%c224, %c0_84], %159 {strides = array<i32>} : memref<288x512xbf16, #tpu.memory_space<vmem>>, vector<32x128xbf16>,
    %c123_i32 = arith.constant 123 : i32
    %161 = tpu.dynamic_rotate %73 by %c123_i32 dim 1 : vector<32x128xf32>, i32 -> vector<32x128xf32>
    %c0_85 = arith.constant 0 : index
    %c8 = arith.constant 8 : index
    %c0_86 = arith.constant 0 : index
    %162 = vector.load %arg11[%c0_85, %c8, %c0_86] : memref<3x9x512xf32, #tpu.memory_space<vmem>>, vector<1x1x128xf32>
    %163 = vector.shape_cast %162 : vector<1x1x128xf32> to vector<1x128xf32>
    %cst_87 = arith.constant 0.000000e+00 : f32
    %164 = vector.broadcast %cst_87 : f32 to vector<1x128xf32>
    %165 = arith.cmpf ogt, %163, %164 : vector<1x128xf32>
    %cst_88 = arith.constant 0.000000e+00 : f32
    %166 = vector.shape_cast %165 : vector<1x128xi1> to vector<1x128xi1>
    %167 = vector.broadcast %166 : vector<1x128xi1> to vector<32x128xi1>
    %168 = vector.broadcast %cst_88 : f32 to vector<32x128xf32>
    %169 = arith.select %167, %161, %168 : vector<32x128xi1>, vector<32x128xf32>
    %170 = arith.truncf %169 : vector<32x128xf32> to vector<32x128xbf16>
    %c256 = arith.constant 256 : index
    %c0_89 = arith.constant 0 : index
    %171 = vector.load %arg16[%c256, %c0_89] : memref<288x512xbf16, #tpu.memory_space<vmem>>, vector<32x128xbf16>
    tpu.vector_store %arg16[%c256, %c0_89], %170 {strides = array<i32>} : memref<288x512xbf16, #tpu.memory_space<vmem>>, vector<32x128xbf16>,
    %c0_90 = arith.constant 0 : index
    %c0_91 = arith.constant 0 : index
    %c0_92 = arith.constant 0 : index
    %172 = vector.load %arg5[%c0_90, %c0_91, %c0_92] : memref<5x32x288xbf16, #tpu.memory_space<vmem>>, vector<1x32x288xbf16>
    %173 = vector.shape_cast %172 : vector<1x32x288xbf16> to vector<32x288xbf16>
    %c0_93 = arith.constant 0 : index
    %c0_94 = arith.constant 0 : index
    %174 = vector.load %arg16[%c0_93, %c0_94] : memref<288x512xbf16, #tpu.memory_space<vmem>>, vector<288x128xbf16>
    %cst_95 = arith.constant dense<0.000000e+00> : vector<32x128xf32>
    %175 = tpu.matmul %173, %174, %cst_95 {dimension_numbers = #tpu.dot_dimension_numbers<[1], [0], [0], [1], [0, 0, 1, 1], [], []>} : vector<32x288xbf16>, vector<288x128xbf16>, vector<32x128xf32> -> vector<32x128xf32>
    %c0_96 = arith.constant 0 : index
    %c0_97 = arith.constant 0 : index
    %c0_98 = arith.constant 0 : index
    %176 = vector.load %arg6[%c0_96, %c0_97, %c0_98] : memref<5x32x1xf32, #tpu.memory_space<vmem>>, vector<1x32x1xf32>
    %177 = vector.shape_cast %176 : vector<1x32x1xf32> to vector<32x1xf32>
    %178 = vector.broadcast %177 : vector<32x1xf32> to vector<32x128xf32>
    %179 = arith.addf %175, %178 : vector<32x128xf32>
    %c0_99 = arith.constant 0 : index
    %c128_100 = arith.constant 128 : index
    %180 = vector.load %arg10[%c0_99, %c128_100] : memref<1x1536xf32, #tpu.memory_space<vmem>>, vector<1x128xf32>
    %181 = vector.broadcast %180 : vector<1x128xf32> to vector<32x128xf32>
    %182 = arith.addf %179, %181 : vector<32x128xf32>
    %cst_101 = arith.constant 0.000000e+00 : f32
    %183 = vector.broadcast %cst_101 : f32 to vector<32x128xf32>
    %184 = arith.cmpf ogt, %182, %183 : vector<32x128xf32>
    %cst_102 = arith.constant 2.000000e-01 : f32
    %185 = vector.broadcast %cst_102 : f32 to vector<32x128xf32>
    %186 = arith.mulf %185, %182 : vector<32x128xf32>
    %187 = arith.select %184, %182, %186 : vector<32x128xi1>, vector<32x128xf32>
    %c0_103 = arith.constant 0 : index
    %c0_104 = arith.constant 0 : index
    %c0_105 = arith.constant 0 : index
    %188 = vector.load %arg12[%c0_103, %c0_104, %c0_105] : memref<3x512x2xf32, #tpu.memory_space<vmem>>, vector<1x128x2xf32>
    %189 = vector.shape_cast %188 : vector<1x128x2xf32> to vector<128x2xf32>
    %c0_106 = arith.constant 0 : index
    %c0_107 = arith.constant 0 : index
    %c0_108 = arith.constant 0 : index
    %190 = vector.load %arg13[%c0_106, %c0_107, %c0_108] : memref<3x2x512xf32, #tpu.memory_space<vmem>>, vector<1x2x128xf32>
    %191 = vector.shape_cast %190 : vector<1x2x128xf32> to vector<2x128xf32>
    %cst_109 = arith.constant dense<0.000000e+00> : vector<32x2xf32>
    %192 = tpu.matmul %187, %189, %cst_109 {dimension_numbers = #tpu.dot_dimension_numbers<[1], [0], [0], [1], [0, 0, 1, 1], [], []>} : vector<32x128xf32>, vector<128x2xf32>, vector<32x2xf32> -> vector<32x2xf32>
    %193 = arith.mulf %187, %187 : vector<32x128xf32>
    %cst_110 = arith.constant dense<0.000000e+00> : vector<32x2xf32>
    %194 = tpu.matmul %193, %189, %cst_110 {dimension_numbers = #tpu.dot_dimension_numbers<[1], [0], [0], [1], [0, 0, 1, 1], [], []>} : vector<32x128xf32>, vector<128x2xf32>, vector<32x2xf32> -> vector<32x2xf32>
    %195 = arith.mulf %192, %192 : vector<32x2xf32>
    %196 = arith.subf %194, %195 : vector<32x2xf32>
    %cst_111 = arith.constant 0.000000e+00 : f32
    %197 = vector.broadcast %cst_111 : f32 to vector<32x2xf32>
    %198 = arith.maximumf %196, %197 : vector<32x2xf32>
    %cst_112 = arith.constant 9.99999993E-9 : f32
    %199 = vector.broadcast %cst_112 : f32 to vector<32x2xf32>
    %200 = arith.addf %198, %199 : vector<32x2xf32>
    %201 = math.rsqrt %200 : vector<32x2xf32>
    %202 = vector.extract_strided_slice %39 {offsets = [64, 0], sizes = [32, 2], strides = [1, 1]} : vector<384x2xf32> to vector<32x2xf32>
    %203 = vector.extract_strided_slice %39 {offsets = [96, 0], sizes = [32, 2], strides = [1, 1]} : vector<384x2xf32> to vector<32x2xf32>
    %204 = arith.mulf %202, %201 : vector<32x2xf32>
    %205 = arith.mulf %204, %192 : vector<32x2xf32>
    %206 = arith.subf %203, %205 : vector<32x2xf32>
    %207 = tpu.concatenate %204, %206 in 0 : vector<32x2xf32>, vector<32x2xf32> -> vector<64x2xf32>
    %cst_113 = arith.constant dense<0.000000e+00> : vector<64x128xf32>
    %208 = tpu.matmul %207, %191, %cst_113 {dimension_numbers = #tpu.dot_dimension_numbers<[1], [0], [0], [1], [0, 0, 1, 1], [], []>} : vector<64x2xf32>, vector<2x128xf32>, vector<64x128xf32> -> vector<64x128xf32>
    %209 = vector.extract_strided_slice %208 {offsets = [0, 0], sizes = [32, 128], strides = [1, 1]} : vector<64x128xf32> to vector<32x128xf32>
    %210 = arith.mulf %209, %187 : vector<32x128xf32>
    %211 = vector.extract_strided_slice %208 {offsets = [32, 0], sizes = [32, 128], strides = [1, 1]} : vector<64x128xf32> to vector<32x128xf32>
    %212 = arith.addf %210, %211 : vector<32x128xf32>
    %c0_114 = arith.constant 0 : index
    %c0_115 = arith.constant 0 : index
    %c0_116 = arith.constant 0 : index
    %213 = vector.load %arg14[%c0_114, %c0_115, %c0_116] : memref<2x128x512xbf16, #tpu.memory_space<vmem>>, vector<1x128x128xbf16>
    %214 = vector.shape_cast %213 : vector<1x128x128xbf16> to vector<128x128xbf16>
    %215 = arith.truncf %212 : vector<32x128xf32> to vector<32x128xbf16>
    %cst_117 = arith.constant dense<0.000000e+00> : vector<32x128xf32>
    %216 = tpu.matmul %215, %214, %cst_117 {dimension_numbers = #tpu.dot_dimension_numbers<[1], [0], [0], [1], [0, 0, 1, 1], [], []>} : vector<32x128xbf16>, vector<128x128xbf16>, vector<32x128xf32> -> vector<32x128xf32>
    %c9_i32 = arith.constant 9 : i32
    %217 = tpu.dynamic_rotate %216 by %c9_i32 dim 1 : vector<32x128xf32>, i32 -> vector<32x128xf32>
    %c1_118 = arith.constant 1 : index
    %c0_119 = arith.constant 0 : index
    %c0_120 = arith.constant 0 : index
    %218 = vector.load %arg11[%c1_118, %c0_119, %c0_120] : memref<3x9x512xf32, #tpu.memory_space<vmem>>, vector<1x1x128xf32>
    %219 = vector.shape_cast %218 : vector<1x1x128xf32> to vector<1x128xf32>
    %cst_121 = arith.constant 0.000000e+00 : f32
    %220 = vector.broadcast %cst_121 : f32 to vector<1x128xf32>
    %221 = arith.cmpf ogt, %219, %220 : vector<1x128xf32>
    %cst_122 = arith.constant 0.000000e+00 : f32
    %222 = vector.shape_cast %221 : vector<1x128xi1> to vector<1x128xi1>
    %223 = vector.broadcast %222 : vector<1x128xi1> to vector<32x128xi1>
    %224 = vector.broadcast %cst_122 : f32 to vector<32x128xf32>
    %225 = arith.select %223, %217, %224 : vector<32x128xi1>, vector<32x128xf32>
    %226 = arith.truncf %225 : vector<32x128xf32> to vector<32x128xbf16>
    %c0_123 = arith.constant 0 : index
    %c0_124 = arith.constant 0 : index
    %227 = vector.load %arg16[%c0_123, %c0_124] : memref<288x512xbf16, #tpu.memory_space<vmem>>, vector<32x128xbf16>
    tpu.vector_store %arg16[%c0_123, %c0_124], %226 {strides = array<i32>} : memref<288x512xbf16, #tpu.memory_space<vmem>>, vector<32x128xbf16>,
    %c8_i32 = arith.constant 8 : i32
    %228 = tpu.dynamic_rotate %216 by %c8_i32 dim 1 : vector<32x128xf32>, i32 -> vector<32x128xf32>
    %c1_125 = arith.constant 1 : index
    %c1_126 = arith.constant 1 : index
    %c0_127 = arith.constant 0 : index
    %229 = vector.load %arg11[%c1_125, %c1_126, %c0_127] : memref<3x9x512xf32, #tpu.memory_space<vmem>>, vector<1x1x128xf32>
    %230 = vector.shape_cast %229 : vector<1x1x128xf32> to vector<1x128xf32>
    %cst_128 = arith.constant 0.000000e+00 : f32
    %231 = vector.broadcast %cst_128 : f32 to vector<1x128xf32>
    %232 = arith.cmpf ogt, %230, %231 : vector<1x128xf32>
    %cst_129 = arith.constant 0.000000e+00 : f32
    %233 = vector.shape_cast %232 : vector<1x128xi1> to vector<1x128xi1>
    %234 = vector.broadcast %233 : vector<1x128xi1> to vector<32x128xi1>
    %235 = vector.broadcast %cst_129 : f32 to vector<32x128xf32>
    %236 = arith.select %234, %228, %235 : vector<32x128xi1>, vector<32x128xf32>
    %237 = arith.truncf %236 : vector<32x128xf32> to vector<32x128xbf16>
    %c32_130 = arith.constant 32 : index
    %c0_131 = arith.constant 0 : index
    %238 = vector.load %arg16[%c32_130, %c0_131] : memref<288x512xbf16, #tpu.memory_space<vmem>>, vector<32x128xbf16>
    tpu.vector_store %arg16[%c32_130, %c0_131], %237 {strides = array<i32>} : memref<288x512xbf16, #tpu.memory_space<vmem>>, vector<32x128xbf16>,
    %c7_i32 = arith.constant 7 : i32
    %239 = tpu.dynamic_rotate %216 by %c7_i32 dim 1 : vector<32x128xf32>, i32 -> vector<32x128xf32>
    %c1_132 = arith.constant 1 : index
    %c2_133 = arith.constant 2 : index
    %c0_134 = arith.constant 0 : index
    %240 = vector.load %arg11[%c1_132, %c2_133, %c0_134] : memref<3x9x512xf32, #tpu.memory_space<vmem>>, vector<1x1x128xf32>
    %241 = vector.shape_cast %240 : vector<1x1x128xf32> to vector<1x128xf32>
    %cst_135 = arith.constant 0.000000e+00 : f32
    %242 = vector.broadcast %cst_135 : f32 to vector<1x128xf32>
    %243 = arith.cmpf ogt, %241, %242 : vector<1x128xf32>
    %cst_136 = arith.constant 0.000000e+00 : f32
    %244 = vector.shape_cast %243 : vector<1x128xi1> to vector<1x128xi1>
    %245 = vector.broadcast %244 : vector<1x128xi1> to vector<32x128xi1>
    %246 = vector.broadcast %cst_136 : f32 to vector<32x128xf32>
    %247 = arith.select %245, %239, %246 : vector<32x128xi1>, vector<32x128xf32>
    %248 = arith.truncf %247 : vector<32x128xf32> to vector<32x128xbf16>
    %c64_137 = arith.constant 64 : index
    %c0_138 = arith.constant 0 : index
    %249 = vector.load %arg16[%c64_137, %c0_138] : memref<288x512xbf16, #tpu.memory_space<vmem>>, vector<32x128xbf16>
    tpu.vector_store %arg16[%c64_137, %c0_138], %248 {strides = array<i32>} : memref<288x512xbf16, #tpu.memory_space<vmem>>, vector<32x128xbf16>,
    %c1_i32_139 = arith.constant 1 : i32
    %250 = tpu.dynamic_rotate %216 by %c1_i32_139 dim 1 : vector<32x128xf32>, i32 -> vector<32x128xf32>
    %c1_140 = arith.constant 1 : index
    %c3_141 = arith.constant 3 : index
    %c0_142 = arith.constant 0 : index
    %251 = vector.load %arg11[%c1_140, %c3_141, %c0_142] : memref<3x9x512xf32, #tpu.memory_space<vmem>>, vector<1x1x128xf32>
    %252 = vector.shape_cast %251 : vector<1x1x128xf32> to vector<1x128xf32>
    %cst_143 = arith.constant 0.000000e+00 : f32
    %253 = vector.broadcast %cst_143 : f32 to vector<1x128xf32>
    %254 = arith.cmpf ogt, %252, %253 : vector<1x128xf32>
    %cst_144 = arith.constant 0.000000e+00 : f32
    %255 = vector.shape_cast %254 : vector<1x128xi1> to vector<1x128xi1>
    %256 = vector.broadcast %255 : vector<1x128xi1> to vector<32x128xi1>
    %257 = vector.broadcast %cst_144 : f32 to vector<32x128xf32>
    %258 = arith.select %256, %250, %257 : vector<32x128xi1>, vector<32x128xf32>
    %259 = arith.truncf %258 : vector<32x128xf32> to vector<32x128xbf16>
    %c96_145 = arith.constant 96 : index
    %c0_146 = arith.constant 0 : index
    %260 = vector.load %arg16[%c96_145, %c0_146] : memref<288x512xbf16, #tpu.memory_space<vmem>>, vector<32x128xbf16>
    tpu.vector_store %arg16[%c96_145, %c0_146], %259 {strides = array<i32>} : memref<288x512xbf16, #tpu.memory_space<vmem>>, vector<32x128xbf16>,
    %c1_147 = arith.constant 1 : index
    %c4_148 = arith.constant 4 : index
    %c0_149 = arith.constant 0 : index
    %261 = vector.load %arg11[%c1_147, %c4_148, %c0_149] : memref<3x9x512xf32, #tpu.memory_space<vmem>>, vector<1x1x128xf32>
    %262 = vector.shape_cast %261 : vector<1x1x128xf32> to vector<1x128xf32>
    %cst_150 = arith.constant 0.000000e+00 : f32
    %263 = vector.broadcast %cst_150 : f32 to vector<1x128xf32>
    %264 = arith.cmpf ogt, %262, %263 : vector<1x128xf32>
    %cst_151 = arith.constant 0.000000e+00 : f32
    %265 = vector.shape_cast %264 : vector<1x128xi1> to vector<1x128xi1>
    %266 = vector.broadcast %265 : vector<1x128xi1> to vector<32x128xi1>
    %267 = vector.broadcast %cst_151 : f32 to vector<32x128xf32>
    %268 = arith.select %266, %216, %267 : vector<32x128xi1>, vector<32x128xf32>
    %269 = arith.truncf %268 : vector<32x128xf32> to vector<32x128xbf16>
    %c128_152 = arith.constant 128 : index
    %c0_153 = arith.constant 0 : index
    %270 = vector.load %arg16[%c128_152, %c0_153] : memref<288x512xbf16, #tpu.memory_space<vmem>>, vector<32x128xbf16>
    tpu.vector_store %arg16[%c128_152, %c0_153], %269 {strides = array<i32>} : memref<288x512xbf16, #tpu.memory_space<vmem>>, vector<32x128xbf16>,
    %c127_i32_154 = arith.constant 127 : i32
    %271 = tpu.dynamic_rotate %216 by %c127_i32_154 dim 1 : vector<32x128xf32>, i32 -> vector<32x128xf32>
    %c1_155 = arith.constant 1 : index
    %c5_156 = arith.constant 5 : index
    %c0_157 = arith.constant 0 : index
    %272 = vector.load %arg11[%c1_155, %c5_156, %c0_157] : memref<3x9x512xf32, #tpu.memory_space<vmem>>, vector<1x1x128xf32>
    %273 = vector.shape_cast %272 : vector<1x1x128xf32> to vector<1x128xf32>
    %cst_158 = arith.constant 0.000000e+00 : f32
    %274 = vector.broadcast %cst_158 : f32 to vector<1x128xf32>
    %275 = arith.cmpf ogt, %273, %274 : vector<1x128xf32>
    %cst_159 = arith.constant 0.000000e+00 : f32
    %276 = vector.shape_cast %275 : vector<1x128xi1> to vector<1x128xi1>
    %277 = vector.broadcast %276 : vector<1x128xi1> to vector<32x128xi1>
    %278 = vector.broadcast %cst_159 : f32 to vector<32x128xf32>
    %279 = arith.select %277, %271, %278 : vector<32x128xi1>, vector<32x128xf32>
    %280 = arith.truncf %279 : vector<32x128xf32> to vector<32x128xbf16>
    %c160_160 = arith.constant 160 : index
    %c0_161 = arith.constant 0 : index
    %281 = vector.load %arg16[%c160_160, %c0_161] : memref<288x512xbf16, #tpu.memory_space<vmem>>, vector<32x128xbf16>
    tpu.vector_store %arg16[%c160_160, %c0_161], %280 {strides = array<i32>} : memref<288x512xbf16, #tpu.memory_space<vmem>>, vector<32x128xbf16>,
    %c121_i32 = arith.constant 121 : i32
    %282 = tpu.dynamic_rotate %216 by %c121_i32 dim 1 : vector<32x128xf32>, i32 -> vector<32x128xf32>
    %c1_162 = arith.constant 1 : index
    %c6_163 = arith.constant 6 : index
    %c0_164 = arith.constant 0 : index
    %283 = vector.load %arg11[%c1_162, %c6_163, %c0_164] : memref<3x9x512xf32, #tpu.memory_space<vmem>>, vector<1x1x128xf32>
    %284 = vector.shape_cast %283 : vector<1x1x128xf32> to vector<1x128xf32>
    %cst_165 = arith.constant 0.000000e+00 : f32
    %285 = vector.broadcast %cst_165 : f32 to vector<1x128xf32>
    %286 = arith.cmpf ogt, %284, %285 : vector<1x128xf32>
    %cst_166 = arith.constant 0.000000e+00 : f32
    %287 = vector.shape_cast %286 : vector<1x128xi1> to vector<1x128xi1>
    %288 = vector.broadcast %287 : vector<1x128xi1> to vector<32x128xi1>
    %289 = vector.broadcast %cst_166 : f32 to vector<32x128xf32>
    %290 = arith.select %288, %282, %289 : vector<32x128xi1>, vector<32x128xf32>
    %291 = arith.truncf %290 : vector<32x128xf32> to vector<32x128xbf16>
    %c192_167 = arith.constant 192 : index
    %c0_168 = arith.constant 0 : index
    %292 = vector.load %arg16[%c192_167, %c0_168] : memref<288x512xbf16, #tpu.memory_space<vmem>>, vector<32x128xbf16>
    tpu.vector_store %arg16[%c192_167, %c0_168], %291 {strides = array<i32>} : memref<288x512xbf16, #tpu.memory_space<vmem>>, vector<32x128xbf16>,
    %c120_i32 = arith.constant 120 : i32
    %293 = tpu.dynamic_rotate %216 by %c120_i32 dim 1 : vector<32x128xf32>, i32 -> vector<32x128xf32>
    %c1_169 = arith.constant 1 : index
    %c7_170 = arith.constant 7 : index
    %c0_171 = arith.constant 0 : index
    %294 = vector.load %arg11[%c1_169, %c7_170, %c0_171] : memref<3x9x512xf32, #tpu.memory_space<vmem>>, vector<1x1x128xf32>
    %295 = vector.shape_cast %294 : vector<1x1x128xf32> to vector<1x128xf32>
    %cst_172 = arith.constant 0.000000e+00 : f32
    %296 = vector.broadcast %cst_172 : f32 to vector<1x128xf32>
    %297 = arith.cmpf ogt, %295, %296 : vector<1x128xf32>
    %cst_173 = arith.constant 0.000000e+00 : f32
    %298 = vector.shape_cast %297 : vector<1x128xi1> to vector<1x128xi1>
    %299 = vector.broadcast %298 : vector<1x128xi1> to vector<32x128xi1>
    %300 = vector.broadcast %cst_173 : f32 to vector<32x128xf32>
    %301 = arith.select %299, %293, %300 : vector<32x128xi1>, vector<32x128xf32>
    %302 = arith.truncf %301 : vector<32x128xf32> to vector<32x128xbf16>
    %c224_174 = arith.constant 224 : index
    %c0_175 = arith.constant 0 : index
    %303 = vector.load %arg16[%c224_174, %c0_175] : memref<288x512xbf16, #tpu.memory_space<vmem>>, vector<32x128xbf16>
    tpu.vector_store %arg16[%c224_174, %c0_175], %302 {strides = array<i32>} : memref<288x512xbf16, #tpu.memory_space<vmem>>, vector<32x128xbf16>,
    %c119_i32 = arith.constant 119 : i32
    %304 = tpu.dynamic_rotate %216 by %c119_i32 dim 1 : vector<32x128xf32>, i32 -> vector<32x128xf32>
    %c1_176 = arith.constant 1 : index
    %c8_177 = arith.constant 8 : index
    %c0_178 = arith.constant 0 : index
    %305 = vector.load %arg11[%c1_176, %c8_177, %c0_178] : memref<3x9x512xf32, #tpu.memory_space<vmem>>, vector<1x1x128xf32>
    %306 = vector.shape_cast %305 : vector<1x1x128xf32> to vector<1x128xf32>
    %cst_179 = arith.constant 0.000000e+00 : f32
    %307 = vector.broadcast %cst_179 : f32 to vector<1x128xf32>
    %308 = arith.cmpf ogt, %306, %307 : vector<1x128xf32>
    %cst_180 = arith.constant 0.000000e+00 : f32
    %309 = vector.shape_cast %308 : vector<1x128xi1> to vector<1x128xi1>
    %310 = vector.broadcast %309 : vector<1x128xi1> to vector<32x128xi1>
    %311 = vector.broadcast %cst_180 : f32 to vector<32x128xf32>
    %312 = arith.select %310, %304, %311 : vector<32x128xi1>, vector<32x128xf32>
    %313 = arith.truncf %312 : vector<32x128xf32> to vector<32x128xbf16>
    %c256_181 = arith.constant 256 : index
    %c0_182 = arith.constant 0 : index
    %314 = vector.load %arg16[%c256_181, %c0_182] : memref<288x512xbf16, #tpu.memory_space<vmem>>, vector<32x128xbf16>
    tpu.vector_store %arg16[%c256_181, %c0_182], %313 {strides = array<i32>} : memref<288x512xbf16, #tpu.memory_space<vmem>>, vector<32x128xbf16>,
    %c1_183 = arith.constant 1 : index
    %c0_184 = arith.constant 0 : index
    %c0_185 = arith.constant 0 : index
    %315 = vector.load %arg5[%c1_183, %c0_184, %c0_185] : memref<5x32x288xbf16, #tpu.memory_space<vmem>>, vector<1x32x288xbf16>
    %316 = vector.shape_cast %315 : vector<1x32x288xbf16> to vector<32x288xbf16>
    %c0_186 = arith.constant 0 : index
    %c0_187 = arith.constant 0 : index
    %317 = vector.load %arg16[%c0_186, %c0_187] : memref<288x512xbf16, #tpu.memory_space<vmem>>, vector<288x128xbf16>
    %cst_188 = arith.constant dense<0.000000e+00> : vector<32x128xf32>
    %318 = tpu.matmul %316, %317, %cst_188 {dimension_numbers = #tpu.dot_dimension_numbers<[1], [0], [0], [1], [0, 0, 1, 1], [], []>} : vector<32x288xbf16>, vector<288x128xbf16>, vector<32x128xf32> -> vector<32x128xf32>
    %c1_189 = arith.constant 1 : index
    %c0_190 = arith.constant 0 : index
    %c0_191 = arith.constant 0 : index
    %319 = vector.load %arg6[%c1_189, %c0_190, %c0_191] : memref<5x32x1xf32, #tpu.memory_space<vmem>>, vector<1x32x1xf32>
    %320 = vector.shape_cast %319 : vector<1x32x1xf32> to vector<32x1xf32>
    %321 = vector.broadcast %320 : vector<32x1xf32> to vector<32x128xf32>
    %322 = arith.addf %318, %321 : vector<32x128xf32>
    %c0_192 = arith.constant 0 : index
    %c256_193 = arith.constant 256 : index
    %323 = vector.load %arg10[%c0_192, %c256_193] : memref<1x1536xf32, #tpu.memory_space<vmem>>, vector<1x128xf32>
    %324 = vector.broadcast %323 : vector<1x128xf32> to vector<32x128xf32>
    %325 = arith.addf %322, %324 : vector<32x128xf32>
    %cst_194 = arith.constant 0.000000e+00 : f32
    %326 = vector.broadcast %cst_194 : f32 to vector<32x128xf32>
    %327 = arith.cmpf ogt, %325, %326 : vector<32x128xf32>
    %cst_195 = arith.constant 2.000000e-01 : f32
    %328 = vector.broadcast %cst_195 : f32 to vector<32x128xf32>
    %329 = arith.mulf %328, %325 : vector<32x128xf32>
    %330 = arith.select %327, %325, %329 : vector<32x128xi1>, vector<32x128xf32>
    %c1_196 = arith.constant 1 : index
    %c0_197 = arith.constant 0 : index
    %c0_198 = arith.constant 0 : index
    %331 = vector.load %arg12[%c1_196, %c0_197, %c0_198] : memref<3x512x2xf32, #tpu.memory_space<vmem>>, vector<1x128x2xf32>
    %332 = vector.shape_cast %331 : vector<1x128x2xf32> to vector<128x2xf32>
    %c1_199 = arith.constant 1 : index
    %c0_200 = arith.constant 0 : index
    %c0_201 = arith.constant 0 : index
    %333 = vector.load %arg13[%c1_199, %c0_200, %c0_201] : memref<3x2x512xf32, #tpu.memory_space<vmem>>, vector<1x2x128xf32>
    %334 = vector.shape_cast %333 : vector<1x2x128xf32> to vector<2x128xf32>
    %cst_202 = arith.constant dense<0.000000e+00> : vector<32x2xf32>
    %335 = tpu.matmul %330, %332, %cst_202 {dimension_numbers = #tpu.dot_dimension_numbers<[1], [0], [0], [1], [0, 0, 1, 1], [], []>} : vector<32x128xf32>, vector<128x2xf32>, vector<32x2xf32> -> vector<32x2xf32>
    %336 = arith.mulf %330, %330 : vector<32x128xf32>
    %cst_203 = arith.constant dense<0.000000e+00> : vector<32x2xf32>
    %337 = tpu.matmul %336, %332, %cst_203 {dimension_numbers = #tpu.dot_dimension_numbers<[1], [0], [0], [1], [0, 0, 1, 1], [], []>} : vector<32x128xf32>, vector<128x2xf32>, vector<32x2xf32> -> vector<32x2xf32>
    %338 = arith.mulf %335, %335 : vector<32x2xf32>
    %339 = arith.subf %337, %338 : vector<32x2xf32>
    %cst_204 = arith.constant 0.000000e+00 : f32
    %340 = vector.broadcast %cst_204 : f32 to vector<32x2xf32>
    %341 = arith.maximumf %339, %340 : vector<32x2xf32>
    %cst_205 = arith.constant 9.99999993E-9 : f32
    %342 = vector.broadcast %cst_205 : f32 to vector<32x2xf32>
    %343 = arith.addf %341, %342 : vector<32x2xf32>
    %344 = math.rsqrt %343 : vector<32x2xf32>
    %345 = vector.extract_strided_slice %39 {offsets = [128, 0], sizes = [32, 2], strides = [1, 1]} : vector<384x2xf32> to vector<32x2xf32>
    %346 = vector.extract_strided_slice %39 {offsets = [160, 0], sizes = [32, 2], strides = [1, 1]} : vector<384x2xf32> to vector<32x2xf32>
    %347 = arith.mulf %345, %344 : vector<32x2xf32>
    %348 = arith.mulf %347, %335 : vector<32x2xf32>
    %349 = arith.subf %346, %348 : vector<32x2xf32>
    %350 = tpu.concatenate %347, %349 in 0 : vector<32x2xf32>, vector<32x2xf32> -> vector<64x2xf32>
    %cst_206 = arith.constant dense<0.000000e+00> : vector<64x128xf32>
    %351 = tpu.matmul %350, %334, %cst_206 {dimension_numbers = #tpu.dot_dimension_numbers<[1], [0], [0], [1], [0, 0, 1, 1], [], []>} : vector<64x2xf32>, vector<2x128xf32>, vector<64x128xf32> -> vector<64x128xf32>
    %352 = vector.extract_strided_slice %351 {offsets = [0, 0], sizes = [32, 128], strides = [1, 1]} : vector<64x128xf32> to vector<32x128xf32>
    %353 = arith.mulf %352, %330 : vector<32x128xf32>
    %354 = vector.extract_strided_slice %351 {offsets = [32, 0], sizes = [32, 128], strides = [1, 1]} : vector<64x128xf32> to vector<32x128xf32>
    %355 = arith.addf %353, %354 : vector<32x128xf32>
    %c9_i32_207 = arith.constant 9 : i32
    %356 = tpu.dynamic_rotate %355 by %c9_i32_207 dim 1 : vector<32x128xf32>, i32 -> vector<32x128xf32>
    %c1_208 = arith.constant 1 : index
    %c0_209 = arith.constant 0 : index
    %c0_210 = arith.constant 0 : index
    %357 = vector.load %arg11[%c1_208, %c0_209, %c0_210] : memref<3x9x512xf32, #tpu.memory_space<vmem>>, vector<1x1x128xf32>
    %358 = vector.shape_cast %357 : vector<1x1x128xf32> to vector<1x128xf32>
    %cst_211 = arith.constant 0.000000e+00 : f32
    %359 = vector.broadcast %cst_211 : f32 to vector<1x128xf32>
    %360 = arith.cmpf ogt, %358, %359 : vector<1x128xf32>
    %cst_212 = arith.constant 0.000000e+00 : f32
    %361 = vector.shape_cast %360 : vector<1x128xi1> to vector<1x128xi1>
    %362 = vector.broadcast %361 : vector<1x128xi1> to vector<32x128xi1>
    %363 = vector.broadcast %cst_212 : f32 to vector<32x128xf32>
    %364 = arith.select %362, %356, %363 : vector<32x128xi1>, vector<32x128xf32>
    %365 = arith.truncf %364 : vector<32x128xf32> to vector<32x128xbf16>
    %c0_213 = arith.constant 0 : index
    %c0_214 = arith.constant 0 : index
    %366 = vector.load %arg16[%c0_213, %c0_214] : memref<288x512xbf16, #tpu.memory_space<vmem>>, vector<32x128xbf16>
    tpu.vector_store %arg16[%c0_213, %c0_214], %365 {strides = array<i32>} : memref<288x512xbf16, #tpu.memory_space<vmem>>, vector<32x128xbf16>,
    %c8_i32_215 = arith.constant 8 : i32
    %367 = tpu.dynamic_rotate %355 by %c8_i32_215 dim 1 : vector<32x128xf32>, i32 -> vector<32x128xf32>
    %c1_216 = arith.constant 1 : index
    %c1_217 = arith.constant 1 : index
    %c0_218 = arith.constant 0 : index
    %368 = vector.load %arg11[%c1_216, %c1_217, %c0_218] : memref<3x9x512xf32, #tpu.memory_space<vmem>>, vector<1x1x128xf32>
    %369 = vector.shape_cast %368 : vector<1x1x128xf32> to vector<1x128xf32>
    %cst_219 = arith.constant 0.000000e+00 : f32
    %370 = vector.broadcast %cst_219 : f32 to vector<1x128xf32>
    %371 = arith.cmpf ogt, %369, %370 : vector<1x128xf32>
    %cst_220 = arith.constant 0.000000e+00 : f32
    %372 = vector.shape_cast %371 : vector<1x128xi1> to vector<1x128xi1>
    %373 = vector.broadcast %372 : vector<1x128xi1> to vector<32x128xi1>
    %374 = vector.broadcast %cst_220 : f32 to vector<32x128xf32>
    %375 = arith.select %373, %367, %374 : vector<32x128xi1>, vector<32x128xf32>
    %376 = arith.truncf %375 : vector<32x128xf32> to vector<32x128xbf16>
    %c32_221 = arith.constant 32 : index
    %c0_222 = arith.constant 0 : index
    %377 = vector.load %arg16[%c32_221, %c0_222] : memref<288x512xbf16, #tpu.memory_space<vmem>>, vector<32x128xbf16>
    tpu.vector_store %arg16[%c32_221, %c0_222], %376 {strides = array<i32>} : memref<288x512xbf16, #tpu.memory_space<vmem>>, vector<32x128xbf16>,
    %c7_i32_223 = arith.constant 7 : i32
    %378 = tpu.dynamic_rotate %355 by %c7_i32_223 dim 1 : vector<32x128xf32>, i32 -> vector<32x128xf32>
    %c1_224 = arith.constant 1 : index
    %c2_225 = arith.constant 2 : index
    %c0_226 = arith.constant 0 : index
    %379 = vector.load %arg11[%c1_224, %c2_225, %c0_226] : memref<3x9x512xf32, #tpu.memory_space<vmem>>, vector<1x1x128xf32>
    %380 = vector.shape_cast %379 : vector<1x1x128xf32> to vector<1x128xf32>
    %cst_227 = arith.constant 0.000000e+00 : f32
    %381 = vector.broadcast %cst_227 : f32 to vector<1x128xf32>
    %382 = arith.cmpf ogt, %380, %381 : vector<1x128xf32>
    %cst_228 = arith.constant 0.000000e+00 : f32
    %383 = vector.shape_cast %382 : vector<1x128xi1> to vector<1x128xi1>
    %384 = vector.broadcast %383 : vector<1x128xi1> to vector<32x128xi1>
    %385 = vector.broadcast %cst_228 : f32 to vector<32x128xf32>
    %386 = arith.select %384, %378, %385 : vector<32x128xi1>, vector<32x128xf32>
    %387 = arith.truncf %386 : vector<32x128xf32> to vector<32x128xbf16>
    %c64_229 = arith.constant 64 : index
    %c0_230 = arith.constant 0 : index
    %388 = vector.load %arg16[%c64_229, %c0_230] : memref<288x512xbf16, #tpu.memory_space<vmem>>, vector<32x128xbf16>
    tpu.vector_store %arg16[%c64_229, %c0_230], %387 {strides = array<i32>} : memref<288x512xbf16, #tpu.memory_space<vmem>>, vector<32x128xbf16>,
    %c1_i32_231 = arith.constant 1 : i32
    %389 = tpu.dynamic_rotate %355 by %c1_i32_231 dim 1 : vector<32x128xf32>, i32 -> vector<32x128xf32>
    %c1_232 = arith.constant 1 : index
    %c3_233 = arith.constant 3 : index
    %c0_234 = arith.constant 0 : index
    %390 = vector.load %arg11[%c1_232, %c3_233, %c0_234] : memref<3x9x512xf32, #tpu.memory_space<vmem>>, vector<1x1x128xf32>
    %391 = vector.shape_cast %390 : vector<1x1x128xf32> to vector<1x128xf32>
    %cst_235 = arith.constant 0.000000e+00 : f32
    %392 = vector.broadcast %cst_235 : f32 to vector<1x128xf32>
    %393 = arith.cmpf ogt, %391, %392 : vector<1x128xf32>
    %cst_236 = arith.constant 0.000000e+00 : f32
    %394 = vector.shape_cast %393 : vector<1x128xi1> to vector<1x128xi1>
    %395 = vector.broadcast %394 : vector<1x128xi1> to vector<32x128xi1>
    %396 = vector.broadcast %cst_236 : f32 to vector<32x128xf32>
    %397 = arith.select %395, %389, %396 : vector<32x128xi1>, vector<32x128xf32>
    %398 = arith.truncf %397 : vector<32x128xf32> to vector<32x128xbf16>
    %c96_237 = arith.constant 96 : index
    %c0_238 = arith.constant 0 : index
    %399 = vector.load %arg16[%c96_237, %c0_238] : memref<288x512xbf16, #tpu.memory_space<vmem>>, vector<32x128xbf16>
    tpu.vector_store %arg16[%c96_237, %c0_238], %398 {strides = array<i32>} : memref<288x512xbf16, #tpu.memory_space<vmem>>, vector<32x128xbf16>,
    %c1_239 = arith.constant 1 : index
    %c4_240 = arith.constant 4 : index
    %c0_241 = arith.constant 0 : index
    %400 = vector.load %arg11[%c1_239, %c4_240, %c0_241] : memref<3x9x512xf32, #tpu.memory_space<vmem>>, vector<1x1x128xf32>
    %401 = vector.shape_cast %400 : vector<1x1x128xf32> to vector<1x128xf32>
    %cst_242 = arith.constant 0.000000e+00 : f32
    %402 = vector.broadcast %cst_242 : f32 to vector<1x128xf32>
    %403 = arith.cmpf ogt, %401, %402 : vector<1x128xf32>
    %cst_243 = arith.constant 0.000000e+00 : f32
    %404 = vector.shape_cast %403 : vector<1x128xi1> to vector<1x128xi1>
    %405 = vector.broadcast %404 : vector<1x128xi1> to vector<32x128xi1>
    %406 = vector.broadcast %cst_243 : f32 to vector<32x128xf32>
    %407 = arith.select %405, %355, %406 : vector<32x128xi1>, vector<32x128xf32>
    %408 = arith.truncf %407 : vector<32x128xf32> to vector<32x128xbf16>
    %c128_244 = arith.constant 128 : index
    %c0_245 = arith.constant 0 : index
    %409 = vector.load %arg16[%c128_244, %c0_245] : memref<288x512xbf16, #tpu.memory_space<vmem>>, vector<32x128xbf16>
    tpu.vector_store %arg16[%c128_244, %c0_245], %408 {strides = array<i32>} : memref<288x512xbf16, #tpu.memory_space<vmem>>, vector<32x128xbf16>,
    %c127_i32_246 = arith.constant 127 : i32
    %410 = tpu.dynamic_rotate %355 by %c127_i32_246 dim 1 : vector<32x128xf32>, i32 -> vector<32x128xf32>
    %c1_247 = arith.constant 1 : index
    %c5_248 = arith.constant 5 : index
    %c0_249 = arith.constant 0 : index
    %411 = vector.load %arg11[%c1_247, %c5_248, %c0_249] : memref<3x9x512xf32, #tpu.memory_space<vmem>>, vector<1x1x128xf32>
    %412 = vector.shape_cast %411 : vector<1x1x128xf32> to vector<1x128xf32>
    %cst_250 = arith.constant 0.000000e+00 : f32
    %413 = vector.broadcast %cst_250 : f32 to vector<1x128xf32>
    %414 = arith.cmpf ogt, %412, %413 : vector<1x128xf32>
    %cst_251 = arith.constant 0.000000e+00 : f32
    %415 = vector.shape_cast %414 : vector<1x128xi1> to vector<1x128xi1>
    %416 = vector.broadcast %415 : vector<1x128xi1> to vector<32x128xi1>
    %417 = vector.broadcast %cst_251 : f32 to vector<32x128xf32>
    %418 = arith.select %416, %410, %417 : vector<32x128xi1>, vector<32x128xf32>
    %419 = arith.truncf %418 : vector<32x128xf32> to vector<32x128xbf16>
    %c160_252 = arith.constant 160 : index
    %c0_253 = arith.constant 0 : index
    %420 = vector.load %arg16[%c160_252, %c0_253] : memref<288x512xbf16, #tpu.memory_space<vmem>>, vector<32x128xbf16>
    tpu.vector_store %arg16[%c160_252, %c0_253], %419 {strides = array<i32>} : memref<288x512xbf16, #tpu.memory_space<vmem>>, vector<32x128xbf16>,
    %c121_i32_254 = arith.constant 121 : i32
    %421 = tpu.dynamic_rotate %355 by %c121_i32_254 dim 1 : vector<32x128xf32>, i32 -> vector<32x128xf32>
    %c1_255 = arith.constant 1 : index
    %c6_256 = arith.constant 6 : index
    %c0_257 = arith.constant 0 : index
    %422 = vector.load %arg11[%c1_255, %c6_256, %c0_257] : memref<3x9x512xf32, #tpu.memory_space<vmem>>, vector<1x1x128xf32>
    %423 = vector.shape_cast %422 : vector<1x1x128xf32> to vector<1x128xf32>
    %cst_258 = arith.constant 0.000000e+00 : f32
    %424 = vector.broadcast %cst_258 : f32 to vector<1x128xf32>
    %425 = arith.cmpf ogt, %423, %424 : vector<1x128xf32>
    %cst_259 = arith.constant 0.000000e+00 : f32
    %426 = vector.shape_cast %425 : vector<1x128xi1> to vector<1x128xi1>
    %427 = vector.broadcast %426 : vector<1x128xi1> to vector<32x128xi1>
    %428 = vector.broadcast %cst_259 : f32 to vector<32x128xf32>
    %429 = arith.select %427, %421, %428 : vector<32x128xi1>, vector<32x128xf32>
    %430 = arith.truncf %429 : vector<32x128xf32> to vector<32x128xbf16>
    %c192_260 = arith.constant 192 : index
    %c0_261 = arith.constant 0 : index
    %431 = vector.load %arg16[%c192_260, %c0_261] : memref<288x512xbf16, #tpu.memory_space<vmem>>, vector<32x128xbf16>
    tpu.vector_store %arg16[%c192_260, %c0_261], %430 {strides = array<i32>} : memref<288x512xbf16, #tpu.memory_space<vmem>>, vector<32x128xbf16>,
    %c120_i32_262 = arith.constant 120 : i32
    %432 = tpu.dynamic_rotate %355 by %c120_i32_262 dim 1 : vector<32x128xf32>, i32 -> vector<32x128xf32>
    %c1_263 = arith.constant 1 : index
    %c7_264 = arith.constant 7 : index
    %c0_265 = arith.constant 0 : index
    %433 = vector.load %arg11[%c1_263, %c7_264, %c0_265] : memref<3x9x512xf32, #tpu.memory_space<vmem>>, vector<1x1x128xf32>
    %434 = vector.shape_cast %433 : vector<1x1x128xf32> to vector<1x128xf32>
    %cst_266 = arith.constant 0.000000e+00 : f32
    %435 = vector.broadcast %cst_266 : f32 to vector<1x128xf32>
    %436 = arith.cmpf ogt, %434, %435 : vector<1x128xf32>
    %cst_267 = arith.constant 0.000000e+00 : f32
    %437 = vector.shape_cast %436 : vector<1x128xi1> to vector<1x128xi1>
    %438 = vector.broadcast %437 : vector<1x128xi1> to vector<32x128xi1>
    %439 = vector.broadcast %cst_267 : f32 to vector<32x128xf32>
    %440 = arith.select %438, %432, %439 : vector<32x128xi1>, vector<32x128xf32>
    %441 = arith.truncf %440 : vector<32x128xf32> to vector<32x128xbf16>
    %c224_268 = arith.constant 224 : index
    %c0_269 = arith.constant 0 : index
    %442 = vector.load %arg16[%c224_268, %c0_269] : memref<288x512xbf16, #tpu.memory_space<vmem>>, vector<32x128xbf16>
    tpu.vector_store %arg16[%c224_268, %c0_269], %441 {strides = array<i32>} : memref<288x512xbf16, #tpu.memory_space<vmem>>, vector<32x128xbf16>,
    %c119_i32_270 = arith.constant 119 : i32
    %443 = tpu.dynamic_rotate %355 by %c119_i32_270 dim 1 : vector<32x128xf32>, i32 -> vector<32x128xf32>
    %c1_271 = arith.constant 1 : index
    %c8_272 = arith.constant 8 : index
    %c0_273 = arith.constant 0 : index
    %444 = vector.load %arg11[%c1_271, %c8_272, %c0_273] : memref<3x9x512xf32, #tpu.memory_space<vmem>>, vector<1x1x128xf32>
    %445 = vector.shape_cast %444 : vector<1x1x128xf32> to vector<1x128xf32>
    %cst_274 = arith.constant 0.000000e+00 : f32
    %446 = vector.broadcast %cst_274 : f32 to vector<1x128xf32>
    %447 = arith.cmpf ogt, %445, %446 : vector<1x128xf32>
    %cst_275 = arith.constant 0.000000e+00 : f32
    %448 = vector.shape_cast %447 : vector<1x128xi1> to vector<1x128xi1>
    %449 = vector.broadcast %448 : vector<1x128xi1> to vector<32x128xi1>
    %450 = vector.broadcast %cst_275 : f32 to vector<32x128xf32>
    %451 = arith.select %449, %443, %450 : vector<32x128xi1>, vector<32x128xf32>
    %452 = arith.truncf %451 : vector<32x128xf32> to vector<32x128xbf16>
    %c256_276 = arith.constant 256 : index
    %c0_277 = arith.constant 0 : index
    %453 = vector.load %arg16[%c256_276, %c0_277] : memref<288x512xbf16, #tpu.memory_space<vmem>>, vector<32x128xbf16>
    tpu.vector_store %arg16[%c256_276, %c0_277], %452 {strides = array<i32>} : memref<288x512xbf16, #tpu.memory_space<vmem>>, vector<32x128xbf16>,
    %c2_278 = arith.constant 2 : index
    %c0_279 = arith.constant 0 : index
    %c0_280 = arith.constant 0 : index
    %454 = vector.load %arg5[%c2_278, %c0_279, %c0_280] : memref<5x32x288xbf16, #tpu.memory_space<vmem>>, vector<1x32x288xbf16>
    %455 = vector.shape_cast %454 : vector<1x32x288xbf16> to vector<32x288xbf16>
    %c0_281 = arith.constant 0 : index
    %c0_282 = arith.constant 0 : index
    %456 = vector.load %arg16[%c0_281, %c0_282] : memref<288x512xbf16, #tpu.memory_space<vmem>>, vector<288x128xbf16>
    %cst_283 = arith.constant dense<0.000000e+00> : vector<32x128xf32>
    %457 = tpu.matmul %455, %456, %cst_283 {dimension_numbers = #tpu.dot_dimension_numbers<[1], [0], [0], [1], [0, 0, 1, 1], [], []>} : vector<32x288xbf16>, vector<288x128xbf16>, vector<32x128xf32> -> vector<32x128xf32>
    %c2_284 = arith.constant 2 : index
    %c0_285 = arith.constant 0 : index
    %c0_286 = arith.constant 0 : index
    %458 = vector.load %arg6[%c2_284, %c0_285, %c0_286] : memref<5x32x1xf32, #tpu.memory_space<vmem>>, vector<1x32x1xf32>
    %459 = vector.shape_cast %458 : vector<1x32x1xf32> to vector<32x1xf32>
    %460 = vector.broadcast %459 : vector<32x1xf32> to vector<32x128xf32>
    %461 = arith.addf %457, %460 : vector<32x128xf32>
    %c0_287 = arith.constant 0 : index
    %c384 = arith.constant 384 : index
    %462 = vector.load %arg10[%c0_287, %c384] : memref<1x1536xf32, #tpu.memory_space<vmem>>, vector<1x128xf32>
    %463 = vector.broadcast %462 : vector<1x128xf32> to vector<32x128xf32>
    %464 = arith.addf %461, %463 : vector<32x128xf32>
    %cst_288 = arith.constant 0.000000e+00 : f32
    %465 = vector.broadcast %cst_288 : f32 to vector<32x128xf32>
    %466 = arith.cmpf ogt, %464, %465 : vector<32x128xf32>
    %cst_289 = arith.constant 2.000000e-01 : f32
    %467 = vector.broadcast %cst_289 : f32 to vector<32x128xf32>
    %468 = arith.mulf %467, %464 : vector<32x128xf32>
    %469 = arith.select %466, %464, %468 : vector<32x128xi1>, vector<32x128xf32>
    %c1_290 = arith.constant 1 : index
    %c0_291 = arith.constant 0 : index
    %c0_292 = arith.constant 0 : index
    %470 = vector.load %arg12[%c1_290, %c0_291, %c0_292] : memref<3x512x2xf32, #tpu.memory_space<vmem>>, vector<1x128x2xf32>
    %471 = vector.shape_cast %470 : vector<1x128x2xf32> to vector<128x2xf32>
    %c1_293 = arith.constant 1 : index
    %c0_294 = arith.constant 0 : index
    %c0_295 = arith.constant 0 : index
    %472 = vector.load %arg13[%c1_293, %c0_294, %c0_295] : memref<3x2x512xf32, #tpu.memory_space<vmem>>, vector<1x2x128xf32>
    %473 = vector.shape_cast %472 : vector<1x2x128xf32> to vector<2x128xf32>
    %cst_296 = arith.constant dense<0.000000e+00> : vector<32x2xf32>
    %474 = tpu.matmul %469, %471, %cst_296 {dimension_numbers = #tpu.dot_dimension_numbers<[1], [0], [0], [1], [0, 0, 1, 1], [], []>} : vector<32x128xf32>, vector<128x2xf32>, vector<32x2xf32> -> vector<32x2xf32>
    %475 = arith.mulf %469, %469 : vector<32x128xf32>
    %cst_297 = arith.constant dense<0.000000e+00> : vector<32x2xf32>
    %476 = tpu.matmul %475, %471, %cst_297 {dimension_numbers = #tpu.dot_dimension_numbers<[1], [0], [0], [1], [0, 0, 1, 1], [], []>} : vector<32x128xf32>, vector<128x2xf32>, vector<32x2xf32> -> vector<32x2xf32>
    %477 = arith.mulf %474, %474 : vector<32x2xf32>
    %478 = arith.subf %476, %477 : vector<32x2xf32>
    %cst_298 = arith.constant 0.000000e+00 : f32
    %479 = vector.broadcast %cst_298 : f32 to vector<32x2xf32>
    %480 = arith.maximumf %478, %479 : vector<32x2xf32>
    %cst_299 = arith.constant 9.99999993E-9 : f32
    %481 = vector.broadcast %cst_299 : f32 to vector<32x2xf32>
    %482 = arith.addf %480, %481 : vector<32x2xf32>
    %483 = math.rsqrt %482 : vector<32x2xf32>
    %484 = vector.extract_strided_slice %39 {offsets = [192, 0], sizes = [32, 2], strides = [1, 1]} : vector<384x2xf32> to vector<32x2xf32>
    %485 = vector.extract_strided_slice %39 {offsets = [224, 0], sizes = [32, 2], strides = [1, 1]} : vector<384x2xf32> to vector<32x2xf32>
    %486 = arith.mulf %484, %483 : vector<32x2xf32>
    %487 = arith.mulf %486, %474 : vector<32x2xf32>
    %488 = arith.subf %485, %487 : vector<32x2xf32>
    %489 = tpu.concatenate %486, %488 in 0 : vector<32x2xf32>, vector<32x2xf32> -> vector<64x2xf32>
    %cst_300 = arith.constant dense<0.000000e+00> : vector<64x128xf32>
    %490 = tpu.matmul %489, %473, %cst_300 {dimension_numbers = #tpu.dot_dimension_numbers<[1], [0], [0], [1], [0, 0, 1, 1], [], []>} : vector<64x2xf32>, vector<2x128xf32>, vector<64x128xf32> -> vector<64x128xf32>
    %491 = vector.extract_strided_slice %490 {offsets = [0, 0], sizes = [32, 128], strides = [1, 1]} : vector<64x128xf32> to vector<32x128xf32>
    %492 = arith.mulf %491, %469 : vector<32x128xf32>
    %493 = vector.extract_strided_slice %490 {offsets = [32, 0], sizes = [32, 128], strides = [1, 1]} : vector<64x128xf32> to vector<32x128xf32>
    %494 = arith.addf %492, %493 : vector<32x128xf32>
    %c1_301 = arith.constant 1 : index
    %c0_302 = arith.constant 0 : index
    %c0_303 = arith.constant 0 : index
    %495 = vector.load %arg14[%c1_301, %c0_302, %c0_303] : memref<2x128x512xbf16, #tpu.memory_space<vmem>>, vector<1x128x512xbf16>
    %496 = vector.shape_cast %495 : vector<1x128x512xbf16> to vector<128x512xbf16>
    %497 = arith.truncf %494 : vector<32x128xf32> to vector<32x128xbf16>
    %cst_304 = arith.constant dense<0.000000e+00> : vector<32x512xf32>
    %498 = tpu.matmul %497, %496, %cst_304 {dimension_numbers = #tpu.dot_dimension_numbers<[1], [0], [0], [1], [0, 0, 1, 1], [], []>} : vector<32x128xbf16>, vector<128x512xbf16>, vector<32x512xf32> -> vector<32x512xf32>
    %c17_i32 = arith.constant 17 : i32
    %499 = tpu.dynamic_rotate %498 by %c17_i32 dim 1 : vector<32x512xf32>, i32 -> vector<32x512xf32>
    %c2_305 = arith.constant 2 : index
    %c0_306 = arith.constant 0 : index
    %c0_307 = arith.constant 0 : index
    %500 = vector.load %arg11[%c2_305, %c0_306, %c0_307] : memref<3x9x512xf32, #tpu.memory_space<vmem>>, vector<1x1x512xf32>
    %501 = vector.shape_cast %500 : vector<1x1x512xf32> to vector<1x512xf32>
    %cst_308 = arith.constant 0.000000e+00 : f32
    %502 = vector.broadcast %cst_308 : f32 to vector<1x512xf32>
    %503 = arith.cmpf ogt, %501, %502 : vector<1x512xf32>
    %cst_309 = arith.constant 0.000000e+00 : f32
    %504 = vector.shape_cast %503 : vector<1x512xi1> to vector<1x512xi1>
    %505 = vector.broadcast %504 : vector<1x512xi1> to vector<32x512xi1>
    %506 = vector.broadcast %cst_309 : f32 to vector<32x512xf32>
    %507 = arith.select %505, %499, %506 : vector<32x512xi1>, vector<32x512xf32>
    %508 = arith.truncf %507 : vector<32x512xf32> to vector<32x512xbf16>
    %c0_310 = arith.constant 0 : index
    %c0_311 = arith.constant 0 : index
    %509 = vector.load %arg16[%c0_310, %c0_311] : memref<288x512xbf16, #tpu.memory_space<vmem>>, vector<32x512xbf16>
    tpu.vector_store %arg16[%c0_310, %c0_311], %508 {strides = array<i32>} : memref<288x512xbf16, #tpu.memory_space<vmem>>, vector<32x512xbf16>,
    %c16_i32 = arith.constant 16 : i32
    %510 = tpu.dynamic_rotate %498 by %c16_i32 dim 1 : vector<32x512xf32>, i32 -> vector<32x512xf32>
    %c2_312 = arith.constant 2 : index
    %c1_313 = arith.constant 1 : index
    %c0_314 = arith.constant 0 : index
    %511 = vector.load %arg11[%c2_312, %c1_313, %c0_314] : memref<3x9x512xf32, #tpu.memory_space<vmem>>, vector<1x1x512xf32>
    %512 = vector.shape_cast %511 : vector<1x1x512xf32> to vector<1x512xf32>
    %cst_315 = arith.constant 0.000000e+00 : f32
    %513 = vector.broadcast %cst_315 : f32 to vector<1x512xf32>
    %514 = arith.cmpf ogt, %512, %513 : vector<1x512xf32>
    %cst_316 = arith.constant 0.000000e+00 : f32
    %515 = vector.shape_cast %514 : vector<1x512xi1> to vector<1x512xi1>
    %516 = vector.broadcast %515 : vector<1x512xi1> to vector<32x512xi1>
    %517 = vector.broadcast %cst_316 : f32 to vector<32x512xf32>
    %518 = arith.select %516, %510, %517 : vector<32x512xi1>, vector<32x512xf32>
    %519 = arith.truncf %518 : vector<32x512xf32> to vector<32x512xbf16>
    %c32_317 = arith.constant 32 : index
    %c0_318 = arith.constant 0 : index
    %520 = vector.load %arg16[%c32_317, %c0_318] : memref<288x512xbf16, #tpu.memory_space<vmem>>, vector<32x512xbf16>
    tpu.vector_store %arg16[%c32_317, %c0_318], %519 {strides = array<i32>} : memref<288x512xbf16, #tpu.memory_space<vmem>>, vector<32x512xbf16>,
    %c15_i32 = arith.constant 15 : i32
    %521 = tpu.dynamic_rotate %498 by %c15_i32 dim 1 : vector<32x512xf32>, i32 -> vector<32x512xf32>
    %c2_319 = arith.constant 2 : index
    %c2_320 = arith.constant 2 : index
    %c0_321 = arith.constant 0 : index
    %522 = vector.load %arg11[%c2_319, %c2_320, %c0_321] : memref<3x9x512xf32, #tpu.memory_space<vmem>>, vector<1x1x512xf32>
    %523 = vector.shape_cast %522 : vector<1x1x512xf32> to vector<1x512xf32>
    %cst_322 = arith.constant 0.000000e+00 : f32
    %524 = vector.broadcast %cst_322 : f32 to vector<1x512xf32>
    %525 = arith.cmpf ogt, %523, %524 : vector<1x512xf32>
    %cst_323 = arith.constant 0.000000e+00 : f32
    %526 = vector.shape_cast %525 : vector<1x512xi1> to vector<1x512xi1>
    %527 = vector.broadcast %526 : vector<1x512xi1> to vector<32x512xi1>
    %528 = vector.broadcast %cst_323 : f32 to vector<32x512xf32>
    %529 = arith.select %527, %521, %528 : vector<32x512xi1>, vector<32x512xf32>
    %530 = arith.truncf %529 : vector<32x512xf32> to vector<32x512xbf16>
    %c64_324 = arith.constant 64 : index
    %c0_325 = arith.constant 0 : index
    %531 = vector.load %arg16[%c64_324, %c0_325] : memref<288x512xbf16, #tpu.memory_space<vmem>>, vector<32x512xbf16>
    tpu.vector_store %arg16[%c64_324, %c0_325], %530 {strides = array<i32>} : memref<288x512xbf16, #tpu.memory_space<vmem>>, vector<32x512xbf16>,
    %c1_i32_326 = arith.constant 1 : i32
    %532 = tpu.dynamic_rotate %498 by %c1_i32_326 dim 1 : vector<32x512xf32>, i32 -> vector<32x512xf32>
    %c2_327 = arith.constant 2 : index
    %c3_328 = arith.constant 3 : index
    %c0_329 = arith.constant 0 : index
    %533 = vector.load %arg11[%c2_327, %c3_328, %c0_329] : memref<3x9x512xf32, #tpu.memory_space<vmem>>, vector<1x1x512xf32>
    %534 = vector.shape_cast %533 : vector<1x1x512xf32> to vector<1x512xf32>
    %cst_330 = arith.constant 0.000000e+00 : f32
    %535 = vector.broadcast %cst_330 : f32 to vector<1x512xf32>
    %536 = arith.cmpf ogt, %534, %535 : vector<1x512xf32>
    %cst_331 = arith.constant 0.000000e+00 : f32
    %537 = vector.shape_cast %536 : vector<1x512xi1> to vector<1x512xi1>
    %538 = vector.broadcast %537 : vector<1x512xi1> to vector<32x512xi1>
    %539 = vector.broadcast %cst_331 : f32 to vector<32x512xf32>
    %540 = arith.select %538, %532, %539 : vector<32x512xi1>, vector<32x512xf32>
    %541 = arith.truncf %540 : vector<32x512xf32> to vector<32x512xbf16>
    %c96_332 = arith.constant 96 : index
    %c0_333 = arith.constant 0 : index
    %542 = vector.load %arg16[%c96_332, %c0_333] : memref<288x512xbf16, #tpu.memory_space<vmem>>, vector<32x512xbf16>
    tpu.vector_store %arg16[%c96_332, %c0_333], %541 {strides = array<i32>} : memref<288x512xbf16, #tpu.memory_space<vmem>>, vector<32x512xbf16>,
    %c2_334 = arith.constant 2 : index
    %c4_335 = arith.constant 4 : index
    %c0_336 = arith.constant 0 : index
    %543 = vector.load %arg11[%c2_334, %c4_335, %c0_336] : memref<3x9x512xf32, #tpu.memory_space<vmem>>, vector<1x1x512xf32>
    %544 = vector.shape_cast %543 : vector<1x1x512xf32> to vector<1x512xf32>
    %cst_337 = arith.constant 0.000000e+00 : f32
    %545 = vector.broadcast %cst_337 : f32 to vector<1x512xf32>
    %546 = arith.cmpf ogt, %544, %545 : vector<1x512xf32>
    %cst_338 = arith.constant 0.000000e+00 : f32
    %547 = vector.shape_cast %546 : vector<1x512xi1> to vector<1x512xi1>
    %548 = vector.broadcast %547 : vector<1x512xi1> to vector<32x512xi1>
    %549 = vector.broadcast %cst_338 : f32 to vector<32x512xf32>
    %550 = arith.select %548, %498, %549 : vector<32x512xi1>, vector<32x512xf32>
    %551 = arith.truncf %550 : vector<32x512xf32> to vector<32x512xbf16>
    %c128_339 = arith.constant 128 : index
    %c0_340 = arith.constant 0 : index
    %552 = vector.load %arg16[%c128_339, %c0_340] : memref<288x512xbf16, #tpu.memory_space<vmem>>, vector<32x512xbf16>
    tpu.vector_store %arg16[%c128_339, %c0_340], %551 {strides = array<i32>} : memref<288x512xbf16, #tpu.memory_space<vmem>>, vector<32x512xbf16>,
    %c511_i32 = arith.constant 511 : i32
    %553 = tpu.dynamic_rotate %498 by %c511_i32 dim 1 : vector<32x512xf32>, i32 -> vector<32x512xf32>
    %c2_341 = arith.constant 2 : index
    %c5_342 = arith.constant 5 : index
    %c0_343 = arith.constant 0 : index
    %554 = vector.load %arg11[%c2_341, %c5_342, %c0_343] : memref<3x9x512xf32, #tpu.memory_space<vmem>>, vector<1x1x512xf32>
    %555 = vector.shape_cast %554 : vector<1x1x512xf32> to vector<1x512xf32>
    %cst_344 = arith.constant 0.000000e+00 : f32
    %556 = vector.broadcast %cst_344 : f32 to vector<1x512xf32>
    %557 = arith.cmpf ogt, %555, %556 : vector<1x512xf32>
    %cst_345 = arith.constant 0.000000e+00 : f32
    %558 = vector.shape_cast %557 : vector<1x512xi1> to vector<1x512xi1>
    %559 = vector.broadcast %558 : vector<1x512xi1> to vector<32x512xi1>
    %560 = vector.broadcast %cst_345 : f32 to vector<32x512xf32>
    %561 = arith.select %559, %553, %560 : vector<32x512xi1>, vector<32x512xf32>
    %562 = arith.truncf %561 : vector<32x512xf32> to vector<32x512xbf16>
    %c160_346 = arith.constant 160 : index
    %c0_347 = arith.constant 0 : index
    %563 = vector.load %arg16[%c160_346, %c0_347] : memref<288x512xbf16, #tpu.memory_space<vmem>>, vector<32x512xbf16>
    tpu.vector_store %arg16[%c160_346, %c0_347], %562 {strides = array<i32>} : memref<288x512xbf16, #tpu.memory_space<vmem>>, vector<32x512xbf16>,
    %c497_i32 = arith.constant 497 : i32
    %564 = tpu.dynamic_rotate %498 by %c497_i32 dim 1 : vector<32x512xf32>, i32 -> vector<32x512xf32>
    %c2_348 = arith.constant 2 : index
    %c6_349 = arith.constant 6 : index
    %c0_350 = arith.constant 0 : index
    %565 = vector.load %arg11[%c2_348, %c6_349, %c0_350] : memref<3x9x512xf32, #tpu.memory_space<vmem>>, vector<1x1x512xf32>
    %566 = vector.shape_cast %565 : vector<1x1x512xf32> to vector<1x512xf32>
    %cst_351 = arith.constant 0.000000e+00 : f32
    %567 = vector.broadcast %cst_351 : f32 to vector<1x512xf32>
    %568 = arith.cmpf ogt, %566, %567 : vector<1x512xf32>
    %cst_352 = arith.constant 0.000000e+00 : f32
    %569 = vector.shape_cast %568 : vector<1x512xi1> to vector<1x512xi1>
    %570 = vector.broadcast %569 : vector<1x512xi1> to vector<32x512xi1>
    %571 = vector.broadcast %cst_352 : f32 to vector<32x512xf32>
    %572 = arith.select %570, %564, %571 : vector<32x512xi1>, vector<32x512xf32>
    %573 = arith.truncf %572 : vector<32x512xf32> to vector<32x512xbf16>
    %c192_353 = arith.constant 192 : index
    %c0_354 = arith.constant 0 : index
    %574 = vector.load %arg16[%c192_353, %c0_354] : memref<288x512xbf16, #tpu.memory_space<vmem>>, vector<32x512xbf16>
    tpu.vector_store %arg16[%c192_353, %c0_354], %573 {strides = array<i32>} : memref<288x512xbf16, #tpu.memory_space<vmem>>, vector<32x512xbf16>,
    %c496_i32 = arith.constant 496 : i32
    %575 = tpu.dynamic_rotate %498 by %c496_i32 dim 1 : vector<32x512xf32>, i32 -> vector<32x512xf32>
    %c2_355 = arith.constant 2 : index
    %c7_356 = arith.constant 7 : index
    %c0_357 = arith.constant 0 : index
    %576 = vector.load %arg11[%c2_355, %c7_356, %c0_357] : memref<3x9x512xf32, #tpu.memory_space<vmem>>, vector<1x1x512xf32>
    %577 = vector.shape_cast %576 : vector<1x1x512xf32> to vector<1x512xf32>
    %cst_358 = arith.constant 0.000000e+00 : f32
    %578 = vector.broadcast %cst_358 : f32 to vector<1x512xf32>
    %579 = arith.cmpf ogt, %577, %578 : vector<1x512xf32>
    %cst_359 = arith.constant 0.000000e+00 : f32
    %580 = vector.shape_cast %579 : vector<1x512xi1> to vector<1x512xi1>
    %581 = vector.broadcast %580 : vector<1x512xi1> to vector<32x512xi1>
    %582 = vector.broadcast %cst_359 : f32 to vector<32x512xf32>
    %583 = arith.select %581, %575, %582 : vector<32x512xi1>, vector<32x512xf32>
    %584 = arith.truncf %583 : vector<32x512xf32> to vector<32x512xbf16>
    %c224_360 = arith.constant 224 : index
    %c0_361 = arith.constant 0 : index
    %585 = vector.load %arg16[%c224_360, %c0_361] : memref<288x512xbf16, #tpu.memory_space<vmem>>, vector<32x512xbf16>
    tpu.vector_store %arg16[%c224_360, %c0_361], %584 {strides = array<i32>} : memref<288x512xbf16, #tpu.memory_space<vmem>>, vector<32x512xbf16>,
    %c495_i32 = arith.constant 495 : i32
    %586 = tpu.dynamic_rotate %498 by %c495_i32 dim 1 : vector<32x512xf32>, i32 -> vector<32x512xf32>
    %c2_362 = arith.constant 2 : index
    %c8_363 = arith.constant 8 : index
    %c0_364 = arith.constant 0 : index
    %587 = vector.load %arg11[%c2_362, %c8_363, %c0_364] : memref<3x9x512xf32, #tpu.memory_space<vmem>>, vector<1x1x512xf32>
    %588 = vector.shape_cast %587 : vector<1x1x512xf32> to vector<1x512xf32>
    %cst_365 = arith.constant 0.000000e+00 : f32
    %589 = vector.broadcast %cst_365 : f32 to vector<1x512xf32>
    %590 = arith.cmpf ogt, %588, %589 : vector<1x512xf32>
    %cst_366 = arith.constant 0.000000e+00 : f32
    %591 = vector.shape_cast %590 : vector<1x512xi1> to vector<1x512xi1>
    %592 = vector.broadcast %591 : vector<1x512xi1> to vector<32x512xi1>
    %593 = vector.broadcast %cst_366 : f32 to vector<32x512xf32>
    %594 = arith.select %592, %586, %593 : vector<32x512xi1>, vector<32x512xf32>
    %595 = arith.truncf %594 : vector<32x512xf32> to vector<32x512xbf16>
    %c256_367 = arith.constant 256 : index
    %c0_368 = arith.constant 0 : index
    %596 = vector.load %arg16[%c256_367, %c0_368] : memref<288x512xbf16, #tpu.memory_space<vmem>>, vector<32x512xbf16>
    tpu.vector_store %arg16[%c256_367, %c0_368], %595 {strides = array<i32>} : memref<288x512xbf16, #tpu.memory_space<vmem>>, vector<32x512xbf16>,
    %c3_369 = arith.constant 3 : index
    %c0_370 = arith.constant 0 : index
    %c0_371 = arith.constant 0 : index
    %597 = vector.load %arg5[%c3_369, %c0_370, %c0_371] : memref<5x32x288xbf16, #tpu.memory_space<vmem>>, vector<1x32x288xbf16>
    %598 = vector.shape_cast %597 : vector<1x32x288xbf16> to vector<32x288xbf16>
    %c0_372 = arith.constant 0 : index
    %c0_373 = arith.constant 0 : index
    %599 = vector.load %arg16[%c0_372, %c0_373] : memref<288x512xbf16, #tpu.memory_space<vmem>>, vector<288x512xbf16>
    %cst_374 = arith.constant dense<0.000000e+00> : vector<32x512xf32>
    %600 = tpu.matmul %598, %599, %cst_374 {dimension_numbers = #tpu.dot_dimension_numbers<[1], [0], [0], [1], [0, 0, 1, 1], [], []>} : vector<32x288xbf16>, vector<288x512xbf16>, vector<32x512xf32> -> vector<32x512xf32>
    %c3_375 = arith.constant 3 : index
    %c0_376 = arith.constant 0 : index
    %c0_377 = arith.constant 0 : index
    %601 = vector.load %arg6[%c3_375, %c0_376, %c0_377] : memref<5x32x1xf32, #tpu.memory_space<vmem>>, vector<1x32x1xf32>
    %602 = vector.shape_cast %601 : vector<1x32x1xf32> to vector<32x1xf32>
    %603 = vector.broadcast %602 : vector<32x1xf32> to vector<32x512xf32>
    %604 = arith.addf %600, %603 : vector<32x512xf32>
    %c0_378 = arith.constant 0 : index
    %c512 = arith.constant 512 : index
    %605 = vector.load %arg10[%c0_378, %c512] : memref<1x1536xf32, #tpu.memory_space<vmem>>, vector<1x512xf32>
    %606 = vector.broadcast %605 : vector<1x512xf32> to vector<32x512xf32>
    %607 = arith.addf %604, %606 : vector<32x512xf32>
    %cst_379 = arith.constant 0.000000e+00 : f32
    %608 = vector.broadcast %cst_379 : f32 to vector<32x512xf32>
    %609 = arith.cmpf ogt, %607, %608 : vector<32x512xf32>
    %cst_380 = arith.constant 2.000000e-01 : f32
    %610 = vector.broadcast %cst_380 : f32 to vector<32x512xf32>
    %611 = arith.mulf %610, %607 : vector<32x512xf32>
    %612 = arith.select %609, %607, %611 : vector<32x512xi1>, vector<32x512xf32>
    %c2_381 = arith.constant 2 : index
    %c0_382 = arith.constant 0 : index
    %c0_383 = arith.constant 0 : index
    %613 = vector.load %arg12[%c2_381, %c0_382, %c0_383] : memref<3x512x2xf32, #tpu.memory_space<vmem>>, vector<1x512x2xf32>
    %614 = vector.shape_cast %613 : vector<1x512x2xf32> to vector<512x2xf32>
    %c2_384 = arith.constant 2 : index
    %c0_385 = arith.constant 0 : index
    %c0_386 = arith.constant 0 : index
    %615 = vector.load %arg13[%c2_384, %c0_385, %c0_386] : memref<3x2x512xf32, #tpu.memory_space<vmem>>, vector<1x2x512xf32>
    %616 = vector.shape_cast %615 : vector<1x2x512xf32> to vector<2x512xf32>
    %cst_387 = arith.constant dense<0.000000e+00> : vector<32x2xf32>
    %617 = tpu.matmul %612, %614, %cst_387 {dimension_numbers = #tpu.dot_dimension_numbers<[1], [0], [0], [1], [0, 0, 1, 1], [], []>} : vector<32x512xf32>, vector<512x2xf32>, vector<32x2xf32> -> vector<32x2xf32>
    %618 = arith.mulf %612, %612 : vector<32x512xf32>
    %cst_388 = arith.constant dense<0.000000e+00> : vector<32x2xf32>
    %619 = tpu.matmul %618, %614, %cst_388 {dimension_numbers = #tpu.dot_dimension_numbers<[1], [0], [0], [1], [0, 0, 1, 1], [], []>} : vector<32x512xf32>, vector<512x2xf32>, vector<32x2xf32> -> vector<32x2xf32>
    %620 = arith.mulf %617, %617 : vector<32x2xf32>
    %621 = arith.subf %619, %620 : vector<32x2xf32>
    %cst_389 = arith.constant 0.000000e+00 : f32
    %622 = vector.broadcast %cst_389 : f32 to vector<32x2xf32>
    %623 = arith.maximumf %621, %622 : vector<32x2xf32>
    %cst_390 = arith.constant 9.99999993E-9 : f32
    %624 = vector.broadcast %cst_390 : f32 to vector<32x2xf32>
    %625 = arith.addf %623, %624 : vector<32x2xf32>
    %626 = math.rsqrt %625 : vector<32x2xf32>
    %627 = vector.extract_strided_slice %39 {offsets = [256, 0], sizes = [32, 2], strides = [1, 1]} : vector<384x2xf32> to vector<32x2xf32>
    %628 = vector.extract_strided_slice %39 {offsets = [288, 0], sizes = [32, 2], strides = [1, 1]} : vector<384x2xf32> to vector<32x2xf32>
    %629 = arith.mulf %627, %626 : vector<32x2xf32>
    %630 = arith.mulf %629, %617 : vector<32x2xf32>
    %631 = arith.subf %628, %630 : vector<32x2xf32>
    %632 = tpu.concatenate %629, %631 in 0 : vector<32x2xf32>, vector<32x2xf32> -> vector<64x2xf32>
    %cst_391 = arith.constant dense<0.000000e+00> : vector<64x512xf32>
    %633 = tpu.matmul %632, %616, %cst_391 {dimension_numbers = #tpu.dot_dimension_numbers<[1], [0], [0], [1], [0, 0, 1, 1], [], []>} : vector<64x2xf32>, vector<2x512xf32>, vector<64x512xf32> -> vector<64x512xf32>
    %634 = vector.extract_strided_slice %633 {offsets = [0, 0], sizes = [32, 512], strides = [1, 1]} : vector<64x512xf32> to vector<32x512xf32>
    %635 = arith.mulf %634, %612 : vector<32x512xf32>
    %636 = vector.extract_strided_slice %633 {offsets = [32, 0], sizes = [32, 512], strides = [1, 1]} : vector<64x512xf32> to vector<32x512xf32>
    %637 = arith.addf %635, %636 : vector<32x512xf32>
    %c17_i32_392 = arith.constant 17 : i32
    %638 = tpu.dynamic_rotate %637 by %c17_i32_392 dim 1 : vector<32x512xf32>, i32 -> vector<32x512xf32>
    %c2_393 = arith.constant 2 : index
    %c0_394 = arith.constant 0 : index
    %c0_395 = arith.constant 0 : index
    %639 = vector.load %arg11[%c2_393, %c0_394, %c0_395] : memref<3x9x512xf32, #tpu.memory_space<vmem>>, vector<1x1x512xf32>
    %640 = vector.shape_cast %639 : vector<1x1x512xf32> to vector<1x512xf32>
    %cst_396 = arith.constant 0.000000e+00 : f32
    %641 = vector.broadcast %cst_396 : f32 to vector<1x512xf32>
    %642 = arith.cmpf ogt, %640, %641 : vector<1x512xf32>
    %cst_397 = arith.constant 0.000000e+00 : f32
    %643 = vector.shape_cast %642 : vector<1x512xi1> to vector<1x512xi1>
    %644 = vector.broadcast %643 : vector<1x512xi1> to vector<32x512xi1>
    %645 = vector.broadcast %cst_397 : f32 to vector<32x512xf32>
    %646 = arith.select %644, %638, %645 : vector<32x512xi1>, vector<32x512xf32>
    %647 = arith.truncf %646 : vector<32x512xf32> to vector<32x512xbf16>
    %c0_398 = arith.constant 0 : index
    %c0_399 = arith.constant 0 : index
    %648 = vector.load %arg16[%c0_398, %c0_399] : memref<288x512xbf16, #tpu.memory_space<vmem>>, vector<32x512xbf16>
    tpu.vector_store %arg16[%c0_398, %c0_399], %647 {strides = array<i32>} : memref<288x512xbf16, #tpu.memory_space<vmem>>, vector<32x512xbf16>,
    %c16_i32_400 = arith.constant 16 : i32
    %649 = tpu.dynamic_rotate %637 by %c16_i32_400 dim 1 : vector<32x512xf32>, i32 -> vector<32x512xf32>
    %c2_401 = arith.constant 2 : index
    %c1_402 = arith.constant 1 : index
    %c0_403 = arith.constant 0 : index
    %650 = vector.load %arg11[%c2_401, %c1_402, %c0_403] : memref<3x9x512xf32, #tpu.memory_space<vmem>>, vector<1x1x512xf32>
    %651 = vector.shape_cast %650 : vector<1x1x512xf32> to vector<1x512xf32>
    %cst_404 = arith.constant 0.000000e+00 : f32
    %652 = vector.broadcast %cst_404 : f32 to vector<1x512xf32>
    %653 = arith.cmpf ogt, %651, %652 : vector<1x512xf32>
    %cst_405 = arith.constant 0.000000e+00 : f32
    %654 = vector.shape_cast %653 : vector<1x512xi1> to vector<1x512xi1>
    %655 = vector.broadcast %654 : vector<1x512xi1> to vector<32x512xi1>
    %656 = vector.broadcast %cst_405 : f32 to vector<32x512xf32>
    %657 = arith.select %655, %649, %656 : vector<32x512xi1>, vector<32x512xf32>
    %658 = arith.truncf %657 : vector<32x512xf32> to vector<32x512xbf16>
    %c32_406 = arith.constant 32 : index
    %c0_407 = arith.constant 0 : index
    %659 = vector.load %arg16[%c32_406, %c0_407] : memref<288x512xbf16, #tpu.memory_space<vmem>>, vector<32x512xbf16>
    tpu.vector_store %arg16[%c32_406, %c0_407], %658 {strides = array<i32>} : memref<288x512xbf16, #tpu.memory_space<vmem>>, vector<32x512xbf16>,
    %c15_i32_408 = arith.constant 15 : i32
    %660 = tpu.dynamic_rotate %637 by %c15_i32_408 dim 1 : vector<32x512xf32>, i32 -> vector<32x512xf32>
    %c2_409 = arith.constant 2 : index
    %c2_410 = arith.constant 2 : index
    %c0_411 = arith.constant 0 : index
    %661 = vector.load %arg11[%c2_409, %c2_410, %c0_411] : memref<3x9x512xf32, #tpu.memory_space<vmem>>, vector<1x1x512xf32>
    %662 = vector.shape_cast %661 : vector<1x1x512xf32> to vector<1x512xf32>
    %cst_412 = arith.constant 0.000000e+00 : f32
    %663 = vector.broadcast %cst_412 : f32 to vector<1x512xf32>
    %664 = arith.cmpf ogt, %662, %663 : vector<1x512xf32>
    %cst_413 = arith.constant 0.000000e+00 : f32
    %665 = vector.shape_cast %664 : vector<1x512xi1> to vector<1x512xi1>
    %666 = vector.broadcast %665 : vector<1x512xi1> to vector<32x512xi1>
    %667 = vector.broadcast %cst_413 : f32 to vector<32x512xf32>
    %668 = arith.select %666, %660, %667 : vector<32x512xi1>, vector<32x512xf32>
    %669 = arith.truncf %668 : vector<32x512xf32> to vector<32x512xbf16>
    %c64_414 = arith.constant 64 : index
    %c0_415 = arith.constant 0 : index
    %670 = vector.load %arg16[%c64_414, %c0_415] : memref<288x512xbf16, #tpu.memory_space<vmem>>, vector<32x512xbf16>
    tpu.vector_store %arg16[%c64_414, %c0_415], %669 {strides = array<i32>} : memref<288x512xbf16, #tpu.memory_space<vmem>>, vector<32x512xbf16>,
    %c1_i32_416 = arith.constant 1 : i32
    %671 = tpu.dynamic_rotate %637 by %c1_i32_416 dim 1 : vector<32x512xf32>, i32 -> vector<32x512xf32>
    %c2_417 = arith.constant 2 : index
    %c3_418 = arith.constant 3 : index
    %c0_419 = arith.constant 0 : index
    %672 = vector.load %arg11[%c2_417, %c3_418, %c0_419] : memref<3x9x512xf32, #tpu.memory_space<vmem>>, vector<1x1x512xf32>
    %673 = vector.shape_cast %672 : vector<1x1x512xf32> to vector<1x512xf32>
    %cst_420 = arith.constant 0.000000e+00 : f32
    %674 = vector.broadcast %cst_420 : f32 to vector<1x512xf32>
    %675 = arith.cmpf ogt, %673, %674 : vector<1x512xf32>
    %cst_421 = arith.constant 0.000000e+00 : f32
    %676 = vector.shape_cast %675 : vector<1x512xi1> to vector<1x512xi1>
    %677 = vector.broadcast %676 : vector<1x512xi1> to vector<32x512xi1>
    %678 = vector.broadcast %cst_421 : f32 to vector<32x512xf32>
    %679 = arith.select %677, %671, %678 : vector<32x512xi1>, vector<32x512xf32>
    %680 = arith.truncf %679 : vector<32x512xf32> to vector<32x512xbf16>
    %c96_422 = arith.constant 96 : index
    %c0_423 = arith.constant 0 : index
    %681 = vector.load %arg16[%c96_422, %c0_423] : memref<288x512xbf16, #tpu.memory_space<vmem>>, vector<32x512xbf16>
    tpu.vector_store %arg16[%c96_422, %c0_423], %680 {strides = array<i32>} : memref<288x512xbf16, #tpu.memory_space<vmem>>, vector<32x512xbf16>,
    %c2_424 = arith.constant 2 : index
    %c4_425 = arith.constant 4 : index
    %c0_426 = arith.constant 0 : index
    %682 = vector.load %arg11[%c2_424, %c4_425, %c0_426] : memref<3x9x512xf32, #tpu.memory_space<vmem>>, vector<1x1x512xf32>
    %683 = vector.shape_cast %682 : vector<1x1x512xf32> to vector<1x512xf32>
    %cst_427 = arith.constant 0.000000e+00 : f32
    %684 = vector.broadcast %cst_427 : f32 to vector<1x512xf32>
    %685 = arith.cmpf ogt, %683, %684 : vector<1x512xf32>
    %cst_428 = arith.constant 0.000000e+00 : f32
    %686 = vector.shape_cast %685 : vector<1x512xi1> to vector<1x512xi1>
    %687 = vector.broadcast %686 : vector<1x512xi1> to vector<32x512xi1>
    %688 = vector.broadcast %cst_428 : f32 to vector<32x512xf32>
    %689 = arith.select %687, %637, %688 : vector<32x512xi1>, vector<32x512xf32>
    %690 = arith.truncf %689 : vector<32x512xf32> to vector<32x512xbf16>
    %c128_429 = arith.constant 128 : index
    %c0_430 = arith.constant 0 : index
    %691 = vector.load %arg16[%c128_429, %c0_430] : memref<288x512xbf16, #tpu.memory_space<vmem>>, vector<32x512xbf16>
    tpu.vector_store %arg16[%c128_429, %c0_430], %690 {strides = array<i32>} : memref<288x512xbf16, #tpu.memory_space<vmem>>, vector<32x512xbf16>,
    %c511_i32_431 = arith.constant 511 : i32
    %692 = tpu.dynamic_rotate %637 by %c511_i32_431 dim 1 : vector<32x512xf32>, i32 -> vector<32x512xf32>
    %c2_432 = arith.constant 2 : index
    %c5_433 = arith.constant 5 : index
    %c0_434 = arith.constant 0 : index
    %693 = vector.load %arg11[%c2_432, %c5_433, %c0_434] : memref<3x9x512xf32, #tpu.memory_space<vmem>>, vector<1x1x512xf32>
    %694 = vector.shape_cast %693 : vector<1x1x512xf32> to vector<1x512xf32>
    %cst_435 = arith.constant 0.000000e+00 : f32
    %695 = vector.broadcast %cst_435 : f32 to vector<1x512xf32>
    %696 = arith.cmpf ogt, %694, %695 : vector<1x512xf32>
    %cst_436 = arith.constant 0.000000e+00 : f32
    %697 = vector.shape_cast %696 : vector<1x512xi1> to vector<1x512xi1>
    %698 = vector.broadcast %697 : vector<1x512xi1> to vector<32x512xi1>
    %699 = vector.broadcast %cst_436 : f32 to vector<32x512xf32>
    %700 = arith.select %698, %692, %699 : vector<32x512xi1>, vector<32x512xf32>
    %701 = arith.truncf %700 : vector<32x512xf32> to vector<32x512xbf16>
    %c160_437 = arith.constant 160 : index
    %c0_438 = arith.constant 0 : index
    %702 = vector.load %arg16[%c160_437, %c0_438] : memref<288x512xbf16, #tpu.memory_space<vmem>>, vector<32x512xbf16>
    tpu.vector_store %arg16[%c160_437, %c0_438], %701 {strides = array<i32>} : memref<288x512xbf16, #tpu.memory_space<vmem>>, vector<32x512xbf16>,
    %c497_i32_439 = arith.constant 497 : i32
    %703 = tpu.dynamic_rotate %637 by %c497_i32_439 dim 1 : vector<32x512xf32>, i32 -> vector<32x512xf32>
    %c2_440 = arith.constant 2 : index
    %c6_441 = arith.constant 6 : index
    %c0_442 = arith.constant 0 : index
    %704 = vector.load %arg11[%c2_440, %c6_441, %c0_442] : memref<3x9x512xf32, #tpu.memory_space<vmem>>, vector<1x1x512xf32>
    %705 = vector.shape_cast %704 : vector<1x1x512xf32> to vector<1x512xf32>
    %cst_443 = arith.constant 0.000000e+00 : f32
    %706 = vector.broadcast %cst_443 : f32 to vector<1x512xf32>
    %707 = arith.cmpf ogt, %705, %706 : vector<1x512xf32>
    %cst_444 = arith.constant 0.000000e+00 : f32
    %708 = vector.shape_cast %707 : vector<1x512xi1> to vector<1x512xi1>
    %709 = vector.broadcast %708 : vector<1x512xi1> to vector<32x512xi1>
    %710 = vector.broadcast %cst_444 : f32 to vector<32x512xf32>
    %711 = arith.select %709, %703, %710 : vector<32x512xi1>, vector<32x512xf32>
    %712 = arith.truncf %711 : vector<32x512xf32> to vector<32x512xbf16>
    %c192_445 = arith.constant 192 : index
    %c0_446 = arith.constant 0 : index
    %713 = vector.load %arg16[%c192_445, %c0_446] : memref<288x512xbf16, #tpu.memory_space<vmem>>, vector<32x512xbf16>
    tpu.vector_store %arg16[%c192_445, %c0_446], %712 {strides = array<i32>} : memref<288x512xbf16, #tpu.memory_space<vmem>>, vector<32x512xbf16>,
    %c496_i32_447 = arith.constant 496 : i32
    %714 = tpu.dynamic_rotate %637 by %c496_i32_447 dim 1 : vector<32x512xf32>, i32 -> vector<32x512xf32>
    %c2_448 = arith.constant 2 : index
    %c7_449 = arith.constant 7 : index
    %c0_450 = arith.constant 0 : index
    %715 = vector.load %arg11[%c2_448, %c7_449, %c0_450] : memref<3x9x512xf32, #tpu.memory_space<vmem>>, vector<1x1x512xf32>
    %716 = vector.shape_cast %715 : vector<1x1x512xf32> to vector<1x512xf32>
    %cst_451 = arith.constant 0.000000e+00 : f32
    %717 = vector.broadcast %cst_451 : f32 to vector<1x512xf32>
    %718 = arith.cmpf ogt, %716, %717 : vector<1x512xf32>
    %cst_452 = arith.constant 0.000000e+00 : f32
    %719 = vector.shape_cast %718 : vector<1x512xi1> to vector<1x512xi1>
    %720 = vector.broadcast %719 : vector<1x512xi1> to vector<32x512xi1>
    %721 = vector.broadcast %cst_452 : f32 to vector<32x512xf32>
    %722 = arith.select %720, %714, %721 : vector<32x512xi1>, vector<32x512xf32>
    %723 = arith.truncf %722 : vector<32x512xf32> to vector<32x512xbf16>
    %c224_453 = arith.constant 224 : index
    %c0_454 = arith.constant 0 : index
    %724 = vector.load %arg16[%c224_453, %c0_454] : memref<288x512xbf16, #tpu.memory_space<vmem>>, vector<32x512xbf16>
    tpu.vector_store %arg16[%c224_453, %c0_454], %723 {strides = array<i32>} : memref<288x512xbf16, #tpu.memory_space<vmem>>, vector<32x512xbf16>,
    %c495_i32_455 = arith.constant 495 : i32
    %725 = tpu.dynamic_rotate %637 by %c495_i32_455 dim 1 : vector<32x512xf32>, i32 -> vector<32x512xf32>
    %c2_456 = arith.constant 2 : index
    %c8_457 = arith.constant 8 : index
    %c0_458 = arith.constant 0 : index
    %726 = vector.load %arg11[%c2_456, %c8_457, %c0_458] : memref<3x9x512xf32, #tpu.memory_space<vmem>>, vector<1x1x512xf32>
    %727 = vector.shape_cast %726 : vector<1x1x512xf32> to vector<1x512xf32>
    %cst_459 = arith.constant 0.000000e+00 : f32
    %728 = vector.broadcast %cst_459 : f32 to vector<1x512xf32>
    %729 = arith.cmpf ogt, %727, %728 : vector<1x512xf32>
    %cst_460 = arith.constant 0.000000e+00 : f32
    %730 = vector.shape_cast %729 : vector<1x512xi1> to vector<1x512xi1>
    %731 = vector.broadcast %730 : vector<1x512xi1> to vector<32x512xi1>
    %732 = vector.broadcast %cst_460 : f32 to vector<32x512xf32>
    %733 = arith.select %731, %725, %732 : vector<32x512xi1>, vector<32x512xf32>
    %734 = arith.truncf %733 : vector<32x512xf32> to vector<32x512xbf16>
    %c256_461 = arith.constant 256 : index
    %c0_462 = arith.constant 0 : index
    %735 = vector.load %arg16[%c256_461, %c0_462] : memref<288x512xbf16, #tpu.memory_space<vmem>>, vector<32x512xbf16>
    tpu.vector_store %arg16[%c256_461, %c0_462], %734 {strides = array<i32>} : memref<288x512xbf16, #tpu.memory_space<vmem>>, vector<32x512xbf16>,
    %c4_463 = arith.constant 4 : index
    %c0_464 = arith.constant 0 : index
    %c0_465 = arith.constant 0 : index
    %736 = vector.load %arg5[%c4_463, %c0_464, %c0_465] : memref<5x32x288xbf16, #tpu.memory_space<vmem>>, vector<1x32x288xbf16>
    %737 = vector.shape_cast %736 : vector<1x32x288xbf16> to vector<32x288xbf16>
    %c0_466 = arith.constant 0 : index
    %c0_467 = arith.constant 0 : index
    %738 = vector.load %arg16[%c0_466, %c0_467] : memref<288x512xbf16, #tpu.memory_space<vmem>>, vector<288x512xbf16>
    %cst_468 = arith.constant dense<0.000000e+00> : vector<32x512xf32>
    %739 = tpu.matmul %737, %738, %cst_468 {dimension_numbers = #tpu.dot_dimension_numbers<[1], [0], [0], [1], [0, 0, 1, 1], [], []>} : vector<32x288xbf16>, vector<288x512xbf16>, vector<32x512xf32> -> vector<32x512xf32>
    %c4_469 = arith.constant 4 : index
    %c0_470 = arith.constant 0 : index
    %c0_471 = arith.constant 0 : index
    %740 = vector.load %arg6[%c4_469, %c0_470, %c0_471] : memref<5x32x1xf32, #tpu.memory_space<vmem>>, vector<1x32x1xf32>
    %741 = vector.shape_cast %740 : vector<1x32x1xf32> to vector<32x1xf32>
    %742 = vector.broadcast %741 : vector<32x1xf32> to vector<32x512xf32>
    %743 = arith.addf %739, %742 : vector<32x512xf32>
    %c0_472 = arith.constant 0 : index
    %c1024 = arith.constant 1024 : index
    %744 = vector.load %arg10[%c0_472, %c1024] : memref<1x1536xf32, #tpu.memory_space<vmem>>, vector<1x512xf32>
    %745 = vector.broadcast %744 : vector<1x512xf32> to vector<32x512xf32>
    %746 = arith.addf %743, %745 : vector<32x512xf32>
    %cst_473 = arith.constant 0.000000e+00 : f32
    %747 = vector.broadcast %cst_473 : f32 to vector<32x512xf32>
    %748 = arith.cmpf ogt, %746, %747 : vector<32x512xf32>
    %cst_474 = arith.constant 2.000000e-01 : f32
    %749 = vector.broadcast %cst_474 : f32 to vector<32x512xf32>
    %750 = arith.mulf %749, %746 : vector<32x512xf32>
    %751 = arith.select %748, %746, %750 : vector<32x512xi1>, vector<32x512xf32>
    %c2_475 = arith.constant 2 : index
    %c0_476 = arith.constant 0 : index
    %c0_477 = arith.constant 0 : index
    %752 = vector.load %arg12[%c2_475, %c0_476, %c0_477] : memref<3x512x2xf32, #tpu.memory_space<vmem>>, vector<1x512x2xf32>
    %753 = vector.shape_cast %752 : vector<1x512x2xf32> to vector<512x2xf32>
    %c2_478 = arith.constant 2 : index
    %c0_479 = arith.constant 0 : index
    %c0_480 = arith.constant 0 : index
    %754 = vector.load %arg13[%c2_478, %c0_479, %c0_480] : memref<3x2x512xf32, #tpu.memory_space<vmem>>, vector<1x2x512xf32>
    %755 = vector.shape_cast %754 : vector<1x2x512xf32> to vector<2x512xf32>
    %cst_481 = arith.constant dense<0.000000e+00> : vector<32x2xf32>
    %756 = tpu.matmul %751, %753, %cst_481 {dimension_numbers = #tpu.dot_dimension_numbers<[1], [0], [0], [1], [0, 0, 1, 1], [], []>} : vector<32x512xf32>, vector<512x2xf32>, vector<32x2xf32> -> vector<32x2xf32>
    %757 = arith.mulf %751, %751 : vector<32x512xf32>
    %cst_482 = arith.constant dense<0.000000e+00> : vector<32x2xf32>
    %758 = tpu.matmul %757, %753, %cst_482 {dimension_numbers = #tpu.dot_dimension_numbers<[1], [0], [0], [1], [0, 0, 1, 1], [], []>} : vector<32x512xf32>, vector<512x2xf32>, vector<32x2xf32> -> vector<32x2xf32>
    %759 = arith.mulf %756, %756 : vector<32x2xf32>
    %760 = arith.subf %758, %759 : vector<32x2xf32>
    %cst_483 = arith.constant 0.000000e+00 : f32
    %761 = vector.broadcast %cst_483 : f32 to vector<32x2xf32>
    %762 = arith.maximumf %760, %761 : vector<32x2xf32>
    %cst_484 = arith.constant 9.99999993E-9 : f32
    %763 = vector.broadcast %cst_484 : f32 to vector<32x2xf32>
    %764 = arith.addf %762, %763 : vector<32x2xf32>
    %765 = math.rsqrt %764 : vector<32x2xf32>
    %766 = vector.extract_strided_slice %39 {offsets = [320, 0], sizes = [32, 2], strides = [1, 1]} : vector<384x2xf32> to vector<32x2xf32>
    %767 = vector.extract_strided_slice %39 {offsets = [352, 0], sizes = [32, 2], strides = [1, 1]} : vector<384x2xf32> to vector<32x2xf32>
    %768 = arith.mulf %766, %765 : vector<32x2xf32>
    %769 = arith.mulf %768, %756 : vector<32x2xf32>
    %770 = arith.subf %767, %769 : vector<32x2xf32>
    %771 = tpu.concatenate %768, %770 in 0 : vector<32x2xf32>, vector<32x2xf32> -> vector<64x2xf32>
    %cst_485 = arith.constant dense<0.000000e+00> : vector<64x512xf32>
    %772 = tpu.matmul %771, %755, %cst_485 {dimension_numbers = #tpu.dot_dimension_numbers<[1], [0], [0], [1], [0, 0, 1, 1], [], []>} : vector<64x2xf32>, vector<2x512xf32>, vector<64x512xf32> -> vector<64x512xf32>
    %773 = vector.extract_strided_slice %772 {offsets = [0, 0], sizes = [32, 512], strides = [1, 1]} : vector<64x512xf32> to vector<32x512xf32>
    %774 = arith.mulf %773, %751 : vector<32x512xf32>
    %775 = vector.extract_strided_slice %772 {offsets = [32, 0], sizes = [32, 512], strides = [1, 1]} : vector<64x512xf32> to vector<32x512xf32>
    %776 = arith.addf %774, %775 : vector<32x512xf32>
    %c0_486 = arith.constant 0 : index
    %c0_487 = arith.constant 0 : index
    %777 = vector.load %arg7[%c0_486, %c0_487] : memref<3x32xf32, #tpu.memory_space<vmem>>, vector<3x32xf32>
    %cst_488 = arith.constant dense<0.000000e+00> : vector<3x512xf32>
    %778 = tpu.matmul %777, %776, %cst_488 {dimension_numbers = #tpu.dot_dimension_numbers<[1], [0], [0], [1], [0, 0, 1, 1], [], []>} : vector<3x32xf32>, vector<32x512xf32>, vector<3x512xf32> -> vector<3x512xf32>
    %c0_489 = arith.constant 0 : index
    %c0_490 = arith.constant 0 : index
    %779 = vector.load %arg8[%c0_489, %c0_490] : memref<3x1xf32, #tpu.memory_space<vmem>>, vector<3x1xf32>
    %780 = vector.broadcast %779 : vector<3x1xf32> to vector<3x512xf32>
    %781 = arith.addf %778, %780 : vector<3x512xf32>
    %782 = vector.extract_strided_slice %781 {offsets = [0, 0], sizes = [3, 256], strides = [1, 1]} : vector<3x512xf32> to vector<3x256xf32>
    %c0_491 = arith.constant 0 : index
    %c0_492 = arith.constant 0 : index
    %c0_493 = arith.constant 0 : index
    %783 = vector.load %arg15[%c0_491, %c0_492, %c0_493] : memref<2x3x256xf32, #tpu.memory_space<vmem>>, vector<1x3x256xf32>
    %784 = vector.shape_cast %783 : vector<1x3x256xf32> to vector<3x256xf32>
    %785 = vector.shape_cast %782 : vector<3x256xf32> to vector<1x3x256xf32>
    tpu.vector_store %arg15[%c0_491, %c0_492, %c0_493], %785 {strides = array<i32>} : memref<2x3x256xf32, #tpu.memory_space<vmem>>, vector<1x3x256xf32>,
    %786 = vector.extract_strided_slice %781 {offsets = [0, 256], sizes = [3, 256], strides = [1, 1]} : vector<3x512xf32> to vector<3x256xf32>
    %c1_494 = arith.constant 1 : index
    %c0_495 = arith.constant 0 : index
    %c0_496 = arith.constant 0 : index
    %787 = vector.load %arg15[%c1_494, %c0_495, %c0_496] : memref<2x3x256xf32, #tpu.memory_space<vmem>>, vector<1x3x256xf32>
    %788 = vector.shape_cast %787 : vector<1x3x256xf32> to vector<3x256xf32>
    %789 = vector.shape_cast %786 : vector<3x256xf32> to vector<1x3x256xf32>
    tpu.vector_store %arg15[%c1_494, %c0_495, %c0_496], %789 {strides = array<i32>} : memref<2x3x256xf32, #tpu.memory_space<vmem>>, vector<1x3x256xf32>,
    return
  }
}

</mosaic_0001>

<bundles_post_ra>
// kernel: custom-call
= control target key start
LH: loop header
LB: loop body
LE: loop exit
PB: predicated region body
PF: predicated region fallthrough
CT: control target
= control target key end

     0   :  { %s6_s0 = inlined_call_operand.vmem [shape: f32[1536], index: 0, kind: output, shape index: {}]  }

// kernel: gnet_forward.1
= control target key start
LH: loop header
LB: loop body
LE: loop exit
PB: predicated region body
PF: predicated region fallthrough
CT: control target
= control target key end

     0   :  { %vm18396_vm0 = vcmask 261120   ;;  %vm18383_vm1 = vcmask 15360   ;;  %v18381_v3 = vmov 0   ;;  %vm18392_vm14 = vcmask 1041408   ;;  %s12548_s17 = smov 5   ;;  %s12549_s21 = smov 127   ;;  %s18365_s0 = inlined_call_operand.vmem [shape: f32[32,2], index: 0, kind: input, shape index: {}]   ;;  %s18366_s1 = inlined_call_operand.vmem [shape: f32[2,32,32], index: 1, kind: input, shape index: {}]   ;;  %s18367_s2 = inlined_call_operand.vmem [shape: f32[2,32,1], index: 2, kind: input, shape index: {}]   ;;  %s18368_s4 = inlined_call_operand.vmem [shape: f32[384,1], index: 4, kind: input, shape index: {}]   ;;  %s18369_s12 = inlined_call_operand.vmem [shape: f32[3,512,2], index: 12, kind: input, shape index: {}]   ;;  %s18370_s9 = inlined_call_operand.vmem [shape: f32[32,128], index: 9, kind: input, shape index: {}]   ;;  %s18371_s10 = inlined_call_operand.vmem [shape: f32[1,1536], index: 10, kind: input, shape index: {}]   ;;  %s18372_s3 = inlined_call_operand.vmem [shape: f32[384,32], index: 3, kind: input, shape index: {}]   ;;  %s18373_s13 = inlined_call_operand.vmem [shape: f32[3,2,512], index: 13, kind: input, shape index: {}]   ;;  %s18374_s11 = inlined_call_operand.vmem [shape: f32[3,9,512], index: 11, kind: input, shape index: {}]   ;;  %s18375_s5 = inlined_call_operand.vmem [shape: bf16[5,32,288], index: 5, kind: input, shape index: {}]   ;;  %s18376_s6 = inlined_call_operand.vmem [shape: f32[5,32,1], index: 6, kind: input, shape index: {}]   ;;  %s18377_s14 = inlined_call_operand.vmem [shape: bf16[2,128,512], index: 14, kind: input, shape index: {}]   ;;  %s18378_s8 = inlined_call_operand.vmem [shape: f32[3,1], index: 8, kind: input, shape index: {}]   ;;  %s18379_s7 = inlined_call_operand.vmem [shape: f32[3,32], index: 7, kind: input, shape index: {}]   ;;  %s18380_s15 = inlined_call_operand.vmem [shape: f32[2,3,256], index: 15, kind: output, shape index: {}]  }
   0x1   :  { %v12653_v0 = vld [vmem:[%s18365_s0] sm:$0xff]  ;;  %v12658_v1 = vld [vmem:[%s18365_s0 + $0x8] sm:$0xff]  ;;  %v12663_v2 = vld [vmem:[%s18365_s0 + $0x10] sm:$0xff]  ;;  %11517 = vset.pattern.permute.xlu0 %v18381_v3  ;;  %11518 = vset.pattern.permute.xlu1 %v18381_v3  ;;  %s12550_s26 = smov 4   ;;  %s12553_s23 = smov 124  }
   0x2   :  { %v54_v4 = vld [vmem:[%s18365_s0 + $0x18] sm:$0xff]  ;;  %v55_v5 = vmul.f32 %v12653_v0, %v12653_v0  ;;  %v56_v6 = vmul.f32 %v12658_v1, %v12658_v1  ;;  %v57_v7 = vmul.f32 %v12663_v2, %v12663_v2  ;;  %v81_v8 = vld [vmem:[%s18366_s1] sm:$0xff]  ;;  %v87_v14 = vld [vmem:[%s18367_s2 + $0x10] sm:$0xff]  ;;  %s12555_s29 = smov 123   ;;  %s12557_s24 = smov 8  }
   0x3   :  { %v58_v9 = vmul.f32 %v54_v4, %v54_v4  ;;  %10374 = vmatprep.mubr.msk.f32.mxu0 %vm18396_vm0, %v81_v8  ;;  %v85_v10 = vld [vmem:[%s18367_s2] sm:$0xff]  ;;  %101 = vperm.xlu1 %11518, %v87_v14   ;;  %v86_v16 = vld [vmem:[%s18367_s2 + $0x8] sm:$0xff]  ;;  %v88_v18 = vld [vmem:[%s18367_s2 + $0x18] sm:$0xff]  ;;  %s12558_s25 = smov 7   ;;  %s12560_s27 = smov 120  }
   0x4   :  { %v60_v11 = vsel %vm18383_vm1, %v55_v5, 0.0  ;;  %v61_v12 = vsel %vm18383_vm1, %v56_v6, 0.0  ;;  %v63_v13 = vsel %vm18383_vm1, %v57_v7, 0.0  ;;  %91 = vperm.xlu0 %11517, %v85_v10   ;;  %v8547_v21 = vld [vmem:[%s18367_s2 + $0x20] sm:$0xff]  ;;  %v8548_v22 = vld [vmem:[%s18367_s2 + $0x28] sm:$0xff]  ;;  %v8549_v25 = vld [vmem:[%s18367_s2 + $0x30] sm:$0xff] }
   0x5   :  { %v62_v15 = vadd.f32 %v61_v12, %v60_v11  ;;  %v65_v17 = vsel %vm18383_vm1, %v58_v9, 0.0  ;;  %v8550_v26 = vld [vmem:[%s18367_s2 + $0x38] sm:$0xff]  ;;  %v406_v29 = vld [vmem:[%s18368_s4] sm:$0xff]  ;;  %v407_v30 = vld [vmem:[%s18368_s4 + $0x8] sm:$0xff]  ;;  %s12552_s2 = smov 3   ;;  %s12561_s0 = smov 119  }
   0x6   :  { %v408_v33 = vld [vmem:[%s18368_s4 + $0x10] sm:$0xff]  ;;  %v409_v34 = vld [vmem:[%s18368_s4 + $0x18] sm:$0xff]  ;;  %v410_v37 = vld [vmem:[%s18368_s4 + $0x20] sm:$0xff]  ;;  %s12564_s28 = smov 15  }
   0x7   :  { %v64_v19 = vadd.f32 %v63_v13, %v62_v15  ;;  %106 = vperm.xlu1 %11518, %v88_v18   ;;  %v411_v38 = vld [vmem:[%s18368_s4 + $0x28] sm:$0xff]  ;;  %v412_v39 = vld [vmem:[%s18368_s4 + $0x30] sm:$0xff]  ;;  %v413_v40 = vld [vmem:[%s18368_s4 + $0x38] sm:$0xff] }
   0x8   :  { %96 = vperm.xlu0 %11517, %v86_v16   ;;  %v82_v48 = vld [vmem:[%s18366_s1 + $0x8] sm:$0xff]  ;;  %v83_v49 = vld [vmem:[%s18366_s1 + $0x10] sm:$0xff]  ;;  %v84_v50 = vld [vmem:[%s18366_s1 + $0x18] sm:$0xff] }
   0x9   :  { %v66_v20 = vadd.f32 %v65_v17, %v64_v19  ;;  %v8543_v51 = vld [vmem:[%s18366_s1 + $0x20] sm:$0xff]  ;;  %v1171_v8 = vld [vmem:[%s18369_s12 + $0x8] sm:$0xff]  ;;  %v1172_v17 = vld [vmem:[%s18369_s12 + $0x10] sm:$0xff] }
   0xa   :  { %10388 = vmatprep.mubr.msk.f32.mxu1 %vm18396_vm0, %v8543_v51  ;;  %v1170_v7 = vld [vmem:[%s18369_s12] sm:$0xff]  ;;  %v1173_v18 = vld [vmem:[%s18369_s12 + $0x18] sm:$0xff]  ;;  %v8544_v19 = vld [vmem:[%s18366_s1 + $0x28] sm:$0xff] }
   0xb   :  { %v67_v23 = vrot.slane %v66_v20, 4  ;;  %236 = vperm.xlu1 %11518, %v8548_v22   ;;  %v1143_v10 = vld [vmem:[%s18370_s9] sm:$0xff]  ;;  %v12763_v15 = vpack.c.bf16 %v1171_v8, %v1170_v7 }
   0xc   :  { %231 = vperm.xlu0 %11517, %v8547_v21   ;;  %v8603_v11 = vld [vmem:[%s18371_s10] ss:$0 sm:$0xff]  ;;  %v12778_v21 = vpack.c.bf16 %v1173_v18, %v1172_v17 }
   0xd   :  { %v68_v24 = vadd.f32 %v67_v23, %v66_v20  ;;  %v1154_v16 = vadd.f32 %v8603_v11, %v1143_v10  ;;  %v8545_v20 = vld [vmem:[%s18366_s1 + $0x30] sm:$0xff]  ;;  %v1174_v23 = vld [vmem:[%s18369_s12 + $0x20] sm:$0xff] }
   0xf   :  { %v69_v27 = vrot.slane %v68_v24, 2  ;;  %246 = vperm.xlu1 %11518, %v8550_v26   ;;  %v1162_v22 = vmul.f32 0.2, %v1154_v16  ;;  %vm1158_vm6 = vcmp.gt.f32.partialorder %v1154_v16, 0.0 }
  0x10   :  { %241 = vperm.xlu0 %11517, %v8549_v25   ;;  %v8546_v25 = vld [vmem:[%s18366_s1 + $0x38] sm:$0xff]  ;;  %s12559_s1 = smov 121  }
  0x11   :  { %v70_v28 = vadd.f32 %v69_v27, %v68_v24  ;;  %v1175_v24 = vld [vmem:[%s18369_s12 + $0x28] sm:$0xff]  ;;  %v12793_v27 = vsel %vm1158_vm6, %v1154_v16, %v1162_v22  ;;  %v362_v22 = vld [vmem:[%s18372_s3 + $0x20] sm:$0xff] }
  0x12   :  { %v10910_v26 = vpack.c.bf16 %v1175_v24, %v1174_v23  ;;  %v363_v23 = vld [vmem:[%s18372_s3 + $0x28] sm:$0xff]  ;;  %v364_v24 = vld [vmem:[%s18372_s3 + $0x30] sm:$0xff] }
  0x13   :  { %v71_v31 = vrot.slane %v70_v28, 1  ;;  %461 = vperm.xlu1 %11518, %v407_v30  }
  0x14   :  { %456 = vperm.xlu0 %11517, %v406_v29   ;;  %v1177_v29 = vld [vmem:[%s18369_s12 + $0x38] sm:$0xff] }
  0x15   :  { %v72_v32 = vadd.f32 %v71_v31, %v70_v28  ;;  %v1176_v28 = vld [vmem:[%s18369_s12 + $0x30] sm:$0xff]  ;;  %v1178_v31 = vld [vmem:[%s18369_s12 + $0x40] sm:$0xff] }
  0x16   :  { %v10914_v30 = vpack.c.bf16 %v1177_v29, %v1176_v28 }
  0x17   :  { %v74_v35 = vmul.f32 0.03125, %v72_v32  ;;  %471 = vperm.xlu1 %11518, %v409_v34   ;;  %v1179_v32 = vld [vmem:[%s18369_s12 + $0x48] sm:$0xff]  ;;  %v1180_v34 = vld [vmem:[%s18369_s12 + $0x50] sm:$0xff] }
  0x18   :  { %466 = vperm.xlu0 %11517, %v408_v33   ;;  %v10918_v33 = vpack.c.bf16 %v1179_v32, %v1178_v31 }
  0x19   :  { %v75_v36 = vadd.f32 1e-08, %v74_v35  ;;  %v1181_v35 = vld [vmem:[%s18369_s12 + $0x58] sm:$0xff] }
  0x1b   :  { %12497 = vrsqrt.f32 %v75_v36  ;;  %481 = vperm.xlu1 %11518, %v411_v38   ;;  %v10922_v36 = vpack.c.bf16 %v1181_v35, %v1180_v34  ;;  %v1183_v38 = vld [vmem:[%s18369_s12 + $0x68] sm:$0xff] }
  0x1c   :  { %476 = vperm.xlu0 %11517, %v410_v37   ;;  %v1182_v37 = vld [vmem:[%s18369_s12 + $0x60] sm:$0xff] }
  0x1f   :  { %491 = vperm.xlu1 %11518, %v413_v40   ;;  %v1144_v40 = vld [vmem:[%s18370_s9 + $0x8] sm:$0xff] }
  0x20   :  { %486 = vperm.xlu0 %11517, %v412_v39   ;;  %v10926_v39 = vpack.c.bf16 %v1183_v38, %v1182_v37 }
  0x25   :  { %v12498_v41 = vpop.eup %12497 }
  0x26   :  { %v77_v42 = vmul.f32 %v12498_v41, %v12653_v0  ;;  %v78_v43 = vmul.f32 %v12498_v41, %v12658_v1  ;;  %v79_v44 = vmul.f32 %v12498_v41, %v12663_v2  ;;  %v80_v45 = vmul.f32 %v12498_v41, %v54_v4  ;;  %v1184_v41 = vld [vmem:[%s18369_s12 + $0x70] sm:$0xff] }
  0x28   :  { %v10878_v46 = vpack.c.bf16 %v78_v43, %v77_v42  ;;  %v10882_v47 = vpack.c.bf16 %v80_v45, %v79_v44  ;;  %v1185_v42 = vld [vmem:[%s18369_s12 + $0x78] sm:$0xff]  ;;  %v1145_v43 = vld [vmem:[%s18370_s9 + $0x10] sm:$0xff]  ;;  %v1155_v44 = vadd.f32 %v8603_v11, %v1144_v40 }
  0x29   :  { %v10930_v45 = vpack.c.bf16 %v1185_v42, %v1184_v41 }
  0x2a   :  { %10879 = vmatprep.subr.bf16.mxu0 %v10878_v46  ;;  %vm1159_vm7 = vcmp.gt.f32.partialorder %v1155_v44, 0.0 }
  0x2b   :  { %10881 = vmatpush3.bf16.msra.mxu0 %v10878_v46  ;;  %v1156_v46 = vadd.f32 %v8603_v11, %v1145_v43  ;;  %v1186_v43 = vld [vmem:[%s18373_s13] sm:$0x3] }
  0x2c   :  { %10883 = vmatprep.subr.bf16.mxu0 %v10882_v47 }
  0x2d   :  { %vm1160_vm8 = vcmp.gt.f32.partialorder %v1156_v46, 0.0 }
  0x2f   :  { %10885 = vmatpush3.bf16.msra.mxu0 %v10882_v47  ;;  %v1146_v47 = vld [vmem:[%s18370_s9 + $0x18] sm:$0xff]  ;;  %s12551_s9 = smov 125  }
  0x32   :  { %10375 = vmatmul.mubr.msk.f32.vlgmr.msra.gmra.mrb[0].mxu0 %vm18396_vm0, %v82_v48  ;;  %v1163_v48 = vmul.f32 0.2, %v1155_v44 }
  0x33   :  { %10377 = vmatprep.mubr.msk.f32.mxu0 %vm18396_vm0, %v83_v49  ;;  %v1157_v49 = vadd.f32 %v8603_v11, %v1146_v47  ;;  %v369_v47 = vld [vmem:[%s18372_s3 + $0x58] sm:$0xff] }
  0x34   :  { %v12837_v51 = vsel %vm1159_vm7, %v1155_v44, %v1163_v48  ;;  %v366_v44 = vld [vmem:[%s18372_s3 + $0x40] sm:$0xff] }
  0x35   :  { %vm1161_vm9 = vcmp.gt.f32.partialorder %v1157_v49, 0.0  ;;  %v370_v48 = vld [vmem:[%s18372_s3 + $0x60] sm:$0xff] }
  0x36   :  { %10378 = vmatmul.mubr.msk.f32.gmra.mrb[2].mxu0 %vm18396_vm0, %v84_v50  ;;  %v1164_v50 = vmul.f32 0.2, %v1156_v46 }
  0x82   :  { %v102_v53 = vpop.permute.xlu1 %101 }
  0x83   :  { %v92_v52 = vpop.permute.xlu0 %91 }
  0x86   :  { %v107_v60 = vpop.permute.xlu1 %106 }
  0x87   :  { %v97_v54 = vpop.permute.xlu0 %96 }
 0x105   :  { %v10376_v55 = vpop.f32.mrb[0].mxu0 }
 0x106   :  { %v194_v56 = vadd.f32 %v10376_v55, %v97_v54  ;;  %v188_v57 = vpop.f32.mrb[1].mxu0  ;;  %v1272_v55 = vmul.f32 %v12793_v27, %v12793_v27 }
 0x107   :  { %v189_v58 = vadd.f32 %v188_v57, %v92_v52  ;;  %v1165_v52 = vmul.f32 0.2, %v1157_v49 }
 0x108   :  { %v212_v59 = vmul.f32 0.2, %v194_v56  ;;  %vm208_vm2 = vcmp.gt.f32.partialorder %v194_v56, 0.0 }
 0x109   :  { %v211_v61 = vmul.f32 0.2, %v189_v58  ;;  %v10379_v62 = vpop.f32.mrb[2].mxu0  ;;  %vm207_vm3 = vcmp.gt.f32.partialorder %v189_v58, 0.0  ;;  %v12845_v54 = vsel %vm1161_vm9, %v1157_v49, %v1165_v52  ;;  %v371_v49 = vld [vmem:[%s18372_s3 + $0x68] sm:$0xff]  ;;  %v373_v52 = vld [vmem:[%s18372_s3 + $0x78] sm:$0xff] }
 0x10a   :  { %v204_v63 = vadd.f32 %v10379_v62, %v107_v60  ;;  %v198_v0 = vpop.f32.mrb[3].mxu0  ;;  %v216_v1 = vsel %vm208_vm2, %v194_v56, %v212_v59  ;;  %v1273_v56 = vmul.f32 %v12837_v51, %v12837_v51  ;;  %v358_v59 = vld [vmem:[%s18372_s3] sm:$0xff]  ;;  %v237_v60 = vpop.permute.xlu1 %236 }
 0x10b   :  { %v199_v2 = vadd.f32 %v198_v0, %v102_v53  ;;  %v215_v4 = vsel %vm207_vm3, %v189_v58, %v211_v61  ;;  %v12840_v53 = vsel %vm1160_vm8, %v1156_v46, %v1164_v50  ;;  %v1275_v58 = vmul.f32 %v12845_v54, %v12845_v54  ;;  %10402 = vmatprep.mubr.msk.f32.mxu0 %vm18396_vm0, %v358_v59  ;;  %v232_v61 = vpop.permute.xlu0 %231  ;;  %v368_v46 = vld [vmem:[%s18372_s3 + $0x50] sm:$0xff] }
 0x10c   :  { %vm210_vm4 = vcmp.gt.f32.partialorder %v204_v63, 0.0  ;;  %v214_v5 = vmul.f32 0.2, %v204_v63  ;;  %v10886_v6 = vpack.c.bf16 %v216_v1, %v215_v4  ;;  %v1274_v57 = vmul.f32 %v12840_v53, %v12840_v53  ;;  %v372_v50 = vld [vmem:[%s18372_s3 + $0x70] sm:$0xff] }
 0x10d   :  { %vm209_vm5 = vcmp.gt.f32.partialorder %v199_v2, 0.0  ;;  %v213_v9 = vmul.f32 0.2, %v199_v2 }
 0x10e   :  { %10887 = vmatprep.subr.bf16.mxu1 %v10886_v6  ;;  %v218_v12 = vsel %vm210_vm4, %v204_v63, %v214_v5  ;;  %v247_v4 = vpop.permute.xlu1 %246 }
 0x10f   :  { %10889 = vmatpush3.bf16.msra.mxu1 %v10886_v6  ;;  %v217_v13 = vsel %vm209_vm5, %v199_v2, %v213_v9  ;;  %v242_v7 = vpop.permute.xlu0 %241 }
 0x110   :  { %v10890_v14 = vpack.c.bf16 %v218_v12, %v217_v13 }
 0x112   :  { %10891 = vmatprep.subr.bf16.mxu1 %v10890_v14 }
 0x113   :  { %10893 = vmatpush3.bf16.msra.mxu1 %v10890_v14 }
 0x114   :  { %10903 = vmatprep.subr.bf16.mxu1 %v12763_v15 }
 0x116   :  { %10389 = vmatmul.mubr.msk.f32.vlgmr.msra.gmra.mrb[0].mxu1 %vm18396_vm0, %v8544_v19  ;;  %v359_v19 = vld [vmem:[%s18372_s3 + $0x8] sm:$0xff] }
 0x117   :  { %10391 = vmatprep.mubr.msk.f32.mxu1 %vm18396_vm0, %v8545_v20  ;;  %10905 = vmatpush3.bf16.msra.mxu1 %v12763_v15  ;;  %v360_v20 = vld [vmem:[%s18372_s3 + $0x10] sm:$0xff] }
 0x118   :  { %10907 = vmatprep.subr.bf16.mxu1 %v12778_v21 }
 0x11a   :  { %10392 = vmatmul.mubr.msk.f32.gmra.mrb[2].mxu1 %vm18396_vm0, %v8546_v25  ;;  %v365_v25 = vld [vmem:[%s18372_s3 + $0x38] sm:$0xff] }
 0x11b   :  { %10909 = vmatpush3.bf16.msra.mxu1 %v12778_v21  ;;  %10506 = vmatprep.mubr.f32.mxu1 %v12793_v27 }
 0x11c   :  { %10911 = vmatprep.subr.bf16.mxu1 %v10910_v26 }
 0x11f   :  { %10913 = vmatpush3.bf16.msra.mxu1 %v10910_v26 }
 0x120   :  { %10915 = vmatprep.subr.bf16.mxu1 %v10914_v30 }
 0x123   :  { %10917 = vmatpush3.bf16.msra.mxu1 %v10914_v30 }
 0x124   :  { %10919 = vmatprep.subr.bf16.mxu1 %v10918_v33 }
 0x127   :  { %10921 = vmatpush3.bf16.msra.mxu1 %v10918_v33 }
 0x128   :  { %10923 = vmatprep.subr.bf16.mxu1 %v10922_v36 }
 0x12b   :  { %10925 = vmatpush3.bf16.msra.mxu1 %v10922_v36 }
 0x12c   :  { %10927 = vmatprep.subr.bf16.mxu1 %v10926_v39 }
 0x12f   :  { %10929 = vmatpush3.bf16.msra.mxu1 %v10926_v39 }
 0x130   :  { %10931 = vmatprep.subr.bf16.mxu1 %v10930_v45 }
 0x133   :  { %10933 = vmatpush3.bf16.msra.mxu1 %v10930_v45 }
 0x134   :  { %10935 = vmatprep.subr.bf16.mxu1 %v12763_v15 }
 0x136   :  { %10507 = vmatmul.mubr.f32.vlgmr.msra.gmra.mrb[4].mxu1 %v12837_v51 }
 0x137   :  { %10937 = vmatpush3.bf16.msra.mxu1 %v12763_v15  ;;  %10509 = vmatprep.mubr.f32.mxu1 %v12840_v53 }
 0x138   :  { %10939 = vmatprep.subr.bf16.mxu1 %v12778_v21 }
 0x13a   :  { %10510 = vmatmul.mubr.f32.gmra.mrb[6].mxu1 %v12845_v54 }
 0x13b   :  { %10941 = vmatpush3.bf16.msra.mxu1 %v12778_v21  ;;  %10544 = vmatprep.mubr.f32.mxu1 %v1272_v55  ;;  %v361_v21 = vld [vmem:[%s18372_s3 + $0x18] sm:$0xff] }
 0x13c   :  { %10943 = vmatprep.subr.bf16.mxu1 %v10910_v26 }
 0x13f   :  { %10945 = vmatpush3.bf16.msra.mxu1 %v10910_v26 }
 0x140   :  { %10947 = vmatprep.subr.bf16.mxu1 %v10914_v30 }
 0x143   :  { %10949 = vmatpush3.bf16.msra.mxu1 %v10914_v30 }
 0x144   :  { %10951 = vmatprep.subr.bf16.mxu1 %v10918_v33 }
 0x147   :  { %10953 = vmatpush3.bf16.msra.mxu1 %v10918_v33 }
 0x148   :  { %10955 = vmatprep.subr.bf16.mxu1 %v10922_v36 }
 0x14b   :  { %10957 = vmatpush3.bf16.msra.mxu1 %v10922_v36 }
 0x14c   :  { %10959 = vmatprep.subr.bf16.mxu1 %v10926_v39 }
 0x14f   :  { %10961 = vmatpush3.bf16.msra.mxu1 %v10926_v39 }
 0x150   :  { %10963 = vmatprep.subr.bf16.mxu1 %v10930_v45 }
 0x153   :  { %10965 = vmatpush3.bf16.msra.mxu1 %v10930_v45  ;;  %v367_v45 = vld [vmem:[%s18372_s3 + $0x48] sm:$0xff] }
 0x154   :  { %10550 = vmatprep.subr.msk.mxu1 %vm18392_vm14, %v1186_v43 }
 0x156   :  { %10545 = vmatmul.mubr.f32.vlgmr.msra.gmra.mrb[8].mxu1 %v1273_v56 }
 0x157   :  { %10547 = vmatprep.mubr.f32.mxu1 %v1274_v57  ;;  %10551 = vmatpush3.msk.msra.mxu1 %vm18392_vm14, %v1186_v43  ;;  %v376_v43 = vld [vmem:[%s18372_s3 + $0x90] sm:$0xff] }
 0x15a   :  { %10548 = vmatmul.mubr.f32.gmra.mrb[10].mxu1 %v1275_v58 }
 0x1e9   :  { %v10390_v62 = vpop.f32.mrb[0].mxu1 }
 0x1ea   :  { %v333_v63 = vadd.f32 %v10390_v62, %v237_v60  ;;  %v327_v0 = vpop.f32.mrb[1].mxu1 }
 0x1eb   :  { %v328_v1 = vadd.f32 %v327_v0, %v232_v61  ;;  %v457_v0 = vpop.permute.xlu0 %456 }
 0x1ec   :  { %vm347_vm10 = vcmp.gt.f32.partialorder %v333_v63, 0.0  ;;  %v351_v2 = vmul.f32 0.2, %v333_v63 }
 0x1ed   :  { %vm346_vm11 = vcmp.gt.f32.partialorder %v328_v1, 0.0  ;;  %v350_v5 = vmul.f32 0.2, %v328_v1  ;;  %v10393_v6 = vpop.f32.mrb[2].mxu1 }
 0x1ee   :  { %v343_v8 = vadd.f32 %v10393_v6, %v247_v4  ;;  %v337_v9 = vpop.f32.mrb[3].mxu1  ;;  %v355_v10 = vsel %vm347_vm10, %v333_v63, %v351_v2  ;;  %v462_v63 = vpop.permute.xlu1 %461 }
 0x1ef   :  { %v338_v11 = vadd.f32 %v337_v9, %v242_v7  ;;  %v354_v12 = vsel %vm346_vm11, %v328_v1, %v350_v5  ;;  %v467_v4 = vpop.permute.xlu0 %466 }
 0x1f0   :  { %vm349_vm12 = vcmp.gt.f32.partialorder %v343_v8, 0.0  ;;  %v353_v13 = vmul.f32 0.2, %v343_v8  ;;  %v10894_v14 = vpack.c.bf16 %v355_v10, %v354_v12 }
 0x1f1   :  { %vm348_vm13 = vcmp.gt.f32.partialorder %v338_v11, 0.0  ;;  %v352_v15 = vmul.f32 0.2, %v338_v11 }
 0x1f2   :  { %10895 = vmatprep.subr.bf16.mxu0 %v10894_v14  ;;  %v357_v16 = vsel %vm349_vm12, %v343_v8, %v353_v13  ;;  %v472_v1 = vpop.permute.xlu1 %471 }
 0x1f3   :  { %10897 = vmatpush3.bf16.msra.mxu0 %v10894_v14  ;;  %v356_v17 = vsel %vm348_vm13, %v338_v11, %v352_v15 }
 0x1f4   :  { %v10898_v18 = vpack.c.bf16 %v357_v16, %v356_v17 }
 0x1f6   :  { %10899 = vmatprep.subr.bf16.mxu0 %v10898_v18  ;;  %v482_v17 = vpop.permute.xlu1 %481 }
 0x1f7   :  { %10901 = vmatpush3.bf16.msra.mxu0 %v10898_v18 }
 0x1fa   :  { %10403 = vmatmul.mubr.msk.f32.vlgmr.msra.gmra.mrb[4].mxu0 %vm18396_vm0, %v359_v19 }
 0x1fb   :  { %10405 = vmatprep.mubr.msk.f32.mxu0 %vm18396_vm0, %v360_v20 }
 0x1fe   :  { %10406 = vmatmul.mubr.msk.f32.gmra.mrb[6].mxu0 %vm18396_vm0, %v361_v21  ;;  %v477_v21 = vpop.permute.xlu0 %476 }
 0x1ff   :  { %10408 = vmatprep.mubr.msk.f32.mxu0 %vm18396_vm0, %v362_v22 }
 0x202   :  { %10409 = vmatmul.mubr.msk.f32.gmra.mrb[8].mxu0 %vm18396_vm0, %v363_v23 }
 0x203   :  { %10411 = vmatprep.mubr.msk.f32.mxu0 %vm18396_vm0, %v364_v24 }
 0x206   :  { %10412 = vmatmul.mubr.msk.f32.gmra.mrb[10].mxu0 %vm18396_vm0, %v365_v25 }
 0x207   :  { %10414 = vmatprep.mubr.msk.f32.mxu0 %vm18396_vm0, %v366_v44  ;;  %v377_v44 = vld [vmem:[%s18372_s3 + $0x98] sm:$0xff] }
 0x209   :  { %v12890_v26 = vpop.f32.mrb[4].mxu1 }
 0x20a   :  { %v12892_v28 = vpop.f32.mrb[5].mxu1  ;;  %v1362_v31 = vmul.f32 %v12890_v26, %v12890_v26  ;;  %10415 = vmatmul.mubr.msk.f32.gmra.mrb[12].mxu0 %vm18396_vm0, %v367_v45  ;;  %v378_v45 = vld [vmem:[%s18372_s3 + $0xa0] sm:$0xff] }
 0x20b   :  { %v1361_v32 = vmul.f32 %v12892_v28, %v12892_v28  ;;  %10417 = vmatprep.mubr.msk.f32.mxu0 %vm18396_vm0, %v368_v46  ;;  %v379_v46 = vld [vmem:[%s18372_s3 + $0xa8] sm:$0xff] }
 0x20d   :  { %v12894_v29 = vpop.f32.mrb[6].mxu1 }
 0x20e   :  { %v12896_v30 = vpop.f32.mrb[7].mxu1  ;;  %v1364_v34 = vmul.f32 %v12894_v29, %v12894_v29  ;;  %10418 = vmatmul.mubr.msk.f32.gmra.mrb[14].mxu0 %vm18396_vm0, %v369_v47  ;;  %v380_v47 = vld [vmem:[%s18372_s3 + $0xb0] sm:$0xff] }
 0x20f   :  { %v1363_v37 = vmul.f32 %v12896_v30, %v12896_v30  ;;  %10420 = vmatprep.mubr.msk.f32.mxu0 %vm18396_vm0, %v370_v48  ;;  %v381_v48 = vld [vmem:[%s18372_s3 + $0xb8] sm:$0xff] }
 0x212   :  { %10421 = vmatmul.mubr.msk.f32.gmra.mrb[16].mxu0 %vm18396_vm0, %v371_v49  ;;  %v382_v49 = vld [vmem:[%s18372_s3 + $0xc0] sm:$0xff] }
 0x213   :  { %10423 = vmatprep.mubr.msk.f32.mxu0 %vm18396_vm0, %v372_v50  ;;  %v383_v50 = vld [vmem:[%s18372_s3 + $0xc8] sm:$0xff] }
 0x216   :  { %10424 = vmatmul.mubr.msk.f32.gmra.mrb[18].mxu0 %vm18396_vm0, %v373_v52  ;;  %v384_v52 = vld [vmem:[%s18372_s3 + $0xd0] sm:$0xff] }
 0x229   :  { %v10546_v33 = vpop.f32.mrb[8].mxu1 }
 0x22a   :  { %v1366_v35 = vsub.f32 %v10546_v33, %v1362_v31  ;;  %v1342_v36 = vpop.f32.mrb[9].mxu1 }
 0x22b   :  { %v1365_v38 = vsub.f32 %v1342_v36, %v1361_v32 }
 0x22c   :  { %v1370_v55 = vmax.f32 %v1366_v35, 0.0 }
 0x22d   :  { %v10549_v39 = vpop.f32.mrb[10].mxu1  ;;  %v1369_v56 = vmax.f32 %v1365_v38, 0.0 }
 0x22e   :  { %v1368_v40 = vsub.f32 %v10549_v39, %v1364_v34  ;;  %v1352_v41 = vpop.f32.mrb[11].mxu1  ;;  %v1374_v57 = vadd.f32 1e-08, %v1370_v55  ;;  %v385_v55 = vld [vmem:[%s18372_s3 + $0xd8] sm:$0xff] }
 0x22f   :  { %v1367_v42 = vsub.f32 %v1352_v41, %v1363_v37  ;;  %v1373_v59 = vadd.f32 1e-08, %v1369_v56  ;;  %v487_v37 = vpop.permute.xlu0 %486  ;;  %v386_v56 = vld [vmem:[%s18372_s3 + $0xe0] sm:$0xff] }
 0x230   :  { %v1372_v58 = vmax.f32 %v1368_v40, 0.0  ;;  %12499 = vrsqrt.f32 %v1374_v57  ;;  %v387_v57 = vld [vmem:[%s18372_s3 + $0xe8] sm:$0xff] }
 0x231   :  { %v1371_v60 = vmax.f32 %v1367_v42, 0.0  ;;  %12501 = vrsqrt.f32 %v1373_v59  ;;  %v375_v42 = vld [vmem:[%s18372_s3 + $0x88] sm:$0xff]  ;;  %v389_v59 = vld [vmem:[%s18372_s3 + $0xf8] sm:$0xff] }
 0x232   :  { %v1376_v61 = vadd.f32 1e-08, %v1372_v58  ;;  %v388_v58 = vld [vmem:[%s18372_s3 + $0xf0] sm:$0xff] }
 0x233   :  { %v1375_v62 = vadd.f32 1e-08, %v1371_v60 }
 0x234   :  { %12503 = vrsqrt.f32 %v1376_v61 }
 0x235   :  { %12505 = vrsqrt.f32 %v1375_v62  ;;  %v390_v62 = vld [vmem:[%s18372_s3 + $0x100] sm:$0xff] }
 0x23a   :  { %v12500_v7 = vpop.eup %12499 }
 0x23b   :  { %v12502_v9 = vpop.eup %12501 }
 0x23e   :  { %v12504_v16 = vpop.eup %12503 }
 0x23f   :  { %v12506_v20 = vpop.eup %12505 }
 0x2cd   :  { %v10404_v2 = vpop.f32.mrb[4].mxu0 }
 0x2ce   :  { %v910_v5 = vadd.f32 %v10404_v2, %v462_v63  ;;  %v904_v6 = vpop.f32.mrb[5].mxu0  ;;  %v391_v63 = vld [vmem:[%s18372_s3 + $0x108] sm:$0xff]  ;;  %v1614_v2 = vld [vmem:[%s18374_s11 + $0x4] ss:$0 sm:$0xff] }
 0x2cf   :  { %v905_v8 = vadd.f32 %v904_v6, %v457_v0  ;;  %v393_v6 = vld [vmem:[%s18372_s3 + $0x118] sm:$0xff]  ;;  %vm1615_vm15 = vcmp.gt.f32.partialorder %v1614_v2, 0.0  ;;  %v1562_v2 = vld [vmem:[%s18374_s11 + $0x1] ss:$0 sm:$0xff] }
 0x2d0   :  { %v1382_v10 = vmul.f32 %v12500_v7, %v910_v5  ;;  %v392_v5 = vld [vmem:[%s18372_s3 + $0x110] sm:$0xff]  ;;  %vm13042_vm2 = vmpackc.low %vm1615_vm15, %vm1615_vm15  ;;  %vm1563_vm7 = vcmp.gt.f32.partialorder %v1562_v2, 0.0 }
 0x2d1   :  { %v1381_v11 = vmul.f32 %v12502_v9, %v905_v8  ;;  %v10407_v12 = vpop.f32.mrb[6].mxu0  ;;  %vm13198_vm8 = vmpackc.low %vm1563_vm7, %vm1563_vm7 }
 0x2d2   :  { %v920_v13 = vadd.f32 %v10407_v12, %v472_v1  ;;  %v914_v14 = vpop.f32.mrb[7].mxu0  ;;  %v1386_v15 = vmul.f32 %v12890_v26, %v1382_v10 }
 0x2d3   :  { %v915_v18 = vadd.f32 %v914_v14, %v467_v4  ;;  %10552 = vmatprep.mubr.msk.f32.mxu1 %vm18383_vm1, %v1381_v11  ;;  %v1385_v19 = vmul.f32 %v1381_v11, %v12892_v28  ;;  %v492_v28 = vpop.permute.xlu1 %491  ;;  %v395_v14 = vld [vmem:[%s18372_s3 + $0x128] sm:$0xff] }
 0x2d4   :  { %v1384_v22 = vmul.f32 %v12504_v16, %v920_v13  ;;  %10553 = vmatmul.mubr.msk.f32.vlgmr.msra.gmra.mrb[12].mxu1 %vm18383_vm1, %v1382_v10  ;;  %v1654_v13 = vld [vmem:[%s18374_s11 + $0x6] ss:$0 sm:$0xff] }
 0x2d5   :  { %v1383_v23 = vmul.f32 %v12506_v20, %v915_v18  ;;  %v10410_v24 = vpop.f32.mrb[8].mxu0  ;;  %v397_v20 = vld [vmem:[%s18372_s3 + $0x138] sm:$0xff]  ;;  %vm1655_vm9 = vcmp.gt.f32.partialorder %v1654_v13, 0.0 }
 0x2d6   :  { %v930_v25 = vadd.f32 %v10410_v24, %v482_v17  ;;  %v924_v31 = vpop.f32.mrb[9].mxu0  ;;  %v1388_v32 = vmul.f32 %v12894_v29, %v1384_v22  ;;  %v399_v24 = vld [vmem:[%s18372_s3 + $0x148] sm:$0xff]  ;;  %vm13209_vm10 = vmpackc.low %vm1655_vm9, %vm1655_vm9 }
 0x2d7   :  { %v925_v33 = vadd.f32 %v924_v31, %v477_v21  ;;  %10555 = vmatprep.mubr.msk.f32.mxu1 %vm18383_vm1, %v1383_v23  ;;  %v1387_v26 = vmul.f32 %v1383_v23, %v12896_v30  ;;  %v374_v30 = vld [vmem:[%s18372_s3 + $0x80] sm:$0xff]  ;;  %v401_v31 = vld [vmem:[%s18372_s3 + $0x158] sm:$0xff] }
 0x2d8   :  { %v1390_v34 = vsub.f32 %v930_v25, %v1386_v15  ;;  %10556 = vmatmul.mubr.msk.f32.gmra.mrb[14].mxu1 %vm18383_vm1, %v1384_v22  ;;  %10426 = vmatprep.mubr.msk.f32.mxu0 %vm18396_vm0, %v374_v30  ;;  %v398_v23 = vld [vmem:[%s18372_s3 + $0x140] sm:$0xff]  ;;  %v400_v25 = vld [vmem:[%s18372_s3 + $0x150] sm:$0xff] }
 0x2d9   :  { %v1389_v35 = vsub.f32 %v925_v33, %v1385_v19  ;;  %v10413_v36 = vpop.f32.mrb[10].mxu0  ;;  %10427 = vmatmul.mubr.msk.f32.gmra.mrb[20].mxu0 %vm18396_vm0, %v375_v42  ;;  %v396_v19 = vld [vmem:[%s18372_s3 + $0x130] sm:$0xff]  ;;  %v403_v33 = vld [vmem:[%s18372_s3 + $0x168] sm:$0xff] }
 0x2da   :  { %v940_v38 = vadd.f32 %v10413_v36, %v492_v28  ;;  %v934_v39 = vpop.f32.mrb[11].mxu0  ;;  %10429 = vmatprep.mubr.msk.f32.mxu0 %vm18396_vm0, %v376_v43  ;;  %v12401_v28 = vld [vmem:[%s18375_s5 + $0x4] ss:$12 sps:$4 sm:$0xff]   ;;  %v415_v43 = vld [vmem:[%s18368_s4 + $0x48] sm:$0xff] }
 0x2db   :  { %v935_v40 = vadd.f32 %v934_v39, %v487_v37  ;;  %10558 = vmatprep.mubr.msk.f32.mxu1 %vm18383_vm1, %v1389_v35  ;;  %v12402_v35 = vld [vmem:[%s18375_s5 + $0x8] ss:$12 sps:$4 sm:$0xff]   ;;  %v1732_v36 = vld [vmem:[%s18376_s6] sm:$0xff] }
 0x2dc   :  { %v1392_v41 = vsub.f32 %v940_v38, %v1388_v32  ;;  %10559 = vmatmul.mubr.msk.f32.gmra.mrb[16].mxu1 %vm18383_vm1, %v1390_v34  ;;  %v402_v32 = vld [vmem:[%s18372_s3 + $0x160] sm:$0xff]  ;;  %v405_v34 = vld [vmem:[%s18372_s3 + $0x178] sm:$0xff]  ;;  %v1734_v37 = vld [vmem:[%s18376_s6 + $0x10] sm:$0xff] }
 0x2dd   :  { %v1391_v29 = vsub.f32 %v935_v40, %v1387_v26  ;;  %10430 = vmatmul.mubr.msk.f32.gmra.mrb[22].mxu0 %vm18396_vm0, %v377_v44  ;;  %v404_v26 = vld [vmem:[%s18372_s3 + $0x170] sm:$0xff]  ;;  %v1733_v38 = vld [vmem:[%s18376_s6 + $0x8] sm:$0xff]  ;;  %v13124_v39 = vpop.f32.mrb[12].mxu0 }
 0x2de   :  { %10432 = vmatprep.mubr.msk.f32.mxu0 %vm18396_vm0, %v378_v45  ;;  %v13126_v40 = vpop.f32.mrb[13].mxu0  ;;  %v416_v42 = vld [vmem:[%s18368_s4 + $0x50] sm:$0xff] }
 0x2df   :  { %10561 = vmatprep.mubr.msk.f32.mxu1 %vm18383_vm1, %v1391_v29  ;;  %v1735_v29 = vld [vmem:[%s18376_s6 + $0x18] sm:$0xff] }
 0x2e0   :  { %10562 = vmatmul.mubr.msk.f32.gmra.mrb[18].mxu1 %vm18383_vm1, %v1392_v41  ;;  %v414_v41 = vld [vmem:[%s18368_s4 + $0x40] sm:$0xff] }
 0x2e1   :  { %10433 = vmatmul.mubr.msk.f32.gmra.mrb[24].mxu0 %vm18396_vm0, %v379_v46  ;;  %10568 = vmatprep.mubr.msk.bf16.mxu1 %vm18396_vm0, %v12402_v35  ;;  %v13134_v30 = vpop.f32.mrb[14].mxu0  ;;  %v418_v46 = vld [vmem:[%s18368_s4 + $0x60] sm:$0xff] }
 0x2e2   :  { %10435 = vmatprep.mubr.msk.f32.mxu0 %vm18396_vm0, %v380_v47  ;;  %v13142_v44 = vpop.f32.mrb[15].mxu0  ;;  %v417_v47 = vld [vmem:[%s18368_s4 + $0x58] sm:$0xff] }
 0x2e5   :  { %10436 = vmatmul.mubr.msk.f32.gmra.mrb[26].mxu0 %vm18396_vm0, %v381_v48  ;;  %v13144_v45 = vpop.f32.mrb[16].mxu0 }
 0x2e6   :  { %10438 = vmatprep.mubr.msk.f32.mxu0 %vm18396_vm0, %v382_v49  ;;  %v13152_v48 = vpop.f32.mrb[17].mxu0 }
 0x2e9   :  { %10439 = vmatmul.mubr.msk.f32.gmra.mrb[28].mxu0 %vm18396_vm0, %v383_v50  ;;  %v13154_v49 = vpop.f32.mrb[18].mxu0  ;;  %v420_v50 = vld [vmem:[%s18368_s4 + $0x70] sm:$0xff] }
 0x2ea   :  { %10441 = vmatprep.mubr.msk.f32.mxu0 %vm18396_vm0, %v384_v52  ;;  %v419_v52 = vld [vmem:[%s18368_s4 + $0x68] sm:$0xff] }
 0x2ed   :  { %10442 = vmatmul.mubr.msk.f32.gmra.mrb[30].mxu0 %vm18396_vm0, %v385_v55  ;;  %v13162_v55 = vpop.f32.mrb[19].mxu0 }
 0x2ee   :  { %10444 = vmatprep.mubr.msk.f32.mxu0 %vm18396_vm0, %v386_v56  ;;  %v421_v56 = vld [vmem:[%s18368_s4 + $0x78] sm:$0xff] }
 0x2f1   :  { %10445 = vmatmul.mubr.msk.f32.gmra.mrb[32].mxu0 %vm18396_vm0, %v387_v57  ;;  %v1542_v57 = vld [vmem:[%s18374_s11] ss:$0 sm:$0xff] }
 0x2f2   :  { %10447 = vmatprep.mubr.msk.f32.mxu0 %vm18396_vm0, %v388_v58  ;;  %vm1543_vm3 = vcmp.gt.f32.partialorder %v1542_v57, 0.0 }
 0x2f3   :  { %vm13173_vm4 = vmpackc.low %vm1543_vm3, %vm1543_vm3 }
 0x2f5   :  { %10448 = vmatmul.mubr.msk.f32.gmra.mrb[34].mxu0 %vm18396_vm0, %v389_v59 }
 0x2f6   :  { %10450 = vmatprep.mubr.msk.f32.mxu0 %vm18396_vm0, %v390_v62 }
 0x2f9   :  { %10451 = vmatmul.mubr.msk.f32.gmra.mrb[36].mxu0 %vm18396_vm0, %v391_v63 }
 0x2fa   :  { %10453 = vmatprep.mubr.msk.f32.mxu0 %vm18396_vm0, %v392_v5 }
 0x2fd   :  { %10454 = vmatmul.mubr.msk.f32.gmra.mrb[38].mxu0 %vm18396_vm0, %v393_v6 }
 0x3a7   :  { %v10554_v60 = vpop.f32.mrb[12].mxu1 }
 0x3a8   :  { %v1487_v61 = vpop.f32.mrb[13].mxu1  ;;  %v1527_v4 = vmul.f32 %v10554_v60, %v12837_v51 }
 0x3a9   :  { %v1526_v7 = vmul.f32 %v1487_v61, %v12793_v27  ;;  %v394_v27 = vld [vmem:[%s18372_s3 + $0x120] sm:$0xff] }
 0x3aa   :  { %10456 = vmatprep.mubr.msk.f32.mxu0 %vm18396_vm0, %v394_v27  ;;  %v1634_v61 = vld [vmem:[%s18374_s11 + $0x5] ss:$0 sm:$0xff] }
 0x3ab   :  { %v10557_v0 = vpop.f32.mrb[14].mxu1  ;;  %10457 = vmatmul.mubr.msk.f32.gmra.mrb[40].mxu0 %vm18396_vm0, %v395_v14  ;;  %vm1635_vm5 = vcmp.gt.f32.partialorder %v1634_v61, 0.0  ;;  %v1694_v61 = vld [vmem:[%s18374_s11 + $0x20] ss:$0 sm:$0xff] }
 0x3ac   :  { %v1497_v1 = vpop.f32.mrb[15].mxu1  ;;  %v1529_v51 = vmul.f32 %v10557_v0, %v12845_v54  ;;  %10459 = vmatprep.mubr.msk.f32.mxu0 %vm18396_vm0, %v396_v19  ;;  %vm13187_vm6 = vmpackc.low %vm1635_vm5, %vm1635_vm5  ;;  %v1582_v19 = vld [vmem:[%s18374_s11 + $0x2] ss:$0 sm:$0xff] }
 0x3ad   :  { %v1528_v12 = vmul.f32 %v1497_v1, %v12840_v53  ;;  %vm1583_vm11 = vcmp.gt.f32.partialorder %v1582_v19, 0.0 }
 0x3ae   :  { %vm13220_vm12 = vmpackc.low %vm1583_vm11, %vm1583_vm11 }
 0x3af   :  { %v10560_v8 = vpop.f32.mrb[16].mxu1  ;;  %10460 = vmatmul.mubr.msk.f32.gmra.mrb[42].mxu0 %vm18396_vm0, %v397_v20 }
 0x3b0   :  { %v1531_v9 = vadd.f32 %v10560_v8, %v1527_v4  ;;  %v1507_v10 = vpop.f32.mrb[17].mxu1  ;;  %10462 = vmatprep.mubr.msk.f32.mxu0 %vm18396_vm0, %v398_v23 }
 0x3b1   :  { %v1530_v11 = vadd.f32 %v1526_v7, %v1507_v10 }
 0x3b3   :  { %v10563_v15 = vpop.f32.mrb[18].mxu1  ;;  %v11519_v16 = vpack.i.bf16 %v1531_v9, %v1530_v11  ;;  %v9075_v17 = vpack.c.bf16 %v1531_v9, %v1530_v11  ;;  %10463 = vmatmul.mubr.msk.f32.gmra.mrb[44].mxu0 %vm18396_vm0, %v399_v24 }
 0x3b4   :  { %v13053_v54 = vadd.f32 %v10563_v15, %v1529_v51  ;;  %v1517_v53 = vpop.f32.mrb[19].mxu1  ;;  %10465 = vmatprep.mubr.msk.f32.mxu0 %vm18396_vm0, %v400_v25 }
 0x3b5   :  { %v13056_v18 = vadd.f32 %v1528_v12, %v1517_v53  ;;  %11520 = vrot.lane.b32.xlu0 %v11519_v16, %s12548_s17  ;;  %9761 = vmatprep.subr.msk.bf16.mxu0 %vm13042_vm2, %v9075_v17 }
 0x3b7   :  { %v11529_v21 = vpack.i.bf16 %v13053_v54, %v13056_v18  ;;  %v9078_v22 = vpack.c.bf16 %v13053_v54, %v13056_v18  ;;  %10466 = vmatmul.mubr.msk.f32.gmra.mrb[46].mxu0 %vm18396_vm0, %v401_v31 }
 0x3b8   :  { %10468 = vmatprep.mubr.msk.f32.mxu0 %vm18396_vm0, %v402_v32 }
 0x3b9   :  { %11525 = vrot.lane.b32.xlu0 %v11519_v16, %s12549_s21  ;;  %11530 = vrot.lane.b32.xlu1 %v11529_v21, %s12548_s17 }
 0x3bb   :  { %10469 = vmatmul.mubr.msk.f32.gmra.mrb[48].mxu0 %vm18396_vm0, %v403_v33 }
 0x3bc   :  { %10471 = vmatprep.mubr.msk.f32.mxu0 %vm18396_vm0, %v404_v26 }
 0x3bd   :  { %11540 = vrot.lane.b32.xlu0 %v11529_v21, %s12549_s21  ;;  %11535 = vrot.lane.b32.xlu1 %v11519_v16, %s12550_s26 }
 0x3bf   :  { %10472 = vmatmul.mubr.msk.f32.gmra.mrb[50].mxu0 %vm18396_vm0, %v405_v34 }
 0x3c0   :  { %1824 = vmatprep.mubr.bf16.mxu0 %v12401_v28 }
 0x3c1   :  { %11545 = vrot.lane.b32.xlu0 %v11519_v16, %s12551_s9  ;;  %11550 = vrot.lane.b32.xlu1 %v11529_v21, %s12550_s26  ;;  %s12554_s26 = smov 1  }
 0x3c5   :  { %11560 = vrot.lane.b32.xlu0 %v11529_v21, %s12551_s9  ;;  %11555 = vrot.lane.b32.xlu1 %v11519_v16, %s12552_s2  ;;  %s12566_s9 = smov 112  }
 0x3c9   :  { %11565 = vrot.lane.b32.xlu0 %v11519_v16, %s12553_s23  ;;  %11570 = vrot.lane.b32.xlu1 %v11529_v21, %s12552_s2 }
 0x3cd   :  { %11580 = vrot.lane.b32.xlu0 %v11529_v21, %s12553_s23  ;;  %11575 = vrot.lane.b32.xlu1 %v11519_v16, %s12554_s26  ;;  %s12556_s23 = smov 9  }
 0x3d1   :  { %11590 = vrot.lane.b32.xlu0 %v11519_v16, %s12555_s29  ;;  %11585 = vrot.lane.b32.xlu1 %v11529_v21, %s12554_s26 }
 0x3d5   :  { %1738 = vperm.xlu0 %11517, %v1732_v36   ;;  %11595 = vrot.lane.b32.xlu1 %v11529_v21, %s12555_s29  ;;  %v1674_v36 = vld [vmem:[%s18374_s11 + $0x7] ss:$0 sm:$0xff]  ;;  %s12565_s29 = smov 113  }
 0x3d6   :  { %vm1675_vm13 = vcmp.gt.f32.partialorder %v1674_v36, 0.0  ;;  %v12406_v36 = vld [vmem:[%s18375_s5 + $0x18] ss:$12 sps:$4 sm:$0xff]  }
 0x3d7   :  { %vm13231_vm15 = vmpackc.low %vm1675_vm13, %vm1675_vm13 }
 0x3d9   :  { %1748 = vperm.xlu0 %11517, %v1734_v37   ;;  %1743 = vperm.xlu1 %11518, %v1733_v38  }
 0x3dd   :  { %496 = vperm.xlu0 %11517, %v414_v41   ;;  %1753 = vperm.xlu1 %11518, %v1735_v29  }
 0x3e1   :  { %506 = vperm.xlu0 %11517, %v416_v42   ;;  %501 = vperm.xlu1 %11518, %v415_v43   ;;  %v1602_v43 = vld [vmem:[%s18374_s11 + $0x3] ss:$0 sm:$0xff] }
 0x3e5   :  { %516 = vperm.xlu0 %11517, %v418_v46   ;;  %511 = vperm.xlu1 %11518, %v417_v47  }
 0x3e9   :  { %526 = vperm.xlu0 %11517, %v420_v50   ;;  %521 = vperm.xlu1 %11518, %v419_v52  }
 0x3ed   :  { %531 = vperm.xlu1 %11518, %v421_v56  }
 0x427   :  { %v11521_v58 = vpop.permute.xlu0 %11520 }
 0x428   :  { %v11523_v59 = vunpack.i.h.bf16 %v11521_v58  ;;  %v11522_v60 = vunpack.i.l.bf16 %v11521_v58 }
 0x42a   :  { %v9051_v63 = vpack.c.bf16 %v11523_v59, %v11522_v60 }
 0x42b   :  { %v11526_v0 = vpop.permute.xlu0 %11525  ;;  %v11531_v1 = vpop.permute.xlu1 %11530 }
 0x42c   :  { %v11528_v4 = vunpack.i.h.bf16 %v11526_v0  ;;  %v11527_v5 = vunpack.i.l.bf16 %v11526_v0  ;;  %v11533_v6 = vunpack.i.h.bf16 %v11531_v1  ;;  %v11532_v7 = vunpack.i.l.bf16 %v11531_v1  ;;  %9762 = vmatpush3.bf16.msk.msra.mxu0 %vm13173_vm4, %v9051_v63 }
 0x42d   :  { %9763 = vmatprep.subr.msk.bf16.mxu0 %vm13042_vm2, %v9078_v22  ;;  %vm1603_vm2 = vcmp.gt.f32.partialorder %v1602_v43, 0.0 }
 0x42e   :  { %v9081_v8 = vpack.c.bf16 %v11528_v4, %v11527_v5  ;;  %v9054_v9 = vpack.c.bf16 %v11533_v6, %v11532_v7  ;;  %vm13242_vm3 = vmpackc.low %vm1603_vm2, %vm1603_vm2  ;;  %v13246_v6 = vpop.f32.mrb[20].mxu0 }
 0x42f   :  { %v11541_v11 = vpop.permute.xlu0 %11540  ;;  %v11536_v51 = vpop.permute.xlu1 %11535 }
 0x430   :  { %v11543_v12 = vunpack.i.h.bf16 %v11541_v11  ;;  %v11542_v27 = vunpack.i.l.bf16 %v11541_v11  ;;  %v11538_v14 = vunpack.i.h.bf16 %v11536_v51  ;;  %v11537_v15 = vunpack.i.l.bf16 %v11536_v51  ;;  %9764 = vmatpush3.bf16.msk.msra.mxu0 %vm13173_vm4, %v9054_v9 }
 0x431   :  { %9765 = vmatprep.subr.msk.bf16.mxu0 %vm13187_vm6, %v9081_v8  ;;  %vm1695_vm4 = vcmp.gt.f32.partialorder %v1694_v61, 0.0 }
 0x432   :  { %v9084_v17 = vpack.c.bf16 %v11543_v12, %v11542_v27  ;;  %v9057_v54 = vpack.c.bf16 %v11538_v14, %v11537_v15  ;;  %v13250_v12 = vpop.f32.mrb[21].mxu0  ;;  %v1913_v27 = vld [vmem:[%s18369_s12] sm:$0xff]  ;;  %v1914_v14 = vld [vmem:[%s18369_s12 + $0x8] sm:$0xff]  ;;  %vm13260_vm5 = vmpackc.low %vm1695_vm4, %vm1695_vm4 }
 0x433   :  { %v11546_v53 = vpop.permute.xlu0 %11545  ;;  %v11551_v18 = vpop.permute.xlu1 %11550  ;;  %v10966_v19 = vpack.c.bf16 %v1914_v14, %v1913_v27  ;;  %v1921_v27 = vld [vmem:[%s18369_s12 + $0x40] sm:$0xff]  ;;  %v1922_v14 = vld [vmem:[%s18369_s12 + $0x48] sm:$0xff] }
 0x434   :  { %v11548_v20 = vunpack.i.h.bf16 %v11546_v53  ;;  %v11547_v21 = vunpack.i.l.bf16 %v11546_v53  ;;  %v11553_v22 = vunpack.i.h.bf16 %v11551_v18  ;;  %v11552_v23 = vunpack.i.l.bf16 %v11551_v18  ;;  %9766 = vmatpush3.bf16.msk.msra.mxu0 %vm13198_vm8, %v9057_v54  ;;  %v12399_v53 = vld [vmem:[%s18375_s5] ss:$12 sps:$4 sm:$0xff]  }
 0x435   :  { %9767 = vmatprep.subr.msk.bf16.mxu0 %vm13187_vm6, %v9084_v17  ;;  %v13264_v17 = vpop.f32.mrb[22].mxu0  ;;  %v10982_v15 = vpack.c.bf16 %v1922_v14, %v1921_v27  ;;  %v8621_v27 = vld [vmem:[%s18371_s10 + $0x1] ss:$0 sm:$0xff] }
 0x436   :  { %v9087_v24 = vpack.c.bf16 %v11548_v20, %v11547_v21  ;;  %v9060_v25 = vpack.c.bf16 %v11553_v22, %v11552_v23  ;;  %v13269_v18 = vpop.f32.mrb[23].mxu0  ;;  %v12404_v22 = vld [vmem:[%s18375_s5 + $0x1c] ss:$12 sps:$4 sm:$0xff]   ;;  %v1915_v23 = vld [vmem:[%s18369_s12 + $0x10] sm:$0xff] }
 0x437   :  { %v11561_v32 = vpop.permute.xlu0 %11560  ;;  %v11556_v33 = vpop.permute.xlu1 %11555 }
 0x438   :  { %v11563_v26 = vunpack.i.h.bf16 %v11561_v32  ;;  %v11562_v34 = vunpack.i.l.bf16 %v11561_v32  ;;  %v11558_v28 = vunpack.i.h.bf16 %v11556_v33  ;;  %v11557_v35 = vunpack.i.l.bf16 %v11556_v33  ;;  %9768 = vmatpush3.bf16.msk.msra.mxu0 %vm13198_vm8, %v9060_v25  ;;  %v13286_v31 = vpop.f32.mrb[24].mxu0  ;;  %v12403_v33 = vld [vmem:[%s18375_s5 + $0x20] ss:$12 sps:$4 sm:$0xff]  }
 0x439   :  { %9769 = vmatprep.subr.msk.bf16.mxu0 %vm13209_vm10, %v9087_v24  ;;  %v1916_v24 = vld [vmem:[%s18369_s12 + $0x18] sm:$0xff]  ;;  %v13288_v32 = vpop.f32.mrb[25].mxu0 }
 0x43a   :  { %v9090_v38 = vpack.c.bf16 %v11563_v26, %v11562_v34  ;;  %v9063_v41 = vpack.c.bf16 %v11558_v28, %v11557_v35  ;;  %v10970_v26 = vpack.c.bf16 %v1916_v24, %v1915_v23  ;;  %v1917_v34 = vld [vmem:[%s18369_s12 + $0x20] sm:$0xff]  ;;  %v1918_v28 = vld [vmem:[%s18369_s12 + $0x28] sm:$0xff]  ;;  %v13303_v35 = vpop.f32.mrb[26].mxu0 }
 0x43b   :  { %v11566_v29 = vpop.permute.xlu0 %11565  ;;  %v11571_v42 = vpop.permute.xlu1 %11570 }
 0x43c   :  { %v11568_v46 = vunpack.i.h.bf16 %v11566_v29  ;;  %v11567_v47 = vunpack.i.l.bf16 %v11566_v29  ;;  %v11573_v50 = vunpack.i.h.bf16 %v11571_v42  ;;  %v11572_v52 = vunpack.i.l.bf16 %v11571_v42  ;;  %9770 = vmatpush3.bf16.msk.msra.mxu0 %vm13220_vm12, %v9063_v41  ;;  %v13308_v37 = vpop.f32.mrb[27].mxu0  ;;  %v1919_v41 = vld [vmem:[%s18369_s12 + $0x30] sm:$0xff]  ;;  %v1920_v29 = vld [vmem:[%s18369_s12 + $0x38] sm:$0xff] }
 0x43d   :  { %9771 = vmatprep.subr.msk.bf16.mxu0 %vm13209_vm10, %v9090_v38  ;;  %v10974_v38 = vpack.c.bf16 %v1918_v28, %v1917_v34  ;;  %v13317_v42 = vpop.f32.mrb[28].mxu0 }
 0x43e   :  { %v9093_v56 = vpack.c.bf16 %v11568_v46, %v11567_v47  ;;  %v9066_v57 = vpack.c.bf16 %v11573_v50, %v11572_v52  ;;  %v13319_v43 = vpop.f32.mrb[29].mxu0  ;;  %v10978_v46 = vpack.c.bf16 %v1920_v29, %v1919_v41 }
 0x43f   :  { %v11581_v59 = vpop.permute.xlu0 %11580  ;;  %v11576_v60 = vpop.permute.xlu1 %11575 }
 0x440   :  { %v11583_v62 = vunpack.i.h.bf16 %v11581_v59  ;;  %v11582_v63 = vunpack.i.l.bf16 %v11581_v59  ;;  %v11578_v0 = vunpack.i.h.bf16 %v11576_v60  ;;  %v11577_v1 = vunpack.i.l.bf16 %v11576_v60  ;;  %9772 = vmatpush3.bf16.msk.msra.mxu0 %vm13220_vm12, %v9066_v57  ;;  %v13321_v47 = vpop.f32.mrb[30].mxu0 }
 0x441   :  { %9773 = vmatprep.subr.msk.bf16.mxu0 %vm13231_vm15, %v9093_v56  ;;  %v13323_v50 = vpop.f32.mrb[31].mxu0 }
 0x442   :  { %v9096_v4 = vpack.c.bf16 %v11583_v62, %v11582_v63  ;;  %v9069_v5 = vpack.c.bf16 %v11578_v0, %v11577_v1  ;;  %v13325_v52 = vpop.f32.mrb[32].mxu0 }
 0x443   :  { %v11591_v7 = vpop.permute.xlu0 %11590  ;;  %v11586_v8 = vpop.permute.xlu1 %11585 }
 0x444   :  { %v11593_v9 = vunpack.i.h.bf16 %v11591_v7  ;;  %v11592_v10 = vunpack.i.l.bf16 %v11591_v7  ;;  %v11588_v11 = vunpack.i.h.bf16 %v11586_v8  ;;  %v11587_v51 = vunpack.i.l.bf16 %v11586_v8  ;;  %9774 = vmatpush3.bf16.msk.msra.mxu0 %vm13242_vm3, %v9069_v5  ;;  %v13327_v56 = vpop.f32.mrb[33].mxu0 }
 0x445   :  { %9775 = vmatprep.subr.msk.bf16.mxu0 %vm13231_vm15, %v9096_v4  ;;  %v13329_v57 = vpop.f32.mrb[34].mxu0 }
 0x446   :  { %v9099_v13 = vpack.c.bf16 %v11593_v9, %v11592_v10  ;;  %v9072_v16 = vpack.c.bf16 %v11588_v11, %v11587_v51  ;;  %v13331_v58 = vpop.f32.mrb[35].mxu0 }
 0x447   :  { %v11596_v54 = vpop.permute.xlu1 %11595  ;;  %v13333_v59 = vpop.f32.mrb[36].mxu0 }
 0x448   :  { %v11598_v20 = vunpack.i.h.bf16 %v11596_v54  ;;  %v11597_v21 = vunpack.i.l.bf16 %v11596_v54  ;;  %9776 = vmatpush3.bf16.msk.msra.mxu0 %vm13242_vm3, %v9072_v16  ;;  %10564 = vmatprep.subr.msk.bf16.mxu1 %vm13260_vm5, %v9099_v13  ;;  %18474 = vst [vmem:[#allocation3_spill] sm:$0xff] %v13333_v59  ;;  %v13335_v60 = vpop.f32.mrb[37].mxu0  ;;  %v1924_v16 = vld [vmem:[%s18369_s12 + $0x58] sm:$0xff] }
 0x449   :  { %10565 = vmatpush3.bf16.msk.msra.mxu1 %vm13260_vm5, %v9099_v13  ;;  %10999 = vmatprep.subr.bf16.mxu0 %v10966_v19  ;;  %18475 = vst [vmem:[#allocation4_spill] sm:$0xff] %v13335_v60  ;;  %v13337_v61 = vpop.f32.mrb[38].mxu0  ;;  %v1923_v13 = vld [vmem:[%s18369_s12 + $0x50] sm:$0xff] }
 0x44a   :  { %v9102_v25 = vpack.c.bf16 %v11598_v20, %v11597_v21  ;;  %18476 = vst [vmem:[#allocation5_spill] sm:$0xff] %v13337_v61  ;;  %v13339_v62 = vpop.f32.mrb[39].mxu0  ;;  %v10986_v54 = vpack.c.bf16 %v1924_v16, %v1923_v13  ;;  %v1927_v21 = vld [vmem:[%s18369_s12 + $0x70] sm:$0xff] }
 0x44b   :  { %1825 = vmatmul.mubr.bf16.vlgmr.msra.gmra.mrb[52].mxu0 %v12399_v53  ;;  %18477 = vst [vmem:[#allocation6_spill] sm:$0xff] %v13339_v62  ;;  %v1925_v53 = vld [vmem:[%s18369_s12 + $0x60] sm:$0xff] }
 0x44c   :  { %10566 = vmatprep.subr.msk.bf16.mxu1 %vm13260_vm5, %v9102_v25  ;;  %1832 = vmatprep.mubr.bf16.mxu0 %v12404_v22  ;;  %v1928_v22 = vld [vmem:[%s18369_s12 + $0x78] sm:$0xff] }
 0x44d   :  { %10567 = vmatpush3.bf16.msk.msra.mxu1 %vm13260_vm5, %v9102_v25  ;;  %11001 = vmatpush3.bf16.msra.mxu0 %v10966_v19  ;;  %v10994_v23 = vpack.c.bf16 %v1928_v22, %v1927_v21 }
 0x44e   :  { %10967 = vmatprep.subr.bf16.mxu1 %v10966_v19  ;;  %11003 = vmatprep.subr.bf16.mxu0 %v10970_v26 }
 0x450   :  { %10569 = vmatmul.mubr.msk.bf16.vlgmr.msra.gmra.mrb[20].mxu1 %vm18396_vm0, %v12403_v33 }
 0x451   :  { %10969 = vmatpush3.bf16.msra.mxu1 %v10966_v19  ;;  %11005 = vmatpush3.bf16.msra.mxu0 %v10970_v26  ;;  %v1926_v19 = vld [vmem:[%s18369_s12 + $0x68] sm:$0xff] }
 0x452   :  { %10971 = vmatprep.subr.bf16.mxu1 %v10970_v26  ;;  %11007 = vmatprep.subr.bf16.mxu0 %v10974_v38  ;;  %v10990_v20 = vpack.c.bf16 %v1926_v19, %v1925_v53 }
 0x453   :  { %1833 = vmatmul.mubr.bf16.gmra.mrb[56].mxu0 %v12406_v36 }
 0x454   :  { %v1739_v34 = vpop.permute.xlu0 %1738 }
 0x455   :  { %10973 = vmatpush3.bf16.msra.mxu1 %v10970_v26  ;;  %11009 = vmatpush3.bf16.msra.mxu0 %v10974_v38 }
 0x456   :  { %10975 = vmatprep.subr.bf16.mxu1 %v10974_v38  ;;  %11011 = vmatprep.subr.bf16.mxu0 %v10978_v46 }
 0x458   :  { %v1744_v41 = vpop.permute.xlu1 %1743 }
 0x459   :  { %10977 = vmatpush3.bf16.msra.mxu1 %v10974_v38  ;;  %11013 = vmatpush3.bf16.msra.mxu0 %v10978_v46 }
 0x45a   :  { %10979 = vmatprep.subr.bf16.mxu1 %v10978_v46  ;;  %11015 = vmatprep.subr.bf16.mxu0 %v10982_v15 }
 0x45d   :  { %10981 = vmatpush3.bf16.msra.mxu1 %v10978_v46  ;;  %11017 = vmatpush3.bf16.msra.mxu0 %v10982_v15 }
 0x45e   :  { %10983 = vmatprep.subr.bf16.mxu1 %v10982_v15  ;;  %11019 = vmatprep.subr.bf16.mxu0 %v10986_v54 }
 0x461   :  { %10985 = vmatpush3.bf16.msra.mxu1 %v10982_v15  ;;  %11021 = vmatpush3.bf16.msra.mxu0 %v10986_v54 }
 0x462   :  { %10987 = vmatprep.subr.bf16.mxu1 %v10986_v54  ;;  %11023 = vmatprep.subr.bf16.mxu0 %v10990_v20 }
 0x465   :  { %10989 = vmatpush3.bf16.msra.mxu1 %v10986_v54  ;;  %11025 = vmatpush3.bf16.msra.mxu0 %v10990_v20 }
 0x466   :  { %10991 = vmatprep.subr.bf16.mxu1 %v10990_v20  ;;  %11027 = vmatprep.subr.bf16.mxu0 %v10994_v23 }
 0x469   :  { %10993 = vmatpush3.bf16.msra.mxu1 %v10990_v20  ;;  %11029 = vmatpush3.bf16.msra.mxu0 %v10994_v23 }
 0x46a   :  { %10995 = vmatprep.subr.bf16.mxu1 %v10994_v23 }
 0x46d   :  { %10997 = vmatpush3.bf16.msra.mxu1 %v10994_v23  ;;  %v1749_v23 = vpop.permute.xlu0 %1748 }
 0x47e   :  { %v13341_v63 = vpop.f32.mrb[40].mxu0 }
 0x47f   :  { %18478 = vst [vmem:[#allocation7_spill] sm:$0xff] %v13341_v63  ;;  %v13343_v0 = vpop.f32.mrb[41].mxu0 }
 0x480   :  { %18479 = vst [vmem:[#allocation8_spill] sm:$0xff] %v13343_v0 }
 0x482   :  { %v13345_v1 = vpop.f32.mrb[42].mxu0 }
 0x483   :  { %18480 = vst [vmem:[#allocation9_spill] sm:$0xff] %v13345_v1  ;;  %v13347_v2 = vpop.f32.mrb[43].mxu0 }
 0x484   :  { %18481 = vst [vmem:[#allocation10_spill] sm:$0xff] %v13347_v2 }
 0x486   :  { %v13349_v4 = vpop.f32.mrb[44].mxu0 }
 0x487   :  { %18482 = vst [vmem:[#allocation11_spill] sm:$0xff] %v13349_v4  ;;  %v13351_v5 = vpop.f32.mrb[45].mxu0 }
 0x488   :  { %18483 = vst [vmem:[#allocation12_spill] sm:$0xff] %v13351_v5 }
 0x48a   :  { %v13353_v7 = vpop.f32.mrb[46].mxu0 }
 0x48b   :  { %18484 = vst [vmem:[#allocation13_spill] sm:$0xff] %v13353_v7  ;;  %v13355_v8 = vpop.f32.mrb[47].mxu0 }
 0x48c   :  { %18485 = vst [vmem:[#allocation14_spill] sm:$0xff] %v13355_v8 }
 0x48e   :  { %v13357_v9 = vpop.f32.mrb[48].mxu0 }
 0x48f   :  { %18486 = vst [vmem:[#allocation15_spill] sm:$0xff] %v13357_v9  ;;  %v13359_v10 = vpop.f32.mrb[49].mxu0 }
 0x490   :  { %18487 = vst [vmem:[#allocation16_spill] sm:$0xff] %v13359_v10 }
 0x492   :  { %v13361_v11 = vpop.f32.mrb[50].mxu0 }
 0x493   :  { %18488 = vst [vmem:[#allocation17_spill] sm:$0xff] %v13361_v11  ;;  %v13363_v51 = vpop.f32.mrb[51].mxu0 }
 0x494   :  { %18489 = vst [vmem:[#allocation18_spill] sm:$0xff] %v13363_v51 }
 0x51e   :  { %v9777_v24 = vpop.f32.mrb[52].mxu0 }
 0x51f   :  { %v9778_v25 = vpop.f32.mrb[53].mxu0 }
 0x520   :  { %v9779_v33 = vadd.f32 %v9778_v25, %v9777_v24  ;;  %v9780_v26 = vpop.f32.mrb[54].mxu0 }
 0x521   :  { %v9781_v28 = vpop.f32.mrb[55].mxu0 }
 0x522   :  { %v9782_v36 = vadd.f32 %v9781_v28, %v9780_v26  ;;  %v1827_v38 = vadd.f32 %v9779_v33, %v1739_v34  ;;  %v1754_v28 = vpop.permute.xlu1 %1753 }
 0x523   :  { %v10570_v29 = vpop.f32.mrb[20].mxu1 }
 0x524   :  { %v1875_v46 = vpop.f32.mrb[21].mxu1  ;;  %v1830_v14 = vadd.f32 %v9782_v36, %v1744_v41 }
 0x525   :  { %v1876_v15 = vadd.f32 %v1875_v46, %v1827_v38  ;;  %v10571_v13 = vpop.f32.mrb[22].mxu1 }
 0x526   :  { %v9783_v16 = vpop.f32.mrb[56].mxu0  ;;  %v1878_v54 = vpop.f32.mrb[23].mxu1 }
 0x527   :  { %v1897_v53 = vadd.f32 %v8621_v27, %v1876_v15  ;;  %v1879_v19 = vadd.f32 %v1878_v54, %v1830_v14  ;;  %v9784_v20 = vpop.f32.mrb[57].mxu0 }
 0x528   :  { %v9785_v21 = vadd.f32 %v9784_v20, %v9783_v16  ;;  %v9786_v22 = vpop.f32.mrb[58].mxu0 }
 0x529   :  { %v1898_v24 = vadd.f32 %v8621_v27, %v1879_v19  ;;  %v9787_v25 = vpop.f32.mrb[59].mxu0  ;;  %vm1901_vm6 = vcmp.gt.f32.partialorder %v1897_v53, 0.0  ;;  %v1905_v33 = vmul.f32 0.2, %v1897_v53 }
 0x52a   :  { %v1835_v26 = vadd.f32 %v9785_v21, %v1749_v23  ;;  %v9788_v34 = vadd.f32 %v9787_v25, %v9786_v22  ;;  %v12407_v21 = vld [vmem:[%s18377_s14] ss:$16 sps:$4 sm:$0xff]  }
 0x52b   :  { %v1906_v3 = vmul.f32 0.2, %v1898_v24  ;;  %v13392_v11 = vsel %vm1901_vm6, %v1897_v53, %v1905_v33  ;;  %vm1902_vm7 = vcmp.gt.f32.partialorder %v1898_v24, 0.0 }
 0x52c   :  { %v1884_v36 = vadd.f32 %v10570_v29, %v1835_v26  ;;  %v1838_v38 = vadd.f32 %v9788_v34, %v1754_v28  ;;  %10604 = vmatprep.mubr.f32.mxu1 %v13392_v11  ;;  %v2015_v41 = vmul.f32 %v13392_v11, %v13392_v11 }
 0x52d   :  { %v13397_v46 = vsel %vm1902_vm7, %v1898_v24, %v1906_v3 }
 0x52e   :  { %v1887_v14 = vadd.f32 %v10571_v13, %v1838_v38  ;;  %10605 = vmatmul.mubr.f32.vlgmr.msra.gmra.mrb[24].mxu1 %v13397_v46  ;;  %v2016_v15 = vmul.f32 %v13397_v46, %v13397_v46  ;;  %10642 = vmatprep.mubr.f32.mxu0 %v2015_v41  ;;  %v1899_v16 = vadd.f32 %v8621_v27, %v1884_v36  ;;  %v502_v41 = vpop.permute.xlu1 %501 }
 0x530   :  { %10643 = vmatmul.mubr.f32.vlgmr.msra.gmra.mrb[60].mxu0 %v2016_v15  ;;  %vm1903_vm8 = vcmp.gt.f32.partialorder %v1899_v16, 0.0  ;;  %v1907_v54 = vmul.f32 0.2, %v1899_v16  ;;  %v1900_v29 = vadd.f32 %v8621_v27, %v1887_v14  ;;  %v1929_v27 = vld [vmem:[%s18373_s13] sm:$0x3] }
 0x531   :  { %10648 = vmatprep.subr.msk.mxu1 %vm18392_vm14, %v1929_v27 }
 0x532   :  { %v13402_v53 = vsel %vm1903_vm8, %v1899_v16, %v1907_v54  ;;  %vm1904_vm9 = vcmp.gt.f32.partialorder %v1900_v29, 0.0  ;;  %v1908_v19 = vmul.f32 0.2, %v1900_v29  ;;  %10649 = vmatpush3.msk.msra.mxu1 %vm18392_vm14, %v1929_v27  ;;  %v497_v16 = vpop.permute.xlu0 %496 }
 0x533   :  { %10607 = vmatprep.mubr.f32.mxu1 %v13402_v53  ;;  %v2017_v3 = vmul.f32 %v13402_v53, %v13402_v53  ;;  %10662 = vmatprep.subr.bf16.mxu1 %v12407_v21 }
 0x534   :  { %v13407_v13 = vsel %vm1904_vm9, %v1900_v29, %v1908_v19 }
 0x535   :  { %10608 = vmatmul.mubr.f32.gmra.mrb[26].mxu1 %v13407_v13  ;;  %10645 = vmatprep.mubr.f32.mxu0 %v2017_v3  ;;  %v2018_v20 = vmul.f32 %v13407_v13, %v13407_v13 }
 0x537   :  { %10646 = vmatmul.mubr.f32.gmra.mrb[62].mxu0 %v2018_v20 }
 0x601   :  { %v10606_v22 = vpop.f32.mrb[24].mxu1 }
 0x602   :  { %v2105_v23 = vmul.f32 %v10606_v22, %v10606_v22  ;;  %v1996_v24 = vpop.f32.mrb[25].mxu1 }
 0x603   :  { %v2104_v25 = vmul.f32 %v1996_v24, %v1996_v24  ;;  %v10644_v33 = vpop.f32.mrb[60].mxu0 }
 0x604   :  { %v2109_v26 = vsub.f32 %v10644_v33, %v2105_v23  ;;  %v2085_v34 = vpop.f32.mrb[61].mxu0  ;;  %v512_v23 = vpop.permute.xlu1 %511 }
 0x605   :  { %v2108_v28 = vsub.f32 %v2085_v34, %v2104_v25  ;;  %v507_v25 = vpop.permute.xlu0 %506 }
 0x606   :  { %v2113_v36 = vmax.f32 %v2109_v26, 0.0 }
 0x607   :  { %v2112_v38 = vmax.f32 %v2108_v28, 0.0  ;;  %v950_v28 = vadd.f32 %v13124_v39, %v502_v41  ;;  %v960_v41 = vadd.f32 %v13134_v30, %v512_v23 }
 0x608   :  { %v2117_v14 = vadd.f32 1e-08, %v2113_v36  ;;  %v10609_v15 = vpop.f32.mrb[26].mxu1 }
 0x609   :  { %v2116_v54 = vadd.f32 1e-08, %v2112_v38  ;;  %v2107_v29 = vmul.f32 %v10609_v15, %v10609_v15  ;;  %v2006_v19 = vpop.f32.mrb[27].mxu1  ;;  %v945_v38 = vadd.f32 %v13126_v40, %v497_v16  ;;  %v517_v10 = vpop.permute.xlu0 %516 }
 0x60a   :  { %12507 = vrsqrt.f32 %v2117_v14  ;;  %v2106_v3 = vmul.f32 %v2006_v19, %v2006_v19  ;;  %v10647_v20 = vpop.f32.mrb[62].mxu0  ;;  %v522_v14 = vpop.permute.xlu1 %521 }
 0x60b   :  { %12509 = vrsqrt.f32 %v2116_v54  ;;  %v2111_v27 = vsub.f32 %v10647_v20, %v2107_v29  ;;  %v2095_v51 = vpop.f32.mrb[63].mxu0  ;;  %v12409_v20 = vld [vmem:[%s18377_s14 + $0x40] ss:$16 sps:$4 sm:$0xff]  }
 0x60c   :  { %v2110_v7 = vsub.f32 %v2095_v51, %v2106_v3  ;;  %v970_v51 = vadd.f32 %v13144_v45, %v522_v14  ;;  %v955_v45 = vadd.f32 %v13142_v44, %v507_v25  ;;  %v12414_v25 = vld [vmem:[%s18377_s14 + $0xe0] ss:$16 sps:$4 sm:$0xff]  }
 0x60d   :  { %v2115_v9 = vmax.f32 %v2111_v27, 0.0 }
 0x60e   :  { %v2114_v33 = vmax.f32 %v2110_v7, 0.0  ;;  %v12408_v7 = vld [vmem:[%s18377_s14 + $0x20] ss:$16 sps:$4 sm:$0xff]  }
 0x60f   :  { %v2119_v26 = vadd.f32 1e-08, %v2115_v9  ;;  %v965_v9 = vadd.f32 %v13152_v48, %v517_v10  ;;  %v527_v10 = vpop.permute.xlu0 %526 }
 0x610   :  { %v2118_v34 = vadd.f32 1e-08, %v2114_v33  ;;  %v975_v30 = vadd.f32 %v13162_v55, %v527_v10  ;;  %v12411_v55 = vld [vmem:[%s18377_s14 + $0x80] ss:$16 sps:$4 sm:$0xff]  }
 0x611   :  { %12511 = vrsqrt.f32 %v2119_v26 }
 0x612   :  { %12513 = vrsqrt.f32 %v2118_v34 }
 0x614   :  { %v12508_v36 = vpop.eup %12507 }
 0x615   :  { %v12510_v8 = vpop.eup %12509  ;;  %v2125_v54 = vmul.f32 %v12508_v36, %v950_v28 }
 0x616   :  { %v2124_v29 = vmul.f32 %v12510_v8, %v945_v38 }
 0x617   :  { %v2129_v3 = vmul.f32 %v10606_v22, %v2125_v54  ;;  %v532_v22 = vpop.permute.xlu1 %531 }
 0x618   :  { %10650 = vmatprep.mubr.msk.f32.mxu1 %vm18383_vm1, %v2124_v29  ;;  %v2128_v39 = vmul.f32 %v2124_v29, %v1996_v24  ;;  %v980_v33 = vadd.f32 %v13154_v49, %v532_v22  ;;  %v12410_v49 = vld [vmem:[%s18377_s14 + $0x60] ss:$16 sps:$4 sm:$0xff]  }
 0x619   :  { %10651 = vmatmul.mubr.msk.f32.vlgmr.msra.gmra.mrb[28].mxu1 %vm18383_vm1, %v2125_v54  ;;  %v2133_v40 = vsub.f32 %v970_v51, %v2129_v3 }
 0x61a   :  { %v2132_v16 = vsub.f32 %v965_v9, %v2128_v39  ;;  %10663 = vmatpush3.bf16.msra.mxu1 %v12407_v21 }
 0x61b   :  { %v12512_v8 = vpop.eup %12511  ;;  %10664 = vmatprep.subr.bf16.mxu1 %v12408_v7 }
 0x61c   :  { %v12514_v48 = vpop.eup %12513  ;;  %v2127_v27 = vmul.f32 %v12512_v8, %v960_v41 }
 0x61d   :  { %v2126_v24 = vmul.f32 %v12514_v48, %v955_v45 }
 0x61e   :  { %v2131_v26 = vmul.f32 %v10609_v15, %v2127_v27  ;;  %10665 = vmatpush3.bf16.msra.mxu1 %v12408_v7  ;;  %v12412_v15 = vld [vmem:[%s18377_s14 + $0xa0] ss:$16 sps:$4 sm:$0xff]  }
 0x61f   :  { %10653 = vmatprep.mubr.msk.f32.mxu1 %vm18383_vm1, %v2126_v24  ;;  %v2130_v21 = vmul.f32 %v2126_v24, %v2006_v19  ;;  %10666 = vmatprep.subr.bf16.mxu1 %v12409_v20  ;;  %v12413_v19 = vld [vmem:[%s18377_s14 + $0xc0] ss:$16 sps:$4 sm:$0xff]  }
 0x620   :  { %10654 = vmatmul.mubr.msk.f32.gmra.mrb[30].mxu1 %vm18383_vm1, %v2127_v27  ;;  %v2135_v44 = vsub.f32 %v980_v33, %v2131_v26  ;;  %v12417_v26 = vld [vmem:[%s18375_s5 + $0x34] ss:$12 sps:$4 sm:$0xff]  }
 0x621   :  { %10656 = vmatprep.mubr.msk.f32.mxu1 %vm18383_vm1, %v2132_v16  ;;  %v2134_v23 = vsub.f32 %v975_v30, %v2130_v21  ;;  %2684 = vmatprep.mubr.bf16.mxu0 %v12417_v26  ;;  %v12418_v30 = vld [vmem:[%s18375_s5 + $0x38] ss:$12 sps:$4 sm:$0xff]   ;;  %v8657_v21 = vld [vmem:[%s18376_s6 + $0x28] sm:$0xff] }
 0x622   :  { %10667 = vmatpush3.bf16.msra.mxu1 %v12409_v20 }
 0x623   :  { %10668 = vmatprep.subr.bf16.mxu1 %v12410_v49 }
 0x624   :  { %10657 = vmatmul.mubr.msk.f32.gmra.mrb[32].mxu1 %vm18383_vm1, %v2133_v40 }
 0x625   :  { %10659 = vmatprep.mubr.msk.f32.mxu1 %vm18383_vm1, %v2134_v23  ;;  %v8659_v23 = vld [vmem:[%s18376_s6 + $0x38] sm:$0xff] }
 0x626   :  { %10669 = vmatpush3.bf16.msra.mxu1 %v12410_v49  ;;  %v8658_v49 = vld [vmem:[%s18376_s6 + $0x30] sm:$0xff] }
 0x627   :  { %10670 = vmatprep.subr.bf16.mxu1 %v12411_v55 }
 0x628   :  { %10660 = vmatmul.mubr.msk.f32.gmra.mrb[34].mxu1 %vm18383_vm1, %v2135_v44  ;;  %v8656_v44 = vld [vmem:[%s18376_s6 + $0x20] sm:$0xff] }
 0x62a   :  { %10671 = vmatpush3.bf16.msra.mxu1 %v12411_v55  ;;  %v423_v55 = vld [vmem:[%s18368_s4 + $0x88] sm:$0xff] }
 0x62b   :  { %10672 = vmatprep.subr.bf16.mxu1 %v12412_v15 }
 0x62e   :  { %10673 = vmatpush3.bf16.msra.mxu1 %v12412_v15  ;;  %v422_v15 = vld [vmem:[%s18368_s4 + $0x80] sm:$0xff] }
 0x62f   :  { %10674 = vmatprep.subr.bf16.mxu1 %v12413_v19 }
 0x632   :  { %10675 = vmatpush3.bf16.msra.mxu1 %v12413_v19  ;;  %v425_v19 = vld [vmem:[%s18368_s4 + $0x98] sm:$0xff] }
 0x633   :  { %10676 = vmatprep.subr.bf16.mxu1 %v12414_v25 }
 0x636   :  { %10677 = vmatpush3.bf16.msra.mxu1 %v12414_v25  ;;  %v424_v25 = vld [vmem:[%s18368_s4 + $0x90] sm:$0xff] }
 0x6ec   :  { %v10652_v34 = vpop.f32.mrb[28].mxu1 }
 0x6ed   :  { %v2229_v28 = vpop.f32.mrb[29].mxu1  ;;  %v2269_v14 = vmul.f32 %v10652_v34, %v13397_v46  ;;  %v427_v34 = vld [vmem:[%s18368_s4 + $0xa8] sm:$0xff] }
 0x6ee   :  { %v2268_v54 = vmul.f32 %v2229_v28, %v13392_v11  ;;  %v8643_v11 = vld [vmem:[%s18374_s11 + $0x44] ss:$0 sm:$0xff] }
 0x6ef   :  { %vm2473_vm10 = vcmp.gt.f32.partialorder %v8643_v11, 0.0  ;;  %v426_v28 = vld [vmem:[%s18368_s4 + $0xa0] sm:$0xff] }
 0x6f0   :  { %vm13470_vm11 = vmpackc.low %vm2473_vm10, %vm2473_vm10 }
 0x6f3   :  { %v10655_v36 = vpop.f32.mrb[30].mxu1 }
 0x6f4   :  { %v2239_v38 = vpop.f32.mrb[31].mxu1  ;;  %v2271_v9 = vmul.f32 %v10655_v36, %v13407_v13  ;;  %v429_v36 = vld [vmem:[%s18368_s4 + $0xb8] sm:$0xff] }
 0x6f5   :  { %v2270_v39 = vmul.f32 %v2239_v38, %v13402_v53  ;;  %v428_v38 = vld [vmem:[%s18368_s4 + $0xb0] sm:$0xff] }
 0x6f7   :  { %v10658_v29 = vpop.f32.mrb[32].mxu1 }
 0x6f8   :  { %v2273_v51 = vadd.f32 %v10658_v29, %v2269_v14  ;;  %v2249_v3 = vpop.f32.mrb[33].mxu1  ;;  %v8639_v14 = vld [vmem:[%s18374_s11 + $0x40] ss:$0 sm:$0xff] }
 0x6f9   :  { %v2272_v7 = vadd.f32 %v2268_v54, %v2249_v3  ;;  %vm2401_vm12 = vcmp.gt.f32.partialorder %v8639_v14, 0.0 }
 0x6fa   :  { %vm13543_vm13 = vmpackc.low %vm2401_vm12, %vm2401_vm12 }
 0x6fb   :  { %v2292_v40 = vpack.c.bf16 %v2273_v51, %v2272_v7  ;;  %v10661_v41 = vpop.f32.mrb[34].mxu1  ;;  %v8644_v7 = vld [vmem:[%s18374_s11 + $0x45] ss:$0 sm:$0xff] }
 0x6fc   :  { %v2275_v16 = vadd.f32 %v10661_v41, %v2271_v9  ;;  %v2259_v8 = vpop.f32.mrb[35].mxu1  ;;  %vm2493_vm15 = vcmp.gt.f32.partialorder %v8644_v7, 0.0 }
 0x6fd   :  { %v2274_v45 = vadd.f32 %v2270_v39, %v2259_v8  ;;  %10678 = vmatprep.mubr.bf16.mxu1 %v2292_v40  ;;  %v8640_v8 = vld [vmem:[%s18374_s11 + $0x41] ss:$0 sm:$0xff]  ;;  %vm13557_vm3 = vmpackc.low %vm2493_vm15, %vm2493_vm15 }
 0x6fe   :  { %vm2421_vm2 = vcmp.gt.f32.partialorder %v8640_v8, 0.0 }
 0x6ff   :  { %v2293_v22 = vpack.c.bf16 %v2275_v16, %v2274_v45  ;;  %vm13568_vm4 = vmpackc.low %vm2421_vm2, %vm2421_vm2 }
 0x701   :  { %10679 = vmatmul.mubr.bf16.vlgmr.msra.gmra.mrb[36].mxu1 %v2293_v22 }
 0x702   :  { %10686 = vmatprep.mubr.msk.bf16.mxu1 %vm18396_vm0, %v12418_v30 }
 0x7d4   :  { %v13464_v46 = vpop.f32.mrb[36].mxu1 }
 0x7d5   :  { %v2376_v20 = vpop.f32.mrb[37].mxu1 }
 0x7d6   :  { %v13466_v48 = vpop.f32.mrb[38].mxu1 }
 0x7d7   :  { %v2379_v13 = vpop.f32.mrb[39].mxu1  ;;  %v11604_v53 = vpack.i.bf16 %v13466_v48, %v13464_v46  ;;  %v9132_v33 = vpack.c.bf16 %v13466_v48, %v13464_v46  ;;  %v8645_v46 = vld [vmem:[%s18374_s11 + $0x46] ss:$0 sm:$0xff] }
 0x7d8   :  { %v11599_v27 = vpack.i.bf16 %v2379_v13, %v2376_v20  ;;  %v9129_v24 = vpack.c.bf16 %v2379_v13, %v2376_v20  ;;  %vm2513_vm5 = vcmp.gt.f32.partialorder %v8645_v46, 0.0 }
 0x7d9   :  { %11605 = vrot.lane.b32.xlu1 %v11604_v53, %s12556_s23  ;;  %vm13579_vm7 = vmpackc.low %vm2513_vm5, %vm2513_vm5 }
 0x7da   :  { %11600 = vrot.lane.b32.xlu0 %v11599_v27, %s12556_s23  ;;  %9852 = vmatprep.subr.msk.bf16.mxu0 %vm13470_vm11, %v9129_v24 }
 0x7dd   :  { %11620 = vrot.lane.b32.xlu1 %v11599_v27, %s12557_s24 }
 0x7de   :  { %11610 = vrot.lane.b32.xlu0 %v11599_v27, %s12549_s21 }
 0x7e1   :  { %11625 = vrot.lane.b32.xlu1 %v11604_v53, %s12557_s24 }
 0x7e2   :  { %11615 = vrot.lane.b32.xlu0 %v11604_v53, %s12549_s21 }
 0x7e5   :  { %11640 = vrot.lane.b32.xlu1 %v11599_v27, %s12558_s25 }
 0x7e6   :  { %11630 = vrot.lane.b32.xlu0 %v11599_v27, %s12559_s1 }
 0x7e9   :  { %11645 = vrot.lane.b32.xlu1 %v11604_v53, %s12558_s25 }
 0x7ea   :  { %11635 = vrot.lane.b32.xlu0 %v11604_v53, %s12559_s1 }
 0x7ed   :  { %11660 = vrot.lane.b32.xlu1 %v11599_v27, %s12554_s26 }
 0x7ee   :  { %11650 = vrot.lane.b32.xlu0 %v11599_v27, %s12560_s27 }
 0x7f1   :  { %11665 = vrot.lane.b32.xlu1 %v11604_v53, %s12554_s26 }
 0x7f2   :  { %11655 = vrot.lane.b32.xlu0 %v11604_v53, %s12560_s27 }
 0x7f5   :  { %11675 = vrot.lane.b32.xlu1 %v11604_v53, %s12561_s0 }
 0x7f6   :  { %11670 = vrot.lane.b32.xlu0 %v11599_v27, %s12561_s0 }
 0x7f9   :  { %2603 = vperm.xlu1 %11518, %v8657_v21  }
 0x7fa   :  { %2598 = vperm.xlu0 %11517, %v8656_v44  }
 0x7fd   :  { %2613 = vperm.xlu1 %11518, %v8659_v23  }
 0x7fe   :  { %2608 = vperm.xlu0 %11517, %v8658_v49  }
 0x801   :  { %541 = vperm.xlu1 %11518, %v423_v55  }
 0x802   :  { %536 = vperm.xlu0 %11517, %v422_v15  }
 0x805   :  { %551 = vperm.xlu1 %11518, %v425_v19   ;;  %v8641_v19 = vld [vmem:[%s18374_s11 + $0x42] ss:$0 sm:$0xff] }
 0x806   :  { %546 = vperm.xlu0 %11517, %v424_v25   ;;  %vm2441_vm6 = vcmp.gt.f32.partialorder %v8641_v19, 0.0  ;;  %v12427_v19 = vld [vmem:[%s18375_s5 + $0x80] ss:$12 sps:$4 sm:$0xff]  }
 0x807   :  { %vm13590_vm8 = vmpackc.low %vm2441_vm6, %vm2441_vm6 }
 0x809   :  { %561 = vperm.xlu1 %11518, %v427_v34  }
 0x80a   :  { %556 = vperm.xlu0 %11517, %v426_v28  }
 0x80d   :  { %571 = vperm.xlu1 %11518, %v429_v36  }
 0x80e   :  { %566 = vperm.xlu0 %11517, %v428_v38  }
 0x84b   :  { %v11606_v54 = vpop.permute.xlu1 %11605 }
 0x84c   :  { %v11601_v29 = vpop.permute.xlu0 %11600  ;;  %v11608_v39 = vunpack.i.h.bf16 %v11606_v54  ;;  %v11607_v40 = vunpack.i.l.bf16 %v11606_v54 }
 0x84d   :  { %v11603_v51 = vunpack.i.h.bf16 %v11601_v29  ;;  %v11602_v3 = vunpack.i.l.bf16 %v11601_v29 }
 0x84e   :  { %v9108_v20 = vpack.c.bf16 %v11608_v39, %v11607_v40  ;;  %v8646_v40 = vld [vmem:[%s18374_s11 + $0x47] ss:$0 sm:$0xff] }
 0x84f   :  { %v9105_v41 = vpack.c.bf16 %v11603_v51, %v11602_v3  ;;  %v11621_v16 = vpop.permute.xlu1 %11620  ;;  %vm2533_vm9 = vcmp.gt.f32.partialorder %v8646_v40, 0.0 }
 0x850   :  { %v11611_v45 = vpop.permute.xlu0 %11610  ;;  %v11623_v13 = vunpack.i.h.bf16 %v11621_v16  ;;  %v11622_v53 = vunpack.i.l.bf16 %v11621_v16  ;;  %vm13601_vm12 = vmpackc.low %vm2533_vm9, %vm2533_vm9 }
 0x851   :  { %v11613_v22 = vunpack.i.h.bf16 %v11611_v45  ;;  %v11612_v11 = vunpack.i.l.bf16 %v11611_v45  ;;  %9853 = vmatpush3.bf16.msk.msra.mxu0 %vm13543_vm13, %v9105_v41 }
 0x852   :  { %9854 = vmatprep.subr.msk.bf16.mxu0 %vm13470_vm11, %v9132_v33  ;;  %v9111_v33 = vpack.c.bf16 %v11623_v13, %v11622_v53 }
 0x853   :  { %v9135_v27 = vpack.c.bf16 %v11613_v22, %v11612_v11  ;;  %v11626_v24 = vpop.permute.xlu1 %11625 }
 0x854   :  { %v11616_v30 = vpop.permute.xlu0 %11615  ;;  %v11628_v23 = vunpack.i.h.bf16 %v11626_v24  ;;  %v11627_v49 = vunpack.i.l.bf16 %v11626_v24 }
 0x855   :  { %v11618_v21 = vunpack.i.h.bf16 %v11616_v30  ;;  %v11617_v44 = vunpack.i.l.bf16 %v11616_v30  ;;  %9855 = vmatpush3.bf16.msk.msra.mxu0 %vm13543_vm13, %v9108_v20  ;;  %v8642_v20 = vld [vmem:[%s18374_s11 + $0x43] ss:$0 sm:$0xff] }
 0x856   :  { %9856 = vmatprep.subr.msk.bf16.mxu0 %vm13557_vm3, %v9135_v27  ;;  %v9114_v36 = vpack.c.bf16 %v11628_v23, %v11627_v49  ;;  %vm2461_vm10 = vcmp.gt.f32.partialorder %v8642_v20, 0.0  ;;  %v8647_v23 = vld [vmem:[%s18374_s11 + $0x60] ss:$0 sm:$0xff]  ;;  %v8672_v20 = vld [vmem:[%s18369_s12 + $0x218] sm:$0xff] }
 0x857   :  { %v9138_v55 = vpack.c.bf16 %v11618_v21, %v11617_v44  ;;  %v11641_v15 = vpop.permute.xlu1 %11640  ;;  %vm13612_vm15 = vmpackc.low %vm2461_vm10, %vm2461_vm10  ;;  %vm2553_vm2 = vcmp.gt.f32.partialorder %v8647_v23, 0.0  ;;  %v8675_v23 = vld [vmem:[%s18369_s12 + $0x230] sm:$0xff] }
 0x858   :  { %v11631_v25 = vpop.permute.xlu0 %11630  ;;  %v11643_v38 = vunpack.i.h.bf16 %v11641_v15  ;;  %v11642_v14 = vunpack.i.l.bf16 %v11641_v15  ;;  %vm13626_vm5 = vmpackc.low %vm2553_vm2, %vm2553_vm2 }
 0x859   :  { %v11633_v34 = vunpack.i.h.bf16 %v11631_v25  ;;  %v11632_v28 = vunpack.i.l.bf16 %v11631_v25  ;;  %9857 = vmatpush3.bf16.msk.msra.mxu0 %vm13568_vm4, %v9111_v33  ;;  %v12428_v33 = vld [vmem:[%s18375_s5 + $0x7c] ss:$12 sps:$4 sm:$0xff]  }
 0x85a   :  { %9858 = vmatprep.subr.msk.bf16.mxu0 %vm13557_vm3, %v9138_v55  ;;  %v9117_v16 = vpack.c.bf16 %v11643_v38, %v11642_v14  ;;  %v8669_v14 = vld [vmem:[%s18369_s12 + $0x200] sm:$0xff] }
 0x85b   :  { %v9141_v54 = vpack.c.bf16 %v11633_v34, %v11632_v28  ;;  %v11646_v29 = vpop.permute.xlu1 %11645 }
 0x85c   :  { %v11636_v3 = vpop.permute.xlu0 %11635  ;;  %v11648_v8 = vunpack.i.h.bf16 %v11646_v29  ;;  %v11647_v45 = vunpack.i.l.bf16 %v11646_v29 }
 0x85d   :  { %v11638_v7 = vunpack.i.h.bf16 %v11636_v3  ;;  %v11637_v39 = vunpack.i.l.bf16 %v11636_v3  ;;  %9859 = vmatpush3.bf16.msk.msra.mxu0 %vm13568_vm4, %v9114_v36 }
 0x85e   :  { %9860 = vmatprep.subr.msk.bf16.mxu0 %vm13579_vm7, %v9141_v54  ;;  %v9120_v24 = vpack.c.bf16 %v11648_v8, %v11647_v45  ;;  %v8670_v54 = vld [vmem:[%s18369_s12 + $0x208] sm:$0xff] }
 0x85f   :  { %v9144_v22 = vpack.c.bf16 %v11638_v7, %v11637_v39  ;;  %v11661_v11 = vpop.permute.xlu1 %11660  ;;  %v13630_v8 = vpack.c.bf16 %v8670_v54, %v8669_v14  ;;  %v8681_v54 = vld [vmem:[%s18369_s12 + $0x260] sm:$0xff] }
 0x860   :  { %v11651_v13 = vpop.permute.xlu0 %11650  ;;  %v11663_v30 = vunpack.i.h.bf16 %v11661_v11  ;;  %v11662_v21 = vunpack.i.l.bf16 %v11661_v11  ;;  %v8671_v11 = vld [vmem:[%s18369_s12 + $0x210] sm:$0xff] }
 0x861   :  { %v11653_v53 = vunpack.i.h.bf16 %v11651_v13  ;;  %v11652_v27 = vunpack.i.l.bf16 %v11651_v13  ;;  %9861 = vmatpush3.bf16.msk.msra.mxu0 %vm13590_vm8, %v9117_v16  ;;  %v12415_v13 = vld [vmem:[%s18375_s5 + $0x30] ss:$12 sps:$4 sm:$0xff]  }
 0x862   :  { %9862 = vmatprep.subr.msk.bf16.mxu0 %vm13579_vm7, %v9144_v22  ;;  %v9123_v25 = vpack.c.bf16 %v11663_v30, %v11662_v21  ;;  %v8673_v30 = vld [vmem:[%s18369_s12 + $0x220] sm:$0xff]  ;;  %v8674_v21 = vld [vmem:[%s18369_s12 + $0x228] sm:$0xff] }
 0x863   :  { %v9147_v44 = vpack.c.bf16 %v11653_v53, %v11652_v27  ;;  %v11666_v46 = vpop.permute.xlu1 %11665  ;;  %v12420_v27 = vld [vmem:[%s18375_s5 + $0x4c] ss:$12 sps:$4 sm:$0xff]  }
 0x864   :  { %v11656_v49 = vpop.permute.xlu0 %11655  ;;  %v11668_v34 = vunpack.i.h.bf16 %v11666_v46  ;;  %v11667_v28 = vunpack.i.l.bf16 %v11666_v46  ;;  %v13668_v46 = vpack.c.bf16 %v8674_v21, %v8673_v30 }
 0x865   :  { %v11658_v55 = vunpack.i.h.bf16 %v11656_v49  ;;  %v11657_v15 = vunpack.i.l.bf16 %v11656_v49  ;;  %9863 = vmatpush3.bf16.msk.msra.mxu0 %vm13590_vm8, %v9120_v24  ;;  %v13651_v24 = vpack.c.bf16 %v8672_v20, %v8671_v11  ;;  %v8676_v49 = vld [vmem:[%s18369_s12 + $0x238] sm:$0xff] }
 0x866   :  { %9864 = vmatprep.subr.msk.bf16.mxu0 %vm13601_vm12, %v9147_v44  ;;  %v9126_v45 = vpack.c.bf16 %v11668_v34, %v11667_v28  ;;  %v12419_v44 = vld [vmem:[%s18375_s5 + $0x50] ss:$12 sps:$4 sm:$0xff]   ;;  %v8678_v34 = vld [vmem:[%s18369_s12 + $0x248] sm:$0xff] }
 0x867   :  { %v9150_v36 = vpack.c.bf16 %v11658_v55, %v11657_v15  ;;  %v11676_v38 = vpop.permute.xlu1 %11675  ;;  %v12422_v55 = vld [vmem:[%s18375_s5 + $0x48] ss:$12 sps:$4 sm:$0xff]   ;;  %v13684_v15 = vpack.c.bf16 %v8676_v49, %v8675_v23  ;;  %v8668_v49 = vld [vmem:[%s18371_s10 + $0x2] ss:$0 sm:$0xff] }
 0x868   :  { %v11671_v29 = vpop.permute.xlu0 %11670  ;;  %v11678_v3 = vunpack.i.h.bf16 %v11676_v38  ;;  %v11677_v7 = vunpack.i.l.bf16 %v11676_v38  ;;  %v8680_v38 = vld [vmem:[%s18369_s12 + $0x258] sm:$0xff] }
 0x869   :  { %v11673_v39 = vunpack.i.h.bf16 %v11671_v29  ;;  %v11672_v40 = vunpack.i.l.bf16 %v11671_v29  ;;  %9865 = vmatpush3.bf16.msk.msra.mxu0 %vm13612_vm15, %v9123_v25  ;;  %v8677_v25 = vld [vmem:[%s18369_s12 + $0x240] sm:$0xff]  ;;  %v8682_v29 = vld [vmem:[%s18369_s12 + $0x268] sm:$0xff] }
 0x86a   :  { %9866 = vmatprep.subr.msk.bf16.mxu0 %vm13601_vm12, %v9150_v36  ;;  %v9156_v53 = vpack.c.bf16 %v11678_v3, %v11677_v7  ;;  %v13701_v28 = vpack.c.bf16 %v8678_v34, %v8677_v25  ;;  %v8679_v36 = vld [vmem:[%s18369_s12 + $0x250] sm:$0xff]  ;;  %v13725_v3 = vpack.c.bf16 %v8682_v29, %v8681_v54 }
 0x86b   :  { %v9153_v22 = vpack.c.bf16 %v11673_v39, %v11672_v40  ;;  %v13713_v14 = vpack.c.bf16 %v8680_v38, %v8679_v36  ;;  %v8683_v7 = vld [vmem:[%s18369_s12 + $0x270] sm:$0xff]  ;;  %v8684_v39 = vld [vmem:[%s18369_s12 + $0x278] sm:$0xff] }
 0x86c   :  { %v13737_v40 = vpack.c.bf16 %v8684_v39, %v8683_v7 }
 0x86d   :  { %9867 = vmatpush3.bf16.msk.msra.mxu0 %vm13612_vm15, %v9126_v45  ;;  %10682 = vmatprep.subr.msk.bf16.mxu1 %vm13626_vm5, %v9153_v22 }
 0x86e   :  { %10683 = vmatpush3.bf16.msk.msra.mxu1 %vm13626_vm5, %v9153_v22  ;;  %11031 = vmatprep.subr.bf16.mxu0 %v13630_v8 }
 0x86f   :  { %10684 = vmatprep.subr.msk.bf16.mxu1 %vm13626_vm5, %v9156_v53 }
 0x870   :  { %2685 = vmatmul.mubr.bf16.vlgmr.msra.gmra.mrb[64].mxu0 %v12415_v13 }
 0x871   :  { %2692 = vmatprep.mubr.bf16.mxu0 %v12420_v27  ;;  %11033 = vmatpush3.bf16.msra.mxu0 %v13630_v8 }
 0x872   :  { %10685 = vmatpush3.bf16.msk.msra.mxu1 %vm13626_vm5, %v9156_v53  ;;  %11035 = vmatprep.subr.bf16.mxu0 %v13651_v24 }
 0x873   :  { %11063 = vmatprep.subr.bf16.mxu1 %v13630_v8 }
 0x875   :  { %10687 = vmatmul.mubr.msk.bf16.vlgmr.msra.gmra.mrb[40].mxu1 %vm18396_vm0, %v12419_v44  ;;  %11037 = vmatpush3.bf16.msra.mxu0 %v13651_v24 }
 0x876   :  { %11065 = vmatpush3.bf16.msra.mxu1 %v13630_v8  ;;  %11039 = vmatprep.subr.bf16.mxu0 %v13668_v46 }
 0x877   :  { %11067 = vmatprep.subr.bf16.mxu1 %v13651_v24 }
 0x878   :  { %2693 = vmatmul.mubr.bf16.gmra.mrb[68].mxu0 %v12422_v55  ;;  %v2604_v21 = vpop.permute.xlu1 %2603 }
 0x879   :  { %11041 = vmatpush3.bf16.msra.mxu0 %v13668_v46  ;;  %v2599_v13 = vpop.permute.xlu0 %2598 }
 0x87a   :  { %11069 = vmatpush3.bf16.msra.mxu1 %v13651_v24  ;;  %11043 = vmatprep.subr.bf16.mxu0 %v13684_v15 }
 0x87b   :  { %11071 = vmatprep.subr.bf16.mxu1 %v13668_v46 }
 0x87c   :  { %v2614_v5 = vpop.permute.xlu1 %2613 }
 0x87d   :  { %11045 = vmatpush3.bf16.msra.mxu0 %v13684_v15 }
 0x87e   :  { %11073 = vmatpush3.bf16.msra.mxu1 %v13668_v46  ;;  %11047 = vmatprep.subr.bf16.mxu0 %v13701_v28 }
 0x87f   :  { %11075 = vmatprep.subr.bf16.mxu1 %v13684_v15 }
 0x881   :  { %11049 = vmatpush3.bf16.msra.mxu0 %v13701_v28 }
 0x882   :  { %11077 = vmatpush3.bf16.msra.mxu1 %v13684_v15  ;;  %11051 = vmatprep.subr.bf16.mxu0 %v13713_v14 }
 0x883   :  { %11079 = vmatprep.subr.bf16.mxu1 %v13701_v28 }
 0x885   :  { %11053 = vmatpush3.bf16.msra.mxu0 %v13713_v14 }
 0x886   :  { %11081 = vmatpush3.bf16.msra.mxu1 %v13701_v28  ;;  %11055 = vmatprep.subr.bf16.mxu0 %v13725_v3 }
 0x887   :  { %11083 = vmatprep.subr.bf16.mxu1 %v13713_v14 }
 0x889   :  { %11057 = vmatpush3.bf16.msra.mxu0 %v13725_v3 }
 0x88a   :  { %11085 = vmatpush3.bf16.msra.mxu1 %v13713_v14  ;;  %11059 = vmatprep.subr.bf16.mxu0 %v13737_v40 }
 0x88b   :  { %11087 = vmatprep.subr.bf16.mxu1 %v13725_v3 }
 0x88d   :  { %11061 = vmatpush3.bf16.msra.mxu0 %v13737_v40 }
 0x88e   :  { %11089 = vmatpush3.bf16.msra.mxu1 %v13725_v3 }
 0x88f   :  { %11091 = vmatprep.subr.bf16.mxu1 %v13737_v40 }
 0x892   :  { %11093 = vmatpush3.bf16.msra.mxu1 %v13737_v40 }
 0x943   :  { %v9868_v45 = vpop.f32.mrb[64].mxu0 }
 0x944   :  { %v9869_v22 = vpop.f32.mrb[65].mxu0 }
 0x945   :  { %v9870_v11 = vadd.f32 %v9869_v22, %v9868_v45  ;;  %v9871_v20 = vpop.f32.mrb[66].mxu0  ;;  %v2609_v22 = vpop.permute.xlu0 %2608 }
 0x946   :  { %v9872_v53 = vpop.f32.mrb[67].mxu0 }
 0x947   :  { %v9873_v27 = vadd.f32 %v9872_v53, %v9871_v20  ;;  %v2687_v30 = vadd.f32 %v9870_v11, %v2599_v13 }
 0x948   :  { %v10688_v44 = vpop.f32.mrb[40].mxu1 }
 0x949   :  { %v2735_v23 = vpop.f32.mrb[41].mxu1  ;;  %v2690_v55 = vadd.f32 %v9873_v27, %v2604_v21 }
 0x94a   :  { %v2736_v25 = vadd.f32 %v2735_v23, %v2687_v30  ;;  %v10689_v34 = vpop.f32.mrb[42].mxu1 }
 0x94b   :  { %v9874_v36 = vpop.f32.mrb[68].mxu0  ;;  %v2738_v38 = vpop.f32.mrb[43].mxu1 }
 0x94c   :  { %v2757_v54 = vadd.f32 %v8668_v49, %v2736_v25  ;;  %v2739_v29 = vadd.f32 %v2738_v38, %v2690_v55  ;;  %v9875_v7 = vpop.f32.mrb[69].mxu0 }
 0x94d   :  { %v9876_v39 = vadd.f32 %v9875_v7, %v9874_v36  ;;  %v9877_v45 = vpop.f32.mrb[70].mxu0 }
 0x94e   :  { %v2758_v20 = vadd.f32 %v8668_v49, %v2739_v29  ;;  %v9878_v11 = vpop.f32.mrb[71].mxu0  ;;  %vm2761_vm6 = vcmp.gt.f32.partialorder %v2757_v54, 0.0  ;;  %v2765_v13 = vmul.f32 0.2, %v2757_v54 }
 0x94f   :  { %v2695_v53 = vadd.f32 %v9876_v39, %v2609_v22  ;;  %v9879_v4 = vadd.f32 %v9878_v11, %v9877_v45 }
 0x950   :  { %vm2762_vm9 = vcmp.gt.f32.partialorder %v2758_v20, 0.0  ;;  %v2766_v1 = vmul.f32 0.2, %v2758_v20  ;;  %v13746_v27 = vsel %vm2761_vm6, %v2757_v54, %v2765_v13 }
 0x951   :  { %v2744_v30 = vadd.f32 %v10688_v44, %v2695_v53  ;;  %v2698_v21 = vadd.f32 %v9879_v4, %v2614_v5  ;;  %10722 = vmatprep.mubr.f32.mxu0 %v13746_v27  ;;  %v2877_v23 = vmul.f32 %v13746_v27, %v13746_v27 }
 0x952   :  { %v13751_v55 = vsel %vm2762_vm9, %v2758_v20, %v2766_v1 }
 0x953   :  { %v2747_v25 = vadd.f32 %v10689_v34, %v2698_v21  ;;  %10723 = vmatmul.mubr.f32.vlgmr.msra.gmra.mrb[72].mxu0 %v13751_v55  ;;  %10760 = vmatprep.mubr.f32.mxu1 %v2877_v23  ;;  %v2878_v36 = vmul.f32 %v13751_v55, %v13751_v55  ;;  %v2759_v38 = vadd.f32 %v8668_v49, %v2744_v30  ;;  %v542_v23 = vpop.permute.xlu1 %541 }
 0x955   :  { %10761 = vmatmul.mubr.f32.vlgmr.msra.gmra.mrb[44].mxu1 %v2878_v36  ;;  %vm2763_vm10 = vcmp.gt.f32.partialorder %v2759_v38, 0.0  ;;  %v2767_v54 = vmul.f32 0.2, %v2759_v38  ;;  %v2760_v44 = vadd.f32 %v8668_v49, %v2747_v25  ;;  %v8685_v49 = vld [vmem:[%s18373_s13 + $0x8] sm:$0x3] }
 0x956   :  { %10766 = vmatprep.subr.msk.mxu0 %vm18392_vm14, %v8685_v49 }
 0x957   :  { %v13756_v4 = vsel %vm2763_vm10, %v2759_v38, %v2767_v54  ;;  %vm2764_vm2 = vcmp.gt.f32.partialorder %v2760_v44, 0.0  ;;  %v2768_v5 = vmul.f32 0.2, %v2760_v44  ;;  %10767 = vmatpush3.msk.msra.mxu0 %vm18392_vm14, %v8685_v49  ;;  %v537_v38 = vpop.permute.xlu0 %536 }
 0x958   :  { %10725 = vmatprep.mubr.f32.mxu0 %v13756_v4  ;;  %v2879_v1 = vmul.f32 %v13756_v4, %v13756_v4 }
 0x959   :  { %v13761_v34 = vsel %vm2764_vm2, %v2760_v44, %v2768_v5 }
 0x95a   :  { %10726 = vmatmul.mubr.f32.gmra.mrb[74].mxu0 %v13761_v34  ;;  %10763 = vmatprep.mubr.f32.mxu1 %v2879_v1  ;;  %v2880_v29 = vmul.f32 %v13761_v34, %v13761_v34 }
 0x95c   :  { %10764 = vmatmul.mubr.f32.gmra.mrb[46].mxu1 %v2880_v29 }
 0xa26   :  { %v10724_v7 = vpop.f32.mrb[72].mxu0 }
 0xa27   :  { %v2967_v39 = vmul.f32 %v10724_v7, %v10724_v7  ;;  %v2858_v45 = vpop.f32.mrb[73].mxu0 }
 0xa28   :  { %v2966_v22 = vmul.f32 %v2858_v45, %v2858_v45  ;;  %v10762_v20 = vpop.f32.mrb[44].mxu1 }
 0xa29   :  { %v2971_v11 = vsub.f32 %v10762_v20, %v2967_v39  ;;  %v2947_v13 = vpop.f32.mrb[45].mxu1  ;;  %v552_v39 = vpop.permute.xlu1 %551 }
 0xa2a   :  { %v2970_v53 = vsub.f32 %v2947_v13, %v2966_v22  ;;  %v547_v22 = vpop.permute.xlu0 %546 }
 0xa2b   :  { %v2975_v30 = vmax.f32 %v2971_v11, 0.0 }
 0xa2c   :  { %v2974_v21 = vmax.f32 %v2970_v53, 0.0  ;;  %v990_v53 = vadd.f32 %v13246_v6, %v542_v23  ;;  %v1000_v6 = vadd.f32 %v13264_v17, %v552_v39 }
 0xa2d   :  { %v2979_v25 = vadd.f32 1e-08, %v2975_v30  ;;  %v10727_v36 = vpop.f32.mrb[74].mxu0 }
 0xa2e   :  { %v2978_v54 = vadd.f32 1e-08, %v2974_v21  ;;  %v2969_v44 = vmul.f32 %v10727_v36, %v10727_v36  ;;  %v2868_v5 = vpop.f32.mrb[75].mxu0  ;;  %v985_v21 = vadd.f32 %v13250_v12, %v537_v38  ;;  %v557_v0 = vpop.permute.xlu0 %556  ;;  %v995_v38 = vadd.f32 %v13269_v18, %v547_v22 }
 0xa2f   :  { %12515 = vrsqrt.f32 %v2979_v25  ;;  %v2968_v1 = vmul.f32 %v2868_v5, %v2868_v5  ;;  %v10765_v29 = vpop.f32.mrb[46].mxu1  ;;  %v562_v25 = vpop.permute.xlu1 %561 }
 0xa30   :  { %12517 = vrsqrt.f32 %v2978_v54  ;;  %v2973_v49 = vsub.f32 %v10765_v29, %v2969_v44  ;;  %v2957_v2 = vpop.f32.mrb[47].mxu1 }
 0xa31   :  { %v2972_v61 = vsub.f32 %v2957_v2, %v2968_v1  ;;  %v1010_v2 = vadd.f32 %v13286_v31, %v562_v25 }
 0xa32   :  { %v2977_v63 = vmax.f32 %v2973_v49, 0.0 }
 0xa33   :  { %v2976_v20 = vmax.f32 %v2972_v61, 0.0  ;;  %v1005_v61 = vadd.f32 %v13288_v32, %v557_v0  ;;  %v572_v49 = vpop.permute.xlu1 %571 }
 0xa34   :  { %v2981_v11 = vadd.f32 1e-08, %v2977_v63 }
 0xa35   :  { %v2980_v13 = vadd.f32 1e-08, %v2976_v20 }
 0xa36   :  { %12519 = vrsqrt.f32 %v2981_v11 }
 0xa37   :  { %12521 = vrsqrt.f32 %v2980_v13 }
 0xa39   :  { %v12516_v30 = vpop.eup %12515 }
 0xa3a   :  { %v12518_v62 = vpop.eup %12517  ;;  %v2987_v54 = vmul.f32 %v12516_v30, %v990_v53 }
 0xa3b   :  { %v2986_v44 = vmul.f32 %v12518_v62, %v985_v21  ;;  %v567_v62 = vpop.permute.xlu0 %566 }
 0xa3c   :  { %v2991_v1 = vmul.f32 %v10724_v7, %v2987_v54  ;;  %v1020_v7 = vadd.f32 %v13303_v35, %v572_v49  ;;  %v1015_v0 = vadd.f32 %v13308_v37, %v567_v62  ;;  %v8715_v49 = vld [vmem:[%s18376_s6 + $0x58] sm:$0xff]  ;;  %v431_v62 = vld [vmem:[%s18368_s4 + $0xc8] sm:$0xff] }
 0xa3d   :  { %10768 = vmatprep.mubr.msk.f32.mxu0 %vm18383_vm1, %v2986_v44  ;;  %v2990_v63 = vmul.f32 %v2986_v44, %v2858_v45 }
 0xa3e   :  { %10769 = vmatmul.mubr.msk.f32.vlgmr.msra.gmra.mrb[76].mxu0 %vm18383_vm1, %v2987_v54  ;;  %v2995_v29 = vsub.f32 %v1010_v2, %v2991_v1 }
 0xa3f   :  { %v2994_v23 = vsub.f32 %v1005_v61, %v2990_v63 }
 0xa40   :  { %v12520_v12 = vpop.eup %12519 }
 0xa41   :  { %v12522_v20 = vpop.eup %12521  ;;  %v2989_v11 = vmul.f32 %v12520_v12, %v1000_v6  ;;  %v8712_v6 = vld [vmem:[%s18376_s6 + $0x40] sm:$0xff]  ;;  %v8713_v12 = vld [vmem:[%s18376_s6 + $0x48] sm:$0xff] }
 0xa42   :  { %v2988_v31 = vmul.f32 %v12522_v20, %v995_v38  ;;  %v430_v38 = vld [vmem:[%s18368_s4 + $0xc0] sm:$0xff]  ;;  %v432_v20 = vld [vmem:[%s18368_s4 + $0xd0] sm:$0xff] }
 0xa43   :  { %v2993_v32 = vmul.f32 %v10727_v36, %v2989_v11 }
 0xa44   :  { %10771 = vmatprep.mubr.msk.f32.mxu0 %vm18383_vm1, %v2988_v31  ;;  %v2992_v45 = vmul.f32 %v2988_v31, %v2868_v5  ;;  %v433_v31 = vld [vmem:[%s18368_s4 + $0xd8] sm:$0xff] }
 0xa45   :  { %10772 = vmatmul.mubr.msk.f32.gmra.mrb[78].mxu0 %vm18383_vm1, %v2989_v11  ;;  %v2997_v17 = vsub.f32 %v1020_v7, %v2993_v32  ;;  %v434_v11 = vld [vmem:[%s18368_s4 + $0xe0] sm:$0xff]  ;;  %v436_v7 = vld [vmem:[%s18368_s4 + $0xf0] sm:$0xff]  ;;  %v435_v32 = vld [vmem:[%s18368_s4 + $0xe8] sm:$0xff] }
 0xa46   :  { %10774 = vmatprep.mubr.msk.f32.mxu0 %vm18383_vm1, %v2994_v23  ;;  %v2996_v39 = vsub.f32 %v1015_v0, %v2992_v45  ;;  %v8714_v23 = vld [vmem:[%s18376_s6 + $0x50] sm:$0xff]  ;;  %v437_v0 = vld [vmem:[%s18368_s4 + $0xf8] sm:$0xff] }
 0xa49   :  { %10775 = vmatmul.mubr.msk.f32.gmra.mrb[80].mxu0 %vm18383_vm1, %v2995_v29 }
 0xa4a   :  { %10777 = vmatprep.mubr.msk.f32.mxu0 %vm18383_vm1, %v2996_v39 }
 0xa4d   :  { %10778 = vmatmul.mubr.msk.f32.gmra.mrb[82].mxu0 %vm18383_vm1, %v2997_v17 }
 0xb11   :  { %v10770_v18 = vpop.f32.mrb[76].mxu0 }
 0xb12   :  { %v3091_v35 = vpop.f32.mrb[77].mxu0  ;;  %v3131_v37 = vmul.f32 %v10770_v18, %v13751_v55 }
 0xb13   :  { %v3130_v5 = vmul.f32 %v3091_v35, %v13746_v27 }
 0xb18   :  { %v10773_v36 = vpop.f32.mrb[78].mxu0 }
 0xb19   :  { %v3101_v22 = vpop.f32.mrb[79].mxu0  ;;  %v3133_v25 = vmul.f32 %v10773_v36, %v13761_v34  ;;  %v12426_v34 = vld [vmem:[%s18375_s5 + $0x68] ss:$12 sps:$4 sm:$0xff]  }
 0xb1a   :  { %v3132_v54 = vmul.f32 %v3101_v22, %v13756_v4  ;;  %v12425_v4 = vld [vmem:[%s18375_s5 + $0x64] ss:$12 sps:$4 sm:$0xff]   ;;  %10784 = vmatprep.mubr.msk.bf16.mxu0 %vm18396_vm0, %v12426_v34 }
 0xb1b   :  { %3430 = vmatprep.mubr.bf16.mxu1 %v12425_v4 }
 0xb1c   :  { %v10776_v13 = vpop.f32.mrb[80].mxu0 }
 0xb1d   :  { %v3135_v53 = vadd.f32 %v10776_v13, %v3131_v37  ;;  %v3111_v30 = vpop.f32.mrb[81].mxu0 }
 0xb1e   :  { %v3134_v21 = vadd.f32 %v3130_v5, %v3111_v30 }
 0xb20   :  { %v10779_v44 = vpop.f32.mrb[82].mxu0  ;;  %v11679_v2 = vpack.i.bf16 %v3135_v53, %v3134_v21  ;;  %v9183_v1 = vpack.c.bf16 %v3135_v53, %v3134_v21 }
 0xb21   :  { %v3137_v61 = vadd.f32 %v10779_v44, %v3133_v25  ;;  %v3121_v63 = vpop.f32.mrb[83].mxu0 }
 0xb22   :  { %v3136_v29 = vadd.f32 %v3132_v54, %v3121_v63  ;;  %11680 = vrot.lane.b32.xlu0 %v11679_v2, %s12556_s23  ;;  %9933 = vmatprep.subr.msk.bf16.mxu1 %vm13470_vm11, %v9183_v1 }
 0xb24   :  { %v11689_v27 = vpack.i.bf16 %v3137_v61, %v3136_v29  ;;  %v9186_v55 = vpack.c.bf16 %v3137_v61, %v3136_v29 }
 0xb26   :  { %11685 = vrot.lane.b32.xlu0 %v11679_v2, %s12549_s21  ;;  %11690 = vrot.lane.b32.xlu1 %v11689_v27, %s12556_s23 }
 0xb2a   :  { %11700 = vrot.lane.b32.xlu0 %v11689_v27, %s12549_s21  ;;  %11695 = vrot.lane.b32.xlu1 %v11679_v2, %s12557_s24 }
 0xb2e   :  { %11705 = vrot.lane.b32.xlu0 %v11679_v2, %s12559_s1  ;;  %11710 = vrot.lane.b32.xlu1 %v11689_v27, %s12557_s24  ;;  %s12567_s24 = smov 111  }
 0xb32   :  { %11720 = vrot.lane.b32.xlu0 %v11689_v27, %s12559_s1  ;;  %11715 = vrot.lane.b32.xlu1 %v11679_v2, %s12558_s25 }
 0xb36   :  { %11725 = vrot.lane.b32.xlu0 %v11679_v2, %s12560_s27  ;;  %11730 = vrot.lane.b32.xlu1 %v11689_v27, %s12558_s25 }
 0xb3a   :  { %11740 = vrot.lane.b32.xlu0 %v11689_v27, %s12560_s27  ;;  %11735 = vrot.lane.b32.xlu1 %v11679_v2, %s12554_s26 }
 0xb3e   :  { %11750 = vrot.lane.b32.xlu0 %v11679_v2, %s12561_s0  ;;  %11745 = vrot.lane.b32.xlu1 %v11689_v27, %s12554_s26 }
 0xb42   :  { %3344 = vperm.xlu0 %11517, %v8712_v6   ;;  %11755 = vrot.lane.b32.xlu1 %v11689_v27, %s12561_s0  ;;  %s12563_s0 = smov 16  }
 0xb46   :  { %3354 = vperm.xlu0 %11517, %v8714_v23   ;;  %3349 = vperm.xlu1 %11518, %v8713_v12  }
 0xb4a   :  { %576 = vperm.xlu0 %11517, %v430_v38   ;;  %3359 = vperm.xlu1 %11518, %v8715_v49  }
 0xb4e   :  { %586 = vperm.xlu0 %11517, %v432_v20   ;;  %581 = vperm.xlu1 %11518, %v431_v62  }
 0xb52   :  { %596 = vperm.xlu0 %11517, %v434_v11   ;;  %591 = vperm.xlu1 %11518, %v433_v31  }
 0xb56   :  { %606 = vperm.xlu0 %11517, %v436_v7   ;;  %601 = vperm.xlu1 %11518, %v435_v32  }
 0xb5a   :  { %611 = vperm.xlu1 %11518, %v437_v0  }
 0xb94   :  { %v11681_v45 = vpop.permute.xlu0 %11680 }
 0xb95   :  { %v11683_v17 = vunpack.i.h.bf16 %v11681_v45  ;;  %v11682_v39 = vunpack.i.l.bf16 %v11681_v45 }
 0xb97   :  { %v9159_v18 = vpack.c.bf16 %v11683_v17, %v11682_v39 }
 0xb98   :  { %v11686_v35 = vpop.permute.xlu0 %11685  ;;  %v11691_v36 = vpop.permute.xlu1 %11690 }
 0xb99   :  { %v11688_v22 = vunpack.i.h.bf16 %v11686_v35  ;;  %v11687_v37 = vunpack.i.l.bf16 %v11686_v35  ;;  %v11693_v5 = vunpack.i.h.bf16 %v11691_v36  ;;  %v11692_v13 = vunpack.i.l.bf16 %v11691_v36  ;;  %9934 = vmatpush3.bf16.msk.msra.mxu1 %vm13543_vm13, %v9159_v18 }
 0xb9a   :  { %9935 = vmatprep.subr.msk.bf16.mxu1 %vm13470_vm11, %v9186_v55 }
 0xb9b   :  { %v9189_v53 = vpack.c.bf16 %v11688_v22, %v11687_v37  ;;  %v9162_v30 = vpack.c.bf16 %v11693_v5, %v11692_v13 }
 0xb9c   :  { %v11701_v21 = vpop.permute.xlu0 %11700  ;;  %v11696_v25 = vpop.permute.xlu1 %11695 }
 0xb9d   :  { %v11703_v54 = vunpack.i.h.bf16 %v11701_v21  ;;  %v11702_v44 = vunpack.i.l.bf16 %v11701_v21  ;;  %v11698_v2 = vunpack.i.h.bf16 %v11696_v25  ;;  %v11697_v1 = vunpack.i.l.bf16 %v11696_v25  ;;  %9936 = vmatpush3.bf16.msk.msra.mxu1 %vm13543_vm13, %v9162_v30 }
 0xb9e   :  { %9937 = vmatprep.subr.msk.bf16.mxu1 %vm13557_vm3, %v9189_v53 }
 0xb9f   :  { %v9192_v61 = vpack.c.bf16 %v11703_v54, %v11702_v44  ;;  %v9165_v63 = vpack.c.bf16 %v11698_v2, %v11697_v1 }
 0xba0   :  { %v11706_v29 = vpop.permute.xlu0 %11705  ;;  %v11711_v27 = vpop.permute.xlu1 %11710 }
 0xba1   :  { %v11708_v10 = vunpack.i.h.bf16 %v11706_v29  ;;  %v11707_v55 = vunpack.i.l.bf16 %v11706_v29  ;;  %v11713_v4 = vunpack.i.h.bf16 %v11711_v27  ;;  %v11712_v34 = vunpack.i.l.bf16 %v11711_v27  ;;  %9938 = vmatpush3.bf16.msk.msra.mxu1 %vm13568_vm4, %v9165_v63 }
 0xba2   :  { %9939 = vmatprep.subr.msk.bf16.mxu1 %vm13557_vm3, %v9192_v61  ;;  %v12423_v61 = vld [vmem:[%s18375_s5 + $0x60] ss:$12 sps:$4 sm:$0xff]  }
 0xba3   :  { %v9195_v6 = vpack.c.bf16 %v11708_v10, %v11707_v55  ;;  %v9168_v9 = vpack.c.bf16 %v11713_v4, %v11712_v34  ;;  %v12430_v10 = vld [vmem:[%s18375_s5 + $0x78] ss:$12 sps:$4 sm:$0xff]  }
 0xba4   :  { %v11721_v23 = vpop.permute.xlu0 %11720  ;;  %v11716_v12 = vpop.permute.xlu1 %11715 }
 0xba5   :  { %v11723_v38 = vunpack.i.h.bf16 %v11721_v23  ;;  %v11722_v49 = vunpack.i.l.bf16 %v11721_v23  ;;  %v11718_v20 = vunpack.i.h.bf16 %v11716_v12  ;;  %v11717_v62 = vunpack.i.l.bf16 %v11716_v12  ;;  %9940 = vmatpush3.bf16.msk.msra.mxu1 %vm13568_vm4, %v9168_v9 }
 0xba6   :  { %9941 = vmatprep.subr.msk.bf16.mxu1 %vm13579_vm7, %v9195_v6 }
 0xba7   :  { %v9198_v11 = vpack.c.bf16 %v11723_v38, %v11722_v49  ;;  %v9171_v31 = vpack.c.bf16 %v11718_v20, %v11717_v62 }
 0xba8   :  { %v11726_v7 = vpop.permute.xlu0 %11725  ;;  %v11731_v32 = vpop.permute.xlu1 %11730 }
 0xba9   :  { %v11728_v26 = vunpack.i.h.bf16 %v11726_v7  ;;  %v11727_v0 = vunpack.i.l.bf16 %v11726_v7  ;;  %v11733_v45 = vunpack.i.h.bf16 %v11731_v32  ;;  %v11732_v17 = vunpack.i.l.bf16 %v11731_v32  ;;  %9942 = vmatpush3.bf16.msk.msra.mxu1 %vm13590_vm8, %v9171_v31 }
 0xbaa   :  { %9943 = vmatprep.subr.msk.bf16.mxu1 %vm13579_vm7, %v9198_v11 }
 0xbab   :  { %v9201_v39 = vpack.c.bf16 %v11728_v26, %v11727_v0  ;;  %v9174_v48 = vpack.c.bf16 %v11733_v45, %v11732_v17 }
 0xbac   :  { %v11741_v18 = vpop.permute.xlu0 %11740  ;;  %v11736_v35 = vpop.permute.xlu1 %11735 }
 0xbad   :  { %v11743_v36 = vunpack.i.h.bf16 %v11741_v18  ;;  %v11742_v22 = vunpack.i.l.bf16 %v11741_v18  ;;  %v11738_v37 = vunpack.i.h.bf16 %v11736_v35  ;;  %v11737_v5 = vunpack.i.l.bf16 %v11736_v35  ;;  %9944 = vmatpush3.bf16.msk.msra.mxu1 %vm13590_vm8, %v9174_v48 }
 0xbae   :  { %9945 = vmatprep.subr.msk.bf16.mxu1 %vm13601_vm12, %v9201_v39 }
 0xbaf   :  { %v9204_v13 = vpack.c.bf16 %v11743_v36, %v11742_v22  ;;  %v9177_v53 = vpack.c.bf16 %v11738_v37, %v11737_v5 }
 0xbb0   :  { %v11751_v30 = vpop.permute.xlu0 %11750  ;;  %v11746_v21 = vpop.permute.xlu1 %11745 }
 0xbb1   :  { %v11753_v51 = vunpack.i.h.bf16 %v11751_v30  ;;  %v11752_v25 = vunpack.i.l.bf16 %v11751_v30  ;;  %v11748_v54 = vunpack.i.h.bf16 %v11746_v21  ;;  %v11747_v44 = vunpack.i.l.bf16 %v11746_v21  ;;  %9946 = vmatpush3.bf16.msk.msra.mxu1 %vm13612_vm15, %v9177_v53 }
 0xbb2   :  { %9947 = vmatprep.subr.msk.bf16.mxu1 %vm13601_vm12, %v9204_v13 }
 0xbb3   :  { %v9207_v2 = vpack.c.bf16 %v11753_v51, %v11752_v25  ;;  %v9180_v41 = vpack.c.bf16 %v11748_v54, %v11747_v44 }
 0xbb4   :  { %v11756_v1 = vpop.permute.xlu1 %11755 }
 0xbb5   :  { %v11758_v63 = vunpack.i.h.bf16 %v11756_v1  ;;  %v11757_v29 = vunpack.i.l.bf16 %v11756_v1  ;;  %9948 = vmatpush3.bf16.msk.msra.mxu1 %vm13612_vm15, %v9180_v41  ;;  %10780 = vmatprep.subr.msk.bf16.mxu0 %vm13626_vm5, %v9207_v2  ;;  %v18508_v41 = vmov 0   ;;  %v8741_v1 = vld [vmem:[%s18373_s13 + $0x8] sm:$0x3] }
 0xbb6   :  { %10781 = vmatpush3.bf16.msk.msra.mxu0 %vm13626_vm5, %v9207_v2  ;;  %11127 = vmatprep.subr.bf16.mxu1 %v13630_v8 }
 0xbb7   :  { %v9210_v27 = vpack.c.bf16 %v11758_v63, %v11757_v29  ;;  %v12434_v63 = vld [vmem:[%s18377_s14 + $0x108] ss:$16 sps:$4 sm:$0xff]   ;;  %v12436_v29 = vld [vmem:[%s18377_s14 + $0x10c] ss:$16 sps:$4 sm:$0xff]  }
 0xbb8   :  { %3431 = vmatmul.mubr.bf16.vlgmr.msra.gmra.mrb[48].mxu1 %v12423_v61  ;;  %v12433_v61 = vld [vmem:[%s18377_s14 + $0x104] ss:$16 sps:$4 sm:$0xff]  }
 0xbb9   :  { %10782 = vmatprep.subr.msk.bf16.mxu0 %vm13626_vm5, %v9210_v27  ;;  %3438 = vmatprep.mubr.bf16.mxu1 %v12428_v33  ;;  %v12442_v33 = vld [vmem:[%s18377_s14 + $0x12c] ss:$16 sps:$4 sm:$0xff]  }
 0xbba   :  { %10783 = vmatpush3.bf16.msk.msra.mxu0 %vm13626_vm5, %v9210_v27  ;;  %11129 = vmatpush3.bf16.msra.mxu1 %v13630_v8  ;;  %v12440_v27 = vld [vmem:[%s18377_s14 + $0x128] ss:$16 sps:$4 sm:$0xff]  }
 0xbbb   :  { %11095 = vmatprep.subr.bf16.mxu0 %v13630_v8  ;;  %11131 = vmatprep.subr.bf16.mxu1 %v13651_v24 }
 0xbbd   :  { %10785 = vmatmul.mubr.msk.bf16.vlgmr.msra.gmra.mrb[84].mxu0 %vm18396_vm0, %v12427_v19  ;;  %v12448_v19 = vld [vmem:[%s18377_s14 + $0x14c] ss:$16 sps:$4 sm:$0xff]  }
 0xbbe   :  { %11097 = vmatpush3.bf16.msra.mxu0 %v13630_v8  ;;  %11133 = vmatpush3.bf16.msra.mxu1 %v13651_v24 }
 0xbbf   :  { %11099 = vmatprep.subr.bf16.mxu0 %v13651_v24  ;;  %11135 = vmatprep.subr.bf16.mxu1 %v13668_v46 }
 0xbc0   :  { %3439 = vmatmul.mubr.bf16.gmra.mrb[52].mxu1 %v12430_v10  ;;  %v12446_v10 = vld [vmem:[%s18377_s14 + $0x148] ss:$16 sps:$4 sm:$0xff]  }
 0xbc2   :  { %11101 = vmatpush3.bf16.msra.mxu0 %v13651_v24  ;;  %11137 = vmatpush3.bf16.msra.mxu1 %v13668_v46 }
 0xbc3   :  { %11103 = vmatprep.subr.bf16.mxu0 %v13668_v46  ;;  %11139 = vmatprep.subr.bf16.mxu1 %v13684_v15 }
 0xbc5   :  { %v3350_v4 = vpop.permute.xlu1 %3349 }
 0xbc6   :  { %11105 = vmatpush3.bf16.msra.mxu0 %v13668_v46  ;;  %11141 = vmatpush3.bf16.msra.mxu1 %v13684_v15 }
 0xbc7   :  { %11107 = vmatprep.subr.bf16.mxu0 %v13684_v15  ;;  %11143 = vmatprep.subr.bf16.mxu1 %v13701_v28 }
 0xbc9   :  { %v3360_v39 = vpop.permute.xlu1 %3359 }
 0xbca   :  { %11109 = vmatpush3.bf16.msra.mxu0 %v13684_v15  ;;  %11145 = vmatpush3.bf16.msra.mxu1 %v13701_v28  ;;  %v3345_v15 = vpop.permute.xlu0 %3344 }
 0xbcb   :  { %11111 = vmatprep.subr.bf16.mxu0 %v13701_v28  ;;  %11147 = vmatprep.subr.bf16.mxu1 %v13713_v14 }
 0xbce   :  { %11113 = vmatpush3.bf16.msra.mxu0 %v13701_v28  ;;  %11149 = vmatpush3.bf16.msra.mxu1 %v13713_v14  ;;  %v3355_v7 = vpop.permute.xlu0 %3354 }
 0xbcf   :  { %11115 = vmatprep.subr.bf16.mxu0 %v13713_v14  ;;  %11151 = vmatprep.subr.bf16.mxu1 %v13725_v3 }
 0xbd2   :  { %11117 = vmatpush3.bf16.msra.mxu0 %v13713_v14  ;;  %11153 = vmatpush3.bf16.msra.mxu1 %v13725_v3 }
 0xbd3   :  { %11119 = vmatprep.subr.bf16.mxu0 %v13725_v3  ;;  %11155 = vmatprep.subr.bf16.mxu1 %v13737_v40 }
 0xbd6   :  { %11121 = vmatpush3.bf16.msra.mxu0 %v13725_v3  ;;  %11157 = vmatpush3.bf16.msra.mxu1 %v13737_v40  ;;  %v8724_v3 = vld [vmem:[%s18371_s10 + $0x3] ss:$0 sm:$0xff] }
 0xbd7   :  { %11123 = vmatprep.subr.bf16.mxu0 %v13737_v40  ;;  %4130 = vmatprep.subr.bf16.mxu1 %v12436_v29 }
 0xbda   :  { %11125 = vmatpush3.bf16.msra.mxu0 %v13737_v40 }
 0xbdb   :  { %10864 = vmatprep.subr.msk.mxu0 %vm18392_vm14, %v8741_v1 }
 0xc8b   :  { %v9949_v16 = vpop.f32.mrb[48].mxu1 }
 0xc8c   :  { %v9950_v8 = vpop.f32.mrb[49].mxu1 }
 0xc8d   :  { %v9951_v24 = vadd.f32 %v9950_v8, %v9949_v16  ;;  %v9952_v46 = vpop.f32.mrb[50].mxu1  ;;  %v12454_v16 = vld [vmem:[%s18377_s14 + $0x16c] ss:$16 sps:$4 sm:$0xff]   ;;  %v12452_v8 = vld [vmem:[%s18377_s14 + $0x168] ss:$16 sps:$4 sm:$0xff]  }
 0xc8e   :  { %v9953_v28 = vpop.f32.mrb[51].mxu1 }
 0xc8f   :  { %v9954_v14 = vadd.f32 %v9953_v28, %v9952_v46  ;;  %v3433_v55 = vadd.f32 %v9951_v24, %v3345_v15 }
 0xc90   :  { %v10786_v34 = vpop.f32.mrb[84].mxu0 }
 0xc91   :  { %v3481_v6 = vpop.f32.mrb[85].mxu0  ;;  %v3436_v9 = vadd.f32 %v9954_v14, %v3350_v4 }
 0xc92   :  { %v3482_v23 = vadd.f32 %v3481_v6, %v3433_v55  ;;  %v10787_v12 = vpop.f32.mrb[86].mxu0 }
 0xc93   :  { %v9955_v38 = vpop.f32.mrb[52].mxu1  ;;  %v3484_v40 = vpop.f32.mrb[87].mxu0 }
 0xc94   :  { %v3503_v49 = vadd.f32 %v8724_v3, %v3482_v23  ;;  %v3485_v20 = vadd.f32 %v3484_v40, %v3436_v9  ;;  %v9956_v62 = vpop.f32.mrb[53].mxu1  ;;  %v582_v9 = vpop.permute.xlu1 %581 }
 0xc95   :  { %v9957_v11 = vadd.f32 %v9956_v62, %v9955_v38  ;;  %v9958_v31 = vpop.f32.mrb[54].mxu1  ;;  %v577_v38 = vpop.permute.xlu0 %576 }
 0xc96   :  { %v3504_v32 = vadd.f32 %v8724_v3, %v3485_v20  ;;  %v9959_v26 = vpop.f32.mrb[55].mxu1  ;;  %vm3507_vm11 = vcmp.gt.f32.partialorder %v3503_v49, 0.0  ;;  %v3511_v0 = vmul.f32 0.2, %v3503_v49 }
 0xc97   :  { %v3441_v45 = vadd.f32 %v9957_v11, %v3355_v7  ;;  %v9960_v17 = vadd.f32 %v9959_v26, %v9958_v31 }
 0xc98   :  { %v3512_v48 = vmul.f32 0.2, %v3504_v32  ;;  %v13938_v18 = vsel %vm3507_vm11, %v3503_v49, %v3511_v0  ;;  %vm3508_vm13 = vcmp.gt.f32.partialorder %v3504_v32, 0.0  ;;  %v592_v0 = vpop.permute.xlu1 %591 }
 0xc99   :  { %v3490_v35 = vadd.f32 %v10786_v34, %v3441_v45  ;;  %v3444_v36 = vadd.f32 %v9960_v17, %v3360_v39  ;;  %10820 = vmatprep.mubr.f32.mxu0 %v13938_v18  ;;  %v3621_v22 = vmul.f32 %v13938_v18, %v13938_v18  ;;  %v587_v17 = vpop.permute.xlu0 %586 }
 0xc9a   :  { %v13943_v37 = vsel %vm3508_vm13, %v3504_v32, %v3512_v48 }
 0xc9b   :  { %v3493_v5 = vadd.f32 %v10787_v12, %v3444_v36  ;;  %10821 = vmatmul.mubr.f32.vlgmr.msra.gmra.mrb[88].mxu0 %v13943_v37  ;;  %v3622_v13 = vmul.f32 %v13943_v37, %v13943_v37  ;;  %10858 = vmatprep.mubr.f32.mxu1 %v3621_v22  ;;  %v3505_v53 = vadd.f32 %v8724_v3, %v3490_v35 }
 0xc9c   :  { %10865 = vmatpush3.msk.msra.mxu0 %vm18392_vm14, %v8741_v1  ;;  %v1030_v35 = vadd.f32 %v13317_v42, %v582_v9  ;;  %v1025_v22 = vadd.f32 %v13319_v43, %v577_v38  ;;  %v12439_v1 = vld [vmem:[%s18377_s14 + $0x124] ss:$16 sps:$4 sm:$0xff]   ;;  %v12464_v38 = vld [vmem:[%s18377_s14 + $0x1a8] ss:$16 sps:$4 sm:$0xff]  }
 0xc9d   :  { %10859 = vmatmul.mubr.f32.vlgmr.msra.gmra.mrb[56].mxu1 %v3622_v13  ;;  %vm3509_vm3 = vcmp.gt.f32.partialorder %v3505_v53, 0.0  ;;  %v3513_v30 = vmul.f32 0.2, %v3505_v53  ;;  %v3506_v21 = vadd.f32 %v8724_v3, %v3493_v5  ;;  %4077 = vmatprep.subr.bf16.mxu0 %v12433_v61  ;;  %v602_v5 = vpop.permute.xlu1 %601  ;;  %v12463_v9 = vld [vmem:[%s18377_s14 + $0x1a4] ss:$16 sps:$4 sm:$0xff]  }
 0xc9e   :  { %4131 = vmatpush1.bf16.msra.mxu1 %v12434_v63  ;;  %v1040_v63 = vadd.f32 %v13321_v47, %v592_v0 }
 0xc9f   :  { %v13948_v51 = vsel %vm3509_vm3, %v3505_v53, %v3513_v30  ;;  %vm3510_vm4 = vcmp.gt.f32.partialorder %v3506_v21, 0.0  ;;  %v3514_v25 = vmul.f32 0.2, %v3506_v21  ;;  %4132 = vmatprep.subr.bf16.mxu1 %v12442_v33  ;;  %v597_v53 = vpop.permute.xlu0 %596 }
 0xca0   :  { %10823 = vmatprep.mubr.f32.mxu0 %v13948_v51  ;;  %v3623_v54 = vmul.f32 %v13948_v51, %v13948_v51  ;;  %v1045_v42 = vadd.f32 %v13327_v56, %v597_v53  ;;  %v12445_v56 = vld [vmem:[%s18377_s14 + $0x144] ss:$16 sps:$4 sm:$0xff]  }
 0xca1   :  { %v13953_v44 = vsel %vm3510_vm4, %v3506_v21, %v3514_v25  ;;  %v12431_v25 = vld [vmem:[%s18377_s14 + $0x100] ss:$16 sps:$4 sm:$0xff]  }
 0xca2   :  { %10824 = vmatmul.mubr.f32.gmra.mrb[90].mxu0 %v13953_v44  ;;  %10861 = vmatprep.mubr.f32.mxu1 %v3623_v54  ;;  %v3624_v2 = vmul.f32 %v13953_v44, %v13953_v44  ;;  %v1050_v54 = vadd.f32 %v13325_v52, %v602_v5  ;;  %v12437_v52 = vld [vmem:[%s18377_s14 + $0x120] ss:$16 sps:$4 sm:$0xff]  }
 0xca3   :  { %4133 = vmatpush1.bf16.msra.mxu1 %v12440_v27  ;;  %v1035_v27 = vadd.f32 %v13323_v50, %v587_v17 }
 0xca4   :  { %10862 = vmatmul.mubr.f32.gmra.mrb[58].mxu1 %v3624_v2  ;;  %4134 = vmatprep.subr.bf16.mxu1 %v12448_v19  ;;  %v612_v19 = vpop.permute.xlu1 %611 }
 0xca5   :  { %4162 = vmatprep.mubr.bf16.mxu1 %v18508_v41  ;;  %v1060_v47 = vadd.f32 %v13329_v57, %v612_v19 }
 0xca7   :  { %4135 = vmatpush1.bf16.msra.mxu1 %v12446_v10 }
 0xca8   :  { %4136 = vmatprep.subr.bf16.mxu1 %v12454_v16  ;;  %v607_v16 = vpop.permute.xlu0 %606 }
 0xca9   :  { %v1055_v50 = vadd.f32 %v13331_v58, %v607_v16  ;;  %v12455_v58 = vld [vmem:[%s18377_s14 + $0x180] ss:$16 sps:$4 sm:$0xff]  }
 0xcab   :  { %4137 = vmatpush1.bf16.msra.mxu1 %v12452_v8 }
 0xd6e   :  { %v10822_v24 = vpop.f32.mrb[88].mxu0 }
 0xd6f   :  { %v3711_v46 = vmul.f32 %v10822_v24, %v10822_v24  ;;  %v3602_v15 = vpop.f32.mrb[89].mxu0 }
 0xd70   :  { %v3710_v28 = vmul.f32 %v3602_v15, %v3602_v15  ;;  %v10860_v14 = vpop.f32.mrb[56].mxu1 }
 0xd71   :  { %v3715_v55 = vsub.f32 %v10860_v14, %v3711_v46  ;;  %v3691_v4 = vpop.f32.mrb[57].mxu1  ;;  %v12451_v14 = vld [vmem:[%s18377_s14 + $0x164] ss:$16 sps:$4 sm:$0xff]  }
 0xd72   :  { %v3714_v34 = vsub.f32 %v3691_v4, %v3710_v28  ;;  %v12449_v4 = vld [vmem:[%s18377_s14 + $0x160] ss:$16 sps:$4 sm:$0xff]  }
 0xd73   :  { %v3719_v6 = vmax.f32 %v3715_v55, 0.0 }
 0xd74   :  { %v3718_v3 = vmax.f32 %v3714_v34, 0.0  ;;  %v12457_v34 = vld [vmem:[%s18377_s14 + $0x184] ss:$16 sps:$4 sm:$0xff]  }
 0xd75   :  { %v3723_v23 = vadd.f32 1e-08, %v3719_v6  ;;  %v10825_v12 = vpop.f32.mrb[90].mxu0  ;;  %v12458_v6 = vld [vmem:[%s18377_s14 + $0x188] ss:$16 sps:$4 sm:$0xff]  }
 0xd76   :  { %v3722_v40 = vadd.f32 1e-08, %v3718_v3  ;;  %v3713_v49 = vmul.f32 %v10825_v12, %v10825_v12  ;;  %v3612_v20 = vpop.f32.mrb[91].mxu0  ;;  %v12460_v3 = vld [vmem:[%s18377_s14 + $0x18c] ss:$16 sps:$4 sm:$0xff]  }
 0xd77   :  { %12523 = vrsqrt.f32 %v3723_v23  ;;  %v3712_v62 = vmul.f32 %v3612_v20, %v3612_v20  ;;  %v10863_v11 = vpop.f32.mrb[58].mxu1  ;;  %v12466_v23 = vld [vmem:[%s18377_s14 + $0x1ac] ss:$16 sps:$4 sm:$0xff]   ;;  %4138 = vmatprep.subr.bf16.mxu1 %v12460_v3 }
 0xd78   :  { %12525 = vrsqrt.f32 %v3722_v40  ;;  %v3717_v31 = vsub.f32 %v10863_v11, %v3713_v49  ;;  %v3701_v7 = vpop.f32.mrb[59].mxu1  ;;  %4139 = vmatpush1.bf16.msra.mxu1 %v12458_v6  ;;  %v12467_v40 = vld [vmem:[%s18377_s14 + $0x1c0] ss:$16 sps:$4 sm:$0xff]   ;;  %v12469_v49 = vld [vmem:[%s18377_s14 + $0x1c4] ss:$16 sps:$4 sm:$0xff]  }
 0xd79   :  { %v3716_v32 = vsub.f32 %v3701_v7, %v3712_v62  ;;  %4140 = vmatprep.subr.bf16.mxu1 %v12466_v23  ;;  %v12472_v62 = vld [vmem:[%s18377_s14 + $0x1cc] ss:$16 sps:$4 sm:$0xff]   ;;  %v12473_v11 = vld [vmem:[%s18377_s14 + $0x1e0] ss:$16 sps:$4 sm:$0xff]   ;;  %v12476_v7 = vld [vmem:[%s18377_s14 + $0x1e8] ss:$16 sps:$4 sm:$0xff]   ;;  %v4215_v23 = vlaneseq }
 0xd7a   :  { %v3721_v26 = vmax.f32 %v3717_v31, 0.0  ;;  %v12475_v31 = vld [vmem:[%s18377_s14 + $0x1e4] ss:$16 sps:$4 sm:$0xff]  }
 0xd7b   :  { %v3720_v45 = vmax.f32 %v3716_v32, 0.0  ;;  %v12478_v32 = vld [vmem:[%s18377_s14 + $0x1ec] ss:$16 sps:$4 sm:$0xff]  }
 0xd7c   :  { %v3725_v39 = vadd.f32 1e-08, %v3721_v26  ;;  %4141 = vmatpush1.bf16.msra.mxu1 %v12464_v38  ;;  %v14270_v38 = vshrl.u32 %v4215_v23, 7 }
 0xd7d   :  { %v3724_v48 = vadd.f32 1e-08, %v3720_v45  ;;  %4142 = vmatprep.subr.bf16.mxu1 %v12472_v62  ;;  %v14287_v62 = vand.u32 127, %v4215_v23 }
 0xd7e   :  { %12527 = vrsqrt.f32 %v3725_v39  ;;  %18525 = vst [vmem:[#allocation35_spill] sm:$0xff] %v14270_v38 }
 0xd7f   :  { %12529 = vrsqrt.f32 %v3724_v48  ;;  %18526 = vst [vmem:[#allocation36_spill] sm:$0xff] %v14287_v62  ;;  %vm18408_vm8 = vcmp.lt.s32.totalorder %v14287_v62, 17 }
 0xd81   :  { %v12524_v36 = vpop.eup %12523 }
 0xd82   :  { %v12526_v13 = vpop.eup %12525  ;;  %v3731_v30 = vmul.f32 %v12524_v36, %v1030_v35 }
 0xd83   :  { %v3730_v21 = vmul.f32 %v12526_v13, %v1025_v22 }
 0xd84   :  { %v3735_v2 = vmul.f32 %v10822_v24, %v3731_v30 }
 0xd85   :  { %10866 = vmatprep.mubr.msk.f32.mxu0 %vm18383_vm1, %v3730_v21  ;;  %v3734_v43 = vmul.f32 %v3730_v21, %v3602_v15  ;;  %v12443_v15 = vld [vmem:[%s18377_s14 + $0x140] ss:$16 sps:$4 sm:$0xff]  }
 0xd86   :  { %10867 = vmatmul.mubr.msk.f32.vlgmr.msra.gmra.mrb[92].mxu0 %vm18383_vm1, %v3731_v30  ;;  %v3739_v61 = vsub.f32 %v1050_v54, %v3735_v2 }
 0xd87   :  { %v3738_v29 = vsub.f32 %v1045_v42, %v3734_v43  ;;  %4078 = vmatpush1.bf16.msra.mxu0 %v12431_v25 }
 0xd88   :  { %v12528_v33 = vpop.eup %12527  ;;  %4079 = vmatprep.subr.bf16.mxu0 %v12439_v1 }
 0xd89   :  { %v12530_v10 = vpop.eup %12529  ;;  %v3733_v8 = vmul.f32 %v12528_v33, %v1040_v63 }
 0xd8a   :  { %v3732_v24 = vmul.f32 %v12530_v10, %v1035_v27 }
 0xd8b   :  { %v3737_v46 = vmul.f32 %v10825_v12, %v3733_v8  ;;  %4080 = vmatpush1.bf16.msra.mxu0 %v12437_v52  ;;  %v12461_v12 = vld [vmem:[%s18377_s14 + $0x1a0] ss:$16 sps:$4 sm:$0xff]  }
 0xd8c   :  { %10869 = vmatprep.mubr.msk.f32.mxu0 %vm18383_vm1, %v3732_v24  ;;  %v3736_v28 = vmul.f32 %v3732_v24, %v3612_v20  ;;  %4081 = vmatprep.subr.bf16.mxu0 %v12445_v56  ;;  %v12470_v20 = vld [vmem:[%s18377_s14 + $0x1c8] ss:$16 sps:$4 sm:$0xff]   ;;  %s12562_s14 = smov 17  }
 0xd8d   :  { %10870 = vmatmul.mubr.msk.f32.gmra.mrb[94].mxu0 %vm18383_vm1, %v3733_v8  ;;  %v3741_v55 = vsub.f32 %v1060_v47, %v3737_v46  ;;  %4143 = vmatpush1.bf16.msra.mxu1 %v12470_v20 }
 0xd8e   :  { %10872 = vmatprep.mubr.msk.f32.mxu0 %vm18383_vm1, %v3738_v29  ;;  %v3740_v57 = vsub.f32 %v1055_v50, %v3736_v28  ;;  %4144 = vmatprep.subr.bf16.mxu1 %v12478_v32  ;;  %v14299_v32 = vsub.s32 2, %v14270_v38 }
 0xd8f   :  { %4082 = vmatpush1.bf16.msra.mxu0 %v12443_v15 }
 0xd90   :  { %4083 = vmatprep.subr.bf16.mxu0 %v12451_v14  ;;  %18528 = vst [vmem:[#allocation38_spill] sm:$0xff] %v14299_v32 }
 0xd91   :  { %10873 = vmatmul.mubr.msk.f32.gmra.mrb[96].mxu0 %vm18383_vm1, %v3739_v61  ;;  %4145 = vmatpush1.bf16.msra.mxu1 %v12476_v7  ;;  %v14294_v7 = vsub.s32 3, %v14270_v38 }
 0xd92   :  { %10875 = vmatprep.mubr.msk.f32.mxu0 %vm18383_vm1, %v3740_v57 }
 0xd93   :  { %4084 = vmatpush1.bf16.msra.mxu0 %v12449_v4  ;;  %18527 = vst [vmem:[#allocation37_spill] sm:$0xff] %v14294_v7 }
 0xd94   :  { %4085 = vmatprep.subr.bf16.mxu0 %v12457_v34 }
 0xd95   :  { %10876 = vmatmul.mubr.msk.f32.gmra.mrb[98].mxu0 %vm18383_vm1, %v3741_v55  ;;  %vm18410_vm1 = vcmp.lt.s32.totalorder %v14287_v62, 16 }
 0xd96   :  { %4109 = vmatprep.mubr.bf16.mxu0 %v18508_v41 }
 0xd97   :  { %4086 = vmatpush1.bf16.msra.mxu0 %v12455_v58 }
 0xd98   :  { %4087 = vmatprep.subr.bf16.mxu0 %v12463_v9  ;;  %v8821_v9 = vld [vmem:[%s18374_s11 + $0x86] ss:$8 sm:$0xf] }
 0xd9b   :  { %4088 = vmatpush1.bf16.msra.mxu0 %v12461_v12  ;;  %v8815_v12 = vld [vmem:[%s18374_s11 + $0x80] ss:$8 sm:$0xf] }
 0xd9c   :  { %4089 = vmatprep.subr.bf16.mxu0 %v12469_v49  ;;  %vm4236_vm7 = vcmp.gt.f32.partialorder %v8815_v12, 0.0  ;;  %v14280_v49 = vsub.s32 1, %v14270_v38 }
 0xd9d   :  { %v4237_v20 = vsel %vm4236_vm7, 1, %v18508_v41 }
 0xd9f   :  { %4090 = vmatpush1.bf16.msra.mxu0 %v12467_v40  ;;  %v12481_v40 = vld [vmem:[%s18375_s5 + $0x94] ss:$12 sps:$4 sm:$0xff]  }
 0xda0   :  { %4091 = vmatprep.subr.bf16.mxu0 %v12475_v31  ;;  %v4245_v31 = vrot.slane %v4237_v20, %v14280_v49 }
 0xda2   :  { %vm14305_vm12 = vcmp.eq.s32.totalorder %v4245_v31, 1 }
 0xda3   :  { %4092 = vmatpush1.bf16.msra.mxu0 %v12473_v11  ;;  %v14290_v11 = vsub.s32 0, %v14270_v38  ;;  %vm9212_vm15 = vmpackc.low %vm14305_vm12, %vm14305_vm12 }
 0xe59   :  { %v10868_v26 = vpop.f32.mrb[92].mxu0 }
 0xe5a   :  { %v3835_v0 = vpop.f32.mrb[93].mxu0  ;;  %v3875_v39 = vmul.f32 %v10868_v26, %v13943_v37 }
 0xe5b   :  { %v3874_v48 = vmul.f32 %v3835_v0, %v13938_v18  ;;  %v4241_v0 = vrot.slane %v4237_v20, %v14290_v11 }
 0xe5d   :  { %vm14322_vm5 = vcmp.eq.s32.totalorder %v4241_v0, 1 }
 0xe5e   :  { %vm18406_vm10 = vmpackc.low %vm14322_vm5, %vm14322_vm5 }
 0xe60   :  { %v10871_v45 = vpop.f32.mrb[94].mxu0 }
 0xe61   :  { %v3845_v17 = vpop.f32.mrb[95].mxu0  ;;  %v3877_v13 = vmul.f32 %v10871_v45, %v13953_v44 }
 0xe62   :  { %v3876_v53 = vmul.f32 %v3845_v17, %v13948_v51 }
 0xe64   :  { %v10874_v35 = vpop.f32.mrb[96].mxu0 }
 0xe65   :  { %v3879_v36 = vadd.f32 %v10874_v35, %v3875_v39  ;;  %v3855_v22 = vpop.f32.mrb[97].mxu0  ;;  %v4253_v35 = vrot.slane %v4237_v20, %v14294_v7 }
 0xe66   :  { %v3878_v5 = vadd.f32 %v3874_v48, %v3855_v22 }
 0xe67   :  { %vm14326_vm6 = vcmp.eq.s32.totalorder %v4253_v35, 1 }
 0xe68   :  { %v3915_v30 = vpack.c.bf16 %v3879_v36, %v3878_v5  ;;  %v10877_v21 = vpop.f32.mrb[98].mxu0  ;;  %v4249_v5 = vrot.slane %v4237_v20, %v14299_v32  ;;  %vm9320_vm2 = vmpackc.low %vm14326_vm6, %vm14326_vm6 }
 0xe69   :  { %v3881_v25 = vadd.f32 %v10877_v21, %v3877_v13  ;;  %v3865_v54 = vpop.f32.mrb[99].mxu0  ;;  %vm18565_vm6 = vmpackc.low %vm14322_vm5, %vm14322_vm5 }
 0xe6a   :  { %v3880_v2 = vadd.f32 %v3876_v53, %v3865_v54  ;;  %4110 = vmatmul.mubr.bf16.vlgmr.msra.gmra.mrb[100].mxu0 %v3915_v30  ;;  %4163 = vmatmul.mubr.bf16.vlgmr.msra.gmra.mrb[60].mxu1 %v3915_v30  ;;  %vm14332_vm9 = vcmp.eq.s32.totalorder %v4249_v5, 1  ;;  %v8835_v5 = vld [vmem:[%s18376_s6 + $0x78] sm:$0xff] }
 0xe6b   :  { %4119 = vmatprep.mubr.bf16.mxu0 %v18508_v41  ;;  %4172 = vmatprep.mubr.bf16.mxu1 %v18508_v41  ;;  %vm18405_vm11 = vmpackc.low %vm14332_vm9, %vm14332_vm9 }
 0xe6c   :  { %v3916_v18 = vpack.c.bf16 %v3881_v25, %v3880_v2 }
 0xe72   :  { %4120 = vmatmul.mubr.bf16.gmra.mrb[104].mxu0 %v3916_v18  ;;  %4173 = vmatmul.mubr.bf16.gmra.mrb[64].mxu1 %v3916_v18 }
 0xe73   :  { %5255 = vmatprep.mubr.bf16.mxu0 %v12481_v40  ;;  %5361 = vmatprep.mubr.bf16.mxu1 %v12481_v40 }
 0xf3d   :  { %v14083_v37 = vpop.f32.mrb[100].mxu0  ;;  %v14085_v1 = vpop.f32.mrb[60].mxu1 }
 0xf3e   :  { %18509 = vst [vmem:[#allocation19_spill] sm:$0xff] %v14083_v37  ;;  %18510 = vst [vmem:[#allocation20_spill] sm:$0xff] %v14085_v1  ;;  %v14087_v44 = vpop.f32.mrb[101].mxu0  ;;  %v14089_v51 = vpop.f32.mrb[61].mxu1 }
 0xf3f   :  { %18511 = vst [vmem:[#allocation21_spill] sm:$0xff] %v14087_v44  ;;  %18512 = vst [vmem:[#allocation22_spill] sm:$0xff] %v14089_v51  ;;  %v14091_v42 = vpop.f32.mrb[102].mxu0  ;;  %v14093_v43 = vpop.f32.mrb[62].mxu1 }
 0xf40   :  { %18513 = vst [vmem:[#allocation23_spill] sm:$0xff] %v14091_v42  ;;  %18514 = vst [vmem:[#allocation24_spill] sm:$0xff] %v14093_v43  ;;  %v14095_v61 = vpop.f32.mrb[103].mxu0  ;;  %v14097_v63 = vpop.f32.mrb[63].mxu1  ;;  %v14101_v29 = vpack.i.bf16 %v14091_v42, %v14083_v37  ;;  %v14105_v52 = vpack.i.bf16 %v14093_v43, %v14085_v1 }
 0xf41   :  { %18515 = vst [vmem:[#allocation25_spill] sm:$0xff] %v14095_v61  ;;  %18516 = vst [vmem:[#allocation26_spill] sm:$0xff] %v14097_v63  ;;  %v14109_v33 = vpack.i.bf16 %v14095_v61, %v14087_v44  ;;  %v14113_v27 = vpack.i.bf16 %v14097_v63, %v14089_v51 }
 0xf42   :  { %11760 = vrot.lane.b32.xlu0 %v14101_v29, %s12562_s14 }
 0xf43   :  { %11820 = vrot.lane.b32.xlu1 %v14109_v33, %s12562_s14 }
 0xf45   :  { %v14119_v19 = vpop.f32.mrb[104].mxu0  ;;  %v14121_v56 = vpop.f32.mrb[64].mxu1 }
 0xf46   :  { %18517 = vst [vmem:[#allocation27_spill] sm:$0xff] %v14119_v19  ;;  %18518 = vst [vmem:[#allocation28_spill] sm:$0xff] %v14121_v56  ;;  %11765 = vrot.lane.b32.xlu0 %v14105_v52, %s12562_s14  ;;  %v14125_v10 = vpop.f32.mrb[105].mxu0  ;;  %v14127_v16 = vpop.f32.mrb[65].mxu1 }
 0xf47   :  { %18519 = vst [vmem:[#allocation29_spill] sm:$0xff] %v14125_v10  ;;  %18520 = vst [vmem:[#allocation30_spill] sm:$0xff] %v14127_v16  ;;  %11825 = vrot.lane.b32.xlu1 %v14113_v27, %s12562_s14  ;;  %v14131_v8 = vpop.f32.mrb[106].mxu0  ;;  %v14133_v24 = vpop.f32.mrb[66].mxu1 }
 0xf48   :  { %18521 = vst [vmem:[#allocation31_spill] sm:$0xff] %v14131_v8  ;;  %18522 = vst [vmem:[#allocation32_spill] sm:$0xff] %v14133_v24  ;;  %v14135_v47 = vpop.f32.mrb[107].mxu0  ;;  %v14137_v46 = vpop.f32.mrb[67].mxu1  ;;  %v14141_v15 = vpack.i.bf16 %v14131_v8, %v14119_v19  ;;  %v14145_v50 = vpack.i.bf16 %v14133_v24, %v14121_v56 }
 0xf49   :  { %18523 = vst [vmem:[#allocation33_spill] sm:$0xff] %v14135_v47  ;;  %18524 = vst [vmem:[#allocation34_spill] sm:$0xff] %v14137_v46  ;;  %v14149_v28 = vpack.i.bf16 %v14135_v47, %v14125_v10  ;;  %v14153_v14 = vpack.i.bf16 %v14137_v46, %v14127_v16 }
 0xf4a   :  { %11770 = vrot.lane.b32.xlu0 %v14101_v29, %s12563_s0 }
 0xf4b   :  { %11830 = vrot.lane.b32.xlu1 %v14109_v33, %s12563_s0 }
 0xf4e   :  { %11775 = vrot.lane.b32.xlu0 %v14105_v52, %s12563_s0 }
 0xf4f   :  { %11835 = vrot.lane.b32.xlu1 %v14113_v27, %s12563_s0 }
 0xf52   :  { %11780 = vrot.lane.b32.xlu0 %v14101_v29, %s12564_s28 }
 0xf53   :  { %11840 = vrot.lane.b32.xlu1 %v14109_v33, %s12564_s28 }
 0xf56   :  { %11785 = vrot.lane.b32.xlu0 %v14105_v52, %s12564_s28 }
 0xf57   :  { %11845 = vrot.lane.b32.xlu1 %v14113_v27, %s12564_s28 }
 0xf5a   :  { %11790 = vrot.lane.b32.xlu0 %v14101_v29, %s12554_s26 }
 0xf5b   :  { %11850 = vrot.lane.b32.xlu1 %v14109_v33, %s12554_s26 }
 0xf5e   :  { %11795 = vrot.lane.b32.xlu0 %v14105_v52, %s12554_s26 }
 0xf5f   :  { %11855 = vrot.lane.b32.xlu1 %v14113_v27, %s12554_s26 }
 0xf62   :  { %11800 = vrot.lane.b32.xlu0 %v14101_v29, %s12549_s21 }
 0xf63   :  { %11860 = vrot.lane.b32.xlu1 %v14109_v33, %s12549_s21 }
 0xf66   :  { %11805 = vrot.lane.b32.xlu0 %v14105_v52, %s12549_s21 }
 0xf67   :  { %11865 = vrot.lane.b32.xlu1 %v14113_v27, %s12549_s21 }
 0xf6a   :  { %11810 = vrot.lane.b32.xlu0 %v14101_v29, %s12565_s29 }
 0xf6b   :  { %11870 = vrot.lane.b32.xlu1 %v14109_v33, %s12565_s29 }
 0xf6e   :  { %11815 = vrot.lane.b32.xlu0 %v14105_v52, %s12565_s29 }
 0xf6f   :  { %11875 = vrot.lane.b32.xlu1 %v14113_v27, %s12565_s29 }
 0xf72   :  { %11880 = vrot.lane.b32.xlu0 %v14141_v15, %s12562_s14 }
 0xf73   :  { %11945 = vrot.lane.b32.xlu1 %v14149_v28, %s12562_s14 }
 0xf76   :  { %11885 = vrot.lane.b32.xlu0 %v14145_v50, %s12562_s14 }
 0xf77   :  { %11950 = vrot.lane.b32.xlu1 %v14153_v14, %s12562_s14 }
 0xf7a   :  { %11890 = vrot.lane.b32.xlu0 %v14141_v15, %s12563_s0 }
 0xf7b   :  { %11955 = vrot.lane.b32.xlu1 %v14149_v28, %s12563_s0 }
 0xf7e   :  { %11895 = vrot.lane.b32.xlu0 %v14145_v50, %s12563_s0 }
 0xf7f   :  { %11960 = vrot.lane.b32.xlu1 %v14153_v14, %s12563_s0 }
 0xf82   :  { %11900 = vrot.lane.b32.xlu0 %v14141_v15, %s12564_s28 }
 0xf83   :  { %11965 = vrot.lane.b32.xlu1 %v14149_v28, %s12564_s28 }
 0xf86   :  { %11905 = vrot.lane.b32.xlu0 %v14145_v50, %s12564_s28 }
 0xf87   :  { %11970 = vrot.lane.b32.xlu1 %v14153_v14, %s12564_s28 }
 0xf8a   :  { %11910 = vrot.lane.b32.xlu0 %v14141_v15, %s12554_s26 }
 0xf8b   :  { %11975 = vrot.lane.b32.xlu1 %v14149_v28, %s12554_s26 }
 0xf8e   :  { %11915 = vrot.lane.b32.xlu0 %v14145_v50, %s12554_s26 }
 0xf8f   :  { %11980 = vrot.lane.b32.xlu1 %v14153_v14, %s12554_s26 }
 0xf92   :  { %11920 = vrot.lane.b32.xlu0 %v14101_v29, %s12566_s9 }
 0xf93   :  { %11985 = vrot.lane.b32.xlu1 %v14109_v33, %s12566_s9 }
 0xf96   :  { %11925 = vrot.lane.b32.xlu0 %v14141_v15, %s12549_s21 }
 0xf97   :  { %11995 = vrot.lane.b32.xlu1 %v14113_v27, %s12566_s9 }
 0xf9a   :  { %11930 = vrot.lane.b32.xlu0 %v14145_v50, %s12549_s21 }
 0xf9b   :  { %12015 = vrot.lane.b32.xlu1 %v14149_v28, %s12549_s21 }
 0xf9e   :  { %11935 = vrot.lane.b32.xlu0 %v14141_v15, %s12565_s29 }
 0xf9f   :  { %12020 = vrot.lane.b32.xlu1 %v14153_v14, %s12549_s21 }
 0xfa2   :  { %11940 = vrot.lane.b32.xlu0 %v14145_v50, %s12565_s29 }
 0xfa3   :  { %12025 = vrot.lane.b32.xlu1 %v14149_v28, %s12565_s29 }
 0xfa6   :  { %11990 = vrot.lane.b32.xlu0 %v14105_v52, %s12566_s9 }
 0xfa7   :  { %12030 = vrot.lane.b32.xlu1 %v14153_v14, %s12565_s29 }
 0xfaa   :  { %12000 = vrot.lane.b32.xlu0 %v14141_v15, %s12566_s9 }
 0xfab   :  { %12035 = vrot.lane.b32.xlu1 %v14149_v28, %s12566_s9 }
 0xfae   :  { %12005 = vrot.lane.b32.xlu0 %v14145_v50, %s12566_s9 }
 0xfaf   :  { %12040 = vrot.lane.b32.xlu1 %v14153_v14, %s12566_s9 }
 0xfb2   :  { %12010 = vrot.lane.b32.xlu0 %v14101_v29, %s12567_s24 }
 0xfb3   :  { %12045 = vrot.lane.b32.xlu1 %v14109_v33, %s12567_s24 }
 0xfb4   :  { %v11761_v26 = vpop.permute.xlu0 %11760 }
 0xfb5   :  { %v11763_v45 = vunpack.i.h.bf16 %v11761_v26  ;;  %v11762_v17 = vunpack.i.l.bf16 %v11761_v26  ;;  %v11821_v39 = vpop.permute.xlu1 %11820 }
 0xfb6   :  { %v11823_v36 = vunpack.i.h.bf16 %v11821_v39  ;;  %v11822_v22 = vunpack.i.l.bf16 %v11821_v39  ;;  %12050 = vrot.lane.b32.xlu0 %v14105_v52, %s12567_s24 }
 0xfb7   :  { %12055 = vrot.lane.b32.xlu1 %v14113_v27, %s12567_s24 }
 0xfb8   :  { %v4227_v13 = vsel %vm18408_vm8, %v11763_v45, %v11823_v36  ;;  %v4226_v53 = vsel %vm18408_vm8, %v11762_v17, %v11822_v22  ;;  %v11766_v30 = vpop.permute.xlu0 %11765 }
 0xfb9   :  { %v11768_v25 = vunpack.i.h.bf16 %v11766_v30  ;;  %v11767_v54 = vunpack.i.l.bf16 %v11766_v30  ;;  %v11826_v2 = vpop.permute.xlu1 %11825  ;;  %v9213_v18 = vpack.c.bf16 %v4227_v13, %v4226_v53  ;;  %v438_v53 = vld [vmem:[%s18368_s4 + $0x100] sm:$0xff] }
 0xfba   :  { %v11828_v52 = vunpack.i.h.bf16 %v11826_v2  ;;  %v11827_v33 = vunpack.i.l.bf16 %v11826_v2  ;;  %12060 = vrot.lane.b32.xlu0 %v14141_v15, %s12567_s24  ;;  %v440_v2 = vld [vmem:[%s18368_s4 + $0x110] sm:$0xff] }
 0xfbb   :  { %v4222_v23 = vsel %vm18408_vm8, %v11822_v22, %v11767_v54  ;;  %v4223_v12 = vsel %vm18408_vm8, %v11823_v36, %v11768_v25  ;;  %9214 = vmatprep.subr.msk.bf16.mxu0 %vm9212_vm15, %v9213_v18  ;;  %12070 = vrot.lane.b32.xlu1 %v14149_v28, %s12567_s24  ;;  %v8834_v36 = vld [vmem:[%s18376_s6 + $0x70] sm:$0xff] }
 0xfbc   :  { %v4219_v15 = vsel %vm18408_vm8, %v11768_v25, %v11828_v52  ;;  %v4231_v40 = vsel %vm18408_vm8, %v11828_v52, %v11763_v45  ;;  %v4218_v20 = vsel %vm18408_vm8, %v11767_v54, %v11827_v33  ;;  %v14356_v31 = vpop.permute.xlu0 %11770  ;;  %v4230_v28 = vsel %vm18408_vm8, %v11827_v33, %v11762_v17  ;;  %v8832_v17 = vld [vmem:[%s18376_s6 + $0x60] sm:$0xff]  ;;  %v439_v25 = vld [vmem:[%s18368_s4 + $0x108] sm:$0xff]  ;;  %v441_v52 = vld [vmem:[%s18368_s4 + $0x118] sm:$0xff] }
 0xfbd   :  { %v14363_v26 = vpop.permute.xlu1 %11830  ;;  %v9321_v0 = vpack.c.bf16 %v4219_v15, %v4218_v20  ;;  %v9324_v45 = vpack.c.bf16 %v4223_v12, %v4222_v23  ;;  %v9216_v39 = vpack.c.bf16 %v4231_v40, %v4230_v28  ;;  %v442_v23 = vld [vmem:[%s18368_s4 + $0x120] sm:$0xff]  ;;  %v443_v15 = vld [vmem:[%s18368_s4 + $0x128] sm:$0xff]  ;;  %v11773_v34 = vunpack.i.h.bf16 %v14356_v31 }
 0xfbe   :  { %12065 = vrot.lane.b32.xlu0 %v14145_v50, %s12567_s24  ;;  %v8816_v20 = vld [vmem:[%s18374_s11 + $0x81] ss:$8 sm:$0xf]  ;;  %v8817_v28 = vld [vmem:[%s18374_s11 + $0x82] ss:$8 sm:$0xf]  ;;  %v11772_v58 = vunpack.i.l.bf16 %v14356_v31  ;;  %v11833_v4 = vunpack.i.h.bf16 %v14363_v26  ;;  %v11832_v57 = vunpack.i.l.bf16 %v14363_v26 }
 0xfbf   :  { %9322 = vmatprep.subr.msk.bf16.mxu1 %vm9320_vm2, %v9321_v0  ;;  %12075 = vrot.lane.b32.xlu1 %v14153_v14, %s12567_s24  ;;  %v8833_v14 = vld [vmem:[%s18376_s6 + $0x68] sm:$0xff]  ;;  %v444_v0 = vld [vmem:[%s18368_s4 + $0x130] sm:$0xff]  ;;  %vm4341_vm13 = vcmp.gt.f32.partialorder %v8816_v20, 0.0  ;;  %vm4446_vm3 = vcmp.gt.f32.partialorder %v8817_v28, 0.0 }
 0xfc0   :  { %9217 = vmatpush1.bf16.msk.msra.mxu0 %vm18406_vm10, %v9216_v39  ;;  %v14385_v50 = vpop.permute.xlu0 %11775  ;;  %9325 = vmatpush1.bf16.msk.msra.mxu1 %vm18405_vm11, %v9324_v45  ;;  %v445_v39 = vld [vmem:[%s18368_s4 + $0x138] sm:$0xff]  ;;  %v14532_v26 = vsel %vm18410_vm1, %v11773_v34, %v11833_v4  ;;  %v14536_v28 = vsel %vm18410_vm1, %v11772_v58, %v11832_v57 }
 0xfc1   :  { %v14395_v35 = vpop.permute.xlu1 %11835  ;;  %v11777_v59 = vunpack.i.l.bf16 %v14385_v50  ;;  %v18568_v21 = vpack.c.bf16 %v14532_v26, %v14536_v28 }
 0xfc2   :  { %5169 = vperm.xlu0 %11517, %v8832_v17   ;;  %v11837_v60 = vunpack.i.l.bf16 %v14395_v35 }
 0xfc3   :  { %5174 = vperm.xlu1 %11518, %v8833_v14   ;;  %v8818_v14 = vld [vmem:[%s18374_s11 + $0x83] ss:$8 sm:$0xf]  ;;  %v14569_v19 = vsel %vm18410_vm1, %v11832_v57, %v11777_v59 }
 0xfc4   :  { %v14400_v22 = vpop.permute.xlu0 %11780  ;;  %vm4551_vm4 = vcmp.gt.f32.partialorder %v8818_v14, 0.0  ;;  %v14587_v57 = vsel %vm18410_vm1, %v11777_v59, %v11837_v60 }
 0xfc5   :  { %v14405_v13 = vpop.permute.xlu1 %11840  ;;  %v14486_v14 = vsel %vm4551_vm4, 1, %v18508_v41  ;;  %vm4817_vm4 = vcmp.gt.f32.partialorder %v8821_v9, 0.0  ;;  %v14596_v9 = vsel %vm18410_vm1, %v11837_v60, %v11772_v58 }
 0xfc6   :  { %5179 = vperm.xlu0 %11517, %v8834_v36   ;;  %v8819_v36 = vld [vmem:[%s18374_s11 + $0x84] ss:$8 sm:$0xf]  ;;  %v11843_v31 = vunpack.i.h.bf16 %v14405_v13  ;;  %v11842_v16 = vunpack.i.l.bf16 %v14405_v13 }
 0xfc7   :  { %5184 = vperm.xlu1 %11518, %v8835_v5   ;;  %v14460_v5 = vsel %vm4341_vm13, 1, %v18508_v41  ;;  %vm4607_vm7 = vcmp.gt.f32.partialorder %v8819_v36, 0.0  ;;  %vm18409_vm13 = vcmp.lt.s32.totalorder %v14287_v62, 15 }
 0xfc8   :  { %v14410_v30 = vpop.permute.xlu0 %11785  ;;  %v4346_v20 = vrot.slane %v14460_v5, %v14290_v11  ;;  %v14496_v6 = vsel %vm4607_vm7, 1, %v18508_v41 }
 0xfc9   :  { %v14415_v54 = vpop.permute.xlu1 %11845  ;;  %v11787_v58 = vunpack.i.l.bf16 %v14410_v30 }
 0xfca   :  { %616 = vperm.xlu0 %11517, %v438_v53   ;;  %v11848_v51 = vunpack.i.h.bf16 %v14415_v54 }
 0xfcb   :  { %621 = vperm.xlu1 %11518, %v439_v25   ;;  %v14465_v25 = vsel %vm4446_vm3, 1, %v18508_v41  ;;  %v14638_v61 = vsel %vm18409_vm13, %v11842_v16, %v11787_v58 }
 0xfcc   :  { %v14420_v18 = vpop.permute.xlu0 %11790 }
 0xfcd   :  { %v14425_v33 = vpop.permute.xlu1 %11850  ;;  %v11792_v28 = vunpack.i.l.bf16 %v14420_v18 }
 0xfce   :  { %626 = vperm.xlu0 %11517, %v440_v2   ;;  %v11853_v26 = vunpack.i.h.bf16 %v14425_v33 }
 0xfcf   :  { %631 = vperm.xlu1 %11518, %v441_v52   ;;  %v8820_v52 = vld [vmem:[%s18374_s11 + $0x85] ss:$8 sm:$0xf] }
 0xfd0   :  { %v14430_v12 = vpop.permute.xlu0 %11795  ;;  %vm4712_vm3 = vcmp.gt.f32.partialorder %v8820_v52, 0.0  ;;  %v11778_v52 = vunpack.i.h.bf16 %v14385_v50 }
 0xfd1   :  { %v14435_v40 = vpop.permute.xlu1 %11855  ;;  %v14522_v3 = vsel %vm4712_vm3, 1, %v18508_v41 }
 0xfd2   :  { %636 = vperm.xlu0 %11517, %v442_v23   ;;  %v4350_v23 = vrot.slane %v14460_v5, %v14280_v49  ;;  %v14573_v24 = vsel %vm18410_vm1, %v11833_v4, %v11778_v52 }
 0xfd3   :  { %641 = vperm.xlu1 %11518, %v443_v15   ;;  %v4358_v15 = vrot.slane %v14460_v5, %v14294_v7 }
 0xfd4   :  { %v14446_v45 = vpop.permute.xlu0 %11800  ;;  %vm14542_vm7 = vcmp.eq.s32.totalorder %v4350_v23, 1  ;;  %v14579_v23 = vsel %vm4817_vm4, 1, %v18508_v41  ;;  %vm14598_vm4 = vcmp.eq.s32.totalorder %v4346_v20, 1  ;;  %v18548_v20 = vrot.slane %v14460_v5, %v14299_v32 }
 0xfd5   :  { %v14451_v17 = vpop.permute.xlu1 %11860  ;;  %vm14563_vm3 = vcmp.eq.s32.totalorder %v4358_v15, 1  ;;  %vm9224_vm11 = vmpackc.low %vm14542_vm7, %vm14542_vm7 }
 0xfd6   :  { %646 = vperm.xlu0 %11517, %v444_v0   ;;  %v11838_v0 = vunpack.i.h.bf16 %v14395_v35  ;;  %v14557_v35 = vld [vmem:[%s18374_s11 + $0x87] ss:$8 sm:$0xf]  ;;  %vm14620_vm0 = vcmp.eq.s32.totalorder %v18548_v20, 1  ;;  %vm9332_vm10 = vmpackc.low %vm14563_vm3, %vm14563_vm3  ;;  %vm18585_vm3 = vcmp.lt.s32.totalorder %v14287_v62, 15 }
 0xfd7   :  { %651 = vperm.xlu1 %11518, %v445_v39   ;;  %vm9227_vm5 = vmpackc.low %vm14598_vm4, %vm14598_vm4 }
 0xfd8   :  { %v14462_v53 = vpop.permute.xlu0 %11805  ;;  %v14583_v13 = vsel %vm18410_vm1, %v11778_v52, %v11838_v0  ;;  %v14592_v8 = vsel %vm18410_vm1, %v11838_v0, %v11773_v34  ;;  %v18547_v34 = vunpack.i.l.bf16 %v14400_v22  ;;  %vm18590_vm4 = vmpackc.low %vm14620_vm0, %vm14620_vm0 }
 0xfd9   :  { %v14467_v2 = vpop.permute.xlu1 %11865 }
 0xfda   :  { %v14614_v60 = vsel %vm18409_vm13, %v18547_v34, %v11842_v16  ;;  %v9333_v34 = vpack.c.bf16 %v14583_v13, %v14587_v57  ;;  %v11847_v13 = vunpack.i.l.bf16 %v14415_v54 }
 0xfdc   :  { %v14489_v36 = vpop.permute.xlu0 %11810 }
 0xfdd   :  { %v14502_v55 = vpop.permute.xlu1 %11870 }
 0xfde   :  { %18537 = vst [vmem:[#allocation39_spill] sm:$0xff] %v14502_v55  ;;  %v18557_v55 = vrot.slane %v14465_v25, %v14290_v11 }
 0xfe0   :  { %v14526_v39 = vpop.permute.xlu0 %11815 }
 0xfe1   :  { %18538 = vst [vmem:[#allocation40_spill] sm:$0xff] %v14526_v39  ;;  %v14540_v38 = vpop.permute.xlu1 %11875 }
 0xfe2   :  { %18539 = vst [vmem:[#allocation41_spill] sm:$0xff] %v14540_v38 }
 0xfe4   :  { %v11881_v46 = vpop.permute.xlu0 %11880 }
 0xfe5   :  { %v11883_v15 = vunpack.i.h.bf16 %v11881_v46  ;;  %v11882_v1 = vunpack.i.l.bf16 %v11881_v46  ;;  %v11946_v4 = vpop.permute.xlu1 %11945  ;;  %v18546_v46 = vunpack.i.h.bf16 %v14400_v22 }
 0xfe6   :  { %v11948_v43 = vunpack.i.h.bf16 %v11946_v4  ;;  %v11947_v52 = vunpack.i.l.bf16 %v11946_v4  ;;  %v11788_v4 = vunpack.i.h.bf16 %v14410_v30 }
 0xfe7   :  { %v14608_v47 = vsel %vm18409_vm13, %v18546_v46, %v11843_v31 }
 0xfe8   :  { %v4229_v46 = vsel %vm18408_vm8, %v11883_v15, %v11948_v43  ;;  %v4228_v59 = vsel %vm18408_vm8, %v11882_v1, %v11947_v52  ;;  %v11886_v37 = vpop.permute.xlu0 %11885  ;;  %v14659_v54 = vsel %vm18409_vm13, %v11843_v31, %v11788_v4 }
 0xfe9   :  { %v11888_v5 = vunpack.i.h.bf16 %v11886_v37  ;;  %v11887_v20 = vunpack.i.l.bf16 %v11886_v37  ;;  %v11951_v38 = vpop.permute.xlu1 %11950  ;;  %v9219_v39 = vpack.c.bf16 %v4229_v46, %v4228_v59  ;;  %v18554_v59 = vrot.slane %v14465_v25, %v14294_v7 }
 0xfea   :  { %v11953_v30 = vunpack.i.h.bf16 %v11951_v38  ;;  %v11952_v63 = vunpack.i.l.bf16 %v11951_v38  ;;  %v18551_v38 = vrot.slane %v14465_v25, %v14280_v49 }
 0xfeb   :  { %v4224_v57 = vsel %vm18408_vm8, %v11947_v52, %v11887_v20  ;;  %v4225_v37 = vsel %vm18408_vm8, %v11948_v43, %v11888_v5  ;;  %9220 = vmatprep.subr.msk.bf16.mxu0 %vm9212_vm15, %v9219_v39  ;;  %vm14670_vm12 = vcmp.eq.s32.totalorder %v18554_v59, 1 }
 0xfec   :  { %vm14653_vm14 = vcmp.eq.s32.totalorder %v18551_v38, 1  ;;  %v4221_v43 = vsel %vm18408_vm8, %v11888_v5, %v11953_v30  ;;  %v4233_v52 = vsel %vm18408_vm8, %v11953_v30, %v11883_v15  ;;  %v4220_v48 = vsel %vm18408_vm8, %v11887_v20, %v11952_v63  ;;  %v11891_v39 = vpop.permute.xlu0 %11890 }
 0xfed   :  { %v4232_v31 = vsel %vm18408_vm8, %v11952_v63, %v11882_v1  ;;  %v11893_v5 = vunpack.i.h.bf16 %v11891_v39  ;;  %v11892_v38 = vunpack.i.l.bf16 %v11891_v39  ;;  %v11956_v44 = vpop.permute.xlu1 %11955  ;;  %v9327_v15 = vpack.c.bf16 %v4221_v43, %v4220_v48 }
 0xfee   :  { %v9330_v20 = vpack.c.bf16 %v4225_v37, %v4224_v57  ;;  %v9222_v30 = vpack.c.bf16 %v4233_v52, %v4232_v31  ;;  %v11958_v42 = vunpack.i.h.bf16 %v11956_v44  ;;  %v11957_v59 = vunpack.i.l.bf16 %v11956_v44 }
 0xfef   :  { %vm14686_vm8 = vcmp.eq.s32.totalorder %v18557_v55, 1  ;;  %v9348_v63 = vpack.c.bf16 %v14659_v54, %v14638_v61  ;;  %v14694_v57 = vsel %vm18409_vm13, %v11788_v4, %v11848_v51  ;;  %v18560_v44 = vunpack.i.h.bf16 %v14400_v22  ;;  %9328 = vmatprep.subr.msk.bf16.mxu1 %vm9320_vm2, %v9327_v15  ;;  %vm18566_vm2 = vmpackc.low %vm14332_vm9, %vm14332_vm9  ;;  %v18691_v54 = vld [vmem:[#allocation28_spill] sm:$0xff] }
 0xff0   :  { %v14704_v43 = vsel %vm18409_vm13, %v11787_v58, %v11847_v13  ;;  %v18561_v55 = vrot.slane %v14465_v25, %v14299_v32  ;;  %v4334_v58 = vsel %vm18410_vm1, %v11893_v5, %v11958_v42  ;;  %v4333_v29 = vsel %vm18410_vm1, %v11892_v38, %v11957_v59  ;;  %9223 = vmatpush1.bf16.msk.msra.mxu0 %vm18565_vm6, %v9222_v30  ;;  %v11896_v25 = vpop.permute.xlu0 %11895  ;;  %vm18411_vm9 = vmpackc.low %vm14620_vm0, %vm14620_vm0 }
 0xff1   :  { %v14700_v37 = vsel %vm18409_vm13, %v11848_v51, %v18560_v44  ;;  %v18564_v51 = vunpack.i.l.bf16 %v14400_v22  ;;  %9331 = vmatpush1.bf16.msk.msra.mxu1 %vm18566_vm2, %v9330_v20  ;;  %v11898_v48 = vunpack.i.h.bf16 %v11896_v25  ;;  %v11897_v39 = vunpack.i.l.bf16 %v11896_v25  ;;  %9226 = vmatprep.subr.msk.bf16.mxu0 %vm9224_vm11, %v18568_v21  ;;  %v11961_v27 = vpop.permute.xlu1 %11960  ;;  %vm18586_vm2 = vmmov %vm18585_vm3 }
 0xff2   :  { %vm14714_vm15 = vcmp.eq.s32.totalorder %v18561_v55, 1  ;;  %9334 = vmatprep.subr.msk.bf16.mxu1 %vm9332_vm10, %v9333_v34  ;;  %v11963_v31 = vunpack.i.h.bf16 %v11961_v27  ;;  %v11962_v15 = vunpack.i.l.bf16 %v11961_v27  ;;  %v11852_v20 = vunpack.i.l.bf16 %v14425_v33  ;;  %vm18593_vm0 = vmpackc.low %vm14670_vm12, %vm14670_vm12 }
 0xff3   :  { %v14722_v52 = vsel %vm18409_vm13, %v11847_v13, %v18564_v51  ;;  %vm18567_vm13 = vcmp.gt.f32.partialorder %v14557_v35, 0.0  ;;  %v11793_v13 = vunpack.i.h.bf16 %v14420_v18  ;;  %v9231_v35 = vpack.c.bf16 %v4334_v58, %v4333_v29 }
 0xff4   :  { %v14741_v22 = vsel %vm18567_vm13, 1, %v18508_v41  ;;  %v11798_v30 = vunpack.i.h.bf16 %v14430_v12  ;;  %v11797_v34 = vunpack.i.l.bf16 %v14430_v12  ;;  %v4329_v44 = vsel %vm18410_vm1, %v11957_v59, %v11897_v39  ;;  %v11901_v25 = vpop.permute.xlu0 %11900 }
 0xff5   :  { %v18569_v55 = vrot.slane %v14486_v14, %v14280_v49  ;;  %v4330_v58 = vsel %vm18410_vm1, %v11958_v42, %v11898_v48  ;;  %v4326_v33 = vsel %vm18410_vm1, %v11898_v48, %v11963_v31  ;;  %v4338_v29 = vsel %vm18410_vm1, %v11963_v31, %v11893_v5 }
 0xff6   :  { %v4325_v12 = vsel %vm18410_vm1, %v11897_v39, %v11962_v15  ;;  %v18572_v59 = vpack.c.bf16 %v14592_v8, %v14596_v9  ;;  %v18573_v42 = vrot.slane %v14486_v14, %v14294_v7  ;;  %v4337_v5 = vsel %vm18410_vm1, %v11962_v15, %v11892_v38  ;;  %v11966_v9 = vpop.permute.xlu1 %11965 }
 0xff7   :  { %vm14773_vm13 = vcmp.eq.s32.totalorder %v18569_v55, 1  ;;  %v11903_v39 = vunpack.i.h.bf16 %v11901_v25  ;;  %v11902_v21 = vunpack.i.l.bf16 %v11901_v25  ;;  %v18576_v8 = vpack.c.bf16 %v14573_v24, %v14569_v19 }
 0xff8   :  { %9229 = vmatpush1.bf16.msk.msra.mxu0 %vm9227_vm5, %v18572_v59  ;;  %vm14796_vm6 = vcmp.eq.s32.totalorder %v18573_v42, 1  ;;  %v9339_v27 = vpack.c.bf16 %v4326_v33, %v4325_v12  ;;  %v11858_v38 = vunpack.i.h.bf16 %v14435_v40  ;;  %v9234_v31 = vpack.c.bf16 %v4338_v29, %v4337_v5 }
 0xff9   :  { %9232 = vmatprep.subr.msk.bf16.mxu0 %vm9224_vm11, %v9231_v35  ;;  %9337 = vmatpush1.bf16.msk.msra.mxu1 %vm18411_vm9, %v18576_v8  ;;  %v11968_v15 = vunpack.i.h.bf16 %v11966_v9  ;;  %v11967_v55 = vunpack.i.l.bf16 %v11966_v9  ;;  %v18577_v19 = vrot.slane %v14486_v14, %v14290_v11  ;;  %v9240_v50 = vpack.c.bf16 %v14700_v37, %v14722_v52 }
 0xffa   :  { %v11857_v35 = vunpack.i.l.bf16 %v14435_v40  ;;  %v9342_v33 = vpack.c.bf16 %v4330_v58, %v4329_v44  ;;  %9340 = vmatprep.subr.msk.bf16.mxu1 %vm9332_vm10, %v9339_v27  ;;  %v9345_v29 = vpack.c.bf16 %v14694_v57, %v14704_v43  ;;  %v18580_v12 = vrot.slane %v14486_v14, %v14299_v32  ;;  %v11906_v14 = vpop.permute.xlu0 %11905  ;;  %v11971_v10 = vpop.permute.xlu1 %11970 }
 0xffb   :  { %vm14822_vm7 = vcmp.eq.s32.totalorder %v18577_v19, 1  ;;  %vm18583_vm9 = vcmp.lt.s32.totalorder %v14287_v62, 1  ;;  %v4439_v52 = vsel %vm18585_vm3, %v11903_v39, %v11968_v15  ;;  %v4438_v57 = vsel %vm18586_vm2, %v11902_v21, %v11967_v55 }
 0xffc   :  { %vm14842_vm1 = vcmp.eq.s32.totalorder %v18580_v12, 1  ;;  %v14850_v56 = vsel %vm18583_vm9, %v11793_v13, %v11853_v26  ;;  %vm18584_vm10 = vmmov %vm18583_vm9  ;;  %9235 = vmatpush1.bf16.msk.msra.mxu0 %vm9227_vm5, %v9234_v31  ;;  %v11908_v44 = vunpack.i.h.bf16 %v11906_v14  ;;  %v11907_v58 = vunpack.i.l.bf16 %v11906_v14 }
 0xffd   :  { %v4541_v40 = vsel %vm18584_vm10, %v11792_v28, %v11852_v20  ;;  %vm18587_vm11 = vmmov %vm18583_vm9  ;;  %v18588_v59 = vpack.c.bf16 %v14608_v47, %v14614_v60  ;;  %9343 = vmatpush1.bf16.msk.msra.mxu1 %vm18590_vm4, %v9342_v33  ;;  %v11973_v25 = vunpack.i.h.bf16 %v11971_v10  ;;  %v11972_v42 = vunpack.i.l.bf16 %v11971_v10 }
 0xffe   :  { %v14865_v43 = vsel %vm18587_vm11, %v11852_v20, %v11797_v34  ;;  %vm18589_vm9 = vmpackc.low %vm14653_vm14, %vm14653_vm14  ;;  %v9243_v20 = vpack.c.bf16 %v4439_v52, %v4438_v57  ;;  %9346 = vmatprep.subr.msk.bf16.mxu1 %vm18593_vm0, %v9345_v29  ;;  %v18598_v8 = vrot.slane %v14496_v6, %v14280_v49  ;;  %v11911_v27 = vpop.permute.xlu0 %11910  ;;  %v11976_v19 = vpop.permute.xlu1 %11975  ;;  %v9249_v16 = vpack.c.bf16 %v14850_v56, %v4541_v40 }
 0xfff   :  { %9238 = vmatprep.subr.msk.bf16.mxu0 %vm18589_vm9, %v18588_v59  ;;  %vm9239_vm5 = vmpackc.low %vm14686_vm8, %vm14686_vm8  ;;  %v11977_v33 = vunpack.i.l.bf16 %v11976_v19  ;;  %v18610_v61 = vrot.slane %v14496_v6, %v14290_v11  ;;  %v11803_v29 = vunpack.i.h.bf16 %v14446_v45  ;;  %v11802_v12 = vunpack.i.l.bf16 %v14446_v45 }
0x1000   :  { %vm18591_vm11 = vmmov %vm18584_vm10  ;;  %9241 = vmatpush1.bf16.msk.msra.mxu0 %vm9239_vm5, %v9240_v50  ;;  %v18614_v56 = vrot.slane %v14496_v6, %v14299_v32  ;;  %v11807_v4 = vunpack.i.l.bf16 %v14462_v53  ;;  %v18630_v51 = vrot.slane %v14522_v3, %v14294_v7  ;;  %v4939_v48 = vrot.slane %v14741_v22, %v14294_v7 }
0x1001   :  { %v14885_v47 = vsel %vm18591_vm11, %v11853_v26, %v11798_v30  ;;  %vm18592_vm2 = vmmov %vm18584_vm10  ;;  %vm18597_vm11 = vcmp.lt.s32.totalorder %v14287_v62, 15 }
0x1002   :  { %v4534_v60 = vsel %vm18592_vm2, %v11798_v30, %v11858_v38  ;;  %vm18412_vm10 = vmpackc.low %vm14714_vm15, %vm14714_vm15  ;;  %v4434_v5 = vsel %vm18597_vm11, %v11967_v55, %v11907_v58  ;;  %v11912_v55 = vunpack.i.l.bf16 %v11911_v27  ;;  %v11981_v1 = vpop.permute.xlu1 %11980 }
0x1003   :  { %vm18594_vm3 = vmmov %vm18592_vm2  ;;  %9349 = vmatpush1.bf16.msk.msra.mxu1 %vm18412_vm10, %v9348_v63  ;;  %v9360_v63 = vpack.c.bf16 %v14885_v47, %v14865_v43  ;;  %vm18617_vm10 = vcmp.lt.s32.totalorder %v14287_v62, 1  ;;  %v11916_v43 = vpop.permute.xlu0 %11915  ;;  %v11808_v47 = vunpack.i.h.bf16 %v14462_v53 }
0x1004   :  { %v14901_v0 = vsel %vm18594_vm3, %v11858_v38, %v11793_v13  ;;  %vm18595_vm9 = vmmov %vm18592_vm2  ;;  %v18605_v38 = vrot.slane %v14496_v6, %v14294_v7  ;;  %v11917_v59 = vunpack.i.l.bf16 %v11916_v43 }
0x1005   :  { %v4533_v26 = vsel %vm18595_vm9, %v11797_v34, %v11857_v35  ;;  %vm18596_vm4 = vmmov %vm18592_vm2  ;;  %vm14912_vm2 = vcmp.eq.s32.totalorder %v18598_v8, 1 }
0x1006   :  { %v4545_v30 = vsel %vm18596_vm4, %v11857_v35, %v11792_v28  ;;  %vm18601_vm0 = vmmov %vm18597_vm11  ;;  %vm14932_vm11 = vcmp.eq.s32.totalorder %v18605_v38, 1  ;;  %v11978_v35 = vunpack.i.h.bf16 %v11976_v19  ;;  %v9357_v6 = vpack.c.bf16 %v4534_v60, %v4533_v26 }
0x1007   :  { %v4435_v18 = vsel %vm18601_vm0, %v11968_v15, %v11908_v44  ;;  %vm18602_vm3 = vmmov %vm18601_vm0  ;;  %v11913_v15 = vunpack.i.h.bf16 %v11911_v27  ;;  %v9252_v57 = vpack.c.bf16 %v14901_v0, %v4545_v30  ;;  %v11983_v60 = vunpack.i.h.bf16 %v11981_v1  ;;  %v15035_v53 = vpop.permute.xlu0 %11920 }
0x1008   :  { %v4431_v13 = vsel %vm18602_vm3, %v11908_v44, %v11973_v25  ;;  %vm18603_vm9 = vmmov %vm18601_vm0  ;;  %v9354_v52 = vpack.c.bf16 %v4435_v18, %v4434_v5  ;;  %v11863_v44 = vunpack.i.h.bf16 %v14451_v17  ;;  %v15049_v18 = vpop.permute.xlu1 %11985  ;;  %v4834_v19 = vrot.slane %v14579_v23, %v14294_v7 }
0x1009   :  { %v4443_v34 = vsel %vm18603_vm9, %v11973_v25, %v11903_v39  ;;  %vm18604_vm4 = vmmov %vm18601_vm0  ;;  %v4544_v14 = vsel %vm18617_vm10, %v11913_v15, %v11978_v35  ;;  %v11982_v25 = vunpack.i.l.bf16 %v11981_v1 }
0x100a   :  { %v4430_v28 = vsel %vm18604_vm4, %v11907_v58, %v11972_v42  ;;  %vm18608_vm3 = vmmov %vm18601_vm0  ;;  %vm14978_vm0 = vcmp.eq.s32.totalorder %v18614_v56, 1  ;;  %v11918_v58 = vunpack.i.h.bf16 %v11916_v43 }
0x100b   :  { %v4442_v39 = vsel %vm18608_vm3, %v11972_v42, %v11902_v21  ;;  %vm18609_vm9 = vmpackc.low %vm14653_vm14, %vm14653_vm14  ;;  %v9351_v50 = vpack.c.bf16 %v4431_v13, %v4430_v28  ;;  %vm14959_vm14 = vcmp.eq.s32.totalorder %v18610_v61, 1  ;;  %v11868_v42 = vunpack.i.h.bf16 %v14467_v2  ;;  %v15127_v56 = vpop.permute.xlu0 %11925 }
0x100c   :  { %9244 = vmatprep.subr.msk.bf16.mxu0 %vm18609_vm9, %v9243_v20  ;;  %v9246_v21 = vpack.c.bf16 %v4443_v34, %v4442_v39  ;;  %vm18613_vm3 = vmpackc.low %vm14670_vm12, %vm14670_vm12  ;;  %v11862_v20 = vunpack.i.l.bf16 %v14451_v17  ;;  %v11867_v17 = vunpack.i.l.bf16 %v14467_v2  ;;  %v18627_v34 = vrot.slane %v14522_v3, %v14280_v49 }
0x100d   :  { %9352 = vmatprep.subr.msk.bf16.mxu1 %vm18613_vm3, %v9351_v50  ;;  %vm9356_vm9 = vmpackc.low %vm14796_vm6, %vm14796_vm6  ;;  %v18633_v39 = vrot.slane %v14522_v3, %v14290_v11  ;;  %v4822_v50 = vrot.slane %v14579_v23, %v14290_v11  ;;  %v4931_v61 = vrot.slane %v14741_v22, %v14280_v49  ;;  %vm18639_vm6 = vcmp.lt.s32.totalorder %v14287_v62, 127 }
0x100e   :  { %vm18618_vm4 = vmmov %vm18617_vm10  ;;  %9247 = vmatpush1.bf16.msk.msra.mxu0 %vm9239_vm5, %v9246_v21 }
0x100f   :  { %v4543_v46 = vsel %vm18618_vm4, %v11912_v55, %v11977_v33  ;;  %vm18619_vm12 = vmpackc.low %vm14773_vm13, %vm14773_vm13  ;;  %v4539_v0 = vsel %vm18618_vm4, %v11977_v33, %v11917_v59 }
0x1010   :  { %9250 = vmatprep.subr.msk.bf16.mxu0 %vm18619_vm12, %v9249_v16  ;;  %vm18620_vm10 = vmpackc.low %vm14714_vm15, %vm14714_vm15  ;;  %v9255_v10 = vpack.c.bf16 %v4544_v14, %v4543_v46  ;;  %v4830_v16 = vrot.slane %v14579_v23, %v14299_v32  ;;  %v11812_v14 = vunpack.i.l.bf16 %v14489_v36  ;;  %v18643_v46 = vld [vmem:[#allocation39_spill] sm:$0xff] }
0x1011   :  { %9355 = vmatpush1.bf16.msk.msra.mxu1 %vm18620_vm10, %v9354_v52  ;;  %vm9251_vm8 = vmpackc.low %vm14822_vm7, %vm14822_vm7  ;;  %v11873_v43 = vunpack.i.h.bf16 %v18643_v46 }
0x1012   :  { %9358 = vmatprep.subr.msk.bf16.mxu1 %vm9356_vm9, %v9357_v6  ;;  %vm18413_vm15 = vmpackc.low %vm14842_vm1, %vm14842_vm1  ;;  %9253 = vmatpush1.bf16.msk.msra.mxu0 %vm9251_vm8, %v9252_v57  ;;  %v11813_v57 = vunpack.i.h.bf16 %v14489_v36  ;;  %v11872_v6 = vunpack.i.l.bf16 %v18643_v46  ;;  %v15146_v36 = vpop.permute.xlu1 %11995  ;;  %v18670_v46 = vld [vmem:[#allocation20_spill] sm:$0xff] }
0x1013   :  { %vm18621_vm3 = vmmov %vm18618_vm4 }
0x1014   :  { %v4540_v26 = vsel %vm18621_vm3, %v11978_v35, %v11918_v58  ;;  %vm18622_vm12 = vmmov %vm18621_vm3  ;;  %v18636_v35 = vrot.slane %v14522_v3, %v14299_v32 }
0x1015   :  { %v4536_v30 = vsel %vm18622_vm12, %v11918_v58, %v11983_v60  ;;  %vm18623_vm10 = vmmov %vm18621_vm3  ;;  %9361 = vmatpush1.bf16.msk.msra.mxu1 %vm18413_vm15, %v9360_v63  ;;  %v9366_v21 = vpack.c.bf16 %v4540_v26, %v4539_v0  ;;  %v15106_v63 = vsel %vm18639_vm6, %v11803_v29, %v11863_v44  ;;  %v18644_v58 = vld [vmem:[#allocation25_spill] sm:$0xff]  ;;  %v18652_v0 = vld [vmem:[#allocation22_spill] sm:$0xff] }
0x1016   :  { %v4548_v5 = vsel %vm18623_vm10, %v11983_v60, %v11913_v15  ;;  %vm18624_vm5 = vmmov %vm18621_vm3  ;;  %vm15071_vm10 = vcmp.eq.s32.totalorder %v18633_v39, 1 }
0x1017   :  { %v4535_v8 = vsel %vm18624_vm5, %v11917_v59, %v11982_v25  ;;  %vm18625_vm4 = vmmov %vm18621_vm3  ;;  %vm15054_vm5 = vcmp.eq.s32.totalorder %v18627_v34, 1  ;;  %v18645_v59 = vld [vmem:[#allocation21_spill] sm:$0xff]  ;;  %v4927_v34 = vrot.slane %v14741_v22, %v14290_v11 }
0x1018   :  { %v4547_v2 = vsel %vm18625_vm4, %v11982_v25, %v11912_v55  ;;  %vm18626_vm3 = vmpackc.low %vm14773_vm13, %vm14773_vm13  ;;  %v9363_v13 = vpack.c.bf16 %v4536_v30, %v4535_v8  ;;  %vm15061_vm13 = vcmp.eq.s32.totalorder %v18630_v51, 1  ;;  %v4826_v55 = vrot.slane %v14579_v23, %v14280_v49  ;;  %v18651_v25 = vld [vmem:[#allocation26_spill] sm:$0xff]  ;;  %v18659_v30 = vld [vmem:[#allocation23_spill] sm:$0xff] }
0x1019   :  { %9256 = vmatprep.subr.msk.bf16.mxu0 %vm18626_vm3, %v9255_v10  ;;  %v9258_v38 = vpack.c.bf16 %v4548_v5, %v4547_v2  ;;  %vm9260_vm12 = vmpackc.low %vm14912_vm2, %vm14912_vm2  ;;  %vm15092_vm3 = vcmp.eq.s32.totalorder %v18636_v35, 1  ;;  %v18646_v1 = vpack.c.bf16 %v18644_v58, %v18645_v59  ;;  %v18653_v26 = vpack.c.bf16 %v18651_v25, %v18652_v0  ;;  %v18660_v5 = vld [vmem:[#allocation19_spill] sm:$0xff]  ;;  %v11931_v2 = vpop.permute.xlu0 %11930  ;;  %v18667_v35 = vld [vmem:[#allocation29_spill] sm:$0xff]  ;;  %v12016_v59 = vpop.permute.xlu1 %12015 }
0x101a   :  { %9364 = vmatprep.subr.msk.bf16.mxu1 %vm9356_vm9, %v9363_v13  ;;  %vm18640_vm9 = vmmov %vm18639_vm6  ;;  %v18661_v8 = vpack.c.bf16 %v18659_v30, %v18660_v5  ;;  %v4935_v51 = vrot.slane %v14741_v22, %v14299_v32  ;;  %v12017_v25 = vunpack.i.l.bf16 %v12016_v59  ;;  %v18672_v0 = vld [vmem:[#allocation34_spill] sm:$0xff] }
0x101b   :  { %v15112_v3 = vsel %vm18640_vm9, %v11802_v12, %v11862_v20  ;;  %vm18641_vm4 = vmmov %vm18639_vm6  ;;  %9259 = vmatpush1.bf16.msk.msra.mxu0 %vm9251_vm8, %v9258_v38 }
0x101c   :  { %v15116_v23 = vsel %vm18641_vm4, %v11808_v47, %v11868_v42  ;;  %vm18642_vm15 = vmmov %vm18641_vm4  ;;  %9262 = vmatprep.subr.msk.bf16.mxu0 %vm9260_vm12, %v18646_v1  ;;  %v4699_v10 = vsel %vm18641_vm4, %v11863_v44, %v11808_v47  ;;  %v18655_v44 = vld [vmem:[#allocation40_spill] sm:$0xff]  ;;  %v12018_v1 = vunpack.i.h.bf16 %v12016_v59  ;;  %v11988_v59 = vunpack.i.h.bf16 %v15049_v18 }
0x101d   :  { %v15120_v52 = vsel %vm18642_vm15, %v11807_v4, %v11867_v17  ;;  %vm18647_vm7 = vmpackc.low %vm14842_vm1, %vm14842_vm1  ;;  %v11817_v45 = vunpack.i.l.bf16 %v18655_v44 }
0x101e   :  { %9367 = vmatpush1.bf16.msk.msra.mxu1 %vm18647_vm7, %v9366_v21  ;;  %vm9263_vm8 = vmpackc.low %vm14959_vm14, %vm14959_vm14  ;;  %v11932_v21 = vunpack.i.l.bf16 %v11931_v2 }
0x101f   :  { %vm18648_vm15 = vmmov %vm18641_vm4  ;;  %9265 = vmatpush1.bf16.msk.msra.mxu0 %vm9263_vm8, %v18661_v8 }
0x1020   :  { %v4698_v24 = vsel %vm18648_vm15, %v11862_v20, %v11807_v4  ;;  %vm18649_vm6 = vmmov %vm18641_vm4  ;;  %v18656_v20 = vld [vmem:[#allocation41_spill] sm:$0xff]  ;;  %vm15178_vm15 = vcmp.eq.s32.totalorder %v4826_v55, 1  ;;  %v11933_v55 = vunpack.i.h.bf16 %v11931_v2  ;;  %v15288_v2 = vpop.permute.xlu0 %11935 }
0x1021   :  { %v4707_v60 = vsel %vm18649_vm6, %v11868_v42, %v11803_v29  ;;  %vm18650_vm1 = vmmov %vm18641_vm4  ;;  %v11818_v29 = vunpack.i.h.bf16 %v18655_v44  ;;  %v11878_v47 = vunpack.i.h.bf16 %v18656_v20  ;;  %v9276_v42 = vpack.c.bf16 %v15106_v63, %v15112_v3  ;;  %v18669_v3 = vld [vmem:[#allocation24_spill] sm:$0xff] }
0x1022   :  { %v4706_v37 = vsel %vm18650_vm1, %v11867_v17, %v11802_v12  ;;  %vm18654_vm9 = vmpackc.low %vm14932_vm11, %vm14932_vm11  ;;  %v11877_v12 = vunpack.i.l.bf16 %v18656_v20  ;;  %v9384_v17 = vpack.c.bf16 %v15116_v23, %v15120_v52  ;;  %vm15194_vm4 = vcmp.eq.s32.totalorder %v4834_v19, 1  ;;  %v18666_v19 = vld [vmem:[#allocation33_spill] sm:$0xff]  ;;  %v12482_v23 = vld [vmem:[%s18375_s5 + $0xac] ss:$12 sps:$4 sm:$0xff]  }
0x1023   :  { %9370 = vmatprep.subr.msk.bf16.mxu1 %vm18654_vm9, %v18653_v26  ;;  %vm18414_vm7 = vmpackc.low %vm14978_vm0, %vm14978_vm0  ;;  %vm18664_vm6 = vcmp.lt.s32.totalorder %v14287_v62, 113  ;;  %v18668_v63 = vpack.c.bf16 %v18666_v19, %v18667_v35  ;;  %v18671_v58 = vpack.c.bf16 %v18669_v3, %v18670_v46  ;;  %v18673_v26 = vld [vmem:[#allocation30_spill] sm:$0xff]  ;;  %v9273_v9 = vpack.c.bf16 %v4699_v10, %v4698_v24  ;;  %v18690_v35 = vld [vmem:[#allocation32_spill] sm:$0xff] }
0x1024   :  { %v15204_v38 = vsel %vm18664_vm6, %v11813_v57, %v11873_v43  ;;  %vm18665_vm1 = vmmov %vm18664_vm6  ;;  %v18674_v44 = vpack.c.bf16 %v18672_v0, %v18673_v26  ;;  %v9381_v20 = vpack.c.bf16 %v4707_v60, %v4706_v37  ;;  %vm15238_vm6 = vcmp.eq.s32.totalorder %v4822_v50, 1  ;;  %v18686_v37 = vld [vmem:[#allocation31_spill] sm:$0xff] }
0x1025   :  { %v15208_v39 = vsel %vm18665_vm1, %v11812_v14, %v11872_v6  ;;  %9268 = vmatprep.subr.msk.bf16.mxu0 %vm9260_vm12, %v18668_v63  ;;  %9373 = vmatpush1.bf16.msk.msra.mxu1 %vm18414_vm7, %v18671_v58  ;;  %vm18675_vm2 = vmmov %vm18654_vm9  ;;  %v15244_v5 = vsel %vm18665_vm1, %v11872_v6, %v11817_v45  ;;  %vm15261_vm12 = vcmp.eq.s32.totalorder %v4830_v16, 1  ;;  %v11927_v19 = vunpack.i.l.bf16 %v15127_v56 }
0x1026   :  { %9376 = vmatprep.subr.msk.bf16.mxu1 %vm18675_vm2, %v18674_v44  ;;  %vm18678_vm9 = vmmov %vm18665_vm1  ;;  %v9288_v6 = vpack.c.bf16 %v15204_v38, %v15208_v39  ;;  %v18692_v63 = vpack.c.bf16 %v18690_v35, %v18691_v54  ;;  %v11923_v58 = vunpack.i.h.bf16 %v15035_v53  ;;  %v11922_v52 = vunpack.i.l.bf16 %v15035_v53 }
0x1027   :  { %v15248_v8 = vsel %vm18678_vm9, %v11873_v43, %v11818_v29  ;;  %vm18679_vm11 = vmmov %vm18665_vm1  ;;  %v15268_v43 = vld [vmem:[%s18374_s11 + $0xa0] ss:$8 sm:$0xf] }
0x1028   :  { %v15252_v31 = vsel %vm18679_vm11, %v11818_v29, %v11878_v47  ;;  %vm18680_vm2 = vmmov %vm18665_vm1  ;;  %v18687_v29 = vld [vmem:[#allocation27_spill] sm:$0xff]  ;;  %v9285_v40 = vpack.c.bf16 %v15248_v8, %v15244_v5 }
0x1029   :  { %v15256_v24 = vsel %vm18680_vm2, %v11817_v45, %v11877_v12  ;;  %vm18415_vm7 = vmpackc.low %vm15061_vm13, %vm15061_vm13  ;;  %v18688_v45 = vpack.c.bf16 %v18686_v37, %v18687_v29  ;;  %v11998_v29 = vunpack.i.h.bf16 %v15146_v36 }
0x102a   :  { %vm18683_vm9 = vmmov %vm18665_vm1  ;;  %vm18684_vm1 = vcmp.lt.s32.totalorder %v14287_v62, 127 }
0x102b   :  { %v15274_v10 = vsel %vm18683_vm9, %v11878_v47, %v11813_v57  ;;  %v4701_v60 = vsel %vm18684_vm1, %v12018_v1, %v11933_v55  ;;  %vm18685_vm11 = vmmov %vm18684_vm1  ;;  %9271 = vmatpush1.bf16.msk.msra.mxu0 %vm9263_vm8, %v18688_v45  ;;  %v15292_v57 = vsel %vm18680_vm2, %v11877_v12, %v11812_v14  ;;  %v11928_v47 = vunpack.i.h.bf16 %v15127_v56  ;;  %v12021_v14 = vpop.permute.xlu1 %12020 }
0x102c   :  { %v4700_v16 = vsel %vm18685_vm11, %v12017_v25, %v11932_v21  ;;  %vm18689_vm9 = vmpackc.low %vm15054_vm5, %vm15054_vm5  ;;  %v9396_v12 = vpack.c.bf16 %v15252_v31, %v15256_v24  ;;  %v12023_v3 = vunpack.i.h.bf16 %v12021_v14  ;;  %v12022_v46 = vunpack.i.l.bf16 %v12021_v14 }
0x102d   :  { %9274 = vmatprep.subr.msk.bf16.mxu0 %vm18689_vm9, %v9273_v9  ;;  %vm18693_vm14 = vmpackc.low %vm14978_vm0, %vm14978_vm0  ;;  %v9279_v56 = vpack.c.bf16 %v4701_v60, %v4700_v16  ;;  %vm15334_vm9 = vcmp.eq.s32.totalorder %v4931_v61, 1  ;;  %v11941_v61 = vpop.permute.xlu0 %11940  ;;  %v9393_v28 = vpack.c.bf16 %v15274_v10, %v15292_v57  ;;  %v11997_v45 = vunpack.i.l.bf16 %v15146_v36 }
0x102e   :  { %9379 = vmatpush1.bf16.msk.msra.mxu1 %vm18693_vm14, %v18692_v63  ;;  %vm9275_vm8 = vmpackc.low %vm15071_vm10, %vm15071_vm10  ;;  %v11943_v8 = vunpack.i.h.bf16 %v11941_v61  ;;  %v11937_v36 = vunpack.i.l.bf16 %v15288_v2 }
0x102f   :  { %9382 = vmatprep.subr.msk.bf16.mxu1 %vm18415_vm7, %v9381_v20  ;;  %vm18416_vm0 = vmpackc.low %vm15092_vm3, %vm15092_vm3  ;;  %v4709_v20 = vsel %vm18684_vm1, %v12023_v3, %v11928_v47  ;;  %9277 = vmatpush1.bf16.msk.msra.mxu0 %vm9275_vm8, %v9276_v42 }
0x1030   :  { %vm18694_vm11 = vmmov %vm18684_vm1 }
0x1031   :  { %v4705_v0 = vsel %vm18694_vm11, %v11928_v47, %v12018_v1  ;;  %vm18695_vm2 = vmmov %vm18684_vm1  ;;  %v11991_v22 = vpop.permute.xlu0 %11990 }
0x1032   :  { %v4704_v26 = vsel %vm18695_vm2, %v11927_v19, %v12017_v25  ;;  %vm18698_vm14 = vmmov %vm18684_vm1  ;;  %vm15354_vm2 = vcmp.eq.s32.totalorder %v4939_v48, 1  ;;  %9385 = vmatpush1.bf16.msk.msra.mxu1 %vm18416_vm0, %v9384_v17  ;;  %v12026_v48 = vpop.permute.xlu1 %12025  ;;  %v11987_v17 = vunpack.i.l.bf16 %v15049_v18  ;;  %v11938_v18 = vunpack.i.h.bf16 %v15288_v2 }
0x1033   :  { %v4697_v9 = vsel %vm18698_vm14, %v11933_v55, %v12023_v3  ;;  %vm18699_vm7 = vmmov %vm18684_vm1  ;;  %v9282_v60 = vpack.c.bf16 %v4705_v0, %v4704_v26  ;;  %v12028_v16 = vunpack.i.h.bf16 %v12026_v48  ;;  %v12027_v37 = vunpack.i.l.bf16 %v12026_v48 }
0x1034   :  { %v4696_v5 = vsel %vm18699_vm7, %v11932_v21, %v12022_v46  ;;  %vm18700_vm11 = vmmov %vm18684_vm1  ;;  %v11942_v21 = vunpack.i.l.bf16 %v11941_v61  ;;  %vm18709_vm0 = vcmp.lt.s32.totalorder %v14287_v62, 113  ;;  %v11993_v10 = vunpack.i.h.bf16 %v11991_v22 }
0x1035   :  { %v4708_v1 = vsel %vm18700_vm11, %v12022_v46, %v11927_v19  ;;  %v9390_v25 = vpack.c.bf16 %v4697_v9, %v4696_v5  ;;  %vm18703_vm7 = vmpackc.low %vm15054_vm5, %vm15054_vm5  ;;  %vm15379_vm5 = vcmp.eq.s32.totalorder %v4927_v34, 1  ;;  %v4806_v27 = vsel %vm18709_vm0, %v12028_v16, %v11943_v8 }
0x1036   :  { %9280 = vmatprep.subr.msk.bf16.mxu0 %vm18703_vm7, %v9279_v56  ;;  %v9387_v42 = vpack.c.bf16 %v4709_v20, %v4708_v1  ;;  %vm18417_vm1 = vmpackc.low %vm15178_vm15, %vm15178_vm15  ;;  %vm15398_vm7 = vcmp.eq.s32.totalorder %v4935_v51, 1  ;;  %v11992_v57 = vunpack.i.l.bf16 %v11991_v22  ;;  %v12031_v15 = vpop.permute.xlu1 %12030 }
0x1037   :  { %vm18706_vm14 = vmpackc.low %vm15061_vm13, %vm15061_vm13  ;;  %9283 = vmatpush1.bf16.msk.msra.mxu0 %vm9275_vm8, %v9282_v60  ;;  %v12033_v35 = vunpack.i.h.bf16 %v12031_v15  ;;  %v12032_v54 = vunpack.i.l.bf16 %v12031_v15 }
0x1038   :  { %9388 = vmatprep.subr.msk.bf16.mxu1 %vm18706_vm14, %v9387_v42  ;;  %vm18418_vm11 = vmpackc.low %vm15194_vm4, %vm15194_vm4  ;;  %vm18711_vm14 = vcmp.lt.s32.totalorder %v14287_v62, 112  ;;  %9286 = vmatprep.subr.msk.bf16.mxu0 %vm18417_vm1, %v9285_v40 }
0x1039   :  { %vm18710_vm13 = vmmov %vm18709_vm0  ;;  %v15415_v51 = vsel %vm18711_vm14, %v11923_v58, %v11988_v59  ;;  %v4912_v33 = vsel %vm18711_vm14, %v11922_v52, %v11987_v17 }
0x103a   :  { %v4805_v34 = vsel %vm18710_vm13, %v12027_v37, %v11942_v21  ;;  %vm18712_vm0 = vmpackc.low %vm15092_vm3, %vm15092_vm3  ;;  %v12036_v38 = vpop.permute.xlu1 %12035  ;;  %v9300_v48 = vpack.c.bf16 %v15415_v51, %v4912_v33  ;;  %v12479_v33 = vld [vmem:[%s18375_s5 + $0x90] ss:$12 sps:$4 sm:$0xff]  }
0x103b   :  { %9391 = vmatpush1.bf16.msk.msra.mxu1 %vm18712_vm0, %v9390_v25  ;;  %vm9287_vm10 = vmpackc.low %vm15238_vm6, %vm15238_vm6  ;;  %v9291_v2 = vpack.c.bf16 %v4806_v27, %v4805_v34  ;;  %v12037_v5 = vunpack.i.l.bf16 %v12036_v38 }
0x103c   :  { %vm18713_vm8 = vmmov %vm18710_vm13  ;;  %9394 = vmatprep.subr.msk.bf16.mxu1 %vm18418_vm11, %v9393_v28  ;;  %vm18719_vm11 = vcmp.lt.s32.totalorder %v14287_v62, 113  ;;  %9289 = vmatpush1.bf16.msk.msra.mxu0 %vm9287_vm10, %v9288_v6 }
0x103d   :  { %v4810_v47 = vsel %vm18713_vm8, %v11938_v18, %v12028_v16  ;;  %vm18714_vm13 = vmmov %vm18713_vm8  ;;  %v4802_v46 = vsel %vm18719_vm11, %v11943_v8, %v12033_v35 }
0x103e   :  { %v4809_v19 = vsel %vm18714_vm13, %v11937_v36, %v12027_v37  ;;  %vm18715_vm0 = vmmov %vm18711_vm14  ;;  %v12041_v30 = vpop.permute.xlu1 %12040 }
0x103f   :  { %v4917_v63 = vsel %vm18715_vm0, %v11998_v29, %v11923_v58  ;;  %vm18716_vm8 = vmmov %vm18715_vm0  ;;  %v12001_v58 = vpop.permute.xlu0 %12000  ;;  %v12043_v60 = vunpack.i.h.bf16 %v12041_v30  ;;  %v12042_v16 = vunpack.i.l.bf16 %v12041_v30  ;;  %v12484_v30 = vld [vmem:[%s18375_s5 + $0xa8] ss:$12 sps:$4 sm:$0xff]  }
0x1040   :  { %v4916_v14 = vsel %vm18716_vm8, %v11997_v45, %v11922_v52  ;;  %vm18717_vm13 = vmmov %vm18715_vm0  ;;  %v4904_v4 = vsel %vm18716_vm8, %v11992_v57, %v11997_v45  ;;  %v12003_v20 = vunpack.i.h.bf16 %v12001_v58  ;;  %v12002_v24 = vunpack.i.l.bf16 %v12001_v58 }
0x1041   :  { %v4908_v56 = vsel %vm18717_vm13, %v11987_v17, %v11992_v57  ;;  %vm18718_vm1 = vmmov %vm18715_vm0  ;;  %vm18725_vm0 = vcmp.gt.f32.partialorder %v15268_v43, 0.0  ;;  %v9405_v61 = vpack.c.bf16 %v4917_v63, %v4916_v14  ;;  %v8864_v63 = vld [vmem:[%s18369_s12 + $0x490] sm:$0xff] }
0x1042   :  { %v4909_v3 = vsel %vm18718_vm1, %v11988_v59, %v11993_v10  ;;  %vm18720_vm3 = vmmov %vm18719_vm11  ;;  %v9294_v59 = vpack.c.bf16 %v4810_v47, %v4809_v19  ;;  %v15484_v39 = vsel %vm18725_vm0, 1, %v18508_v41  ;;  %v12046_v51 = vpop.permute.xlu1 %12045 }
0x1043   :  { %v4814_v40 = vsel %vm18720_vm3, %v12033_v35, %v11938_v18  ;;  %vm18721_vm14 = vmmov %vm18720_vm3  ;;  %v9297_v1 = vpack.c.bf16 %v4909_v3, %v4908_v56  ;;  %v12006_v43 = vpop.permute.xlu0 %12005  ;;  %v5036_v13 = vrot.slane %v15484_v39, %v14280_v49  ;;  %v12048_v15 = vunpack.i.h.bf16 %v12046_v51 }
0x1044   :  { %v4801_v0 = vsel %vm18721_vm14, %v11942_v21, %v12032_v54  ;;  %vm18722_vm1 = vmmov %vm18720_vm3  ;;  %v12008_v25 = vunpack.i.h.bf16 %v12006_v43  ;;  %v12007_v8 = vunpack.i.l.bf16 %v12006_v43  ;;  %v5032_v21 = vrot.slane %v15484_v39, %v14290_v11 }
0x1045   :  { %v4813_v26 = vsel %vm18722_vm1, %v12032_v54, %v11937_v36  ;;  %v9402_v9 = vpack.c.bf16 %v4802_v46, %v4801_v0  ;;  %vm18723_vm11 = vmpackc.low %vm15178_vm15, %vm15178_vm15  ;;  %v5040_v35 = vrot.slane %v15484_v39, %v14299_v32 }
0x1046   :  { %9292 = vmatprep.subr.msk.bf16.mxu0 %vm18723_vm11, %v9291_v2  ;;  %vm18724_vm3 = vmpackc.low %vm15261_vm12, %vm15261_vm12  ;;  %v9399_v31 = vpack.c.bf16 %v4814_v40, %v4813_v26  ;;  %v12047_v2 = vunpack.i.l.bf16 %v12046_v51  ;;  %v12056_v44 = vpop.permute.xlu1 %12055  ;;  %v8867_v26 = vld [vmem:[%s18369_s12 + $0x4a8] sm:$0xff] }
0x1047   :  { %9397 = vmatpush1.bf16.msk.msra.mxu1 %vm18724_vm3, %v9396_v12  ;;  %vm18726_vm15 = vmmov %vm18716_vm8  ;;  %v12038_v12 = vunpack.i.h.bf16 %v12036_v38  ;;  %9295 = vmatpush1.bf16.msk.msra.mxu0 %vm9287_vm10, %v9294_v59  ;;  %v12011_v36 = vpop.permute.xlu0 %12010  ;;  %v12058_v40 = vunpack.i.h.bf16 %v12056_v44  ;;  %v12057_v0 = vunpack.i.l.bf16 %v12056_v44  ;;  %v8897_v44 = vld [vmem:[%s18369_s12 + $0x598] sm:$0xff] }
0x1048   :  { %v4905_v6 = vsel %vm18726_vm15, %v11993_v10, %v11998_v29  ;;  %vm9296_vm13 = vmpackc.low %vm15334_vm9, %vm15334_vm9  ;;  %v12013_v22 = vunpack.i.h.bf16 %v12011_v36  ;;  %v5044_v10 = vrot.slane %v15484_v39, %v14294_v7  ;;  %v12012_v57 = vunpack.i.l.bf16 %v12011_v36 }
0x1049   :  { %vm9404_vm14 = vmpackc.low %vm15354_vm2, %vm15354_vm2  ;;  %9298 = vmatprep.subr.msk.bf16.mxu0 %vm9296_vm13, %v9297_v1  ;;  %v9408_v42 = vpack.c.bf16 %v4905_v6, %v4904_v4  ;;  %vm15590_vm9 = vcmp.eq.s32.totalorder %v5032_v21, 1  ;;  %v8863_v21 = vld [vmem:[%s18369_s12 + $0x488] sm:$0xff] }
0x104a   :  { %vm18727_vm1 = vmpackc.low %vm15194_vm4, %vm15194_vm4  ;;  %vm15594_vm2 = vcmp.eq.s32.totalorder %v5044_v10, 1 }
0x104b   :  { %9400 = vmatprep.subr.msk.bf16.mxu1 %vm18727_vm1, %v9399_v31  ;;  %vm18728_vm6 = vmmov %vm18724_vm3  ;;  %v12051_v54 = vpop.permute.xlu0 %12050 }
0x104c   :  { %9403 = vmatpush1.bf16.msk.msra.mxu1 %vm18728_vm6, %v9402_v9  ;;  %vm9299_vm4 = vmpackc.low %vm15379_vm5, %vm15379_vm5  ;;  %v12053_v55 = vunpack.i.h.bf16 %v12051_v54  ;;  %v12052_v14 = vunpack.i.l.bf16 %v12051_v54  ;;  %v8878_v54 = vld [vmem:[%s18369_s12 + $0x500] sm:$0xff] }
0x104d   :  { %9406 = vmatprep.subr.msk.bf16.mxu1 %vm9404_vm14, %v9405_v61  ;;  %vm9407_vm12 = vmpackc.low %vm15398_vm7, %vm15398_vm7  ;;  %9301 = vmatpush1.bf16.msk.msra.mxu0 %vm9299_vm4, %v9300_v48  ;;  %vm15612_vm7 = vcmp.eq.s32.totalorder %v5040_v35, 1  ;;  %v8847_v35 = vld [vmem:[%s18369_s12 + $0x408] sm:$0xff] }
0x104e   :  { %vm18729_vm10 = vmmov %vm18716_vm8 }
0x104f   :  { %v4915_v50 = vsel %vm18729_vm10, %v12003_v20, %v12038_v12  ;;  %vm18730_vm11 = vmmov %vm18716_vm8  ;;  %vm18440_vm10 = vcmp.lt.s32.totalorder %v14287_v62, 111  ;;  %v12061_v6 = vpop.permute.xlu0 %12060 }
0x1050   :  { %v4914_v37 = vsel %vm18730_vm11, %v12002_v24, %v12037_v5  ;;  %vm18731_vm3 = vmmov %vm18716_vm8  ;;  %9409 = vmatpush1.bf16.msk.msra.mxu1 %vm9407_vm12, %v9408_v42  ;;  %vm15576_vm11 = vcmp.eq.s32.totalorder %v5036_v13, 1  ;;  %v5018_v46 = vsel %vm18440_vm10, %v12013_v22, %v12048_v15  ;;  %v5017_v53 = vsel %vm18440_vm10, %v12012_v57, %v12047_v2  ;;  %v8862_v13 = vld [vmem:[%s18369_s12 + $0x480] sm:$0xff] }
0x1051   :  { %v4910_v28 = vsel %vm18731_vm3, %v12037_v5, %v12007_v8  ;;  %vm18732_vm0 = vmmov %vm18731_vm3  ;;  %v9306_v19 = vpack.c.bf16 %v4915_v50, %v4914_v37  ;;  %v5013_v58 = vsel %vm18440_vm10, %v12047_v2, %v12052_v14  ;;  %v5014_v59 = vsel %vm18440_vm10, %v12048_v15, %v12053_v55  ;;  %v12071_v5 = vpop.permute.xlu1 %12070  ;;  %v12485_v2 = vld [vmem:[%s18375_s5 + $0x98] ss:$12 sps:$4 sm:$0xff]  }
0x1052   :  { %v4911_v52 = vsel %vm18732_vm0, %v12038_v12, %v12008_v25  ;;  %vm18733_vm8 = vmmov %vm18732_vm0  ;;  %v9309_v9 = vpack.c.bf16 %v5014_v59, %v5013_v58  ;;  %v5010_v38 = vsel %vm18440_vm10, %v12053_v55, %v12058_v40  ;;  %v5022_v39 = vsel %vm18440_vm10, %v12058_v40, %v12013_v22  ;;  %v8865_v55 = vld [vmem:[%s18369_s12 + $0x498] sm:$0xff]  ;;  %v8880_v40 = vld [vmem:[%s18369_s12 + $0x510] sm:$0xff] }
0x1053   :  { %v4907_v17 = vsel %vm18733_vm8, %v12008_v25, %v12043_v60  ;;  %vm18734_vm15 = vmmov %vm18732_vm0  ;;  %v9303_v47 = vpack.c.bf16 %v4911_v52, %v4910_v28  ;;  %v5009_v4 = vsel %vm18440_vm10, %v12052_v14, %v12057_v0  ;;  %v5021_v31 = vsel %vm18440_vm10, %v12057_v0, %v12012_v57  ;;  %v8896_v14 = vld [vmem:[%s18369_s12 + $0x590] sm:$0xff]  ;;  %v8881_v58 = vld [vmem:[%s18369_s12 + $0x518] sm:$0xff] }
0x1054   :  { %v4919_v29 = vsel %vm18734_vm15, %v12043_v60, %v12003_v20  ;;  %vm18735_vm1 = vmmov %vm18732_vm0  ;;  %v9312_v20 = vpack.c.bf16 %v5018_v46, %v5017_v53  ;;  %v12063_v12 = vunpack.i.h.bf16 %v12061_v6  ;;  %v9417_v1 = vpack.c.bf16 %v5022_v39, %v5021_v31  ;;  %v8848_v46 = vld [vmem:[%s18369_s12 + $0x410] sm:$0xff]  ;;  %v8849_v53 = vld [vmem:[%s18369_s12 + $0x418] sm:$0xff] }
0x1055   :  { %v4906_v45 = vsel %vm18735_vm1, %v12007_v8, %v12042_v16  ;;  %vm18736_vm6 = vmmov %vm18732_vm0  ;;  %9304 = vmatprep.subr.msk.bf16.mxu0 %vm9296_vm13, %v9303_v47  ;;  %v12062_v43 = vunpack.i.l.bf16 %v12061_v6  ;;  %v12073_v61 = vunpack.i.h.bf16 %v12071_v5  ;;  %v12072_v25 = vunpack.i.l.bf16 %v12071_v5  ;;  %v12066_v8 = vpop.permute.xlu0 %12065  ;;  %v12076_v60 = vpop.permute.xlu1 %12075  ;;  %v8866_v59 = vld [vmem:[%s18369_s12 + $0x4a0] sm:$0xff]  ;;  %v12486_v39 = vld [vmem:[%s18375_s5 + $0xb0] ss:$12 sps:$4 sm:$0xff]  }
0x1056   :  { %v4918_v18 = vsel %vm18736_vm6, %v12042_v16, %v12002_v24  ;;  %v9414_v34 = vpack.c.bf16 %v4907_v17, %v4906_v45  ;;  %9307 = vmatpush1.bf16.msk.msra.mxu0 %vm9299_vm4, %v9306_v19  ;;  %vm9308_vm5 = vmpackc.low %vm15576_vm11, %vm15576_vm11  ;;  %v9420_v24 = vpack.c.bf16 %v5010_v38, %v5009_v4  ;;  %v12068_v48 = vunpack.i.h.bf16 %v12066_v8  ;;  %v8894_v45 = vld [vmem:[%s18369_s12 + $0x580] sm:$0xff]  ;;  %v8899_v38 = vld [vmem:[%s18369_s12 + $0x5a8] sm:$0xff] }
0x1057   :  { %v9411_v27 = vpack.c.bf16 %v4919_v29, %v4918_v18  ;;  %vm9311_vm13 = vmpackc.low %vm15590_vm9, %vm15590_vm9  ;;  %9310 = vmatprep.subr.msk.bf16.mxu0 %vm9308_vm5, %v9309_v9  ;;  %v12067_v42 = vunpack.i.l.bf16 %v12066_v8  ;;  %v5020_v16 = vsel %vm18440_vm10, %v12063_v12, %v12073_v61  ;;  %v5019_v50 = vsel %vm18440_vm10, %v12062_v43, %v12072_v25  ;;  %v8895_v18 = vld [vmem:[%s18369_s12 + $0x588] sm:$0xff]  ;;  %v8846_v19 = vld [vmem:[%s18369_s12 + $0x400] sm:$0xff] }
0x1058   :  { %vm9419_vm4 = vmpackc.low %vm15612_vm7, %vm15612_vm7  ;;  %v12078_v37 = vunpack.i.h.bf16 %v12076_v60  ;;  %v12077_v28 = vunpack.i.l.bf16 %v12076_v60  ;;  %v5016_v17 = vsel %vm18440_vm10, %v12073_v61, %v12068_v48  ;;  %v15670_v29 = vpack.c.bf16 %v8863_v21, %v8862_v13  ;;  %v8898_v9 = vld [vmem:[%s18369_s12 + $0x5a0] sm:$0xff]  ;;  %v8869_v61 = vld [vmem:[%s18369_s12 + $0x4b8] sm:$0xff] }
0x1059   :  { %9412 = vmatprep.subr.msk.bf16.mxu1 %vm9404_vm14, %v9411_v27  ;;  %5256 = vmatmul.mubr.bf16.vlgmr.msra.gmra.mrb[108].mxu0 %v12479_v33  ;;  %vm9416_vm14 = vmpackc.low %vm15594_vm2, %vm15594_vm2  ;;  %v5015_v52 = vsel %vm18440_vm10, %v12072_v25, %v12067_v42  ;;  %v9318_v51 = vpack.c.bf16 %v5020_v16, %v5019_v50  ;;  %v15696_v47 = vpack.c.bf16 %v8895_v18, %v8894_v45  ;;  %v8850_v31 = vld [vmem:[%s18369_s12 + $0x420] sm:$0xff]  ;;  %v8900_v25 = vld [vmem:[%s18369_s12 + $0x5b0] sm:$0xff] }
0x105a   :  { %9415 = vmatpush1.bf16.msk.msra.mxu1 %vm9407_vm12, %v9414_v34  ;;  %5265 = vmatprep.mubr.bf16.mxu0 %v12482_v23  ;;  %v9315_v36 = vpack.c.bf16 %v5016_v17, %v5015_v52  ;;  %v5012_v27 = vsel %vm18440_vm10, %v12068_v48, %v12078_v37  ;;  %v5024_v34 = vsel %vm18440_vm10, %v12078_v37, %v12063_v12  ;;  %vm18745_vm12 = vcmask 261120   ;;  %v8882_v12 = vld [vmem:[%s18369_s12 + $0x520] sm:$0xff]  ;;  %v8901_v8 = vld [vmem:[%s18369_s12 + $0x5b8] sm:$0xff]  ;;  %v8852_v48 = vld [vmem:[%s18369_s12 + $0x430] sm:$0xff] }
0x105b   :  { %9313 = vmatpush1.bf16.msk.msra.mxu0 %vm9311_vm13, %v9312_v20  ;;  %9418 = vmatprep.subr.msk.bf16.mxu1 %vm9416_vm14, %v9417_v1  ;;  %v5011_v22 = vsel %vm18440_vm10, %v12067_v42, %v12077_v28  ;;  %v5023_v10 = vsel %vm18440_vm10, %v12077_v28, %v12062_v43  ;;  %v15738_v56 = vpack.c.bf16 %v8847_v35, %v8846_v19  ;;  %vm18746_vm3 = vmmov %vm18745_vm12  ;;  %v8883_v1 = vld [vmem:[%s18369_s12 + $0x528] sm:$0xff]  ;;  %v8868_v43 = vld [vmem:[%s18369_s12 + $0x4b0] sm:$0xff] }
0x105c   :  { %v9426_v57 = vpack.c.bf16 %v5012_v27, %v5011_v22  ;;  %v9423_v15 = vpack.c.bf16 %v5024_v34, %v5023_v10  ;;  %9316 = vmatprep.subr.msk.bf16.mxu0 %vm9308_vm5, %v9315_v36  ;;  %v15755_v0 = vpack.c.bf16 %v8897_v44, %v8896_v14  ;;  %v15779_v4 = vpack.c.bf16 %v8849_v53, %v8848_v46  ;;  %v8853_v42 = vld [vmem:[%s18369_s12 + $0x438] sm:$0xff]  ;;  %v8884_v60 = vld [vmem:[%s18369_s12 + $0x530] sm:$0xff]  ;;  %vm18747_vm0 = vmmov %vm18746_vm3 }
0x105d   :  { %5362 = vmatmul.mubr.bf16.vlgmr.msra.gmra.mrb[68].mxu1 %v12479_v33  ;;  %v8879_v33 = vld [vmem:[%s18369_s12 + $0x508] sm:$0xff]  ;;  %v15783_v6 = vpack.c.bf16 %v8881_v58, %v8880_v40  ;;  %v15785_v20 = vpack.c.bf16 %v8867_v26, %v8866_v59  ;;  %v15797_v5 = vpack.c.bf16 %v8899_v38, %v8898_v9  ;;  %v15819_v13 = vpack.c.bf16 %v8883_v1, %v8882_v12  ;;  %v8885_v50 = vld [vmem:[%s18369_s12 + $0x538] sm:$0xff]  ;;  %v8870_v37 = vld [vmem:[%s18369_s12 + $0x4c0] sm:$0xff] }
0x105e   :  { %5371 = vmatprep.mubr.bf16.mxu1 %v12482_v23  ;;  %9421 = vmatpush1.bf16.msk.msra.mxu1 %vm9419_vm4, %v9420_v24  ;;  %v15741_v3 = vpack.c.bf16 %v8879_v33, %v8878_v54  ;;  %v15743_v23 = vpack.c.bf16 %v8865_v55, %v8864_v63  ;;  %v8851_v24 = vld [vmem:[%s18369_s12 + $0x428] sm:$0xff]  ;;  %v15821_v21 = vpack.c.bf16 %v8869_v61, %v8868_v43  ;;  %vm18748_vm8 = vmmov %vm18747_vm0  ;;  %v8902_v52 = vld [vmem:[%s18369_s12 + $0x5c0] sm:$0xff] }
0x105f   :  { %9319 = vmatpush1.bf16.msk.msra.mxu0 %vm9311_vm13, %v9318_v51  ;;  %9424 = vmatprep.subr.msk.bf16.mxu1 %vm9416_vm14, %v9423_v15  ;;  %v15834_v16 = vpack.c.bf16 %v8901_v8, %v8900_v25  ;;  %v8871_v28 = vld [vmem:[%s18369_s12 + $0x4c8] sm:$0xff]  ;;  %v15853_v45 = vpack.c.bf16 %v8853_v42, %v8852_v48  ;;  %v15857_v18 = vpack.c.bf16 %v8885_v50, %v8884_v60  ;;  %v8854_v27 = vld [vmem:[%s18369_s12 + $0x440] sm:$0xff]  ;;  %v8873_v15 = vld [vmem:[%s18369_s12 + $0x4d8] sm:$0xff] }
0x1060   :  { %11159 = vmatprep.subr.bf16.mxu0 %v15670_v29  ;;  %v8903_v17 = vld [vmem:[%s18369_s12 + $0x5c8] sm:$0xff]  ;;  %v15859_v36 = vpack.c.bf16 %v8871_v28, %v8870_v37  ;;  %v8886_v22 = vld [vmem:[%s18369_s12 + $0x540] sm:$0xff]  ;;  %v8905_v19 = vld [vmem:[%s18369_s12 + $0x5d8] sm:$0xff] }
0x1061   :  { %5266 = vmatmul.mubr.bf16.gmra.mrb[112].mxu0 %v12484_v30  ;;  %v8855_v34 = vld [vmem:[%s18369_s12 + $0x448] sm:$0xff]  ;;  %v15871_v51 = vpack.c.bf16 %v8903_v17, %v8902_v52  ;;  %v8856_v63 = vld [vmem:[%s18369_s12 + $0x450] sm:$0xff]  ;;  %v8857_v55 = vld [vmem:[%s18369_s12 + $0x458] sm:$0xff] }
0x1062   :  { %5308 = vmatprep.mubr.bf16.mxu0 %v18508_v41  ;;  %9427 = vmatpush1.bf16.msk.msra.mxu1 %vm9419_vm4, %v9426_v57  ;;  %v8887_v10 = vld [vmem:[%s18369_s12 + $0x548] sm:$0xff]  ;;  %v8872_v57 = vld [vmem:[%s18369_s12 + $0x4d0] sm:$0xff]  ;;  %v15889_v35 = vpack.c.bf16 %v8855_v34, %v8854_v27  ;;  %v8889_v46 = vld [vmem:[%s18369_s12 + $0x558] sm:$0xff]  ;;  %v15913_v53 = vpack.c.bf16 %v8857_v55, %v8856_v63 }
0x1063   :  { %11191 = vmatprep.subr.bf16.mxu1 %v15696_v47  ;;  %v15893_v54 = vpack.c.bf16 %v8887_v10, %v8886_v22  ;;  %v15895_v33 = vpack.c.bf16 %v8873_v15, %v8872_v57  ;;  %v8888_v44 = vld [vmem:[%s18369_s12 + $0x550] sm:$0xff]  ;;  %v8874_v58 = vld [vmem:[%s18369_s12 + $0x4e0] sm:$0xff]  ;;  %v8875_v59 = vld [vmem:[%s18369_s12 + $0x4e8] sm:$0xff]  ;;  %v5170_v10 = vpop.permute.xlu0 %5169  ;;  %v5175_v15 = vpop.permute.xlu1 %5174 }
0x1064   :  { %v15917_v40 = vpack.c.bf16 %v8889_v46, %v8888_v44  ;;  %v8858_v26 = vld [vmem:[%s18369_s12 + $0x460] sm:$0xff]  ;;  %v15931_v9 = vpack.c.bf16 %v8875_v59, %v8874_v58  ;;  %v8859_v38 = vld [vmem:[%s18369_s12 + $0x468] sm:$0xff]  ;;  %v8876_v25 = vld [vmem:[%s18369_s12 + $0x4f0] sm:$0xff] }
0x1065   :  { %5372 = vmatmul.mubr.bf16.gmra.mrb[72].mxu1 %v12484_v30  ;;  %v15815_v30 = vpack.c.bf16 %v8851_v24, %v8850_v31  ;;  %v8907_v31 = vld [vmem:[%s18369_s12 + $0x5e8] sm:$0xff]  ;;  %v15942_v24 = vpack.c.bf16 %v8859_v38, %v8858_v26  ;;  %v8890_v1 = vld [vmem:[%s18369_s12 + $0x560] sm:$0xff]  ;;  %v8877_v8 = vld [vmem:[%s18369_s12 + $0x4f8] sm:$0xff] }
0x1066   :  { %5414 = vmatprep.mubr.bf16.mxu1 %v18508_v41  ;;  %v8891_v43 = vld [vmem:[%s18369_s12 + $0x568] sm:$0xff]  ;;  %v8860_v48 = vld [vmem:[%s18369_s12 + $0x470] sm:$0xff]  ;;  %v15966_v42 = vpack.c.bf16 %v8877_v8, %v8876_v25  ;;  %v8861_v60 = vld [vmem:[%s18369_s12 + $0x478] sm:$0xff] }
0x1067   :  { %v15953_v61 = vpack.c.bf16 %v8891_v43, %v8890_v1  ;;  %v8908_v50 = vld [vmem:[%s18369_s12 + $0x5f0] sm:$0xff]  ;;  %v8909_v37 = vld [vmem:[%s18369_s12 + $0x5f8] sm:$0xff]  ;;  %v15978_v28 = vpack.c.bf16 %v8861_v60, %v8860_v48  ;;  %v5435_v22 = vld [vmem:[%s18371_s10 + $0x4] sm:$0xf] }
0x1068   :  { %v15980_v52 = vpack.c.bf16 %v8909_v37, %v8908_v50  ;;  %v8892_v17 = vld [vmem:[%s18369_s12 + $0x570] sm:$0xff]  ;;  %v8893_v27 = vld [vmem:[%s18369_s12 + $0x578] sm:$0xff]  ;;  %v16000_v57 = vrot.slane %v5435_v22, %v14290_v11  ;;  %v16006_v63 = vrot.slane %v5435_v22, %v14299_v32 }
0x1069   :  { %8842 = vmatmul.mubr.msk.bf16.vlgmr.msra.gmra.mrb[108].mxu0 %vm18745_vm12, %v12485_v2  ;;  %v15989_v34 = vpack.c.bf16 %v8893_v27, %v8892_v17 }
0x106a   :  { %5318 = vmatprep.mubr.bf16.mxu0 %v18508_v41  ;;  %11161 = vmatpush3.bf16.msra.mxu0 %v15738_v56 }
0x106b   :  { %11163 = vmatprep.subr.bf16.mxu0 %v15743_v23 }
0x106d   :  { %8844 = vmatmul.mubr.msk.bf16.vlgmr.msra.gmra.mrb[68].mxu1 %vm18746_vm3, %v12485_v2  ;;  %v8904_v2 = vld [vmem:[%s18369_s12 + $0x5d0] sm:$0xff] }
0x106e   :  { %5424 = vmatprep.mubr.bf16.mxu1 %v18508_v41  ;;  %11193 = vmatpush3.bf16.msra.mxu1 %v15741_v3  ;;  %v15904_v14 = vpack.c.bf16 %v8905_v19, %v8904_v2  ;;  %v16003_v19 = vrot.slane %v5435_v22, %v14280_v49 }
0x106f   :  { %11195 = vmatprep.subr.bf16.mxu1 %v15755_v0  ;;  %11165 = vmatpush3.bf16.msra.mxu0 %v15779_v4 }
0x1070   :  { %11167 = vmatprep.subr.bf16.mxu0 %v15785_v20 }
0x1071   :  { %8843 = vmatmul.mubr.msk.bf16.gmra.mrb[112].mxu0 %vm18747_vm0, %v12486_v39 }
0x1072   :  { %11197 = vmatpush3.bf16.msra.mxu1 %v15783_v6 }
0x1073   :  { %11199 = vmatprep.subr.bf16.mxu1 %v15797_v5  ;;  %11169 = vmatpush3.bf16.msra.mxu0 %v15815_v30 }
0x1074   :  { %11171 = vmatprep.subr.bf16.mxu0 %v15821_v21 }
0x1075   :  { %8845 = vmatmul.mubr.msk.bf16.gmra.mrb[72].mxu1 %vm18748_vm8, %v12486_v39  ;;  %v8906_v39 = vld [vmem:[%s18369_s12 + $0x5e0] sm:$0xff] }
0x1076   :  { %11201 = vmatpush3.bf16.msra.mxu1 %v15819_v13  ;;  %v15944_v12 = vpack.c.bf16 %v8907_v31, %v8906_v39 }
0x1077   :  { %11203 = vmatprep.subr.bf16.mxu1 %v15834_v16  ;;  %11173 = vmatpush3.bf16.msra.mxu0 %v15853_v45 }
0x1078   :  { %11175 = vmatprep.subr.bf16.mxu0 %v15859_v36 }
0x107a   :  { %11205 = vmatpush3.bf16.msra.mxu1 %v15857_v18 }
0x107b   :  { %11207 = vmatprep.subr.bf16.mxu1 %v15871_v51  ;;  %11177 = vmatpush3.bf16.msra.mxu0 %v15889_v35 }
0x107c   :  { %11179 = vmatprep.subr.bf16.mxu0 %v15895_v33 }
0x107e   :  { %11209 = vmatpush3.bf16.msra.mxu1 %v15893_v54 }
0x107f   :  { %11211 = vmatprep.subr.bf16.mxu1 %v15904_v14  ;;  %11181 = vmatpush3.bf16.msra.mxu0 %v15913_v53 }
0x1080   :  { %11183 = vmatprep.subr.bf16.mxu0 %v15931_v9 }
0x1082   :  { %11213 = vmatpush3.bf16.msra.mxu1 %v15917_v40 }
0x1083   :  { %11185 = vmatpush3.bf16.msra.mxu0 %v15942_v24  ;;  %11215 = vmatprep.subr.bf16.mxu1 %v15944_v12 }
0x1084   :  { %11187 = vmatprep.subr.bf16.mxu0 %v15966_v42 }
0x1086   :  { %11217 = vmatpush3.bf16.msra.mxu1 %v15953_v61 }
0x1087   :  { %11219 = vmatprep.subr.bf16.mxu1 %v15980_v52  ;;  %11189 = vmatpush3.bf16.msra.mxu0 %v15978_v28 }
0x1088   :  { %11223 = vmatprep.subr.bf16.mxu0 %v15670_v29 }
0x108a   :  { %11221 = vmatpush3.bf16.msra.mxu1 %v15989_v34 }
0x108b   :  { %11255 = vmatprep.subr.bf16.mxu1 %v15696_v47  ;;  %v16009_v47 = vrot.slane %v5435_v22, %v14294_v7 }
0x113c   :  { %v5310_v2 = vpop.f32.mrb[108].mxu0 }
0x113d   :  { %v11430_v55 = vadd.f32 %v5310_v2, %v5170_v10  ;;  %v5312_v29 = vpop.f32.mrb[109].mxu0  ;;  %v5180_v2 = vpop.permute.xlu0 %5179 }
0x113e   :  { %v11431_v46 = vadd.f32 %v5312_v29, %v5170_v10  ;;  %v5314_v59 = vpop.f32.mrb[110].mxu0 }
0x113f   :  { %v5457_v38 = vadd.f32 %v11430_v55, %v16000_v57  ;;  %v11432_v39 = vadd.f32 %v5314_v59, %v5175_v15  ;;  %v5316_v1 = vpop.f32.mrb[111].mxu0 }
0x1140   :  { %v5416_v44 = vpop.f32.mrb[68].mxu1  ;;  %v5458_v25 = vadd.f32 %v11431_v46, %v16003_v19  ;;  %v11433_v48 = vadd.f32 %v5316_v1, %v5175_v15  ;;  %v5185_v46 = vpop.permute.xlu1 %5184 }
0x1141   :  { %v11438_v58 = vadd.f32 %v5416_v44, %v5170_v10  ;;  %v5418_v26 = vpop.f32.mrb[69].mxu1  ;;  %vm5473_vm15 = vcmp.gt.f32.partialorder %v5457_v38, 0.0  ;;  %v5489_v37 = vmul.f32 0.2, %v5457_v38  ;;  %v16016_v22 = vadd.f32 %v11432_v39, %v16000_v57 }
0x1142   :  { %v11439_v31 = vadd.f32 %v5418_v26, %v5170_v10  ;;  %v5420_v43 = vpop.f32.mrb[70].mxu1  ;;  %v5462_v10 = vadd.f32 %v11433_v48, %v16003_v19  ;;  %vm5474_vm6 = vcmp.gt.f32.partialorder %v5458_v25, 0.0  ;;  %v5490_v44 = vmul.f32 0.2, %v5458_v25 }
0x1143   :  { %v5459_v8 = vadd.f32 %v11438_v58, %v16006_v63  ;;  %v11440_v60 = vadd.f32 %v5420_v43, %v5175_v15  ;;  %v5422_v50 = vpop.f32.mrb[71].mxu1  ;;  %v16020_v59 = vsel %vm5473_vm15, %v5457_v38, %v5489_v37  ;;  %vm5477_vm5 = vcmp.gt.f32.partialorder %v16016_v22, 0.0 }
0x1144   :  { %v5460_v17 = vadd.f32 %v11439_v31, %v16009_v47  ;;  %v11441_v29 = vadd.f32 %v5422_v50, %v5175_v15  ;;  %v5320_v58 = vpop.f32.mrb[112].mxu0  ;;  %vm5478_vm9 = vcmp.gt.f32.partialorder %v5462_v10, 0.0  ;;  %v16023_v62 = vsel %vm5474_vm6, %v5458_v25, %v5490_v44 }
0x1145   :  { %vm5475_vm1 = vcmp.gt.f32.partialorder %v5459_v8, 0.0  ;;  %v5491_v27 = vmul.f32 0.2, %v5459_v8  ;;  %v5463_v55 = vadd.f32 %v11440_v60, %v16006_v63  ;;  %v11434_v1 = vadd.f32 %v5320_v58, %v5180_v2  ;;  %v5322_v39 = vpop.f32.mrb[113].mxu0  ;;  %5652 = vmatprep.mubr.f32.mxu0 %v16023_v62 }
0x1146   :  { %vm5476_vm11 = vcmp.gt.f32.partialorder %v5460_v17, 0.0  ;;  %v5492_v26 = vmul.f32 0.2, %v5460_v17  ;;  %v5464_v31 = vadd.f32 %v11441_v29, %v16009_v47  ;;  %v5494_v48 = vmul.f32 0.2, %v5462_v10  ;;  %v5324_v15 = vpop.f32.mrb[114].mxu0  ;;  %5653 = vmatmul.mubr.f32.vlgmr.msra.gmra.mrb[116].mxu0 %v16020_v59 }
0x1147   :  { %v11435_v32 = vadd.f32 %v5322_v39, %v5180_v2  ;;  %v16029_v38 = vsel %vm5475_vm1, %v5459_v8, %v5491_v27  ;;  %v5465_v37 = vadd.f32 %v11434_v1, %v16000_v57  ;;  %v11436_v29 = vadd.f32 %v5324_v15, %v5185_v46  ;;  %v5326_v25 = vpop.f32.mrb[115].mxu0  ;;  %11225 = vmatpush3.bf16.msra.mxu0 %v15738_v56 }
0x1148   :  { %v5426_v43 = vpop.f32.mrb[72].mxu1  ;;  %v16026_v7 = vsel %vm5476_vm11, %v5460_v17, %v5492_v26  ;;  %vm5480_vm2 = vcmp.gt.f32.partialorder %v5464_v31, 0.0  ;;  %v16040_v1 = vsel %vm5478_vm9, %v5462_v10, %v5494_v48  ;;  %11227 = vmatprep.subr.bf16.mxu0 %v15743_v23  ;;  %vm5479_vm7 = vcmp.gt.f32.partialorder %v5463_v55, 0.0 }
0x1149   :  { %v11442_v60 = vadd.f32 %v5426_v43, %v5180_v2  ;;  %v5428_v50 = vpop.f32.mrb[73].mxu1  ;;  %5737 = vmatprep.mubr.f32.mxu1 %v16026_v7  ;;  %v5466_v39 = vadd.f32 %v11435_v32, %v16003_v19  ;;  %v11437_v43 = vadd.f32 %v5326_v25, %v5185_v46  ;;  %v5469_v27 = vadd.f32 %v11436_v29, %v16000_v57 }
0x114a   :  { %v11443_v58 = vadd.f32 %v5428_v50, %v5180_v2  ;;  %v5430_v44 = vpop.f32.mrb[74].mxu1  ;;  %5738 = vmatmul.mubr.f32.vlgmr.msra.gmra.mrb[76].mxu1 %v16029_v38  ;;  %5657 = vmatprep.mubr.f32.mxu0 %v16040_v1  ;;  %v5496_v50 = vmul.f32 0.2, %v5464_v31  ;;  %v5493_v57 = vmul.f32 0.2, %v16016_v22  ;;  %vm5481_vm14 = vcmp.gt.f32.partialorder %v5465_v37, 0.0 }
0x114b   :  { %v11444_v17 = vadd.f32 %v5430_v44, %v5185_v46  ;;  %v5432_v26 = vpop.f32.mrb[75].mxu1  ;;  %v5467_v8 = vadd.f32 %v11442_v60, %v16006_v63  ;;  %v5470_v15 = vadd.f32 %v11437_v43, %v16003_v19  ;;  %11257 = vmatpush3.bf16.msra.mxu1 %v15741_v3  ;;  %v5495_v10 = vmul.f32 0.2, %v5463_v55  ;;  %11229 = vmatpush3.bf16.msra.mxu0 %v15779_v4  ;;  %v18749_v44 = vld [vmem:[#allocation35_spill] sm:$0xff] }
0x114c   :  { %v5468_v2 = vadd.f32 %v11443_v58, %v16009_v47  ;;  %v11445_v56 = vadd.f32 %v5432_v26, %v5185_v46  ;;  %11259 = vmatprep.subr.bf16.mxu1 %v15755_v0  ;;  %vm5482_vm13 = vcmp.gt.f32.partialorder %v5466_v39, 0.0  ;;  %v5498_v3 = vmul.f32 0.2, %v5466_v39  ;;  %11231 = vmatprep.subr.bf16.mxu0 %v15785_v20 }
0x114d   :  { %v5471_v32 = vadd.f32 %v11444_v17, %v16006_v63  ;;  %v16053_v63 = vsel %vm5480_vm2, %v5464_v31, %v5496_v50  ;;  %v16058_v23 = vsel %vm5477_vm5, %v16016_v22, %v5493_v57  ;;  %v16060_v46 = vsel %vm5479_vm7, %v5463_v55, %v5495_v10 }
0x114e   :  { %v5472_v19 = vadd.f32 %v11445_v56, %v16009_v47  ;;  %5742 = vmatprep.mubr.f32.mxu1 %v16053_v63  ;;  %v5497_v0 = vmul.f32 0.2, %v5465_v37  ;;  %5658 = vmatmul.mubr.f32.gmra.mrb[118].mxu0 %v16058_v23  ;;  %v16065_v47 = vsel %vm5482_vm13, %v5466_v39, %v5498_v3  ;;  %vm5484_vm4 = vcmp.gt.f32.partialorder %v5468_v2, 0.0 }
0x114f   :  { %5743 = vmatmul.mubr.f32.gmra.mrb[78].mxu1 %v16060_v46  ;;  %v5500_v4 = vmul.f32 0.2, %v5468_v2  ;;  %vm5486_vm12 = vcmp.gt.f32.partialorder %v5470_v15, 0.0  ;;  %5662 = vmatprep.mubr.f32.mxu0 %v16065_v47  ;;  %v5502_v22 = vmul.f32 0.2, %v5470_v15  ;;  %vm5483_vm3 = vcmp.gt.f32.partialorder %v5467_v8, 0.0 }
0x1150   :  { %11261 = vmatpush3.bf16.msra.mxu1 %v15783_v6  ;;  %v5499_v55 = vmul.f32 0.2, %v5467_v8  ;;  %11233 = vmatpush3.bf16.msra.mxu0 %v15815_v30  ;;  %vm5488_vm0 = vcmp.gt.f32.partialorder %v5472_v19, 0.0  ;;  %v5504_v20 = vmul.f32 0.2, %v5472_v19  ;;  %v16074_v48 = vsel %vm5481_vm14, %v5465_v37, %v5497_v0 }
0x1151   :  { %v16069_v31 = vsel %vm5484_vm4, %v5468_v2, %v5500_v4  ;;  %11263 = vmatprep.subr.bf16.mxu1 %v15797_v5  ;;  %v16077_v60 = vsel %vm5486_vm12, %v5470_v15, %v5502_v22  ;;  %11235 = vmatprep.subr.bf16.mxu0 %v15821_v21  ;;  %v5501_v29 = vmul.f32 0.2, %v5469_v27  ;;  %vm5485_vm8 = vcmp.gt.f32.partialorder %v5469_v27, 0.0 }
0x1152   :  { %5747 = vmatprep.mubr.f32.mxu1 %v16069_v31  ;;  %v16079_v6 = vsel %vm5483_vm3, %v5467_v8, %v5499_v55  ;;  %5663 = vmatmul.mubr.f32.gmra.mrb[120].mxu0 %v16074_v48  ;;  %v16084_v30 = vsel %vm5488_vm0, %v5472_v19, %v5504_v20  ;;  %vm5487_vm15 = vcmp.gt.f32.partialorder %v5471_v32, 0.0  ;;  %v5503_v5 = vmul.f32 0.2, %v5471_v32 }
0x1153   :  { %5748 = vmatmul.mubr.f32.gmra.mrb[80].mxu1 %v16079_v6  ;;  %5667 = vmatprep.mubr.f32.mxu0 %v16077_v60  ;;  %v16090_v37 = vsel %vm5485_vm8, %v5469_v27, %v5501_v29  ;;  %v5759_v58 = vmul.f32 %v16023_v62, %v16023_v62  ;;  %vm18751_vm1 = vcmask 1041408   ;;  %vm18758_vm2 = vcmask 15360  }
0x1154   :  { %11265 = vmatpush3.bf16.msra.mxu1 %v15819_v13  ;;  %5752 = vmatprep.mubr.f32.mxu1 %v16084_v30  ;;  %v16093_v21 = vsel %vm5487_vm15, %v5471_v32, %v5503_v5  ;;  %v5761_v13 = vmul.f32 %v16026_v7, %v16026_v7  ;;  %vm18752_vm6 = vmmov %vm18751_vm1 }
0x1155   :  { %11237 = vmatpush3.bf16.msra.mxu0 %v15853_v45  ;;  %11267 = vmatprep.subr.bf16.mxu1 %v15834_v16  ;;  %v5758_v16 = vmul.f32 %v16020_v59, %v16020_v59  ;;  %v5763_v45 = vmul.f32 %v16040_v1, %v16040_v1  ;;  %vm18753_vm11 = vmmov %vm18751_vm1 }
0x1156   :  { %11239 = vmatprep.subr.bf16.mxu0 %v15859_v36  ;;  %5668 = vmatmul.mubr.f32.gmra.mrb[122].mxu0 %v16090_v37  ;;  %v5765_v36 = vmul.f32 %v16053_v63, %v16053_v63  ;;  %vm18754_vm9 = vmmov %vm18751_vm1 }
0x1157   :  { %5753 = vmatmul.mubr.f32.gmra.mrb[82].mxu1 %v16093_v21  ;;  %5838 = vmatprep.mubr.f32.mxu0 %v5759_v58  ;;  %vm18759_vm5 = vmmov %vm18758_vm2 }
0x1158   :  { %11269 = vmatpush3.bf16.msra.mxu1 %v15857_v18  ;;  %5923 = vmatprep.mubr.f32.mxu1 %v5761_v13  ;;  %v5760_v18 = vmul.f32 %v16029_v38, %v16029_v38  ;;  %vm18762_vm7 = vmmov %vm18758_vm2 }
0x1159   :  { %11241 = vmatpush3.bf16.msra.mxu0 %v15889_v35  ;;  %11271 = vmatprep.subr.bf16.mxu1 %v15871_v51  ;;  %v5762_v51 = vmul.f32 %v16058_v23, %v16058_v23  ;;  %v5767_v35 = vmul.f32 %v16065_v47, %v16065_v47  ;;  %vm18763_vm13 = vmmov %vm18758_vm2 }
0x115a   :  { %11243 = vmatprep.subr.bf16.mxu0 %v15895_v33  ;;  %v5769_v33 = vmul.f32 %v16069_v31, %v16069_v31  ;;  %vm18766_vm14 = vmmov %vm18758_vm2 }
0x115b   :  { %vm18767_vm4 = vmmov %vm18758_vm2 }
0x115c   :  { %11273 = vmatpush3.bf16.msra.mxu1 %v15893_v54  ;;  %v5764_v54 = vmul.f32 %v16060_v46, %v16060_v46  ;;  %vm18769_vm12 = vmmov %vm18758_vm2 }
0x115d   :  { %11245 = vmatpush3.bf16.msra.mxu0 %v15913_v53  ;;  %11275 = vmatprep.subr.bf16.mxu1 %v15904_v14  ;;  %v5766_v14 = vmul.f32 %v16074_v48, %v16074_v48  ;;  %v5771_v53 = vmul.f32 %v16077_v60, %v16077_v60  ;;  %vm18770_vm3 = vmmov %vm18758_vm2 }
0x115e   :  { %11247 = vmatprep.subr.bf16.mxu0 %v15931_v9  ;;  %v5773_v9 = vmul.f32 %v16084_v30, %v16084_v30  ;;  %vm18771_vm0 = vmmov %vm18758_vm2 }
0x115f   :  { %vm18772_vm8 = vmmov %vm18771_vm0 }
0x1160   :  { %11277 = vmatpush3.bf16.msra.mxu1 %v15917_v40  ;;  %v5768_v40 = vmul.f32 %v16079_v6, %v16079_v6  ;;  %vm18773_vm15 = vmmov %vm18771_vm0 }
0x1161   :  { %11249 = vmatpush3.bf16.msra.mxu0 %v15942_v24  ;;  %11279 = vmatprep.subr.bf16.mxu1 %v15944_v12  ;;  %v5770_v24 = vmul.f32 %v16090_v37, %v16090_v37  ;;  %v5772_v12 = vmul.f32 %v16093_v21, %v16093_v21 }
0x1162   :  { %11251 = vmatprep.subr.bf16.mxu0 %v15966_v42  ;;  %v12568_v42 = vmov 1983009808  }
0x1164   :  { %11281 = vmatpush3.bf16.msra.mxu1 %v15953_v61  ;;  %v8910_v61 = vld [vmem:[%s18373_s13 + $0x10] sm:$0xff] }
0x1165   :  { %11253 = vmatpush3.bf16.msra.mxu0 %v15978_v28  ;;  %11283 = vmatprep.subr.bf16.mxu1 %v15980_v52  ;;  %v5979_v28 = vunpack.c.l.s4 %v12568_v42  ;;  %v18425_v52 = vmov 0.0   ;;  %v5977_v25 = vcombine.high %v8910_v61, %v8910_v61 }
0x1168   :  { %11285 = vmatpush3.bf16.msra.mxu1 %v15989_v34  ;;  %5839 = vmatmul.mubr.f32.vlgmr.msra.gmra.mrb[124].mxu0 %v5758_v16  ;;  %v5980_v34 = vunpack.c.0.s8 %v5979_v28 }
0x1169   :  { %5843 = vmatprep.mubr.f32.mxu0 %v5763_v45 }
0x116a   :  { %v16152_v39 = vsub.s32 %v5980_v34, %v18749_v44 }
0x116b   :  { %5924 = vmatmul.mubr.f32.vlgmr.msra.gmra.mrb[84].mxu1 %v5760_v18 }
0x116c   :  { %5928 = vmatprep.mubr.f32.mxu1 %v5765_v36  ;;  %5844 = vmatmul.mubr.f32.gmra.mrb[126].mxu0 %v5762_v51  ;;  %18750 = vst [vmem:[#allocation39_spill] sm:$0xff] %v16152_v39  ;;  %v5984_v43 = vrot.slane %v8910_v61, %v16152_v39  ;;  %v5991_v17 = vrot.slane %v5977_v25, %v16152_v39 }
0x116d   :  { %5848 = vmatprep.mubr.f32.mxu0 %v5767_v35 }
0x116e   :  { %v5992_v26 = vcombine.high %v5984_v43, %v5984_v43  ;;  %v5993_v8 = vcombine.high %v5991_v17, %v5991_v17 }
0x116f   :  { %5929 = vmatmul.mubr.f32.gmra.mrb[86].mxu1 %v5764_v54 }
0x1170   :  { %5933 = vmatprep.mubr.f32.mxu1 %v5769_v33  ;;  %5849 = vmatmul.mubr.f32.gmra.mrb[128].mxu0 %v5766_v14 }
0x1171   :  { %5853 = vmatprep.mubr.f32.mxu0 %v5771_v53  ;;  %8911 = vmatprep.subr.msk.mxu0 %vm18751_vm1, %v5992_v26  ;;  %vm18774_vm1 = vmmov %vm18771_vm0 }
0x1172   :  { %8921 = vmatprep.subr.msk.mxu1 %vm18752_vm6, %v5993_v8  ;;  %8912 = vmatpush1.msk.msra.mxu0 %vm18753_vm11, %v5984_v43  ;;  %vm18775_vm6 = vmmov %vm18771_vm0 }
0x1173   :  { %5934 = vmatmul.mubr.f32.gmra.mrb[88].mxu1 %v5768_v40  ;;  %vm18776_vm11 = vmmov %vm18771_vm0 }
0x1174   :  { %5938 = vmatprep.mubr.f32.mxu1 %v5773_v9  ;;  %5854 = vmatmul.mubr.f32.gmra.mrb[130].mxu0 %v5770_v24 }
0x1175   :  { %6090 = vmatprep.mubr.f32.mxu0 %v18425_v52  ;;  %8922 = vmatpush1.msk.msra.mxu1 %vm18754_vm9, %v5991_v17  ;;  %vm18777_vm9 = vmmov %vm18771_vm0 }
0x1177   :  { %5939 = vmatmul.mubr.f32.gmra.mrb[90].mxu1 %v5772_v12 }
0x1178   :  { %6203 = vmatprep.mubr.f32.mxu1 %v18425_v52 }
0x1219   :  { %v10046_v27 = vpop.f32.mrb[116].mxu0 }
0x121a   :  { %v10047_v2 = vpop.f32.mrb[117].mxu0 }
0x121b   :  { %v10048_v15 = vadd.f32 %v10047_v2, %v10046_v27 }
0x121d   :  { %v10090_v32 = vpop.f32.mrb[76].mxu1 }
0x121e   :  { %v10091_v56 = vpop.f32.mrb[77].mxu1 }
0x121f   :  { %v10092_v50 = vadd.f32 %v10091_v56, %v10090_v32 }
0x1221   :  { %v16160_v57 = vadd.f32 %v10092_v50, %v10048_v15  ;;  %v10049_v10 = vpop.f32.mrb[118].mxu0 }
0x1222   :  { %v10093_v19 = vpop.f32.mrb[78].mxu1  ;;  %v10050_v3 = vpop.f32.mrb[119].mxu0 }
0x1223   :  { %v10094_v0 = vpop.f32.mrb[79].mxu1  ;;  %v10051_v4 = vadd.f32 %v10050_v3, %v10049_v10  ;;  %v5944_v25 = vmul.f32 %v16160_v57, %v16160_v57 }
0x1224   :  { %v10095_v22 = vadd.f32 %v10094_v0, %v10093_v19  ;;  %v617_v0 = vpop.permute.xlu0 %616 }
0x1225   :  { %v10052_v20 = vpop.f32.mrb[120].mxu0 }
0x1226   :  { %v16162_v55 = vadd.f32 %v10095_v22, %v10051_v4  ;;  %v10096_v29 = vpop.f32.mrb[80].mxu1  ;;  %v10053_v5 = vpop.f32.mrb[121].mxu0 }
0x1227   :  { %v10097_v58 = vpop.f32.mrb[81].mxu1  ;;  %v10054_v13 = vadd.f32 %v10053_v5, %v10052_v20 }
0x1228   :  { %v10098_v16 = vadd.f32 %v10097_v58, %v10096_v29  ;;  %v5945_v32 = vmul.f32 %v16162_v55, %v16162_v55 }
0x1229   :  { %v10055_v18 = vpop.f32.mrb[122].mxu0 }
0x122a   :  { %v16164_v45 = vadd.f32 %v10098_v16, %v10054_v13  ;;  %v10099_v36 = vpop.f32.mrb[82].mxu1  ;;  %v10056_v51 = vpop.f32.mrb[123].mxu0 }
0x122b   :  { %v10100_v35 = vpop.f32.mrb[83].mxu1  ;;  %v10057_v54 = vadd.f32 %v10056_v51, %v10055_v18  ;;  %v622_v51 = vpop.permute.xlu1 %621 }
0x122c   :  { %v10101_v33 = vadd.f32 %v10100_v35, %v10099_v36  ;;  %v5946_v58 = vmul.f32 %v16164_v45, %v16164_v45 }
0x122e   :  { %v16166_v14 = vadd.f32 %v10101_v33, %v10057_v54 }
0x123b   :  { %v10134_v53 = vpop.f32.mrb[124].mxu0 }
0x123c   :  { %v10135_v40 = vpop.f32.mrb[125].mxu0 }
0x123d   :  { %v10136_v9 = vadd.f32 %v10135_v40, %v10134_v53  ;;  %v627_v53 = vpop.permute.xlu0 %626  ;;  %v5947_v40 = vmul.f32 %v16166_v14, %v16166_v14 }
0x123e   :  { %v10178_v24 = vpop.f32.mrb[84].mxu1 }
0x123f   :  { %v10179_v12 = vpop.f32.mrb[85].mxu1  ;;  %v10137_v61 = vpop.f32.mrb[126].mxu0 }
0x1240   :  { %v10180_v42 = vadd.f32 %v10179_v12, %v10178_v24  ;;  %v10138_v28 = vpop.f32.mrb[127].mxu0 }
0x1241   :  { %v10139_v34 = vadd.f32 %v10138_v28, %v10137_v61 }
0x1242   :  { %v5926_v44 = vadd.f32 %v10180_v42, %v10136_v9  ;;  %v10181_v43 = vpop.f32.mrb[86].mxu1  ;;  %v632_v42 = vpop.permute.xlu1 %631 }
0x1243   :  { %v10182_v17 = vpop.f32.mrb[87].mxu1  ;;  %v10140_v26 = vpop.f32.mrb[128].mxu0 }
0x1244   :  { %v5948_v8 = vsub.f32 %v5926_v44, %v5944_v25  ;;  %v10183_v27 = vadd.f32 %v10182_v17, %v10181_v43  ;;  %v10141_v2 = vpop.f32.mrb[129].mxu0  ;;  %v637_v43 = vpop.permute.xlu0 %636 }
0x1245   :  { %v10142_v15 = vadd.f32 %v10141_v2, %v10140_v26  ;;  %v18757_v2 = vld [vmem:[#allocation8_spill] sm:$0xff] }
0x1246   :  { %v5952_v56 = vmax.f32 %v5948_v8, 0.0  ;;  %v5931_v50 = vadd.f32 %v10183_v27, %v10139_v34  ;;  %v10184_v10 = vpop.f32.mrb[88].mxu1  ;;  %v18755_v34 = vld [vmem:[#allocation4_spill] sm:$0xff]  ;;  %v18756_v8 = vld [vmem:[#allocation3_spill] sm:$0xff] }
0x1247   :  { %v10185_v19 = vpop.f32.mrb[89].mxu1  ;;  %v10143_v3 = vpop.f32.mrb[130].mxu0  ;;  %v1065_v25 = vadd.f32 %v18755_v34, %v617_v0  ;;  %v1070_v27 = vadd.f32 %v18756_v8, %v622_v51 }
0x1248   :  { %v5956_v4 = vadd.f32 1e-08, %v5952_v56  ;;  %v5949_v22 = vsub.f32 %v5931_v50, %v5945_v32  ;;  %v10186_v20 = vadd.f32 %v10185_v19, %v10184_v10  ;;  %v10144_v29 = vpop.f32.mrb[131].mxu0  ;;  %v642_v50 = vpop.permute.xlu1 %641 }
0x1249   :  { %v10145_v5 = vadd.f32 %v10144_v29, %v10143_v3  ;;  %v18760_v3 = vld [vmem:[#allocation6_spill] sm:$0xff] }
0x124a   :  { %12531 = vrsqrt.f32 %v5956_v4  ;;  %v5953_v13 = vmax.f32 %v5949_v22, 0.0  ;;  %v5936_v16 = vadd.f32 %v10186_v20, %v10142_v15  ;;  %v10187_v18 = vpop.f32.mrb[90].mxu1  ;;  %v1085_v15 = vadd.f32 %v18757_v2, %v637_v43  ;;  %v18761_v4 = vld [vmem:[#allocation7_spill] sm:$0xff] }
0x124b   :  { %v10188_v36 = vpop.f32.mrb[91].mxu1  ;;  %v1075_v0 = vadd.f32 %v18760_v3, %v627_v53  ;;  %v1090_v22 = vadd.f32 %v18761_v4, %v642_v50  ;;  %v18768_v53 = vld [vmem:[#allocation9_spill] sm:$0xff] }
0x124c   :  { %v5957_v35 = vadd.f32 1e-08, %v5953_v13  ;;  %v5950_v54 = vsub.f32 %v5936_v16, %v5946_v58  ;;  %v10189_v33 = vadd.f32 %v10188_v36, %v10187_v18  ;;  %v18764_v13 = vld [vmem:[#allocation5_spill] sm:$0xff]  ;;  %v18765_v18 = vld [vmem:[#allocation10_spill] sm:$0xff] }
0x124d   :  { %v1080_v16 = vadd.f32 %v18764_v13, %v632_v42 }
0x124e   :  { %12533 = vrsqrt.f32 %v5957_v35  ;;  %v5954_v9 = vmax.f32 %v5950_v54, 0.0  ;;  %v5941_v24 = vadd.f32 %v10189_v33, %v10145_v5 }
0x1250   :  { %v5958_v12 = vadd.f32 1e-08, %v5954_v9  ;;  %v5951_v61 = vsub.f32 %v5941_v24, %v5947_v40 }
0x1252   :  { %12535 = vrsqrt.f32 %v5958_v12  ;;  %v5955_v28 = vmax.f32 %v5951_v61, 0.0 }
0x1254   :  { %v12532_v44 = vpop.eup %12531  ;;  %v5959_v17 = vadd.f32 1e-08, %v5955_v28 }
0x1255   :  { %v5964_v26 = vmul.f32 %v12532_v44, %v1065_v25 }
0x1256   :  { %12537 = vrsqrt.f32 %v5959_v17 }
0x1257   :  { %8913 = vmatmul.mubr.msk.f32.vlgmr.msra.gmra.mrb[132].mxu0 %vm18758_vm2, %v5964_v26  ;;  %8923 = vmatmul.mubr.msk.f32.vlgmr.msra.gmra.mrb[92].mxu1 %vm18759_vm5, %v5964_v26  ;;  %v5968_v32 = vmul.f32 %v5964_v26, %v16160_v57  ;;  %v647_v57 = vpop.permute.xlu0 %646  ;;  %vm18778_vm2 = vmmov %vm18771_vm0 }
0x1258   :  { %v12534_v56 = vpop.eup %12533  ;;  %6096 = vmatprep.mubr.f32.mxu0 %v18425_v52  ;;  %6209 = vmatprep.mubr.f32.mxu1 %v18425_v52  ;;  %v1095_v36 = vadd.f32 %v18765_v18, %v647_v57 }
0x1259   :  { %v5965_v10 = vmul.f32 %v12534_v56, %v1070_v27  ;;  %v5972_v19 = vsub.f32 %v1085_v15, %v5968_v32 }
0x125b   :  { %8914 = vmatmul.mubr.msk.f32.gmra.mrb[134].mxu0 %vm18762_vm7, %v5965_v10  ;;  %8924 = vmatmul.mubr.msk.f32.gmra.mrb[94].mxu1 %vm18763_vm13, %v5965_v10  ;;  %v5969_v20 = vmul.f32 %v5965_v10, %v16162_v55  ;;  %v652_v55 = vpop.permute.xlu1 %651 }
0x125c   :  { %v12536_v29 = vpop.eup %12535  ;;  %6102 = vmatprep.mubr.f32.mxu0 %v18425_v52  ;;  %6215 = vmatprep.mubr.f32.mxu1 %v18425_v52  ;;  %v1100_v40 = vadd.f32 %v18768_v53, %v652_v55 }
0x125d   :  { %v5966_v5 = vmul.f32 %v12536_v29, %v1075_v0  ;;  %v5973_v58 = vsub.f32 %v1090_v22, %v5969_v20 }
0x125f   :  { %8915 = vmatmul.mubr.msk.f32.gmra.mrb[136].mxu0 %vm18766_vm14, %v5966_v5  ;;  %8925 = vmatmul.mubr.msk.f32.gmra.mrb[96].mxu1 %vm18767_vm4, %v5966_v5  ;;  %v5970_v51 = vmul.f32 %v5966_v5, %v16164_v45 }
0x1260   :  { %v12538_v35 = vpop.eup %12537  ;;  %6108 = vmatprep.mubr.f32.mxu0 %v18425_v52  ;;  %6221 = vmatprep.mubr.f32.mxu1 %v18425_v52 }
0x1261   :  { %v5967_v54 = vmul.f32 %v12538_v35, %v1080_v16  ;;  %v5974_v33 = vsub.f32 %v1095_v36, %v5970_v51 }
0x1263   :  { %8916 = vmatmul.mubr.msk.f32.gmra.mrb[138].mxu0 %vm18769_vm12, %v5967_v54  ;;  %8926 = vmatmul.mubr.msk.f32.gmra.mrb[98].mxu1 %vm18770_vm3, %v5967_v54  ;;  %v5971_v9 = vmul.f32 %v5967_v54, %v16166_v14 }
0x1264   :  { %6114 = vmatprep.mubr.f32.mxu0 %v18425_v52  ;;  %6227 = vmatprep.mubr.f32.mxu1 %v18425_v52 }
0x1265   :  { %v5975_v45 = vsub.f32 %v1100_v40, %v5971_v9 }
0x1267   :  { %8917 = vmatmul.mubr.msk.f32.gmra.mrb[140].mxu0 %vm18771_vm0, %v5972_v19  ;;  %8927 = vmatmul.mubr.msk.f32.gmra.mrb[100].mxu1 %vm18772_vm8, %v5972_v19 }
0x1268   :  { %6120 = vmatprep.mubr.f32.mxu0 %v18425_v52  ;;  %6233 = vmatprep.mubr.f32.mxu1 %v18425_v52 }
0x126b   :  { %8918 = vmatmul.mubr.msk.f32.gmra.mrb[142].mxu0 %vm18773_vm15, %v5973_v58  ;;  %8928 = vmatmul.mubr.msk.f32.gmra.mrb[102].mxu1 %vm18774_vm1, %v5973_v58 }
0x126c   :  { %6126 = vmatprep.mubr.f32.mxu0 %v18425_v52  ;;  %6239 = vmatprep.mubr.f32.mxu1 %v18425_v52 }
0x126f   :  { %8919 = vmatmul.mubr.msk.f32.gmra.mrb[144].mxu0 %vm18775_vm6, %v5974_v33  ;;  %8929 = vmatmul.mubr.msk.f32.gmra.mrb[104].mxu1 %vm18776_vm11, %v5974_v33 }
0x1270   :  { %6132 = vmatprep.mubr.f32.mxu0 %v18425_v52  ;;  %6245 = vmatprep.mubr.f32.mxu1 %v18425_v52 }
0x1273   :  { %8920 = vmatmul.mubr.msk.f32.gmra.mrb[146].mxu0 %vm18777_vm9, %v5975_v45  ;;  %8930 = vmatmul.mubr.msk.f32.gmra.mrb[106].mxu1 %vm18778_vm2, %v5975_v45 }
0x132a   :  { %v6092_v14 = vpop.f32.mrb[132].mxu0  ;;  %v6205_v24 = vpop.f32.mrb[92].mxu1 }
0x132b   :  { %v6094_v12 = vpop.f32.mrb[133].mxu0  ;;  %v6207_v61 = vpop.f32.mrb[93].mxu1  ;;  %v6252_v32 = vmul.f32 %v6092_v14, %v16020_v59  ;;  %v6254_v56 = vmul.f32 %v6205_v24, %v16029_v38 }
0x132c   :  { %v6253_v50 = vmul.f32 %v6094_v12, %v16023_v62  ;;  %v6255_v10 = vmul.f32 %v6207_v61, %v16026_v7 }
0x132e   :  { %v6098_v42 = vpop.f32.mrb[134].mxu0  ;;  %v6211_v28 = vpop.f32.mrb[94].mxu1 }
0x132f   :  { %v6100_v34 = vpop.f32.mrb[135].mxu0  ;;  %v6213_v25 = vpop.f32.mrb[95].mxu1  ;;  %v6256_v59 = vmul.f32 %v6098_v42, %v16058_v23  ;;  %v6258_v38 = vmul.f32 %v6211_v28, %v16060_v46 }
0x1330   :  { %v6257_v62 = vmul.f32 %v6100_v34, %v16040_v1  ;;  %v6259_v7 = vmul.f32 %v6213_v25, %v16053_v63 }
0x1332   :  { %v6104_v44 = vpop.f32.mrb[136].mxu0  ;;  %v6217_v43 = vpop.f32.mrb[96].mxu1 }
0x1333   :  { %v6106_v17 = vpop.f32.mrb[137].mxu0  ;;  %v6219_v26 = vpop.f32.mrb[97].mxu1  ;;  %v6260_v5 = vmul.f32 %v6104_v44, %v16074_v48  ;;  %v6262_v58 = vmul.f32 %v6217_v43, %v16079_v6 }
0x1334   :  { %v6261_v13 = vmul.f32 %v6106_v17, %v16065_v47  ;;  %v6263_v16 = vmul.f32 %v6219_v26, %v16069_v31 }
0x1336   :  { %v6110_v8 = vpop.f32.mrb[138].mxu0  ;;  %v6223_v27 = vpop.f32.mrb[98].mxu1 }
0x1337   :  { %v6112_v2 = vpop.f32.mrb[139].mxu0  ;;  %v6225_v15 = vpop.f32.mrb[99].mxu1  ;;  %v6264_v51 = vmul.f32 %v6110_v8, %v16090_v37  ;;  %v6266_v23 = vmul.f32 %v6223_v27, %v16093_v21 }
0x1338   :  { %v6265_v48 = vmul.f32 %v6112_v2, %v16077_v60  ;;  %v6267_v6 = vmul.f32 %v6225_v15, %v16084_v30 }
0x133a   :  { %v6116_v19 = vpop.f32.mrb[140].mxu0  ;;  %v6229_v3 = vpop.f32.mrb[100].mxu1 }
0x133b   :  { %v16222_v0 = vadd.f32 %v6252_v32, %v6116_v19  ;;  %v16224_v4 = vadd.f32 %v6254_v56, %v6229_v3  ;;  %v6118_v22 = vpop.f32.mrb[141].mxu0  ;;  %v6231_v20 = vpop.f32.mrb[101].mxu1  ;;  %v8931_v3 = vld [vmem:[%s18374_s11 + $0x80] ss:$8 sm:$0xf] }
0x133c   :  { %v16226_v29 = vadd.f32 %v6253_v50, %v6118_v22  ;;  %v16228_v57 = vadd.f32 %v6255_v10, %v6231_v20  ;;  %vm6333_vm5 = vcmp.gt.f32.partialorder %v8931_v3, 0.0  ;;  %v12490_v22 = vld [vmem:[%s18375_s5 + $0xc4] ss:$12 sps:$4 sm:$0xff]  }
0x133d   :  { %18779 = vst [vmem:[#allocation25_spill] sm:$0xff] %v16222_v0  ;;  %18780 = vst [vmem:[#allocation21_spill] sm:$0xff] %v16224_v4  ;;  %v6334_v20 = vsel %vm6333_vm5, 1, %v18508_v41  ;;  %7337 = vmatprep.mubr.bf16.mxu0 %v12490_v22  ;;  %7443 = vmatprep.mubr.bf16.mxu1 %v12490_v22 }
0x133e   :  { %18781 = vst [vmem:[#allocation26_spill] sm:$0xff] %v16226_v29  ;;  %18782 = vst [vmem:[#allocation22_spill] sm:$0xff] %v16228_v57  ;;  %v6122_v18 = vpop.f32.mrb[142].mxu0  ;;  %v6235_v36 = vpop.f32.mrb[102].mxu1 }
0x133f   :  { %v16240_v35 = vadd.f32 %v6256_v59, %v6122_v18  ;;  %v16242_v46 = vadd.f32 %v6258_v38, %v6235_v36  ;;  %v6124_v1 = vpop.f32.mrb[143].mxu0  ;;  %v6237_v63 = vpop.f32.mrb[103].mxu1  ;;  %v6342_v59 = vrot.slane %v6334_v20, %v14280_v49 }
0x1340   :  { %v16246_v55 = vadd.f32 %v6257_v62, %v6124_v1  ;;  %v16248_v47 = vadd.f32 %v6259_v7, %v6237_v63  ;;  %v6338_v62 = vrot.slane %v6334_v20, %v14290_v11  ;;  %v18799_v63 = vld [vmem:[#allocation36_spill] sm:$0xff] }
0x1341   :  { %18783 = vst [vmem:[#allocation40_spill] sm:$0xff] %v16240_v35  ;;  %18784 = vst [vmem:[#allocation41_spill] sm:$0xff] %v16242_v46  ;;  %v16252_v31 = vpack.i.bf16 %v16240_v35, %v16222_v0  ;;  %v16256_v37 = vpack.i.bf16 %v16242_v46, %v16224_v4  ;;  %vm16439_vm7 = vcmp.eq.s32.totalorder %v6342_v59, 1  ;;  %vm18800_vm13 = vcmp.lt.s32.totalorder %v18799_v63, 17 }
0x1342   :  { %18785 = vst [vmem:[#allocation23_spill] sm:$0xff] %v16246_v55  ;;  %18786 = vst [vmem:[#allocation19_spill] sm:$0xff] %v16248_v47  ;;  %v6128_v21 = vpop.f32.mrb[144].mxu0  ;;  %v6241_v54 = vpop.f32.mrb[104].mxu1  ;;  %v16260_v33 = vpack.i.bf16 %v16246_v55, %v16226_v29  ;;  %v16264_v60 = vpack.i.bf16 %v16248_v47, %v16228_v57  ;;  %vm16456_vm12 = vcmp.eq.s32.totalorder %v6338_v62, 1  ;;  %vm18833_vm10 = vcmp.lt.s32.totalorder %v18799_v63, 17 }
0x1343   :  { %v16266_v30 = vadd.f32 %v6260_v5, %v6128_v21  ;;  %v16268_v53 = vadd.f32 %v6262_v58, %v6241_v54  ;;  %v6243_v40 = vpop.f32.mrb[105].mxu1  ;;  %12080 = vrot.lane.b32.xlu0 %v16252_v31, %s12562_s14  ;;  %v6130_v9 = vpop.f32.mrb[145].mxu0  ;;  %vm18801_vm14 = vmmov %vm18800_vm13 }
0x1344   :  { %v16272_v45 = vadd.f32 %v6263_v16, %v6243_v40  ;;  %v16274_v14 = vadd.f32 %v6261_v13, %v6130_v9  ;;  %12140 = vrot.lane.b32.xlu1 %v16260_v33, %s12562_s14  ;;  %v18797_v16 = vld [vmem:[#allocation37_spill] sm:$0xff]  ;;  %vm9428_vm4 = vmpackc.low %vm16439_vm7, %vm16439_vm7 }
0x1345   :  { %18787 = vst [vmem:[#allocation33_spill] sm:$0xff] %v16266_v30  ;;  %18788 = vst [vmem:[#allocation29_spill] sm:$0xff] %v16268_v53  ;;  %v6350_v18 = vrot.slane %v6334_v20, %v18797_v16 }
0x1346   :  { %18789 = vst [vmem:[#allocation24_spill] sm:$0xff] %v16272_v45  ;;  %18790 = vst [vmem:[#allocation20_spill] sm:$0xff] %v16274_v14  ;;  %v6134_v24 = vpop.f32.mrb[146].mxu0  ;;  %v6247_v12 = vpop.f32.mrb[106].mxu1 }
0x1347   :  { %v16278_v61 = vadd.f32 %v6264_v51, %v6134_v24  ;;  %v16280_v42 = vadd.f32 %v6266_v23, %v6247_v12  ;;  %v6249_v28 = vpop.f32.mrb[107].mxu1  ;;  %12085 = vrot.lane.b32.xlu0 %v16256_v37, %s12562_s14  ;;  %v6136_v34 = vpop.f32.mrb[147].mxu0  ;;  %v18798_v23 = vld [vmem:[#allocation38_spill] sm:$0xff]  ;;  %vm16460_vm3 = vcmp.eq.s32.totalorder %v6350_v18, 1  ;;  %vm18808_vm8 = vmmov %vm18800_vm13  ;;  %v8950_v18 = vld [vmem:[%s18376_s6 + $0x90] sm:$0xff] }
0x1348   :  { %v16284_v25 = vadd.f32 %v6267_v6, %v6249_v28  ;;  %v16286_v44 = vadd.f32 %v6265_v48, %v6136_v34  ;;  %12145 = vrot.lane.b32.xlu1 %v16264_v60, %s12562_s14  ;;  %v6346_v1 = vrot.slane %v6334_v20, %v18798_v23  ;;  %vm18809_vm15 = vmmov %vm18808_vm8 }
0x1349   :  { %18791 = vst [vmem:[#allocation34_spill] sm:$0xff] %v16278_v61  ;;  %18792 = vst [vmem:[#allocation30_spill] sm:$0xff] %v16280_v42  ;;  %v16292_v43 = vpack.i.bf16 %v16278_v61, %v16266_v30  ;;  %v16296_v17 = vpack.i.bf16 %v16280_v42, %v16268_v53 }
0x134a   :  { %18793 = vst [vmem:[#allocation31_spill] sm:$0xff] %v16284_v25  ;;  %18794 = vst [vmem:[#allocation27_spill] sm:$0xff] %v16286_v44  ;;  %v16300_v26 = vpack.i.bf16 %v16286_v44, %v16274_v14  ;;  %v16304_v8 = vpack.i.bf16 %v16284_v25, %v16272_v45  ;;  %vm16466_vm0 = vcmp.eq.s32.totalorder %v6346_v1, 1 }
0x134b   :  { %12090 = vrot.lane.b32.xlu0 %v16252_v31, %s12563_s0  ;;  %vm9431_vm1 = vmpackc.low %vm16456_vm12, %vm16456_vm12 }
0x134c   :  { %12150 = vrot.lane.b32.xlu1 %v16260_v33, %s12563_s0  ;;  %vm18810_vm6 = vmmov %vm18808_vm8 }
0x134d   :  { %vm18811_vm11 = vmmov %vm18810_vm6 }
0x134e   :  { %vm18812_vm9 = vmmov %vm18810_vm6 }
0x134f   :  { %12095 = vrot.lane.b32.xlu0 %v16256_v37, %s12563_s0  ;;  %vm9536_vm2 = vmpackc.low %vm16460_vm3, %vm16460_vm3 }
0x1350   :  { %12155 = vrot.lane.b32.xlu1 %v16264_v60, %s12563_s0  ;;  %vm18813_vm5 = vmmov %vm18810_vm6 }
0x1351   :  { %vm18859_vm3 = vmpackc.low %vm16466_vm0, %vm16466_vm0 }
0x1353   :  { %12100 = vrot.lane.b32.xlu0 %v16252_v31, %s12564_s28 }
0x1354   :  { %12160 = vrot.lane.b32.xlu1 %v16260_v33, %s12564_s28 }
0x1357   :  { %12105 = vrot.lane.b32.xlu0 %v16256_v37, %s12564_s28 }
0x1358   :  { %12165 = vrot.lane.b32.xlu1 %v16264_v60, %s12564_s28 }
0x135b   :  { %12110 = vrot.lane.b32.xlu0 %v16252_v31, %s12554_s26 }
0x135c   :  { %12170 = vrot.lane.b32.xlu1 %v16260_v33, %s12554_s26 }
0x135f   :  { %12115 = vrot.lane.b32.xlu0 %v16256_v37, %s12554_s26 }
0x1360   :  { %12175 = vrot.lane.b32.xlu1 %v16264_v60, %s12554_s26 }
0x1363   :  { %12120 = vrot.lane.b32.xlu0 %v16252_v31, %s12549_s21 }
0x1364   :  { %12180 = vrot.lane.b32.xlu1 %v16260_v33, %s12549_s21 }
0x1367   :  { %12125 = vrot.lane.b32.xlu0 %v16256_v37, %s12549_s21 }
0x1368   :  { %12185 = vrot.lane.b32.xlu1 %v16264_v60, %s12549_s21 }
0x136b   :  { %12130 = vrot.lane.b32.xlu0 %v16252_v31, %s12565_s29 }
0x136c   :  { %12190 = vrot.lane.b32.xlu1 %v16260_v33, %s12565_s29 }
0x136f   :  { %12135 = vrot.lane.b32.xlu0 %v16256_v37, %s12565_s29 }
0x1370   :  { %12195 = vrot.lane.b32.xlu1 %v16264_v60, %s12565_s29 }
0x1373   :  { %12200 = vrot.lane.b32.xlu0 %v16292_v43, %s12562_s14 }
0x1374   :  { %12265 = vrot.lane.b32.xlu1 %v16300_v26, %s12562_s14 }
0x1377   :  { %12205 = vrot.lane.b32.xlu0 %v16296_v17, %s12562_s14 }
0x1378   :  { %12270 = vrot.lane.b32.xlu1 %v16304_v8, %s12562_s14 }
0x137b   :  { %12210 = vrot.lane.b32.xlu0 %v16292_v43, %s12563_s0 }
0x137c   :  { %12275 = vrot.lane.b32.xlu1 %v16300_v26, %s12563_s0 }
0x137f   :  { %12215 = vrot.lane.b32.xlu0 %v16296_v17, %s12563_s0 }
0x1380   :  { %12280 = vrot.lane.b32.xlu1 %v16304_v8, %s12563_s0 }
0x1383   :  { %12220 = vrot.lane.b32.xlu0 %v16292_v43, %s12564_s28 }
0x1384   :  { %12285 = vrot.lane.b32.xlu1 %v16300_v26, %s12564_s28 }
0x1387   :  { %12225 = vrot.lane.b32.xlu0 %v16296_v17, %s12564_s28 }
0x1388   :  { %12290 = vrot.lane.b32.xlu1 %v16304_v8, %s12564_s28 }
0x138b   :  { %12230 = vrot.lane.b32.xlu0 %v16292_v43, %s12554_s26 }
0x138c   :  { %12295 = vrot.lane.b32.xlu1 %v16300_v26, %s12554_s26 }
0x138f   :  { %12235 = vrot.lane.b32.xlu0 %v16296_v17, %s12554_s26 }
0x1390   :  { %12300 = vrot.lane.b32.xlu1 %v16304_v8, %s12554_s26 }
0x1393   :  { %12240 = vrot.lane.b32.xlu0 %v16252_v31, %s12566_s9 }
0x1394   :  { %12305 = vrot.lane.b32.xlu1 %v16260_v33, %s12566_s9 }
0x1397   :  { %12245 = vrot.lane.b32.xlu0 %v16292_v43, %s12549_s21 }
0x1398   :  { %12315 = vrot.lane.b32.xlu1 %v16264_v60, %s12566_s9 }
0x139b   :  { %12250 = vrot.lane.b32.xlu0 %v16296_v17, %s12549_s21 }
0x139c   :  { %12335 = vrot.lane.b32.xlu1 %v16300_v26, %s12549_s21 }
0x139f   :  { %12255 = vrot.lane.b32.xlu0 %v16292_v43, %s12565_s29 }
0x13a0   :  { %12340 = vrot.lane.b32.xlu1 %v16304_v8, %s12549_s21 }
0x13a3   :  { %12260 = vrot.lane.b32.xlu0 %v16296_v17, %s12565_s29 }
0x13a4   :  { %12345 = vrot.lane.b32.xlu1 %v16300_v26, %s12565_s29 }
0x13a7   :  { %12310 = vrot.lane.b32.xlu0 %v16256_v37, %s12566_s9 }
0x13a8   :  { %12350 = vrot.lane.b32.xlu1 %v16304_v8, %s12565_s29 }
0x13ab   :  { %12320 = vrot.lane.b32.xlu0 %v16292_v43, %s12566_s9 }
0x13ac   :  { %12355 = vrot.lane.b32.xlu1 %v16300_v26, %s12566_s9 }
0x13af   :  { %12325 = vrot.lane.b32.xlu0 %v16296_v17, %s12566_s9 }
0x13b0   :  { %12360 = vrot.lane.b32.xlu1 %v16304_v8, %s12566_s9 }
0x13b3   :  { %12330 = vrot.lane.b32.xlu0 %v16252_v31, %s12567_s24 }
0x13b4   :  { %12365 = vrot.lane.b32.xlu1 %v16260_v33, %s12567_s24 }
0x13b5   :  { %v12081_v38 = vpop.permute.xlu0 %12080 }
0x13b6   :  { %v12083_v7 = vunpack.i.h.bf16 %v12081_v38  ;;  %v12082_v5 = vunpack.i.l.bf16 %v12081_v38  ;;  %v12141_v58 = vpop.permute.xlu1 %12140 }
0x13b7   :  { %v12143_v36 = vunpack.i.h.bf16 %v12141_v58  ;;  %v12142_v51 = vunpack.i.l.bf16 %v12141_v58  ;;  %12370 = vrot.lane.b32.xlu0 %v16256_v37, %s12567_s24 }
0x13b8   :  { %12375 = vrot.lane.b32.xlu1 %v16264_v60, %s12567_s24 }
0x13b9   :  { %v6325_v48 = vsel %vm18800_vm13, %v12083_v7, %v12143_v36  ;;  %v6324_v6 = vsel %vm18801_vm14, %v12082_v5, %v12142_v51  ;;  %v12086_v31 = vpop.permute.xlu0 %12085  ;;  %vm18450_vm13 = vmpackc.low %vm16466_vm0, %vm16466_vm0 }
0x13ba   :  { %v9429_v37 = vpack.c.bf16 %v6325_v48, %v6324_v6  ;;  %v12088_v54 = vunpack.i.h.bf16 %v12086_v31  ;;  %v12087_v33 = vunpack.i.l.bf16 %v12086_v31  ;;  %v12146_v40 = vpop.permute.xlu1 %12145  ;;  %v446_v48 = vld [vmem:[%s18368_s4 + $0x140] sm:$0xff]  ;;  %v447_v31 = vld [vmem:[%s18368_s4 + $0x148] sm:$0xff] }
0x13bb   :  { %v12148_v9 = vunpack.i.h.bf16 %v12146_v40  ;;  %v12147_v24 = vunpack.i.l.bf16 %v12146_v40  ;;  %12380 = vrot.lane.b32.xlu0 %v16292_v43, %s12567_s24  ;;  %v449_v40 = vld [vmem:[%s18368_s4 + $0x158] sm:$0xff] }
0x13bc   :  { %v6320_v28 = vsel %vm18808_vm8, %v12142_v51, %v12087_v33  ;;  %v6321_v34 = vsel %vm18809_vm15, %v12143_v36, %v12088_v54  ;;  %9430 = vmatprep.subr.msk.bf16.mxu0 %vm9428_vm4, %v9429_v37  ;;  %12390 = vrot.lane.b32.xlu1 %v16300_v26, %s12567_s24  ;;  %v8951_v51 = vld [vmem:[%s18376_s6 + $0x98] sm:$0xff] }
0x13bd   :  { %v6317_v43 = vsel %vm18810_vm6, %v12088_v54, %v12148_v9  ;;  %v6329_v3 = vsel %vm18811_vm11, %v12148_v9, %v12083_v7  ;;  %v6316_v22 = vsel %vm18812_vm9, %v12087_v33, %v12147_v24  ;;  %v16490_v20 = vpop.permute.xlu0 %12090  ;;  %v6328_v26 = vsel %vm18813_vm5, %v12147_v24, %v12082_v5  ;;  %v8948_v5 = vld [vmem:[%s18376_s6 + $0x80] sm:$0xff]  ;;  %v448_v54 = vld [vmem:[%s18368_s4 + $0x150] sm:$0xff] }
0x13be   :  { %v9537_v59 = vpack.c.bf16 %v6317_v43, %v6316_v22  ;;  %v16497_v38 = vpop.permute.xlu1 %12150  ;;  %v9540_v62 = vpack.c.bf16 %v6321_v34, %v6320_v28  ;;  %v9432_v7 = vpack.c.bf16 %v6329_v3, %v6328_v26  ;;  %v450_v24 = vld [vmem:[%s18368_s4 + $0x160] sm:$0xff]  ;;  %v451_v34 = vld [vmem:[%s18368_s4 + $0x168] sm:$0xff]  ;;  %v452_v22 = vld [vmem:[%s18368_s4 + $0x170] sm:$0xff]  ;;  %vm18816_vm5 = vcmp.lt.s32.totalorder %v18799_v63, 16 }
0x13bf   :  { %12385 = vrot.lane.b32.xlu0 %v16296_v17, %s12567_s24  ;;  %v8932_v43 = vld [vmem:[%s18374_s11 + $0x81] ss:$8 sm:$0xf]  ;;  %v12152_v52 = vunpack.i.l.bf16 %v16497_v38 }
0x13c0   :  { %9538 = vmatprep.subr.msk.bf16.mxu1 %vm9536_vm2, %v9537_v59  ;;  %12395 = vrot.lane.b32.xlu1 %v16304_v8, %s12567_s24  ;;  %v8949_v8 = vld [vmem:[%s18376_s6 + $0x88] sm:$0xff]  ;;  %v453_v26 = vld [vmem:[%s18368_s4 + $0x178] sm:$0xff]  ;;  %vm6436_vm14 = vcmp.gt.f32.partialorder %v8932_v43, 0.0 }
0x13c1   :  { %9433 = vmatpush1.bf16.msk.msra.mxu0 %vm9431_vm1, %v9432_v7  ;;  %v16519_v17 = vpop.permute.xlu0 %12095  ;;  %9541 = vmatpush1.bf16.msk.msra.mxu1 %vm18450_vm13, %v9540_v62  ;;  %v8933_v62 = vld [vmem:[%s18374_s11 + $0x82] ss:$8 sm:$0xf]  ;;  %v8934_v7 = vld [vmem:[%s18374_s11 + $0x83] ss:$8 sm:$0xf] }
0x13c2   :  { %v16529_v58 = vpop.permute.xlu1 %12155  ;;  %vm6539_vm8 = vcmp.gt.f32.partialorder %v8933_v62, 0.0  ;;  %vm6642_vm15 = vcmp.gt.f32.partialorder %v8934_v7, 0.0  ;;  %v12092_v62 = vunpack.i.l.bf16 %v16490_v20  ;;  %v12153_v7 = vunpack.i.h.bf16 %v16497_v38 }
0x13c3   :  { %7251 = vperm.xlu0 %11517, %v8948_v5   ;;  %v16614_v43 = vsel %vm6539_vm8, 1, %v18508_v41  ;;  %v12158_v32 = vunpack.i.h.bf16 %v16529_v58  ;;  %v12157_v38 = vunpack.i.l.bf16 %v16529_v58 }
0x13c4   :  { %7256 = vperm.xlu1 %11518, %v8949_v8   ;;  %v8365_v8 = vld [vmem:[%s18378_s8] sm:$0x7] }
0x13c5   :  { %v16534_v36 = vpop.permute.xlu0 %12100 }
0x13c6   :  { %v16539_v1 = vpop.permute.xlu1 %12160  ;;  %v12103_v45 = vunpack.i.h.bf16 %v16534_v36 }
0x13c7   :  { %7261 = vperm.xlu0 %11517, %v8950_v18   ;;  %v16594_v18 = vsel %vm6436_vm14, 1, %v18508_v41  ;;  %vm18817_vm14 = vmmov %vm18816_vm5  ;;  %v12163_v53 = vunpack.i.h.bf16 %v16539_v1  ;;  %v12162_v46 = vunpack.i.l.bf16 %v16539_v1 }
0x13c8   :  { %7266 = vperm.xlu1 %11518, %v8951_v51   ;;  %v8935_v51 = vld [vmem:[%s18374_s11 + $0x84] ss:$8 sm:$0xf]  ;;  %v6449_v10 = vrot.slane %v16594_v18, %v18798_v23  ;;  %v16655_v27 = vsel %vm18817_vm14, %v12092_v62, %v12152_v52 }
0x13c9   :  { %v16544_v6 = vpop.permute.xlu0 %12105  ;;  %vm6697_vm6 = vcmp.gt.f32.partialorder %v8935_v51, 0.0  ;;  %v12097_v51 = vunpack.i.l.bf16 %v16519_v17 }
0x13ca   :  { %v16549_v37 = vpop.permute.xlu1 %12165 }
0x13cb   :  { %656 = vperm.xlu0 %11517, %v446_v48   ;;  %v16722_v61 = vsel %vm18816_vm5, %v12097_v51, %v12157_v38 }
0x13cc   :  { %661 = vperm.xlu1 %11518, %v447_v31  }
0x13cd   :  { %v16554_v33 = vpop.permute.xlu0 %12110 }
0x13ce   :  { %v16559_v9 = vpop.permute.xlu1 %12170 }
0x13cf   :  { %666 = vperm.xlu0 %11517, %v448_v54   ;;  %v6445_v54 = vrot.slane %v16594_v18, %v14280_v49 }
0x13d0   :  { %671 = vperm.xlu1 %11518, %v449_v40   ;;  %v8936_v40 = vld [vmem:[%s18374_s11 + $0x85] ss:$8 sm:$0xf] }
0x13d1   :  { %v16564_v28 = vpop.permute.xlu0 %12115  ;;  %vm6800_vm11 = vcmp.gt.f32.partialorder %v8936_v40, 0.0  ;;  %v12098_v40 = vunpack.i.h.bf16 %v16519_v17  ;;  %vm16679_vm8 = vcmp.eq.s32.totalorder %v6445_v54, 1  ;;  %v16694_v17 = vld [vmem:[%s18374_s11 + $0x87] ss:$8 sm:$0xf] }
0x13d2   :  { %v16572_v3 = vpop.permute.xlu1 %12175  ;;  %v16658_v15 = vsel %vm6800_vm11, 1, %v18508_v41  ;;  %vm18825_vm11 = vmmov %vm18816_vm5 }
0x13d3   :  { %676 = vperm.xlu0 %11517, %v450_v24   ;;  %v8937_v24 = vld [vmem:[%s18374_s11 + $0x86] ss:$8 sm:$0xf]  ;;  %v16714_v54 = vsel %vm18825_vm11, %v12153_v7, %v12098_v40  ;;  %vm18829_vm11 = vmmov %vm18816_vm5 }
0x13d4   :  { %681 = vperm.xlu1 %11518, %v451_v34   ;;  %v6453_v34 = vrot.slane %v16594_v18, %v18797_v16  ;;  %vm6903_vm9 = vcmp.gt.f32.partialorder %v8937_v24, 0.0  ;;  %v16647_v24 = vsel %vm6697_vm6, 1, %v18508_v41  ;;  %vm18824_vm6 = vmmov %vm18816_vm5 }
0x13d5   :  { %v16580_v59 = vpop.permute.xlu0 %12120  ;;  %v16710_v58 = vsel %vm18824_vm6, %v12152_v52, %v12097_v51  ;;  %vm18863_vm12 = vmpackc.low %vm16679_vm8, %vm16679_vm8 }
0x13d6   :  { %v16588_v5 = vpop.permute.xlu1 %12180 }
0x13d7   :  { %686 = vperm.xlu0 %11517, %v452_v22   ;;  %v16617_v22 = vsel %vm6642_vm15, 1, %v18508_v41  ;;  %vm16698_vm15 = vcmp.eq.s32.totalorder %v6453_v34, 1 }
0x13d8   :  { %691 = vperm.xlu1 %11518, %v453_v26   ;;  %v12093_v26 = vunpack.i.h.bf16 %v16490_v20  ;;  %vm18864_vm0 = vmpackc.low %vm16698_vm15, %vm16698_vm15  ;;  %v18880_v30 = vrot.slane %v16617_v22, %v14290_v11 }
0x13d9   :  { %v16599_v48 = vpop.permute.xlu0 %12125 }
0x13da   :  { %v16601_v31 = vpop.permute.xlu1 %12185  ;;  %v16651_v2 = vsel %vm18816_vm5, %v12093_v26, %v12153_v7  ;;  %v16737_v0 = vsel %vm18829_vm11, %v12158_v32, %v12093_v26  ;;  %v12107_v7 = vunpack.i.l.bf16 %v16544_v6  ;;  %vm18834_vm11 = vmmov %vm18833_vm10 }
0x13db   :  { %8368 = vperm.xlu0 %11517, %v8365_v8   ;;  %v6441_v8 = vrot.slane %v16594_v18, %v14290_v11  ;;  %v16661_v18 = vsel %vm6903_vm9, 1, %v18508_v41  ;;  %vm18826_vm9 = vmmov %vm18816_vm5 }
0x13dc   :  { %v16718_v34 = vsel %vm18826_vm9, %v12098_v40, %v12158_v32  ;;  %vm18830_vm9 = vmmov %vm18816_vm5  ;;  %vm16744_vm5 = vcmp.eq.s32.totalorder %v6449_v10, 1 }
0x13dd   :  { %v16623_v19 = vpop.permute.xlu0 %12130  ;;  %vm16729_vm6 = vcmp.eq.s32.totalorder %v6441_v8, 1  ;;  %v12108_v8 = vunpack.i.h.bf16 %v16544_v6  ;;  %v12168_v6 = vunpack.i.h.bf16 %v16549_v37 }
0x13de   :  { %18814 = vst [vmem:[#allocation32_spill] sm:$0xff] %v16623_v19  ;;  %v16629_v50 = vpop.permute.xlu1 %12190  ;;  %v12167_v19 = vunpack.i.l.bf16 %v16549_v37 }
0x13df   :  { %18815 = vst [vmem:[#allocation28_spill] sm:$0xff] %v16629_v50  ;;  %v18836_v50 = vunpack.i.l.bf16 %v16534_v36 }
0x13e1   :  { %v16667_v20 = vpop.permute.xlu0 %12135 }
0x13e2   :  { %18818 = vst [vmem:[#allocation35_spill] sm:$0xff] %v16667_v20  ;;  %v16669_v56 = vpop.permute.xlu1 %12195 }
0x13e3   :  { %18819 = vst [vmem:[#allocation4_spill] sm:$0xff] %v16669_v56 }
0x13e5   :  { %v12201_v39 = vpop.permute.xlu0 %12200 }
0x13e6   :  { %v12203_v25 = vunpack.i.h.bf16 %v12201_v39  ;;  %v12202_v52 = vunpack.i.l.bf16 %v12201_v39  ;;  %v12266_v4 = vpop.permute.xlu1 %12265  ;;  %v16741_v39 = vsel %vm18830_vm9, %v12157_v38, %v12092_v62  ;;  %vm18835_vm9 = vcmp.lt.s32.totalorder %v18799_v63, 15 }
0x13e7   :  { %v12268_v40 = vunpack.i.h.bf16 %v12266_v4  ;;  %v12267_v14 = vunpack.i.l.bf16 %v12266_v4  ;;  %v9549_v4 = vpack.c.bf16 %v16718_v34, %v16722_v61  ;;  %v16757_v62 = vsel %vm18835_vm9, %v12103_v45, %v12163_v53  ;;  %vm18837_vm14 = vmmov %vm18835_vm9 }
0x13e8   :  { %v16763_v61 = vsel %vm18837_vm14, %v18836_v50, %v12162_v46 }
0x13e9   :  { %v6327_v51 = vsel %vm18833_vm10, %v12203_v25, %v12268_v40  ;;  %v6326_v32 = vsel %vm18834_vm11, %v12202_v52, %v12267_v14  ;;  %v12206_v26 = vpop.permute.xlu0 %12205  ;;  %vm18838_vm10 = vmmov %vm18835_vm9 }
0x13ea   :  { %v9435_v10 = vpack.c.bf16 %v6327_v51, %v6326_v32  ;;  %v12208_v38 = vunpack.i.h.bf16 %v12206_v26  ;;  %v12207_v35 = vunpack.i.l.bf16 %v12206_v26  ;;  %v12271_v56 = vpop.permute.xlu1 %12270  ;;  %v16768_v47 = vsel %vm18838_vm10, %v12162_v46, %v12107_v7  ;;  %vm18839_vm9 = vmmov %vm18834_vm11 }
0x13eb   :  { %v12273_v34 = vunpack.i.h.bf16 %v12271_v56  ;;  %v12272_v57 = vunpack.i.l.bf16 %v12271_v56  ;;  %v18840_v56 = vrot.slane %v16614_v43, %v14280_v49  ;;  %v16789_v50 = vsel %vm18838_vm10, %v12163_v53, %v12108_v8  ;;  %vm18844_vm7 = vmmov %vm18839_vm9 }
0x13ec   :  { %v6322_v51 = vsel %vm18834_vm11, %v12267_v14, %v12207_v35  ;;  %v6323_v32 = vsel %vm18839_vm9, %v12268_v40, %v12208_v38  ;;  %9436 = vmatprep.subr.msk.bf16.mxu0 %vm9428_vm4, %v9435_v10  ;;  %vm18843_vm11 = vmmov %vm18839_vm9  ;;  %v18845_v26 = vrot.slane %v16614_v43, %v18797_v16  ;;  %v18908_v46 = vrot.slane %v16647_v24, %v14290_v11 }
0x13ed   :  { %vm16783_vm14 = vcmp.eq.s32.totalorder %v18840_v56, 1  ;;  %v6319_v14 = vsel %vm18843_vm11, %v12208_v38, %v12273_v34  ;;  %v6331_v37 = vsel %vm18839_vm9, %v12273_v34, %v12203_v25  ;;  %v6318_v13 = vsel %vm18844_vm7, %v12207_v35, %v12272_v57  ;;  %v12211_v40 = vpop.permute.xlu0 %12210  ;;  %vm18848_vm10 = vmmov %vm18844_vm7 }
0x13ee   :  { %vm16800_vm4 = vcmp.eq.s32.totalorder %v18845_v26, 1  ;;  %v6330_v53 = vsel %vm18848_vm10, %v12272_v57, %v12202_v52  ;;  %v9543_v56 = vpack.c.bf16 %v6319_v14, %v6318_v13  ;;  %v12213_v29 = vunpack.i.h.bf16 %v12211_v40  ;;  %v12276_v55 = vpop.permute.xlu1 %12275 }
0x13ef   :  { %v12212_v38 = vunpack.i.l.bf16 %v12211_v40  ;;  %v9546_v35 = vpack.c.bf16 %v6323_v32, %v6322_v51  ;;  %v9438_v25 = vpack.c.bf16 %v6331_v37, %v6330_v53  ;;  %v12278_v34 = vunpack.i.h.bf16 %v12276_v55 }
0x13f0   :  { %v12277_v20 = vunpack.i.l.bf16 %v12276_v55  ;;  %v18849_v26 = vrot.slane %v16614_v43, %v14290_v11  ;;  %v9444_v52 = vpack.c.bf16 %v16737_v0, %v16741_v39  ;;  %v9453_v51 = vpack.c.bf16 %v16757_v62, %v16763_v61  ;;  %9544 = vmatprep.subr.msk.bf16.mxu1 %vm9536_vm2, %v9543_v56 }
0x13f1   :  { %v9564_v55 = vpack.c.bf16 %v16789_v50, %v16768_v47  ;;  %vm18852_vm10 = vcmp.lt.s32.totalorder %v18799_v63, 15  ;;  %v18853_v14 = vrot.slane %v16614_v43, %v18798_v23  ;;  %9439 = vmatpush1.bf16.msk.msra.mxu0 %vm9431_vm1, %v9438_v25  ;;  %v12216_v60 = vpop.permute.xlu0 %12215  ;;  %9547 = vmatpush1.bf16.msk.msra.mxu1 %vm18859_vm3, %v9546_v35  ;;  %vm18860_vm2 = vcmp.gt.f32.partialorder %v16694_v17, 0.0  ;;  %vm9443_vm1 = vmpackc.low %vm16729_vm6, %vm16729_vm6  ;;  %v18992_v47 = vld [vmem:[#allocation29_spill] sm:$0xff] }
0x13f2   :  { %vm16815_vm7 = vcmp.eq.s32.totalorder %v18849_v26, 1  ;;  %v16827_v32 = vsel %vm18852_vm10, %v12108_v8, %v12168_v6  ;;  %vm18856_vm11 = vmmov %vm18852_vm10  ;;  %vm18857_vm10 = vcmp.lt.s32.totalorder %v18799_v63, 16  ;;  %v12218_v21 = vunpack.i.h.bf16 %v12216_v60  ;;  %v12281_v12 = vpop.permute.xlu1 %12280  ;;  %9550 = vmatprep.subr.msk.bf16.mxu1 %vm18864_vm0, %v9549_v4 }
0x13f3   :  { %vm16837_vm9 = vcmp.eq.s32.totalorder %v18853_v14, 1  ;;  %v16843_v39 = vsel %vm18856_vm11, %v12168_v6, %v12103_v45  ;;  %v6430_v8 = vsel %vm18857_vm10, %v12213_v29, %v12278_v34  ;;  %vm18858_vm13 = vmmov %vm18857_vm10  ;;  %v16862_v45 = vsel %vm18860_vm2, 1, %v18508_v41 }
0x13f4   :  { %v6429_v37 = vsel %vm18858_vm13, %v12212_v38, %v12277_v20  ;;  %vm18861_vm13 = vmmov %vm18856_vm11  ;;  %v12217_v13 = vunpack.i.l.bf16 %v12216_v60  ;;  %v18862_v40 = vpack.c.bf16 %v16651_v2, %v16655_v27  ;;  %v18865_v17 = vunpack.i.l.bf16 %v16534_v36 }
0x13f5   :  { %v16866_v43 = vsel %vm18861_vm13, %v12107_v7, %v12167_v19  ;;  %v9447_v6 = vpack.c.bf16 %v6430_v8, %v6429_v37  ;;  %v12113_v2 = vunpack.i.h.bf16 %v16554_v33  ;;  %v12283_v7 = vunpack.i.h.bf16 %v12281_v12  ;;  %vm9551_vm10 = vmpackc.low %vm16744_vm5, %vm16744_vm5 }
0x13f6   :  { %9442 = vmatprep.subr.msk.bf16.mxu0 %vm18863_vm12, %v18862_v40  ;;  %v16888_v27 = vsel %vm18856_vm11, %v12167_v19, %v18865_v17  ;;  %v12282_v53 = vunpack.i.l.bf16 %v12281_v12  ;;  %v12112_v4 = vunpack.i.l.bf16 %v16554_v33  ;;  %v12173_v56 = vunpack.i.h.bf16 %v16559_v9  ;;  %v12286_v40 = vpop.permute.xlu1 %12285  ;;  %vm9455_vm6 = vmpackc.low %vm16815_vm7, %vm16815_vm7 }
0x13f7   :  { %v12172_v35 = vunpack.i.l.bf16 %v16559_v9  ;;  %vm18866_vm3 = vcmp.lt.s32.totalorder %v18799_v63, 16  ;;  %v18867_v19 = vrot.slane %v16617_v22, %v14280_v49  ;;  %9445 = vmatpush1.bf16.msk.msra.mxu0 %vm9443_vm1, %v9444_v52  ;;  %v18874_v37 = vrot.slane %v16617_v22, %v18797_v16  ;;  %vm18892_vm5 = vmpackc.low %vm16800_vm4, %vm16800_vm4 }
0x13f8   :  { %v6425_v36 = vsel %vm18866_vm3, %v12277_v20, %v12217_v13  ;;  %vm18870_vm13 = vmmov %vm18866_vm3  ;;  %v12221_v20 = vpop.permute.xlu0 %12220  ;;  %v18879_v52 = vpack.c.bf16 %v16714_v54, %v16710_v58  ;;  %v12288_v17 = vunpack.i.h.bf16 %v12286_v40  ;;  %v12118_v54 = vunpack.i.h.bf16 %v16564_v28 }
0x13f9   :  { %vm16902_vm2 = vcmp.eq.s32.totalorder %v18867_v19, 1  ;;  %v6426_v26 = vsel %vm18870_vm13, %v12278_v34, %v12218_v21  ;;  %vm18871_vm12 = vmmov %vm18866_vm3  ;;  %v12182_v0 = vunpack.i.l.bf16 %v16588_v5  ;;  %v18932_v25 = vrot.slane %v16658_v15, %v14290_v11 }
0x13fa   :  { %v6422_v14 = vsel %vm18871_vm12, %v12218_v21, %v12283_v7  ;;  %vm18872_vm0 = vmmov %vm18866_vm3  ;;  %vm16922_vm3 = vcmp.eq.s32.totalorder %v18874_v37, 1  ;;  %v12223_v21 = vunpack.i.h.bf16 %v12221_v20  ;;  %9553 = vmatpush1.bf16.msk.msra.mxu1 %vm9551_vm10, %v18879_v52  ;;  %v9558_v19 = vpack.c.bf16 %v6426_v26, %v6425_v36  ;;  %v12291_v44 = vpop.permute.xlu1 %12290 }
0x13fb   :  { %v6434_v8 = vsel %vm18872_vm0, %v12283_v7, %v12213_v29  ;;  %vm18873_vm11 = vmmov %vm18872_vm0  ;;  %v12287_v7 = vunpack.i.l.bf16 %v12286_v40  ;;  %v9561_v36 = vpack.c.bf16 %v16827_v32, %v16866_v43  ;;  %v18896_v37 = vrot.slane %v16647_v24, %v14280_v49 }
0x13fc   :  { %v6421_v9 = vsel %vm18873_vm11, %v12217_v13, %v12282_v53  ;;  %vm18877_vm13 = vmmov %vm18872_vm0  ;;  %v12222_v13 = vunpack.i.l.bf16 %v12221_v20  ;;  %vm16948_vm0 = vcmp.eq.s32.totalorder %v18880_v30, 1 }
0x13fd   :  { %v6433_v29 = vsel %vm18877_vm13, %v12282_v53, %v12212_v38  ;;  %v9555_v60 = vpack.c.bf16 %v6422_v14, %v6421_v9  ;;  %vm18878_vm12 = vmpackc.low %vm16679_vm8, %vm16679_vm8  ;;  %v12117_v38 = vunpack.i.l.bf16 %v16564_v28  ;;  %v12177_v53 = vunpack.i.l.bf16 %v16572_v3  ;;  %v18953_v28 = vld [vmem:[#allocation28_spill] sm:$0xff] }
0x13fe   :  { %9448 = vmatprep.subr.msk.bf16.mxu0 %vm18878_vm12, %v9447_v6  ;;  %v9450_v12 = vpack.c.bf16 %v6434_v8, %v6433_v29  ;;  %vm9452_vm8 = vmpackc.low %vm16783_vm14, %vm16783_vm14  ;;  %v12178_v6 = vunpack.i.h.bf16 %v16572_v3  ;;  %v18884_v14 = vrot.slane %v16617_v22, %v18798_v23  ;;  %v9456_v3 = vpack.c.bf16 %v16843_v39, %v16888_v27  ;;  %v12226_v22 = vpop.permute.xlu0 %12225  ;;  %v18974_v29 = vld [vmem:[#allocation24_spill] sm:$0xff] }
0x13ff   :  { %vm18883_vm11 = vmpackc.low %vm16698_vm15, %vm16698_vm15  ;;  %vm18887_vm15 = vcmp.lt.s32.totalorder %v18799_v63, 15  ;;  %vm18889_vm13 = vcmp.lt.s32.totalorder %v18799_v63, 1  ;;  %v12228_v32 = vunpack.i.h.bf16 %v12226_v22  ;;  %v12227_v43 = vunpack.i.l.bf16 %v12226_v22 }
0x1400   :  { %9556 = vmatprep.subr.msk.bf16.mxu1 %vm18883_vm11, %v9555_v60  ;;  %vm16966_vm12 = vcmp.eq.s32.totalorder %v18884_v14, 1  ;;  %v6533_v42 = vsel %vm18887_vm15, %v12223_v21, %v12288_v17  ;;  %vm18888_vm11 = vmmov %vm18887_vm15  ;;  %9451 = vmatpush1.bf16.msk.msra.mxu0 %vm9443_vm1, %v9450_v12  ;;  %v6634_v39 = vsel %vm18889_vm13, %v12113_v2, %v12173_v56  ;;  %v12292_v8 = vunpack.i.l.bf16 %v12291_v44 }
0x1401   :  { %v6532_v26 = vsel %vm18888_vm11, %v12222_v13, %v12287_v7  ;;  %9454 = vmatprep.subr.msk.bf16.mxu0 %vm9452_vm8, %v9453_v51  ;;  %9559 = vmatpush1.bf16.msk.msra.mxu1 %vm9551_vm10, %v9558_v19  ;;  %vm18890_vm1 = vmmov %vm18889_vm13  ;;  %v12293_v51 = vunpack.i.h.bf16 %v12291_v44  ;;  %v18903_v12 = vrot.slane %v16647_v24, %v18797_v16  ;;  %v12296_v19 = vpop.permute.xlu1 %12295  ;;  %vm17077_vm14 = vcmp.eq.s32.totalorder %v18908_v46, 1 }
0x1402   :  { %v9459_v27 = vpack.c.bf16 %v6533_v42, %v6532_v26  ;;  %v6633_v62 = vsel %vm18890_vm1, %v12112_v4, %v12172_v35  ;;  %vm18891_vm13 = vmmov %vm18890_vm1  ;;  %9562 = vmatprep.subr.msk.bf16.mxu1 %vm18892_vm5, %v9561_v36  ;;  %v6625_v9 = vsel %vm18890_vm1, %v12117_v38, %v12177_v53  ;;  %vm17032_vm5 = vcmp.eq.s32.totalorder %v18896_v37, 1 }
0x1403   :  { %v17009_v61 = vsel %vm18891_vm13, %v12172_v35, %v12117_v38  ;;  %vm18893_vm15 = vmmov %vm18890_vm1  ;;  %vm18895_vm13 = vcmp.lt.s32.totalorder %v18799_v63, 15  ;;  %v12231_v38 = vpop.permute.xlu0 %12230  ;;  %v12297_v36 = vunpack.i.l.bf16 %v12296_v19  ;;  %v18914_v22 = vrot.slane %v16647_v24, %v18798_v23 }
0x1404   :  { %v17021_v1 = vsel %vm18893_vm15, %v12173_v56, %v12118_v54  ;;  %vm18894_vm11 = vmmov %vm18890_vm1  ;;  %v6528_v20 = vsel %vm18895_vm13, %v12287_v7, %v12227_v43  ;;  %9457 = vmatpush1.bf16.msk.msra.mxu0 %vm9455_vm6, %v9456_v3  ;;  %v12233_v30 = vunpack.i.h.bf16 %v12231_v38  ;;  %v12298_v3 = vunpack.i.h.bf16 %v12296_v19 }
0x1405   :  { %v6626_v35 = vsel %vm18894_vm11, %v12118_v54, %v12178_v6  ;;  %vm18899_vm10 = vmmov %vm18895_vm13  ;;  %v12232_v54 = vunpack.i.l.bf16 %v12231_v38  ;;  %9460 = vmatprep.subr.msk.bf16.mxu0 %vm9452_vm8, %v9459_v27  ;;  %v9576_v50 = vpack.c.bf16 %v17021_v1, %v17009_v61  ;;  %vm18911_vm8 = vcmp.lt.s32.totalorder %v18799_v63, 1  ;;  %v12301_v57 = vpop.permute.xlu1 %12300 }
0x1406   :  { %v6529_v56 = vsel %vm18899_vm10, %v12288_v17, %v12228_v32  ;;  %vm18900_vm15 = vmmov %vm18899_vm10  ;;  %v9573_v33 = vpack.c.bf16 %v6626_v35, %v6625_v9  ;;  %v12183_v44 = vunpack.i.h.bf16 %v16588_v5  ;;  %v12302_v61 = vunpack.i.l.bf16 %v12301_v57 }
0x1407   :  { %v6525_v60 = vsel %vm18900_vm15, %v12228_v32, %v12293_v51  ;;  %vm18901_vm11 = vmmov %vm18899_vm10  ;;  %v9570_v26 = vpack.c.bf16 %v6529_v56, %v6528_v20  ;;  %v12236_v24 = vpop.permute.xlu0 %12235  ;;  %v18920_v35 = vrot.slane %v16658_v15, %v14280_v49  ;;  %v12187_v38 = vunpack.i.l.bf16 %v16601_v31 }
0x1408   :  { %v6537_v52 = vsel %vm18901_vm11, %v12293_v51, %v12223_v21  ;;  %vm18902_vm1 = vmmov %vm18899_vm10  ;;  %vm17052_vm10 = vcmp.eq.s32.totalorder %v18903_v12, 1  ;;  %v12238_v27 = vunpack.i.h.bf16 %v12236_v24  ;;  %v12237_v32 = vunpack.i.l.bf16 %v12236_v24 }
0x1409   :  { %v6524_v40 = vsel %vm18902_vm1, %v12227_v43, %v12292_v8  ;;  %vm18906_vm13 = vmmov %vm18902_vm1  ;;  %v12128_v51 = vunpack.i.h.bf16 %v16599_v48  ;;  %v6908_v19 = vrot.slane %v16661_v18, %v14290_v11 }
0x140a   :  { %v6536_v21 = vsel %vm18906_vm13, %v12292_v8, %v12222_v13  ;;  %v9567_v7 = vpack.c.bf16 %v6525_v60, %v6524_v40  ;;  %vm18907_vm15 = vmpackc.low %vm16837_vm9, %vm16837_vm9  ;;  %v9465_v13 = vpack.c.bf16 %v6634_v39, %v6633_v62  ;;  %v12303_v62 = vunpack.i.h.bf16 %v12301_v57 }
0x140b   :  { %9565 = vmatpush1.bf16.msk.msra.mxu1 %vm18907_vm15, %v9564_v55  ;;  %v9462_v14 = vpack.c.bf16 %v6537_v52, %v6536_v21  ;;  %vm9464_vm11 = vmpackc.low %vm16902_vm2, %vm16902_vm2  ;;  %v6638_v55 = vsel %vm18911_vm8, %v12178_v6, %v12113_v2  ;;  %v12127_v8 = vunpack.i.l.bf16 %v16599_v48  ;;  %v17164_v56 = vpop.permute.xlu0 %12240  ;;  %v18926_v60 = vrot.slane %v16658_v15, %v18797_v16 }
0x140c   :  { %vm18912_vm1 = vmmov %vm18911_vm8  ;;  %vm17102_vm8 = vcmp.eq.s32.totalorder %v18914_v22, 1  ;;  %v12188_v40 = vunpack.i.h.bf16 %v16601_v31  ;;  %v7011_v22 = vrot.slane %v16862_v45, %v14290_v11 }
0x140d   :  { %v6637_v42 = vsel %vm18912_vm1, %v12177_v53, %v12112_v4  ;;  %vm18913_vm13 = vmpackc.low %vm16800_vm4, %vm16800_vm4  ;;  %v12123_v4 = vunpack.i.h.bf16 %v16580_v59  ;;  %v6636_v6 = vsel %vm18912_vm1, %v12233_v30, %v12298_v3  ;;  %9463 = vmatpush1.bf16.msk.msra.mxu0 %vm9455_vm6, %v9462_v14  ;;  %v12122_v53 = vunpack.i.l.bf16 %v16580_v59 }
0x140e   :  { %9568 = vmatprep.subr.msk.bf16.mxu1 %vm18913_vm13, %v9567_v7  ;;  %vm18451_vm15 = vmpackc.low %vm16922_vm3, %vm16922_vm3  ;;  %9466 = vmatprep.subr.msk.bf16.mxu0 %vm9464_vm11, %v9465_v13  ;;  %v9468_v43 = vpack.c.bf16 %v6638_v55, %v6637_v42  ;;  %v17187_v7 = vpop.permute.xlu1 %12305  ;;  %v6916_v13 = vrot.slane %v16661_v18, %v18798_v23  ;;  %v17241_v42 = vld [vmem:[%s18374_s11 + $0xa0] ss:$8 sm:$0xf]  ;;  %v18962_v59 = vrot.slane %v16661_v18, %v18797_v16 }
0x140f   :  { %vm18917_vm4 = vmmov %vm18912_vm1  ;;  %v17248_v34 = vpop.permute.xlu0 %12245 }
0x1410   :  { %v6635_v10 = vsel %vm18917_vm4, %v12232_v54, %v12297_v36  ;;  %vm18918_vm13 = vmpackc.low %vm16837_vm9, %vm16837_vm9  ;;  %v6632_v20 = vsel %vm18917_vm4, %v12298_v3, %v12238_v27 }
0x1411   :  { %v9471_v39 = vpack.c.bf16 %v6636_v6, %v6635_v10  ;;  %9571 = vmatpush1.bf16.msk.msra.mxu1 %vm18918_vm13, %v9570_v26  ;;  %vm9467_vm7 = vmpackc.low %vm16948_vm0, %vm16948_vm0  ;;  %v7023_v26 = vrot.slane %v16862_v45, %v18797_v16  ;;  %v18944_v10 = vld [vmem:[#allocation35_spill] sm:$0xff] }
0x1412   :  { %9574 = vmatprep.subr.msk.bf16.mxu1 %vm18451_vm15, %v9573_v33  ;;  %vm18919_vm6 = vmmov %vm18912_vm1  ;;  %vm17147_vm1 = vcmp.eq.s32.totalorder %v18920_v35, 1  ;;  %9469 = vmatpush1.bf16.msk.msra.mxu0 %vm9467_vm7, %v9468_v43  ;;  %v7019_v33 = vrot.slane %v16862_v45, %v18798_v23  ;;  %v12138_v24 = vunpack.i.h.bf16 %v18944_v10  ;;  %v17281_v43 = vpop.permute.xlu1 %12315  ;;  %v12193_v35 = vunpack.i.h.bf16 %v18953_v28 }
0x1413   :  { %v6631_v1 = vsel %vm18919_vm6, %v12297_v36, %v12237_v32  ;;  %vm18923_vm13 = vmmov %vm18917_vm4  ;;  %vm17169_vm6 = vcmp.eq.s32.totalorder %v18926_v60, 1  ;;  %9472 = vmatprep.subr.msk.bf16.mxu0 %vm9464_vm11, %v9471_v39  ;;  %vm17201_vm11 = vcmp.eq.s32.totalorder %v18932_v25, 1  ;;  %v12137_v39 = vunpack.i.l.bf16 %v18944_v10  ;;  %v18967_v10 = vld [vmem:[#allocation27_spill] sm:$0xff] }
0x1414   :  { %v6628_v5 = vsel %vm18923_vm13, %v12238_v27, %v12303_v62  ;;  %vm18924_vm15 = vmmov %vm18917_vm4  ;;  %v9582_v46 = vpack.c.bf16 %v6632_v20, %v6631_v1  ;;  %v18945_v27 = vld [vmem:[#allocation23_spill] sm:$0xff]  ;;  %v12192_v20 = vunpack.i.l.bf16 %v18953_v28  ;;  %v18955_v60 = vrot.slane %v16661_v18, %v14280_v49  ;;  %v18970_v18 = vld [vmem:[#allocation41_spill] sm:$0xff] }
0x1415   :  { %v6640_v37 = vsel %vm18924_vm15, %v12303_v62, %v12233_v30  ;;  %vm18925_vm9 = vmmov %vm18917_vm4 }
0x1416   :  { %v6627_v48 = vsel %vm18925_vm9, %v12237_v32, %v12302_v61  ;;  %vm18929_vm15 = vmmov %vm18917_vm4  ;;  %vm18931_vm4 = vcmp.lt.s32.totalorder %v18799_v63, 127  ;;  %v18946_v32 = vld [vmem:[#allocation26_spill] sm:$0xff] }
0x1417   :  { %v6639_v12 = vsel %vm18929_vm15, %v12302_v61, %v12232_v54  ;;  %v9579_v21 = vpack.c.bf16 %v6628_v5, %v6627_v48  ;;  %vm18930_vm9 = vmpackc.low %vm16966_vm12, %vm16966_vm12  ;;  %v17193_v31 = vsel %vm18931_vm4, %v12123_v4, %v12183_v44  ;;  %v18947_v57 = vpack.c.bf16 %v18945_v27, %v18946_v32  ;;  %v18949_v61 = vld [vmem:[#allocation32_spill] sm:$0xff] }
0x1418   :  { %9577 = vmatpush1.bf16.msk.msra.mxu1 %vm18930_vm9, %v9576_v50  ;;  %v9474_v30 = vpack.c.bf16 %v6640_v37, %v6639_v12  ;;  %vm9476_vm2 = vmpackc.low %vm17032_vm5, %vm17032_vm5  ;;  %v18939_v50 = vrot.slane %v16658_v15, %v18798_v23  ;;  %v7015_v15 = vrot.slane %v16862_v45, %v14280_v49  ;;  %v18954_v5 = vld [vmem:[#allocation4_spill] sm:$0xff]  ;;  %vm18982_vm5 = vcmp.lt.s32.totalorder %v18799_v63, 127 }
0x1419   :  { %vm18935_vm13 = vmmov %vm18931_vm4  ;;  %v12198_v37 = vunpack.i.h.bf16 %v18954_v5  ;;  %v12197_v48 = vunpack.i.l.bf16 %v18954_v5  ;;  %v18968_v27 = vld [vmem:[#allocation20_spill] sm:$0xff] }
0x141a   :  { %v17213_v14 = vsel %vm18935_vm13, %v12122_v53, %v12182_v0  ;;  %vm18936_vm15 = vmmov %vm18931_vm4  ;;  %9475 = vmatpush1.bf16.msk.msra.mxu0 %vm9467_vm7, %v9474_v30  ;;  %v18969_v32 = vpack.c.bf16 %v18967_v10, %v18968_v27  ;;  %v18987_v10 = vld [vmem:[#allocation33_spill] sm:$0xff] }
0x141b   :  { %v17217_v3 = vsel %vm18936_vm15, %v12182_v0, %v12127_v8  ;;  %vm18937_vm9 = vmmov %vm18931_vm4  ;;  %vm17234_vm15 = vcmp.eq.s32.totalorder %v18939_v50, 1  ;;  %9478 = vmatprep.subr.msk.bf16.mxu0 %vm9476_vm2, %v18947_v57  ;;  %v12133_v0 = vunpack.i.h.bf16 %v18949_v61  ;;  %v18971_v57 = vld [vmem:[#allocation21_spill] sm:$0xff] }
0x141c   :  { %v17221_v36 = vsel %vm18937_vm9, %v12183_v44, %v12128_v51  ;;  %vm18938_vm4 = vmpackc.low %vm16922_vm3, %vm16922_vm3  ;;  %v9492_v44 = vpack.c.bf16 %v17193_v31, %v17213_v14 }
0x141d   :  { %9580 = vmatprep.subr.msk.bf16.mxu1 %vm18938_vm4, %v9579_v21  ;;  %vm9584_vm13 = vmpackc.low %vm17052_vm10, %vm17052_vm10  ;;  %v9489_v62 = vpack.c.bf16 %v17221_v36, %v17217_v3  ;;  %v12132_v3 = vunpack.i.l.bf16 %v18949_v61  ;;  %v18959_v36 = vld [vmem:[#allocation40_spill] sm:$0xff]  ;;  %v18972_v61 = vpack.c.bf16 %v18970_v18, %v18971_v57 }
0x141e   :  { %vm18942_vm3 = vmmov %vm18937_vm9 }
0x141f   :  { %v17260_v6 = vsel %vm18942_vm3, %v12128_v51, %v12188_v40  ;;  %vm18943_vm0 = vmmov %vm18942_vm3  ;;  %v18950_v51 = vld [vmem:[#allocation19_spill] sm:$0xff]  ;;  %vm17310_vm3 = vcmp.eq.s32.totalorder %v18955_v60, 1 }
0x1420   :  { %v17264_v58 = vsel %vm18943_vm0, %v12127_v8, %v12187_v38  ;;  %vm18948_vm7 = vmpackc.low %vm16966_vm12, %vm16966_vm12  ;;  %v18951_v8 = vld [vmem:[#allocation22_spill] sm:$0xff]  ;;  %v6796_v21 = vsel %vm18943_vm0, %v12188_v40, %v12123_v4  ;;  %v12251_v4 = vpop.permute.xlu0 %12250  ;;  %v18973_v60 = vld [vmem:[#allocation31_spill] sm:$0xff] }
0x1421   :  { %9583 = vmatpush1.bf16.msk.msra.mxu1 %vm18948_vm7, %v9582_v46  ;;  %vm9479_vm9 = vmpackc.low %vm17077_vm14, %vm17077_vm14  ;;  %v18952_v1 = vpack.c.bf16 %v18950_v51, %v18951_v8  ;;  %v9600_v25 = vpack.c.bf16 %v17260_v6, %v17264_v58  ;;  %v18960_v46 = vld [vmem:[#allocation25_spill] sm:$0xff]  ;;  %v12253_v6 = vunpack.i.h.bf16 %v12251_v4  ;;  %v12252_v58 = vunpack.i.l.bf16 %v12251_v4  ;;  %v12336_v51 = vpop.permute.xlu1 %12335 }
0x1422   :  { %vm18452_vm12 = vmpackc.low %vm17102_vm8, %vm17102_vm8  ;;  %v18961_v50 = vpack.c.bf16 %v18959_v36, %v18960_v46  ;;  %v12248_v8 = vunpack.i.h.bf16 %v17248_v34  ;;  %v12338_v28 = vunpack.i.h.bf16 %v12336_v51  ;;  %v12337_v5 = vunpack.i.l.bf16 %v12336_v51 }
0x1423   :  { %9586 = vmatprep.subr.msk.bf16.mxu1 %vm9584_vm13, %v18952_v1  ;;  %vm18958_vm7 = vmmov %vm18943_vm0  ;;  %vm17336_vm0 = vcmp.eq.s32.totalorder %v18962_v59, 1  ;;  %v12247_v1 = vunpack.i.l.bf16 %v17248_v34  ;;  %v18975_v36 = vpack.c.bf16 %v18973_v60, %v18974_v29  ;;  %v18986_v59 = vld [vmem:[#allocation34_spill] sm:$0xff] }
0x1424   :  { %v6795_v30 = vsel %vm18958_vm7, %v12187_v38, %v12122_v53  ;;  %9481 = vmatpush1.bf16.msk.msra.mxu0 %vm9479_vm9, %v18961_v50  ;;  %vm18965_vm7 = vcmp.lt.s32.totalorder %v18799_v63, 113  ;;  %v18988_v27 = vpack.c.bf16 %v18986_v59, %v18987_v10  ;;  %vm18994_vm14 = vmpackc.low %vm17102_vm8, %vm17102_vm8 }
0x1425   :  { %v17342_v40 = vsel %vm18965_vm7, %v12192_v20, %v12137_v39  ;;  %vm18966_vm4 = vmmov %vm18965_vm7  ;;  %9484 = vmatprep.subr.msk.bf16.mxu0 %vm9476_vm2, %v18969_v32  ;;  %9589 = vmatpush1.bf16.msk.msra.mxu1 %vm18452_vm12, %v18972_v61  ;;  %vm17377_vm2 = vcmp.eq.s32.totalorder %v6908_v19, 1  ;;  %v9597_v34 = vpack.c.bf16 %v6796_v21, %v6795_v30  ;;  %vm17396_vm12 = vcmp.eq.s32.totalorder %v6916_v13, 1  ;;  %v17416_v13 = vpop.permute.xlu0 %12255  ;;  %v18991_v61 = vld [vmem:[#allocation30_spill] sm:$0xff] }
0x1426   :  { %v17346_v38 = vsel %vm18966_vm4, %v12193_v35, %v12138_v24  ;;  %9592 = vmatprep.subr.msk.bf16.mxu1 %vm9584_vm13, %v18975_v36  ;;  %v17383_v50 = vsel %vm18966_vm4, %v12133_v0, %v12193_v35  ;;  %vm18978_vm7 = vmmov %vm18966_vm4  ;;  %v6790_v35 = vsel %vm18982_vm5, %v12338_v28, %v12253_v6  ;;  %v18993_v51 = vpack.c.bf16 %v18991_v61, %v18992_v47 }
0x1427   :  { %v17387_v4 = vsel %vm18978_vm7, %v12198_v37, %v12133_v0  ;;  %vm18979_vm10 = vmmov %vm18966_vm4  ;;  %v9501_v18 = vpack.c.bf16 %v17346_v38, %v17342_v40  ;;  %v12258_v14 = vunpack.i.h.bf16 %v17416_v13 }
0x1428   :  { %v17391_v17 = vsel %vm18979_vm10, %v12197_v48, %v12132_v3  ;;  %vm9596_vm13 = vmpackc.low %vm17169_vm6, %vm17169_vm6  ;;  %9487 = vmatpush1.bf16.msk.msra.mxu0 %vm9479_vm9, %v18988_v27 }
0x1429   :  { %vm18983_vm4 = vmmov %vm18982_vm5  ;;  %vm18989_vm5 = vcmp.lt.s32.totalorder %v18799_v63, 113  ;;  %9595 = vmatpush1.bf16.msk.msra.mxu1 %vm18994_vm14, %v18993_v51  ;;  %vm18999_vm14 = vcmp.lt.s32.totalorder %v18799_v63, 127 }
0x142a   :  { %v6794_v21 = vsel %vm18983_vm4, %v12248_v8, %v12338_v28  ;;  %vm18984_vm7 = vmmov %vm18983_vm4  ;;  %v17420_v32 = vsel %vm18989_vm5, %v12132_v3, %v12192_v20  ;;  %v12341_v20 = vpop.permute.xlu1 %12340  ;;  %v17451_v40 = vsel %vm18989_vm5, %v12137_v39, %v12197_v48  ;;  %9598 = vmatprep.subr.msk.bf16.mxu1 %vm9596_vm13, %v9597_v34  ;;  %v12308_v39 = vunpack.i.h.bf16 %v17187_v7 }
0x142b   :  { %v6789_v0 = vsel %vm18984_vm7, %v12337_v5, %v12252_v58  ;;  %vm18985_vm10 = vmmov %vm18983_vm4  ;;  %vm18995_vm7 = vcmp.gt.f32.partialorder %v17241_v42, 0.0  ;;  %v12343_v2 = vunpack.i.h.bf16 %v12341_v20  ;;  %v12342_v38 = vunpack.i.l.bf16 %v12341_v20 }
0x142c   :  { %v6793_v30 = vsel %vm18985_vm10, %v12247_v1, %v12337_v5  ;;  %v9495_v57 = vpack.c.bf16 %v6790_v35, %v6789_v0  ;;  %vm18990_vm4 = vmpackc.low %vm17147_vm1, %vm17147_vm1  ;;  %v17443_v3 = vsel %vm18995_vm7, 1, %v18508_v41  ;;  %v9609_v42 = vpack.c.bf16 %v17387_v4, %v17391_v17 }
0x142d   :  { %9490 = vmatprep.subr.msk.bf16.mxu0 %vm18990_vm4, %v9489_v62  ;;  %vm18454_vm9 = vmpackc.low %vm17201_vm11, %vm17201_vm11  ;;  %vm17468_vm4 = vcmp.eq.s32.totalorder %v7015_v15, 1  ;;  %v6786_v28 = vsel %vm18999_vm14, %v12253_v6, %v12343_v2  ;;  %v12261_v15 = vpop.permute.xlu0 %12260  ;;  %v12307_v4 = vunpack.i.l.bf16 %v17187_v7  ;;  %v12318_v17 = vunpack.i.h.bf16 %v17281_v43 }
0x142e   :  { %vm18996_vm10 = vmmov %vm18989_vm5  ;;  %9493 = vmatpush1.bf16.msk.msra.mxu0 %vm18454_vm9, %v9492_v44  ;;  %v12262_v36 = vunpack.i.l.bf16 %v12261_v15  ;;  %v12346_v31 = vpop.permute.xlu1 %12345  ;;  %v12317_v35 = vunpack.i.l.bf16 %v17281_v43  ;;  %v7114_v53 = vrot.slane %v17443_v3, %v14290_v11 }
0x142f   :  { %v17447_v62 = vsel %vm18996_vm10, %v12138_v24, %v12198_v37  ;;  %vm18453_vm8 = vmpackc.low %vm17234_vm15, %vm17234_vm15  ;;  %v12243_v24 = vunpack.i.h.bf16 %v17164_v56  ;;  %v9498_v37 = vpack.c.bf16 %v6794_v21, %v6793_v30  ;;  %v12348_v44 = vunpack.i.h.bf16 %v12346_v31 }
0x1430   :  { %vm19000_vm7 = vmmov %vm18999_vm14  ;;  %vm17491_vm14 = vcmp.eq.s32.totalorder %v7023_v26, 1  ;;  %9601 = vmatpush1.bf16.msk.msra.mxu1 %vm18453_vm8, %v9600_v25  ;;  %v12257_v26 = vunpack.i.l.bf16 %v17416_v13  ;;  %v12347_v34 = vunpack.i.l.bf16 %v12346_v31  ;;  %v12242_v25 = vunpack.i.l.bf16 %v17164_v56 }
0x1431   :  { %v6798_v5 = vsel %vm19000_vm7, %v12343_v2, %v12248_v8  ;;  %vm19001_vm10 = vmmov %vm19000_vm7  ;;  %v12311_v52 = vpop.permute.xlu0 %12310  ;;  %v9504_v21 = vpack.c.bf16 %v17383_v50, %v17420_v32  ;;  %v9612_v50 = vpack.c.bf16 %v17447_v62, %v17451_v40 }
0x1432   :  { %v6785_v60 = vsel %vm19001_vm10, %v12252_v58, %v12342_v38  ;;  %vm19002_vm5 = vmmov %vm19000_vm7  ;;  %v12313_v30 = vunpack.i.h.bf16 %v12311_v52  ;;  %v12312_v59 = vunpack.i.l.bf16 %v12311_v52  ;;  %v12351_v54 = vpop.permute.xlu1 %12350 }
0x1433   :  { %v6797_v29 = vsel %vm19002_vm5, %v12342_v38, %v12247_v1  ;;  %v9606_v8 = vpack.c.bf16 %v6786_v28, %v6785_v60  ;;  %v12263_v1 = vunpack.i.h.bf16 %v12261_v15  ;;  %vm19005_vm7 = vmpackc.low %vm17147_vm1, %vm17147_vm1  ;;  %vm17513_vm1 = vcmp.eq.s32.totalorder %v7011_v22, 1 }
0x1434   :  { %v9603_v58 = vpack.c.bf16 %v6798_v5, %v6797_v29  ;;  %9496 = vmatprep.subr.msk.bf16.mxu0 %vm19005_vm7, %v9495_v57  ;;  %vm18455_vm5 = vmpackc.low %vm17336_vm0, %vm17336_vm0  ;;  %vm19008_vm7 = vcmp.lt.s32.totalorder %v18799_v63, 113  ;;  %v12353_v27 = vunpack.i.h.bf16 %v12351_v54  ;;  %v12352_v13 = vunpack.i.l.bf16 %v12351_v54 }
0x1435   :  { %v6893_v22 = vsel %vm19008_vm7, %v12348_v44, %v12263_v1  ;;  %vm19009_vm8 = vmmov %vm19008_vm7  ;;  %v12321_v62 = vpop.permute.xlu0 %12320  ;;  %v7118_v29 = vrot.slane %v17443_v3, %v14280_v49 }
0x1436   :  { %9604 = vmatprep.subr.msk.bf16.mxu1 %vm9596_vm13, %v9603_v58  ;;  %v6897_v56 = vsel %vm19009_vm8, %v12258_v14, %v12348_v44  ;;  %vm19010_vm10 = vmmov %vm19008_vm7  ;;  %vm19015_vm8 = vcmp.lt.s32.totalorder %v18799_v63, 112  ;;  %v12323_v38 = vunpack.i.h.bf16 %v12321_v62 }
0x1437   :  { %v6892_v7 = vsel %vm19010_vm10, %v12347_v34, %v12262_v36  ;;  %vm19011_vm9 = vmmov %vm19008_vm7  ;;  %v6998_v10 = vsel %vm19015_vm8, %v12243_v24, %v12308_v39 }
0x1438   :  { %v6896_v43 = vsel %vm19011_vm9, %v12257_v26, %v12347_v34  ;;  %vm19012_vm6 = vmpackc.low %vm17201_vm11, %vm17201_vm11  ;;  %v9507_v0 = vpack.c.bf16 %v6893_v22, %v6892_v7 }
0x1439   :  { %9499 = vmatpush1.bf16.msk.msra.mxu0 %vm19012_vm6, %v9498_v37  ;;  %vm19013_vm13 = vmpackc.low %vm17310_vm3, %vm17310_vm3  ;;  %v9510_v57 = vpack.c.bf16 %v6897_v56, %v6896_v43  ;;  %v12326_v45 = vpop.permute.xlu0 %12325 }
0x143a   :  { %9502 = vmatprep.subr.msk.bf16.mxu0 %vm19013_vm13, %v9501_v18  ;;  %vm19014_vm9 = vmpackc.low %vm17234_vm15, %vm17234_vm15 }
0x143b   :  { %9607 = vmatpush1.bf16.msk.msra.mxu1 %vm19014_vm9, %v9606_v8  ;;  %vm9503_vm11 = vmpackc.low %vm17377_vm2, %vm17377_vm2 }
0x143c   :  { %9610 = vmatprep.subr.msk.bf16.mxu1 %vm18455_vm5, %v9609_v42  ;;  %vm9611_vm15 = vmpackc.low %vm17396_vm12, %vm17396_vm12  ;;  %v12322_v42 = vunpack.i.l.bf16 %v12321_v62 }
0x143d   :  { %vm19016_vm10 = vmmov %vm19015_vm8  ;;  %9505 = vmatpush1.bf16.msk.msra.mxu0 %vm9503_vm11, %v9504_v21  ;;  %v12331_v7 = vpop.permute.xlu0 %12330 }
0x143e   :  { %v6997_v55 = vsel %vm19016_vm10, %v12242_v25, %v12307_v4  ;;  %vm19017_vm7 = vmmov %vm19015_vm8  ;;  %vm19021_vm8 = vcmp.lt.s32.totalorder %v18799_v63, 113  ;;  %v12332_v54 = vunpack.i.l.bf16 %v12331_v7 }
0x143f   :  { %v7002_v32 = vsel %vm19017_vm7, %v12318_v17, %v12243_v24  ;;  %vm19018_vm6 = vmmov %vm19017_vm7  ;;  %v6889_v51 = vsel %vm19021_vm8, %v12263_v1, %v12353_v27  ;;  %9613 = vmatpush1.bf16.msk.msra.mxu1 %vm9611_vm15, %v9612_v50  ;;  %v12356_v24 = vpop.permute.xlu1 %12355  ;;  %v12328_v1 = vunpack.i.h.bf16 %v12326_v45 }
0x1440   :  { %v7001_v18 = vsel %vm19018_vm6, %v12317_v35, %v12242_v25  ;;  %vm19019_vm13 = vmmov %vm19018_vm6  ;;  %v12358_v28 = vunpack.i.h.bf16 %v12356_v24  ;;  %v12357_v5 = vunpack.i.l.bf16 %v12356_v24 }
0x1441   :  { %v6993_v61 = vsel %vm19019_vm13, %v12307_v4, %v12312_v59  ;;  %vm19020_vm9 = vmmov %vm19018_vm6  ;;  %vm17611_vm13 = vcmp.eq.s32.totalorder %v7019_v33, 1  ;;  %v9621_v15 = vpack.c.bf16 %v7002_v32, %v7001_v18  ;;  %v9516_v33 = vpack.c.bf16 %v6998_v10, %v6997_v55  ;;  %v12371_v48 = vpop.permute.xlu0 %12370  ;;  %v8981_v55 = vld [vmem:[%s18369_s12 + $0x498] sm:$0xff] }
0x1442   :  { %v6994_v47 = vsel %vm19020_vm9, %v12308_v39, %v12313_v30  ;;  %vm19022_vm5 = vmmov %vm19021_vm8  ;;  %v6989_v58 = vsel %vm19020_vm9, %v12312_v59, %v12317_v35  ;;  %v7126_v4 = vrot.slane %v17443_v3, %v18797_v16  ;;  %v12373_v32 = vunpack.i.h.bf16 %v12371_v48 }
0x1443   :  { %v6901_v20 = vsel %vm19022_vm5, %v12353_v27, %v12258_v14  ;;  %vm19023_vm10 = vmmov %vm19022_vm5  ;;  %v9513_v60 = vpack.c.bf16 %v6994_v47, %v6993_v61  ;;  %v12361_v46 = vpop.permute.xlu1 %12360  ;;  %v12488_v27 = vld [vmem:[%s18375_s5 + $0xc0] ss:$12 sps:$4 sm:$0xff]   ;;  %v12372_v18 = vunpack.i.l.bf16 %v12371_v48  ;;  %v8980_v48 = vld [vmem:[%s18369_s12 + $0x490] sm:$0xff] }
0x1444   :  { %v6888_v40 = vsel %vm19023_vm10, %v12262_v36, %v12352_v13  ;;  %vm19024_vm7 = vmmov %vm19022_vm5  ;;  %v12327_v36 = vunpack.i.l.bf16 %v12326_v45  ;;  %v12362_v44 = vunpack.i.l.bf16 %v12361_v46  ;;  %v17864_v6 = vpack.c.bf16 %v8981_v55, %v8980_v48  ;;  %v9004_v55 = vld [vmem:[%s18369_s12 + $0x550] sm:$0xff] }
0x1445   :  { %v6900_v2 = vsel %vm19024_vm7, %v12352_v13, %v12257_v26  ;;  %vm19025_vm5 = vmpackc.low %vm17310_vm3, %vm17310_vm3  ;;  %v9618_v37 = vpack.c.bf16 %v6889_v51, %v6888_v40  ;;  %v12363_v26 = vunpack.i.h.bf16 %v12361_v46  ;;  %v7122_v13 = vrot.slane %v17443_v3, %v18798_v23  ;;  %v8979_v46 = vld [vmem:[%s18369_s12 + $0x488] sm:$0xff] }
0x1446   :  { %9508 = vmatprep.subr.msk.bf16.mxu0 %vm19025_vm5, %v9507_v0  ;;  %v9615_v39 = vpack.c.bf16 %v6901_v20, %v6900_v2  ;;  %vm9512_vm6 = vmpackc.low %vm17468_vm4, %vm17468_vm4  ;;  %v12333_v0 = vunpack.i.h.bf16 %v12331_v7  ;;  %vm17702_vm4 = vcmp.eq.s32.totalorder %v7118_v29, 1  ;;  %v9014_v2 = vld [vmem:[%s18369_s12 + $0x5a0] sm:$0xff] }
0x1447   :  { %vm9620_vm3 = vmpackc.low %vm17491_vm14, %vm17491_vm14  ;;  %9511 = vmatpush1.bf16.msk.msra.mxu0 %vm9503_vm11, %v9510_v57  ;;  %vm17715_vm14 = vcmp.eq.s32.totalorder %v7126_v4, 1  ;;  %v12491_v57 = vld [vmem:[%s18375_s5 + $0xdc] ss:$12 sps:$4 sm:$0xff]  }
0x1448   :  { %vm19028_vm8 = vmmov %vm19020_vm9  ;;  %9514 = vmatprep.subr.msk.bf16.mxu0 %vm9512_vm6, %v9513_v60 }
0x1449   :  { %v6990_v8 = vsel %vm19028_vm8, %v12313_v30, %v12318_v17  ;;  %vm19029_vm10 = vmpackc.low %vm17336_vm0, %vm17336_vm0  ;;  %v12366_v30 = vpop.permute.xlu1 %12365 }
0x144a   :  { %9616 = vmatprep.subr.msk.bf16.mxu1 %vm19029_vm10, %v9615_v39  ;;  %vm9515_vm0 = vmpackc.low %vm17513_vm1, %vm17513_vm1  ;;  %v9624_v19 = vpack.c.bf16 %v6990_v8, %v6989_v58  ;;  %v12368_v50 = vunpack.i.h.bf16 %v12366_v30  ;;  %v12367_v10 = vunpack.i.l.bf16 %v12366_v30  ;;  %vm17711_vm1 = vcmp.eq.s32.totalorder %v7114_v53, 1 }
0x144b   :  { %9619 = vmatpush1.bf16.msk.msra.mxu1 %vm9611_vm15, %v9618_v37  ;;  %vm19030_vm2 = vmmov %vm19028_vm8  ;;  %9517 = vmatpush1.bf16.msk.msra.mxu0 %vm9515_vm0, %v9516_v33  ;;  %v12381_v37 = vpop.permute.xlu0 %12380  ;;  %v12493_v33 = vld [vmem:[%s18375_s5 + $0xd8] ss:$12 sps:$4 sm:$0xff]  }
0x144c   :  { %v7000_v31 = vsel %vm19030_vm2, %v12323_v38, %v12358_v28  ;;  %vm19031_vm11 = vmmov %vm19030_vm2  ;;  %9622 = vmatprep.subr.msk.bf16.mxu1 %vm9620_vm3, %v9621_v15  ;;  %v12383_v12 = vunpack.i.h.bf16 %v12381_v37  ;;  %v12382_v58 = vunpack.i.l.bf16 %v12381_v37 }
0x144d   :  { %v6999_v14 = vsel %vm19031_vm11, %v12322_v42, %v12357_v5  ;;  %vm9623_vm12 = vmpackc.low %vm17611_vm13, %vm17611_vm13  ;;  %v12376_v3 = vpop.permute.xlu1 %12375  ;;  %vm17733_vm11 = vcmp.eq.s32.totalorder %v7122_v13, 1  ;;  %v8995_v13 = vld [vmem:[%s18369_s12 + $0x508] sm:$0xff] }
0x144e   :  { %vm19032_vm15 = vmmov %vm19030_vm2  ;;  %v9522_v43 = vpack.c.bf16 %v7000_v31, %v6999_v14  ;;  %v12378_v51 = vunpack.i.h.bf16 %v12376_v3  ;;  %v12377_v20 = vunpack.i.l.bf16 %v12376_v3 }
0x144f   :  { %v6995_v34 = vsel %vm19032_vm15, %v12357_v5, %v12327_v36  ;;  %vm19033_vm7 = vmmov %vm19030_vm2  ;;  %9625 = vmatpush1.bf16.msk.msra.mxu1 %vm9623_vm12, %v9624_v19 }
0x1450   :  { %v6996_v25 = vsel %vm19033_vm7, %v12358_v28, %v12328_v1  ;;  %vm19034_vm5 = vmmov %vm19030_vm2 }
0x1451   :  { %v9519_v17 = vpack.c.bf16 %v6996_v25, %v6995_v34  ;;  %v6992_v35 = vsel %vm19034_vm5, %v12328_v1, %v12363_v26  ;;  %vm19035_vm9 = vmmov %vm19030_vm2  ;;  %v12391_v29 = vpop.permute.xlu1 %12390  ;;  %v12386_v1 = vpop.permute.xlu0 %12385 }
0x1452   :  { %v7004_v22 = vsel %vm19035_vm9, %v12363_v26, %v12323_v38  ;;  %vm19036_vm8 = vmmov %vm19030_vm2  ;;  %v12393_v8 = vunpack.i.h.bf16 %v12391_v29  ;;  %v12392_v45 = vunpack.i.l.bf16 %v12391_v29  ;;  %v12388_v53 = vunpack.i.h.bf16 %v12386_v1  ;;  %v8984_v29 = vld [vmem:[%s18369_s12 + $0x4b0] sm:$0xff] }
0x1453   :  { %v6991_v56 = vsel %vm19036_vm8, %v12327_v36, %v12362_v44  ;;  %vm19037_vm10 = vmmov %vm19030_vm2  ;;  %9520 = vmatprep.subr.msk.bf16.mxu0 %vm9512_vm6, %v9519_v17  ;;  %vm19044_vm6 = vcmp.lt.s32.totalorder %v18799_v63, 111  ;;  %v8978_v36 = vld [vmem:[%s18369_s12 + $0x480] sm:$0xff]  ;;  %v12387_v31 = vunpack.i.l.bf16 %v12386_v1 }
0x1454   :  { %v7003_v52 = vsel %vm19037_vm10, %v12362_v44, %v12322_v42  ;;  %v9630_v21 = vpack.c.bf16 %v6992_v35, %v6991_v56  ;;  %9523 = vmatpush1.bf16.msk.msra.mxu0 %vm9515_vm0, %v9522_v43  ;;  %v7101_v61 = vsel %vm19044_vm6, %v12333_v0, %v12368_v50  ;;  %vm9524_vm2 = vmpackc.low %vm17702_vm4, %vm17702_vm4  ;;  %v17791_v17 = vpack.c.bf16 %v8979_v46, %v8978_v36  ;;  %v9010_v35 = vld [vmem:[%s18369_s12 + $0x580] sm:$0xff]  ;;  %v8968_v36 = vld [vmem:[%s18369_s12 + $0x430] sm:$0xff] }
0x1455   :  { %v9627_v59 = vpack.c.bf16 %v7004_v22, %v7003_v52  ;;  %vm9527_vm5 = vmpackc.low %vm17711_vm1, %vm17711_vm1  ;;  %v12396_v14 = vpop.permute.xlu1 %12395  ;;  %v9011_v22 = vld [vmem:[%s18369_s12 + $0x588] sm:$0xff]  ;;  %v8962_v63 = vld [vmem:[%s18369_s12 + $0x400] sm:$0xff]  ;;  %vm19061_vm4 = vcmask 261120  }
0x1456   :  { %vm9632_vm8 = vmpackc.low %vm17715_vm14, %vm17715_vm14  ;;  %v12398_v19 = vunpack.i.h.bf16 %v12396_v14  ;;  %v12397_v34 = vunpack.i.l.bf16 %v12396_v14  ;;  %v8969_v46 = vld [vmem:[%s18369_s12 + $0x438] sm:$0xff] }
0x1457   :  { %9628 = vmatprep.subr.msk.bf16.mxu1 %vm9620_vm3, %v9627_v59  ;;  %vm19045_vm3 = vmmov %vm19044_vm6  ;;  %7338 = vmatmul.mubr.bf16.vlgmr.msra.gmra.mrb[148].mxu0 %v12488_v27  ;;  %v12494_v59 = vld [vmem:[%s18375_s5 + $0xc8] ss:$12 sps:$4 sm:$0xff]   ;;  %v9001_v14 = vld [vmem:[%s18369_s12 + $0x538] sm:$0xff] }
0x1458   :  { %9631 = vmatpush1.bf16.msk.msra.mxu1 %vm9623_vm12, %v9630_v21  ;;  %v7100_v47 = vsel %vm19045_vm3, %v12332_v54, %v12367_v10  ;;  %vm19046_vm13 = vmmov %vm19045_vm3  ;;  %7347 = vmatprep.mubr.bf16.mxu0 %v12491_v57 }
0x1459   :  { %v7096_v62 = vsel %vm19046_vm13, %v12367_v10, %v12372_v18  ;;  %vm19047_vm0 = vmmov %vm19045_vm3  ;;  %v9528_v28 = vpack.c.bf16 %v7101_v61, %v7100_v47  ;;  %v17823_v10 = vpack.c.bf16 %v9011_v22, %v9010_v35  ;;  %v8965_v61 = vld [vmem:[%s18369_s12 + $0x418] sm:$0xff]  ;;  %v8996_v47 = vld [vmem:[%s18369_s12 + $0x510] sm:$0xff] }
0x145a   :  { %v7097_v40 = vsel %vm19047_vm0, %v12368_v50, %v12373_v32  ;;  %vm19050_vm12 = vmmov %vm19047_vm0  ;;  %v7099_v4 = vsel %vm19047_vm0, %v12393_v8, %v12388_v53  ;;  %v8963_v50 = vld [vmem:[%s18369_s12 + $0x408] sm:$0xff]  ;;  %v8970_v22 = vld [vmem:[%s18369_s12 + $0x440] sm:$0xff] }
0x145b   :  { %v9525_v38 = vpack.c.bf16 %v7097_v40, %v7096_v62  ;;  %v7093_v42 = vsel %vm19050_vm12, %v12373_v32, %v12378_v51  ;;  %vm19051_vm15 = vmmov %vm19047_vm0  ;;  %7444 = vmatmul.mubr.bf16.vlgmr.msra.gmra.mrb[108].mxu1 %v12488_v27  ;;  %v8994_v27 = vld [vmem:[%s18369_s12 + $0x500] sm:$0xff]  ;;  %v9012_v32 = vld [vmem:[%s18369_s12 + $0x590] sm:$0xff]  ;;  %v17859_v3 = vpack.c.bf16 %v8963_v50, %v8962_v63 }
0x145c   :  { %v7105_v24 = vsel %vm19051_vm15, %v12378_v51, %v12333_v0  ;;  %vm19052_vm7 = vmmov %vm19047_vm0  ;;  %7453 = vmatprep.mubr.bf16.mxu1 %v12491_v57  ;;  %v17862_v9 = vpack.c.bf16 %v8995_v13, %v8994_v27  ;;  %v8964_v57 = vld [vmem:[%s18369_s12 + $0x410] sm:$0xff]  ;;  %v8982_v62 = vld [vmem:[%s18369_s12 + $0x4a0] sm:$0xff] }
0x145d   :  { %v7092_v39 = vsel %vm19052_vm7, %v12372_v18, %v12377_v20  ;;  %vm19053_vm9 = vmmov %vm19047_vm0  ;;  %9526 = vmatprep.subr.msk.bf16.mxu0 %vm9524_vm2, %v9525_v38  ;;  %v9013_v18 = vld [vmem:[%s18369_s12 + $0x598] sm:$0xff]  ;;  %v8983_v40 = vld [vmem:[%s18369_s12 + $0x4a8] sm:$0xff] }
0x145e   :  { %v7104_v5 = vsel %vm19053_vm9, %v12377_v20, %v12332_v54  ;;  %v9636_v60 = vpack.c.bf16 %v7093_v42, %v7092_v39  ;;  %vm9635_vm10 = vmpackc.low %vm17733_vm11, %vm17733_vm11  ;;  %9529 = vmatpush1.bf16.msk.msra.mxu0 %vm9527_vm5, %v9528_v28  ;;  %v17876_v51 = vpack.c.bf16 %v9013_v18, %v9012_v32  ;;  %v8997_v20 = vld [vmem:[%s18369_s12 + $0x518] sm:$0xff]  ;;  %v9015_v38 = vld [vmem:[%s18369_s12 + $0x5a8] sm:$0xff]  ;;  %v17906_v37 = vpack.c.bf16 %v8983_v40, %v8982_v62 }
0x145f   :  { %v9633_v15 = vpack.c.bf16 %v7105_v24, %v7104_v5  ;;  %vm19054_vm6 = vmmov %vm19047_vm0  ;;  %7348 = vmatmul.mubr.bf16.gmra.mrb[152].mxu0 %v12493_v33  ;;  %v12495_v42 = vld [vmem:[%s18375_s5 + $0xe0] ss:$12 sps:$4 sm:$0xff]   ;;  %v17900_v24 = vpack.c.bf16 %v8965_v61, %v8964_v57  ;;  %v17904_v39 = vpack.c.bf16 %v8997_v20, %v8996_v47  ;;  %v8972_v27 = vld [vmem:[%s18369_s12 + $0x450] sm:$0xff] }
0x1460   :  { %v7103_v26 = vsel %vm19054_vm6, %v12383_v12, %v12393_v8  ;;  %vm19055_vm3 = vmmov %vm19047_vm0  ;;  %7390 = vmatprep.mubr.bf16.mxu0 %v18508_v41  ;;  %v8966_v28 = vld [vmem:[%s18369_s12 + $0x420] sm:$0xff]  ;;  %v9017_v8 = vld [vmem:[%s18369_s12 + $0x5b8] sm:$0xff] }
0x1461   :  { %9634 = vmatprep.subr.msk.bf16.mxu1 %vm9632_vm8, %v9633_v15  ;;  %v7102_v44 = vsel %vm19055_vm3, %v12382_v58, %v12392_v45  ;;  %vm19056_vm13 = vmmov %vm19047_vm0  ;;  %v8998_v5 = vld [vmem:[%s18369_s12 + $0x520] sm:$0xff]  ;;  %v8985_v15 = vld [vmem:[%s18369_s12 + $0x4b8] sm:$0xff] }
0x1462   :  { %9637 = vmatpush1.bf16.msk.msra.mxu1 %vm9635_vm10, %v9636_v60  ;;  %v7098_v25 = vsel %vm19056_vm13, %v12392_v45, %v12387_v31  ;;  %vm19057_vm12 = vmmov %vm19047_vm0  ;;  %v9534_v21 = vpack.c.bf16 %v7103_v26, %v7102_v44  ;;  %v17918_v60 = vpack.c.bf16 %v9015_v38, %v9014_v2  ;;  %v17942_v1 = vpack.c.bf16 %v8985_v15, %v8984_v29  ;;  %v8986_v26 = vld [vmem:[%s18369_s12 + $0x4c0] sm:$0xff]  ;;  %v8987_v44 = vld [vmem:[%s18369_s12 + $0x4c8] sm:$0xff] }
0x1463   :  { %v9531_v56 = vpack.c.bf16 %v7099_v4, %v7098_v25  ;;  %v7095_v7 = vsel %vm19057_vm12, %v12388_v53, %v12398_v19  ;;  %vm19058_vm15 = vmmov %vm19047_vm0  ;;  %7454 = vmatmul.mubr.bf16.gmra.mrb[112].mxu1 %v12493_v33  ;;  %v9000_v53 = vld [vmem:[%s18369_s12 + $0x530] sm:$0xff]  ;;  %v17974_v25 = vpack.c.bf16 %v8969_v46, %v8968_v36  ;;  %v17980_v35 = vpack.c.bf16 %v8987_v44, %v8986_v26  ;;  %v8973_v13 = vld [vmem:[%s18369_s12 + $0x458] sm:$0xff] }
0x1464   :  { %v7107_v43 = vsel %vm19058_vm15, %v12398_v19, %v12383_v12  ;;  %vm19059_vm7 = vmmov %vm19047_vm0  ;;  %7496 = vmatprep.mubr.bf16.mxu1 %v18508_v41  ;;  %v8999_v12 = vld [vmem:[%s18369_s12 + $0x528] sm:$0xff]  ;;  %v9018_v19 = vld [vmem:[%s18369_s12 + $0x5c0] sm:$0xff]  ;;  %v17978_v4 = vpack.c.bf16 %v9001_v14, %v9000_v53  ;;  %v18034_v18 = vpack.c.bf16 %v8973_v13, %v8972_v27 }
0x1465   :  { %v7094_v52 = vsel %vm19059_vm7, %v12387_v31, %v12397_v34  ;;  %vm19060_vm9 = vmmov %vm19047_vm0  ;;  %9532 = vmatprep.subr.msk.bf16.mxu0 %vm9524_vm2, %v9531_v56  ;;  %v17940_v33 = vpack.c.bf16 %v8999_v12, %v8998_v5  ;;  %v8971_v56 = vld [vmem:[%s18369_s12 + $0x448] sm:$0xff]  ;;  %v9005_v32 = vld [vmem:[%s18369_s12 + $0x558] sm:$0xff] }
0x1466   :  { %v7106_v0 = vsel %vm19060_vm9, %v12397_v34, %v12382_v58  ;;  %v9642_v30 = vpack.c.bf16 %v7095_v7, %v7094_v52  ;;  %9535 = vmatpush1.bf16.msk.msra.mxu0 %vm9527_vm5, %v9534_v21  ;;  %vm19062_vm1 = vmmov %vm19061_vm4  ;;  %v9016_v58 = vld [vmem:[%s18369_s12 + $0x5b0] sm:$0xff]  ;;  %v9019_v34 = vld [vmem:[%s18369_s12 + $0x5c8] sm:$0xff]  ;;  %v18038_v57 = vpack.c.bf16 %v9005_v32, %v9004_v55 }
0x1467   :  { %v9639_v54 = vpack.c.bf16 %v7107_v43, %v7106_v0  ;;  %11287 = vmatprep.subr.bf16.mxu0 %v17791_v17  ;;  %vm19063_vm14 = vmmov %vm19062_vm1  ;;  %v17955_v31 = vpack.c.bf16 %v9017_v8, %v9016_v58  ;;  %v9002_v7 = vld [vmem:[%s18369_s12 + $0x540] sm:$0xff]  ;;  %v17992_v43 = vpack.c.bf16 %v9019_v34, %v9018_v19  ;;  %v9003_v52 = vld [vmem:[%s18369_s12 + $0x548] sm:$0xff] }
0x1468   :  { %vm19064_vm2 = vmmov %vm19062_vm1  ;;  %v8988_v21 = vld [vmem:[%s18369_s12 + $0x4d0] sm:$0xff]  ;;  %v8989_v0 = vld [vmem:[%s18369_s12 + $0x4d8] sm:$0xff]  ;;  %v18014_v63 = vpack.c.bf16 %v9003_v52, %v9002_v7  ;;  %v7257_v52 = vpop.permute.xlu1 %7256 }
0x1469   :  { %9640 = vmatprep.subr.msk.bf16.mxu1 %vm9632_vm8, %v9639_v54  ;;  %8958 = vmatmul.mubr.msk.bf16.vlgmr.msra.gmra.mrb[148].mxu0 %vm19061_vm4, %v12494_v59  ;;  %v18010_v54 = vpack.c.bf16 %v8971_v56, %v8970_v22  ;;  %v18016_v50 = vpack.c.bf16 %v8989_v0, %v8988_v21  ;;  %v8990_v61 = vld [vmem:[%s18369_s12 + $0x4e0] sm:$0xff]  ;;  %v8991_v47 = vld [vmem:[%s18369_s12 + $0x4e8] sm:$0xff]  ;;  %v8992_v29 = vld [vmem:[%s18369_s12 + $0x4f0] sm:$0xff]  ;;  %v7252_v56 = vpop.permute.xlu0 %7251 }
0x146a   :  { %9643 = vmatpush1.bf16.msk.msra.mxu1 %vm9635_vm10, %v9642_v30  ;;  %7400 = vmatprep.mubr.bf16.mxu0 %v18508_v41  ;;  %v9020_v30 = vld [vmem:[%s18369_s12 + $0x5d0] sm:$0xff]  ;;  %v8974_v20 = vld [vmem:[%s18369_s12 + $0x460] sm:$0xff]  ;;  %v18052_v62 = vpack.c.bf16 %v8991_v47, %v8990_v61  ;;  %v8975_v40 = vld [vmem:[%s18369_s12 + $0x468] sm:$0xff] }
0x146b   :  { %11319 = vmatprep.subr.bf16.mxu1 %v17823_v10  ;;  %11289 = vmatpush3.bf16.msra.mxu0 %v17859_v3  ;;  %v9022_v2 = vld [vmem:[%s18369_s12 + $0x5e0] sm:$0xff]  ;;  %v9023_v38 = vld [vmem:[%s18369_s12 + $0x5e8] sm:$0xff]  ;;  %v8993_v15 = vld [vmem:[%s18369_s12 + $0x4f8] sm:$0xff] }
0x146c   :  { %11291 = vmatprep.subr.bf16.mxu0 %v17864_v6  ;;  %v9007_v5 = vld [vmem:[%s18369_s12 + $0x568] sm:$0xff]  ;;  %v8976_v58 = vld [vmem:[%s18369_s12 + $0x470] sm:$0xff]  ;;  %v18087_v8 = vpack.c.bf16 %v8993_v15, %v8992_v29  ;;  %v8977_v36 = vld [vmem:[%s18369_s12 + $0x478] sm:$0xff] }
0x146d   :  { %8960 = vmatmul.mubr.msk.bf16.vlgmr.msra.gmra.mrb[108].mxu1 %vm19062_vm1, %v12494_v59  ;;  %v9021_v59 = vld [vmem:[%s18369_s12 + $0x5d8] sm:$0xff]  ;;  %v9024_v46 = vld [vmem:[%s18369_s12 + $0x5f0] sm:$0xff]  ;;  %v18099_v14 = vpack.c.bf16 %v8977_v36, %v8976_v58  ;;  %v7517_v22 = vld [vmem:[%s18371_s10 + $0x8] sm:$0xf] }
0x146e   :  { %7506 = vmatprep.mubr.bf16.mxu1 %v18508_v41  ;;  %11321 = vmatpush3.bf16.msra.mxu1 %v17862_v9  ;;  %v8967_v41 = vld [vmem:[%s18369_s12 + $0x428] sm:$0xff]  ;;  %v18025_v48 = vpack.c.bf16 %v9021_v59, %v9020_v30  ;;  %v9025_v53 = vld [vmem:[%s18369_s12 + $0x5f8] sm:$0xff]  ;;  %v9008_v44 = vld [vmem:[%s18369_s12 + $0x570] sm:$0xff]  ;;  %v18121_v7 = vrot.slane %v7517_v22, %v14290_v11  ;;  %v18124_v0 = vrot.slane %v7517_v22, %v14280_v49 }
0x146f   :  { %11323 = vmatprep.subr.bf16.mxu1 %v17876_v51  ;;  %11293 = vmatpush3.bf16.msra.mxu0 %v17900_v24  ;;  %v17936_v45 = vpack.c.bf16 %v8967_v41, %v8966_v28  ;;  %v18065_v28 = vpack.c.bf16 %v9023_v38, %v9022_v2  ;;  %v9006_v41 = vld [vmem:[%s18369_s12 + $0x560] sm:$0xff]  ;;  %v18101_v26 = vpack.c.bf16 %v9025_v53, %v9024_v46  ;;  %v9009_v19 = vld [vmem:[%s18369_s12 + $0x578] sm:$0xff]  ;;  %v7262_v46 = vpop.permute.xlu0 %7261 }
0x1470   :  { %11295 = vmatprep.subr.bf16.mxu0 %v17906_v37  ;;  %v18074_v12 = vpack.c.bf16 %v9007_v5, %v9006_v41  ;;  %v18110_v34 = vpack.c.bf16 %v9009_v19, %v9008_v44  ;;  %v18127_v30 = vrot.slane %v7517_v22, %v18798_v23 }
0x1471   :  { %8959 = vmatmul.mubr.msk.bf16.gmra.mrb[152].mxu0 %vm19063_vm14, %v12495_v42 }
0x1472   :  { %11325 = vmatpush3.bf16.msra.mxu1 %v17904_v39 }
0x1473   :  { %11327 = vmatprep.subr.bf16.mxu1 %v17918_v60  ;;  %11297 = vmatpush3.bf16.msra.mxu0 %v17936_v45 }
0x1474   :  { %11299 = vmatprep.subr.bf16.mxu0 %v17942_v1 }
0x1475   :  { %8961 = vmatmul.mubr.msk.bf16.gmra.mrb[112].mxu1 %vm19064_vm2, %v12495_v42  ;;  %v18063_v42 = vpack.c.bf16 %v8975_v40, %v8974_v20 }
0x1476   :  { %11329 = vmatpush3.bf16.msra.mxu1 %v17940_v33 }
0x1477   :  { %11331 = vmatprep.subr.bf16.mxu1 %v17955_v31  ;;  %11301 = vmatpush3.bf16.msra.mxu0 %v17974_v25 }
0x1478   :  { %11303 = vmatprep.subr.bf16.mxu0 %v17980_v35 }
0x147a   :  { %11333 = vmatpush3.bf16.msra.mxu1 %v17978_v4 }
0x147b   :  { %11335 = vmatprep.subr.bf16.mxu1 %v17992_v43  ;;  %11305 = vmatpush3.bf16.msra.mxu0 %v18010_v54 }
0x147c   :  { %11307 = vmatprep.subr.bf16.mxu0 %v18016_v50 }
0x147e   :  { %11337 = vmatpush3.bf16.msra.mxu1 %v18014_v63 }
0x147f   :  { %11339 = vmatprep.subr.bf16.mxu1 %v18025_v48  ;;  %11309 = vmatpush3.bf16.msra.mxu0 %v18034_v18 }
0x1480   :  { %11311 = vmatprep.subr.bf16.mxu0 %v18052_v62 }
0x1482   :  { %11341 = vmatpush3.bf16.msra.mxu1 %v18038_v57 }
0x1483   :  { %11313 = vmatpush3.bf16.msra.mxu0 %v18063_v42  ;;  %11343 = vmatprep.subr.bf16.mxu1 %v18065_v28 }
0x1484   :  { %11315 = vmatprep.subr.bf16.mxu0 %v18087_v8 }
0x1486   :  { %11345 = vmatpush3.bf16.msra.mxu1 %v18074_v12 }
0x1487   :  { %11347 = vmatprep.subr.bf16.mxu1 %v18101_v26  ;;  %11317 = vmatpush3.bf16.msra.mxu0 %v18099_v14 }
0x1488   :  { %11351 = vmatprep.subr.bf16.mxu0 %v17791_v17 }
0x148a   :  { %11349 = vmatpush3.bf16.msra.mxu1 %v18110_v34 }
0x148b   :  { %11383 = vmatprep.subr.bf16.mxu1 %v17823_v10  ;;  %v18130_v10 = vrot.slane %v7517_v22, %v18797_v16  ;;  %v7267_v22 = vpop.permute.xlu1 %7266 }
0x153c   :  { %v7392_v21 = vpop.f32.mrb[148].mxu0 }
0x153d   :  { %v11446_v59 = vadd.f32 %v7392_v21, %v7252_v56  ;;  %v7394_v17 = vpop.f32.mrb[149].mxu0 }
0x153e   :  { %v11447_v13 = vadd.f32 %v7394_v17, %v7252_v56  ;;  %v7396_v32 = vpop.f32.mrb[150].mxu0 }
0x153f   :  { %v7539_v11 = vadd.f32 %v11446_v59, %v18121_v7  ;;  %v11448_v47 = vadd.f32 %v7396_v32, %v7257_v52  ;;  %v7398_v40 = vpop.f32.mrb[151].mxu0 }
0x1540   :  { %v7498_v27 = vpop.f32.mrb[108].mxu1  ;;  %v7540_v2 = vadd.f32 %v11447_v13, %v18124_v0  ;;  %v11449_v38 = vadd.f32 %v7398_v40, %v7257_v52 }
0x1541   :  { %v11454_v55 = vadd.f32 %v7498_v27, %v7252_v56  ;;  %v7500_v61 = vpop.f32.mrb[109].mxu1  ;;  %vm7555_vm11 = vcmp.gt.f32.partialorder %v7539_v11, 0.0  ;;  %v7571_v16 = vmul.f32 0.2, %v7539_v11  ;;  %v18137_v58 = vadd.f32 %v11448_v47, %v18121_v7 }
0x1542   :  { %v11455_v20 = vadd.f32 %v7500_v61, %v7252_v56  ;;  %v7502_v49 = vpop.f32.mrb[110].mxu1  ;;  %v7544_v36 = vadd.f32 %v11449_v38, %v18124_v0  ;;  %vm7556_vm8 = vcmp.gt.f32.partialorder %v7540_v2, 0.0  ;;  %v7572_v19 = vmul.f32 0.2, %v7540_v2 }
0x1543   :  { %v7541_v23 = vadd.f32 %v11454_v55, %v18127_v30  ;;  %v11456_v41 = vadd.f32 %v7502_v49, %v7257_v52  ;;  %v7504_v5 = vpop.f32.mrb[111].mxu1  ;;  %v18141_v21 = vsel %vm7555_vm11, %v7539_v11, %v7571_v16  ;;  %vm7559_vm13 = vcmp.gt.f32.partialorder %v18137_v58, 0.0 }
0x1544   :  { %v7542_v29 = vadd.f32 %v11455_v20, %v18130_v10  ;;  %v11457_v44 = vadd.f32 %v7504_v5, %v7257_v52  ;;  %v7402_v56 = vpop.f32.mrb[152].mxu0  ;;  %vm7560_vm6 = vcmp.gt.f32.partialorder %v7544_v36, 0.0  ;;  %v18144_v32 = vsel %vm7556_vm8, %v7540_v2, %v7572_v19 }
0x1545   :  { %vm7557_vm5 = vcmp.gt.f32.partialorder %v7541_v23, 0.0  ;;  %v7573_v15 = vmul.f32 0.2, %v7541_v23  ;;  %v7545_v53 = vadd.f32 %v11456_v41, %v18127_v30  ;;  %v11450_v27 = vadd.f32 %v7402_v56, %v7262_v46  ;;  %v7404_v13 = vpop.f32.mrb[153].mxu0  ;;  %7732 = vmatprep.mubr.f32.mxu0 %v18144_v32 }
0x1546   :  { %vm7558_vm10 = vcmp.gt.f32.partialorder %v7542_v29, 0.0  ;;  %v7574_v59 = vmul.f32 0.2, %v7542_v29  ;;  %v7546_v17 = vadd.f32 %v11457_v44, %v18130_v10  ;;  %v7576_v61 = vmul.f32 0.2, %v7544_v36  ;;  %v7406_v52 = vpop.f32.mrb[154].mxu0  ;;  %7733 = vmatmul.mubr.f32.vlgmr.msra.gmra.mrb[156].mxu0 %v18141_v21 }
0x1547   :  { %v11451_v47 = vadd.f32 %v7404_v13, %v7262_v46  ;;  %v18150_v11 = vsel %vm7557_vm5, %v7541_v23, %v7573_v15  ;;  %v7547_v38 = vadd.f32 %v11450_v27, %v18121_v7  ;;  %v11452_v41 = vadd.f32 %v7406_v52, %v7267_v22  ;;  %v7408_v2 = vpop.f32.mrb[155].mxu0  ;;  %11353 = vmatpush3.bf16.msra.mxu0 %v17859_v3 }
0x1548   :  { %v7508_v55 = vpop.f32.mrb[112].mxu1  ;;  %v18147_v49 = vsel %vm7558_vm10, %v7542_v29, %v7574_v59  ;;  %v11453_v19 = vadd.f32 %v7408_v2, %v7267_v22  ;;  %vm7562_vm3 = vcmp.gt.f32.partialorder %v7546_v17, 0.0  ;;  %v18161_v59 = vsel %vm7560_vm6, %v7544_v36, %v7576_v61  ;;  %11355 = vmatprep.subr.bf16.mxu0 %v17864_v6 }
0x1549   :  { %v11458_v20 = vadd.f32 %v7508_v55, %v7262_v46  ;;  %v7510_v40 = vpop.f32.mrb[113].mxu1  ;;  %7817 = vmatprep.mubr.f32.mxu1 %v18147_v49  ;;  %v7548_v44 = vadd.f32 %v11451_v47, %v18124_v0  ;;  %v7551_v15 = vadd.f32 %v11452_v41, %v18121_v7  ;;  %7737 = vmatprep.mubr.f32.mxu0 %v18161_v59  ;;  %v7578_v55 = vmul.f32 0.2, %v7546_v17 }
0x154a   :  { %v11459_v5 = vadd.f32 %v7510_v40, %v7262_v46  ;;  %v7512_v16 = vpop.f32.mrb[114].mxu1  ;;  %7818 = vmatmul.mubr.f32.vlgmr.msra.gmra.mrb[116].mxu1 %v18150_v11  ;;  %v7552_v27 = vadd.f32 %v11453_v19, %v18124_v0  ;;  %v7575_v7 = vmul.f32 0.2, %v18137_v58  ;;  %vm7561_vm0 = vcmp.gt.f32.partialorder %v7545_v53, 0.0 }
0x154b   :  { %v11460_v29 = vadd.f32 %v7512_v16, %v7267_v22  ;;  %v7514_v56 = vpop.f32.mrb[115].mxu1  ;;  %v7549_v23 = vadd.f32 %v11458_v20, %v18127_v30  ;;  %11385 = vmatpush3.bf16.msra.mxu1 %v17862_v9  ;;  %v7577_v36 = vmul.f32 0.2, %v7545_v53  ;;  %11357 = vmatpush3.bf16.msra.mxu0 %v17900_v24  ;;  %vm7564_vm12 = vcmp.gt.f32.partialorder %v7548_v44, 0.0 }
0x154c   :  { %v7550_v46 = vadd.f32 %v11459_v5, %v18130_v10  ;;  %v11461_v3 = vadd.f32 %v7514_v56, %v7267_v22  ;;  %11387 = vmatprep.subr.bf16.mxu1 %v17876_v51  ;;  %v7580_v9 = vmul.f32 0.2, %v7548_v44  ;;  %v18179_v6 = vsel %vm7559_vm13, %v18137_v58, %v7575_v7  ;;  %11359 = vmatprep.subr.bf16.mxu0 %v17906_v37 }
0x154d   :  { %v7553_v13 = vadd.f32 %v11460_v29, %v18127_v30  ;;  %v18174_v30 = vsel %vm7562_vm3, %v7546_v17, %v7578_v55  ;;  %v18181_v22 = vsel %vm7561_vm0, %v7545_v53, %v7577_v36  ;;  %vm7563_vm15 = vcmp.gt.f32.partialorder %v7547_v38, 0.0  ;;  %7738 = vmatmul.mubr.f32.gmra.mrb[158].mxu0 %v18179_v6 }
0x154e   :  { %v7554_v0 = vadd.f32 %v11461_v3, %v18130_v10  ;;  %7822 = vmatprep.mubr.f32.mxu1 %v18174_v30  ;;  %v7579_v51 = vmul.f32 0.2, %v7547_v38  ;;  %v18186_v10 = vsel %vm7564_vm12, %v7548_v44, %v7580_v9  ;;  %vm7566_vm7 = vcmp.gt.f32.partialorder %v7550_v46, 0.0 }
0x154f   :  { %7823 = vmatmul.mubr.f32.gmra.mrb[118].mxu1 %v18181_v22  ;;  %v7582_v24 = vmul.f32 0.2, %v7550_v46  ;;  %vm7568_vm9 = vcmp.gt.f32.partialorder %v7552_v27, 0.0  ;;  %7742 = vmatprep.mubr.f32.mxu0 %v18186_v10  ;;  %v7584_v58 = vmul.f32 0.2, %v7552_v27  ;;  %vm7565_vm4 = vcmp.gt.f32.partialorder %v7549_v23, 0.0 }
0x1550   :  { %11389 = vmatpush3.bf16.msra.mxu1 %v17904_v39  ;;  %v7581_v53 = vmul.f32 0.2, %v7549_v23  ;;  %11361 = vmatpush3.bf16.msra.mxu0 %v17936_v45  ;;  %vm7570_vm1 = vcmp.gt.f32.partialorder %v7554_v0, 0.0  ;;  %v7586_v37 = vmul.f32 0.2, %v7554_v0  ;;  %v18195_v61 = vsel %vm7563_vm15, %v7547_v38, %v7579_v51 }
0x1551   :  { %v18190_v17 = vsel %vm7566_vm7, %v7550_v46, %v7582_v24  ;;  %11391 = vmatprep.subr.bf16.mxu1 %v17918_v60  ;;  %v18198_v47 = vsel %vm7568_vm9, %v7552_v27, %v7584_v58  ;;  %11363 = vmatprep.subr.bf16.mxu0 %v17942_v1  ;;  %v7583_v20 = vmul.f32 0.2, %v7551_v15  ;;  %vm7567_vm14 = vcmp.gt.f32.partialorder %v7551_v15, 0.0 }
0x1552   :  { %7827 = vmatprep.mubr.f32.mxu1 %v18190_v17  ;;  %v18200_v39 = vsel %vm7565_vm4, %v7549_v23, %v7581_v53  ;;  %7743 = vmatmul.mubr.f32.gmra.mrb[160].mxu0 %v18195_v61  ;;  %v18205_v45 = vsel %vm7570_vm1, %v7554_v0, %v7586_v37  ;;  %vm7569_vm2 = vcmp.gt.f32.partialorder %v7553_v13, 0.0  ;;  %v7585_v60 = vmul.f32 0.2, %v7553_v13 }
0x1553   :  { %7828 = vmatmul.mubr.f32.gmra.mrb[120].mxu1 %v18200_v39  ;;  %7747 = vmatprep.mubr.f32.mxu0 %v18198_v47  ;;  %v18211_v52 = vsel %vm7567_vm14, %v7551_v15, %v7583_v20  ;;  %v7839_v40 = vmul.f32 %v18144_v32, %v18144_v32  ;;  %vm19067_vm11 = vcmask 1041408   ;;  %vm19074_vm6 = vcmask 15360  }
0x1554   :  { %11393 = vmatpush3.bf16.msra.mxu1 %v17940_v33  ;;  %7832 = vmatprep.mubr.f32.mxu1 %v18205_v45  ;;  %v18214_v1 = vsel %vm7569_vm2, %v7553_v13, %v7585_v60  ;;  %v7841_v33 = vmul.f32 %v18147_v49, %v18147_v49  ;;  %vm19068_vm5 = vmmov %vm19067_vm11 }
0x1555   :  { %11365 = vmatpush3.bf16.msra.mxu0 %v17974_v25  ;;  %11395 = vmatprep.subr.bf16.mxu1 %v17955_v31  ;;  %v7838_v31 = vmul.f32 %v18141_v21, %v18141_v21  ;;  %v7843_v25 = vmul.f32 %v18161_v59, %v18161_v59  ;;  %vm19069_vm8 = vmmov %vm19068_vm5 }
0x1556   :  { %11367 = vmatprep.subr.bf16.mxu0 %v17980_v35  ;;  %7748 = vmatmul.mubr.f32.gmra.mrb[162].mxu0 %v18211_v52  ;;  %v7845_v35 = vmul.f32 %v18174_v30, %v18174_v30  ;;  %vm19070_vm10 = vmmov %vm19068_vm5 }
0x1557   :  { %7833 = vmatmul.mubr.f32.gmra.mrb[122].mxu1 %v18214_v1  ;;  %7918 = vmatprep.mubr.f32.mxu0 %v7839_v40  ;;  %vm19075_vm3 = vmmov %vm19074_vm6 }
0x1558   :  { %11397 = vmatpush3.bf16.msra.mxu1 %v17978_v4  ;;  %8003 = vmatprep.mubr.f32.mxu1 %v7841_v33  ;;  %v7840_v4 = vmul.f32 %v18150_v11, %v18150_v11  ;;  %vm19078_vm13 = vmmov %vm19075_vm3 }
0x1559   :  { %11369 = vmatpush3.bf16.msra.mxu0 %v18010_v54  ;;  %11399 = vmatprep.subr.bf16.mxu1 %v17992_v43  ;;  %v7842_v43 = vmul.f32 %v18179_v6, %v18179_v6  ;;  %v7847_v54 = vmul.f32 %v18186_v10, %v18186_v10  ;;  %vm19079_vm0 = vmmov %vm19075_vm3 }
0x155a   :  { %11371 = vmatprep.subr.bf16.mxu0 %v18016_v50  ;;  %v7849_v50 = vmul.f32 %v18190_v17, %v18190_v17  ;;  %vm19082_vm12 = vmmov %vm19079_vm0 }
0x155b   :  { %vm19083_vm15 = vmmov %vm19079_vm0 }
0x155c   :  { %11401 = vmatpush3.bf16.msra.mxu1 %v18014_v63  ;;  %v7844_v63 = vmul.f32 %v18181_v22, %v18181_v22  ;;  %vm19085_vm7 = vmmov %vm19079_vm0 }
0x155d   :  { %11373 = vmatpush3.bf16.msra.mxu0 %v18034_v18  ;;  %11403 = vmatprep.subr.bf16.mxu1 %v18025_v48  ;;  %v7846_v48 = vmul.f32 %v18195_v61, %v18195_v61  ;;  %v7851_v18 = vmul.f32 %v18198_v47, %v18198_v47  ;;  %vm19086_vm9 = vmmov %vm19079_vm0 }
0x155e   :  { %11375 = vmatprep.subr.bf16.mxu0 %v18052_v62  ;;  %v7853_v62 = vmul.f32 %v18205_v45, %v18205_v45  ;;  %vm19087_vm4 = vmmov %vm19079_vm0 }
0x155f   :  { %vm19088_vm1 = vmmov %vm19079_vm0 }
0x1560   :  { %11405 = vmatpush3.bf16.msra.mxu1 %v18038_v57  ;;  %v7848_v57 = vmul.f32 %v18200_v39, %v18200_v39  ;;  %vm19089_vm14 = vmmov %vm19079_vm0 }
0x1561   :  { %11377 = vmatpush3.bf16.msra.mxu0 %v18063_v42  ;;  %11407 = vmatprep.subr.bf16.mxu1 %v18065_v28  ;;  %v7850_v42 = vmul.f32 %v18211_v52, %v18211_v52  ;;  %v7852_v28 = vmul.f32 %v18214_v1, %v18214_v1  ;;  %vm19090_vm2 = vmmov %vm19079_vm0 }
0x1562   :  { %11379 = vmatprep.subr.bf16.mxu0 %v18087_v8  ;;  %v9026_v8 = vld [vmem:[%s18373_s13 + $0x10] sm:$0xff] }
0x1564   :  { %11409 = vmatpush3.bf16.msra.mxu1 %v18074_v12  ;;  %v19065_v12 = vmov 0.0  }
0x1565   :  { %11381 = vmatpush3.bf16.msra.mxu0 %v18099_v14  ;;  %11411 = vmatprep.subr.bf16.mxu1 %v18101_v26  ;;  %v19066_v14 = vld [vmem:[#allocation39_spill] sm:$0xff] }
0x1566   :  { %v8064_v26 = vrot.slane %v9026_v8, %v19066_v14 }
0x1568   :  { %11413 = vmatpush3.bf16.msra.mxu1 %v18110_v34  ;;  %7919 = vmatmul.mubr.f32.vlgmr.msra.gmra.mrb[164].mxu0 %v7838_v31  ;;  %v8057_v34 = vcombine.high %v9026_v8, %v9026_v8  ;;  %v8072_v38 = vcombine.high %v8064_v26, %v8064_v26 }
0x1569   :  { %7923 = vmatprep.mubr.f32.mxu0 %v7843_v25 }
0x156a   :  { %v8071_v41 = vrot.slane %v8057_v34, %v19066_v14  ;;  %9027 = vmatprep.subr.msk.mxu0 %vm19067_vm11, %v8072_v38  ;;  %vm19091_vm11 = vmmov %vm19079_vm0 }
0x156b   :  { %8004 = vmatmul.mubr.f32.vlgmr.msra.gmra.mrb[124].mxu1 %v7840_v4  ;;  %9028 = vmatpush1.msk.msra.mxu0 %vm19068_vm5, %v8064_v26  ;;  %vm19092_vm5 = vmmov %vm19079_vm0 }
0x156c   :  { %8008 = vmatprep.mubr.f32.mxu1 %v7845_v35  ;;  %7924 = vmatmul.mubr.f32.gmra.mrb[166].mxu0 %v7842_v43  ;;  %v8073_v5 = vcombine.high %v8071_v41, %v8071_v41 }
0x156d   :  { %7928 = vmatprep.mubr.f32.mxu0 %v7847_v54 }
0x156e   :  { %9037 = vmatprep.subr.msk.mxu1 %vm19069_vm8, %v8073_v5  ;;  %vm19093_vm8 = vmmov %vm19079_vm0 }
0x156f   :  { %8009 = vmatmul.mubr.f32.gmra.mrb[126].mxu1 %v7844_v63 }
0x1570   :  { %8013 = vmatprep.mubr.f32.mxu1 %v7849_v50  ;;  %7929 = vmatmul.mubr.f32.gmra.mrb[168].mxu0 %v7846_v48 }
0x1571   :  { %7933 = vmatprep.mubr.f32.mxu0 %v7851_v18  ;;  %9038 = vmatpush1.msk.msra.mxu1 %vm19070_vm10, %v8071_v41  ;;  %vm19094_vm10 = vmmov %vm19079_vm0 }
0x1573   :  { %8014 = vmatmul.mubr.f32.gmra.mrb[128].mxu1 %v7848_v57 }
0x1574   :  { %8018 = vmatprep.mubr.f32.mxu1 %v7853_v62  ;;  %7934 = vmatmul.mubr.f32.gmra.mrb[170].mxu0 %v7850_v42 }
0x1575   :  { %8170 = vmatprep.mubr.f32.mxu0 %v19065_v12 }
0x1577   :  { %8019 = vmatmul.mubr.f32.gmra.mrb[130].mxu1 %v7852_v28 }
0x1578   :  { %8283 = vmatprep.mubr.f32.mxu1 %v19065_v12 }
0x1619   :  { %v10222_v2 = vpop.f32.mrb[156].mxu0 }
0x161a   :  { %v10223_v16 = vpop.f32.mrb[157].mxu0 }
0x161b   :  { %v10224_v44 = vadd.f32 %v10223_v16, %v10222_v2 }
0x161d   :  { %v10266_v19 = vpop.f32.mrb[116].mxu1 }
0x161e   :  { %v10267_v29 = vpop.f32.mrb[117].mxu1 }
0x161f   :  { %v10268_v56 = vadd.f32 %v10267_v29, %v10266_v19 }
0x1620   :  { %v10225_v15 = vpop.f32.mrb[158].mxu0 }
0x1621   :  { %v18278_v23 = vadd.f32 %v10268_v56, %v10224_v44  ;;  %v10226_v27 = vpop.f32.mrb[159].mxu0  ;;  %v657_v56 = vpop.permute.xlu0 %656 }
0x1622   :  { %v10269_v46 = vpop.f32.mrb[118].mxu1  ;;  %v10227_v3 = vadd.f32 %v10226_v27, %v10225_v15 }
0x1623   :  { %v10270_v13 = vpop.f32.mrb[119].mxu1  ;;  %v8024_v62 = vmul.f32 %v18278_v23, %v18278_v23 }
0x1624   :  { %v10271_v55 = vadd.f32 %v10270_v13, %v10269_v46 }
0x1625   :  { %v10228_v36 = vpop.f32.mrb[160].mxu0 }
0x1626   :  { %v18280_v7 = vadd.f32 %v10271_v55, %v10227_v3  ;;  %v10272_v0 = vpop.f32.mrb[120].mxu1  ;;  %v10229_v9 = vpop.f32.mrb[161].mxu0 }
0x1627   :  { %v10273_v51 = vpop.f32.mrb[121].mxu1  ;;  %v10230_v24 = vadd.f32 %v10229_v9, %v10228_v36 }
0x1628   :  { %v10274_v58 = vadd.f32 %v10273_v51, %v10272_v0  ;;  %v8025_v5 = vmul.f32 %v18280_v7, %v18280_v7 }
0x1629   :  { %v10231_v37 = vpop.f32.mrb[162].mxu0 }
0x162a   :  { %v18282_v53 = vadd.f32 %v10274_v58, %v10230_v24  ;;  %v10275_v20 = vpop.f32.mrb[122].mxu1  ;;  %v10232_v60 = vpop.f32.mrb[163].mxu0 }
0x162b   :  { %v10276_v40 = vpop.f32.mrb[123].mxu1  ;;  %v10233_v33 = vadd.f32 %v10232_v60, %v10231_v37  ;;  %v662_v24 = vpop.permute.xlu1 %661 }
0x162c   :  { %v10277_v31 = vadd.f32 %v10276_v40, %v10275_v20  ;;  %v8026_v55 = vmul.f32 %v18282_v53, %v18282_v53  ;;  %v667_v60 = vpop.permute.xlu0 %666 }
0x162e   :  { %v18284_v25 = vadd.f32 %v10277_v31, %v10233_v33 }
0x1630   :  { %v8027_v40 = vmul.f32 %v18284_v25, %v18284_v25 }
0x163b   :  { %v10310_v4 = vpop.f32.mrb[164].mxu0 }
0x163c   :  { %v10311_v35 = vpop.f32.mrb[165].mxu0 }
0x163d   :  { %v10312_v43 = vadd.f32 %v10311_v35, %v10310_v4 }
0x163e   :  { %v10354_v54 = vpop.f32.mrb[124].mxu1 }
0x163f   :  { %v10355_v63 = vpop.f32.mrb[125].mxu1  ;;  %v10313_v50 = vpop.f32.mrb[166].mxu0 }
0x1640   :  { %v10356_v48 = vadd.f32 %v10355_v63, %v10354_v54  ;;  %v10314_v18 = vpop.f32.mrb[167].mxu0  ;;  %v19071_v63 = vld [vmem:[#allocation12_spill] sm:$0xff] }
0x1641   :  { %v10315_v57 = vadd.f32 %v10314_v18, %v10313_v50  ;;  %v1105_v50 = vadd.f32 %v19071_v63, %v657_v56  ;;  %v677_v18 = vpop.permute.xlu0 %676 }
0x1642   :  { %v8006_v42 = vadd.f32 %v10356_v48, %v10312_v43  ;;  %v10357_v28 = vpop.f32.mrb[126].mxu1  ;;  %v672_v43 = vpop.permute.xlu1 %671 }
0x1643   :  { %v10358_v8 = vpop.f32.mrb[127].mxu1  ;;  %v10316_v14 = vpop.f32.mrb[168].mxu0 }
0x1644   :  { %v8028_v26 = vsub.f32 %v8006_v42, %v8024_v62  ;;  %v10359_v34 = vadd.f32 %v10358_v8, %v10357_v28  ;;  %v10317_v38 = vpop.f32.mrb[169].mxu0  ;;  %v19072_v42 = vld [vmem:[#allocation11_spill] sm:$0xff]  ;;  %v19073_v8 = vld [vmem:[#allocation16_spill] sm:$0xff] }
0x1645   :  { %v10318_v41 = vadd.f32 %v10317_v38, %v10316_v14  ;;  %v1110_v28 = vadd.f32 %v19072_v42, %v662_v24  ;;  %v1125_v14 = vadd.f32 %v19073_v8, %v677_v18  ;;  %v19084_v24 = vld [vmem:[#allocation17_spill] sm:$0xff] }
0x1646   :  { %v8032_v2 = vmax.f32 %v8028_v26, 0.0  ;;  %v8011_v16 = vadd.f32 %v10359_v34, %v10315_v57  ;;  %v10360_v44 = vpop.f32.mrb[128].mxu1  ;;  %v682_v38 = vpop.permute.xlu1 %681 }
0x1647   :  { %v10361_v19 = vpop.f32.mrb[129].mxu1  ;;  %v10319_v29 = vpop.f32.mrb[170].mxu0 }
0x1648   :  { %v8036_v15 = vadd.f32 1e-08, %v8032_v2  ;;  %v8029_v46 = vsub.f32 %v8011_v16, %v8025_v5  ;;  %v10362_v27 = vadd.f32 %v10361_v19, %v10360_v44  ;;  %v10320_v13 = vpop.f32.mrb[171].mxu0  ;;  %v19076_v2 = vld [vmem:[#allocation14_spill] sm:$0xff]  ;;  %v19077_v44 = vld [vmem:[#allocation15_spill] sm:$0xff] }
0x1649   :  { %v10321_v3 = vadd.f32 %v10320_v13, %v10319_v29  ;;  %v1115_v16 = vadd.f32 %v19076_v2, %v667_v60  ;;  %v1130_v19 = vadd.f32 %v19077_v44, %v682_v38 }
0x164a   :  { %12539 = vrsqrt.f32 %v8036_v15  ;;  %v8033_v36 = vmax.f32 %v8029_v46, 0.0  ;;  %v8016_v0 = vadd.f32 %v10362_v27, %v10318_v41  ;;  %v10363_v9 = vpop.f32.mrb[130].mxu1  ;;  %v19080_v27 = vld [vmem:[#allocation13_spill] sm:$0xff] }
0x164b   :  { %v10364_v51 = vpop.f32.mrb[131].mxu1  ;;  %v1120_v13 = vadd.f32 %v19080_v27, %v672_v43 }
0x164c   :  { %v8037_v58 = vadd.f32 1e-08, %v8033_v36  ;;  %v8030_v37 = vsub.f32 %v8016_v0, %v8026_v55  ;;  %v10365_v20 = vadd.f32 %v10364_v51, %v10363_v9 }
0x164e   :  { %12541 = vrsqrt.f32 %v8037_v58  ;;  %v8034_v33 = vmax.f32 %v8030_v37, 0.0  ;;  %v8021_v31 = vadd.f32 %v10365_v20, %v10321_v3  ;;  %v19081_v3 = vld [vmem:[#allocation18_spill] sm:$0xff] }
0x1650   :  { %v8038_v4 = vadd.f32 1e-08, %v8034_v33  ;;  %v8031_v35 = vsub.f32 %v8021_v31, %v8027_v40 }
0x1652   :  { %12543 = vrsqrt.f32 %v8038_v4  ;;  %v8035_v54 = vmax.f32 %v8031_v35, 0.0 }
0x1654   :  { %v12540_v48 = vpop.eup %12539  ;;  %v8039_v57 = vadd.f32 1e-08, %v8035_v54 }
0x1655   :  { %v8044_v62 = vmul.f32 %v12540_v48, %v1105_v50 }
0x1656   :  { %12545 = vrsqrt.f32 %v8039_v57 }
0x1657   :  { %9029 = vmatmul.mubr.msk.f32.vlgmr.msra.gmra.mrb[172].mxu0 %vm19074_vm6, %v8044_v62  ;;  %9039 = vmatmul.mubr.msk.f32.vlgmr.msra.gmra.mrb[132].mxu1 %vm19075_vm3, %v8044_v62  ;;  %v8048_v26 = vmul.f32 %v8044_v62, %v18278_v23  ;;  %v687_v23 = vpop.permute.xlu0 %686  ;;  %vm19095_vm6 = vcmask 261120  }
0x1658   :  { %v12542_v34 = vpop.eup %12541  ;;  %8176 = vmatprep.mubr.f32.mxu0 %v19065_v12  ;;  %8289 = vmatprep.mubr.f32.mxu1 %v19065_v12  ;;  %v1135_v55 = vadd.f32 %v19081_v3, %v687_v23  ;;  %vm19096_vm3 = vmmov %vm19095_vm6 }
0x1659   :  { %v8045_v41 = vmul.f32 %v12542_v34, %v1110_v28  ;;  %v8052_v5 = vsub.f32 %v1125_v14, %v8048_v26 }
0x165b   :  { %9030 = vmatmul.mubr.msk.f32.gmra.mrb[174].mxu0 %vm19078_vm13, %v8045_v41  ;;  %9040 = vmatmul.mubr.msk.f32.gmra.mrb[134].mxu1 %vm19079_vm0, %v8045_v41  ;;  %v8049_v29 = vmul.f32 %v8045_v41, %v18280_v7  ;;  %v692_v7 = vpop.permute.xlu1 %691 }
0x165c   :  { %v12544_v56 = vpop.eup %12543  ;;  %8182 = vmatprep.mubr.f32.mxu0 %v19065_v12  ;;  %8295 = vmatprep.mubr.f32.mxu1 %v19065_v12  ;;  %v1140_v58 = vadd.f32 %v19084_v24, %v692_v7 }
0x165d   :  { %v8046_v15 = vmul.f32 %v12544_v56, %v1115_v16  ;;  %v8053_v46 = vsub.f32 %v1130_v19, %v8049_v29 }
0x165f   :  { %9031 = vmatmul.mubr.msk.f32.gmra.mrb[176].mxu0 %vm19082_vm12, %v8046_v15  ;;  %9041 = vmatmul.mubr.msk.f32.gmra.mrb[136].mxu1 %vm19083_vm15, %v8046_v15  ;;  %v8050_v36 = vmul.f32 %v8046_v15, %v18282_v53 }
0x1660   :  { %v12546_v0 = vpop.eup %12545  ;;  %8188 = vmatprep.mubr.f32.mxu0 %v19065_v12  ;;  %8301 = vmatprep.mubr.f32.mxu1 %v19065_v12 }
0x1661   :  { %v8047_v9 = vmul.f32 %v12546_v0, %v1120_v13  ;;  %v8054_v51 = vsub.f32 %v1135_v55, %v8050_v36 }
0x1663   :  { %9032 = vmatmul.mubr.msk.f32.gmra.mrb[178].mxu0 %vm19085_vm7, %v8047_v9  ;;  %9042 = vmatmul.mubr.msk.f32.gmra.mrb[138].mxu1 %vm19086_vm9, %v8047_v9  ;;  %v8051_v37 = vmul.f32 %v8047_v9, %v18284_v25 }
0x1664   :  { %8194 = vmatprep.mubr.f32.mxu0 %v19065_v12  ;;  %8307 = vmatprep.mubr.f32.mxu1 %v19065_v12 }
0x1665   :  { %v8055_v53 = vsub.f32 %v1140_v58, %v8051_v37 }
0x1667   :  { %9033 = vmatmul.mubr.msk.f32.gmra.mrb[180].mxu0 %vm19087_vm4, %v8052_v5  ;;  %9043 = vmatmul.mubr.msk.f32.gmra.mrb[140].mxu1 %vm19088_vm1, %v8052_v5 }
0x1668   :  { %8200 = vmatprep.mubr.f32.mxu0 %v19065_v12  ;;  %8313 = vmatprep.mubr.f32.mxu1 %v19065_v12 }
0x166b   :  { %9034 = vmatmul.mubr.msk.f32.gmra.mrb[182].mxu0 %vm19089_vm14, %v8053_v46  ;;  %9044 = vmatmul.mubr.msk.f32.gmra.mrb[142].mxu1 %vm19090_vm2, %v8053_v46 }
0x166c   :  { %8206 = vmatprep.mubr.f32.mxu0 %v19065_v12  ;;  %8319 = vmatprep.mubr.f32.mxu1 %v19065_v12 }
0x166f   :  { %9035 = vmatmul.mubr.msk.f32.gmra.mrb[184].mxu0 %vm19091_vm11, %v8054_v51  ;;  %9045 = vmatmul.mubr.msk.f32.gmra.mrb[144].mxu1 %vm19092_vm5, %v8054_v51 }
0x1670   :  { %8212 = vmatprep.mubr.f32.mxu0 %v19065_v12  ;;  %8325 = vmatprep.mubr.f32.mxu1 %v19065_v12 }
0x1673   :  { %9036 = vmatmul.mubr.msk.f32.gmra.mrb[186].mxu0 %vm19093_vm8, %v8055_v53  ;;  %9046 = vmatmul.mubr.msk.f32.gmra.mrb[146].mxu1 %vm19094_vm10, %v8055_v53 }
0x1674   :  { %8438 = vmatprep.mubr.f32.mxu0 %v19065_v12  ;;  %8509 = vmatprep.mubr.f32.mxu1 %v19065_v12 }
0x172a   :  { %v8172_v25 = vpop.f32.mrb[172].mxu0  ;;  %v8285_v20 = vpop.f32.mrb[132].mxu1 }
0x172b   :  { %v8174_v60 = vpop.f32.mrb[173].mxu0  ;;  %v8287_v40 = vpop.f32.mrb[133].mxu1  ;;  %v8332_v42 = vmul.f32 %v8172_v25, %v18141_v21  ;;  %v8334_v12 = vmul.f32 %v8285_v20, %v18150_v11 }
0x172c   :  { %v8333_v28 = vmul.f32 %v8174_v60, %v18144_v32  ;;  %v8335_v8 = vmul.f32 %v8287_v40, %v18147_v49 }
0x172e   :  { %v8178_v33 = vpop.f32.mrb[174].mxu0  ;;  %v8291_v31 = vpop.f32.mrb[134].mxu1 }
0x172f   :  { %v8180_v4 = vpop.f32.mrb[175].mxu0  ;;  %v8293_v35 = vpop.f32.mrb[135].mxu1  ;;  %v8336_v44 = vmul.f32 %v8178_v33, %v18179_v6  ;;  %v8338_v19 = vmul.f32 %v8291_v31, %v18181_v22 }
0x1730   :  { %v8337_v21 = vmul.f32 %v8180_v4, %v18161_v59  ;;  %v8339_v11 = vmul.f32 %v8293_v35, %v18174_v30 }
0x1732   :  { %v8184_v43 = vpop.f32.mrb[176].mxu0  ;;  %v8297_v54 = vpop.f32.mrb[136].mxu1 }
0x1733   :  { %v8186_v63 = vpop.f32.mrb[177].mxu0  ;;  %v8299_v50 = vpop.f32.mrb[137].mxu1  ;;  %v8340_v13 = vmul.f32 %v8184_v43, %v18195_v61  ;;  %v8342_v3 = vmul.f32 %v8297_v54, %v18200_v39 }
0x1734   :  { %v8341_v22 = vmul.f32 %v8186_v63, %v18186_v10  ;;  %v8343_v59 = vmul.f32 %v8299_v50, %v18190_v17 }
0x1736   :  { %v8190_v48 = vpop.f32.mrb[178].mxu0  ;;  %v8303_v18 = vpop.f32.mrb[138].mxu1 }
0x1737   :  { %v8192_v57 = vpop.f32.mrb[179].mxu0  ;;  %v8305_v62 = vpop.f32.mrb[139].mxu1  ;;  %v8344_v61 = vmul.f32 %v8190_v48, %v18211_v52  ;;  %v8346_v39 = vmul.f32 %v8303_v18, %v18214_v1 }
0x1738   :  { %v8345_v10 = vmul.f32 %v8192_v57, %v18198_v47  ;;  %v8347_v17 = vmul.f32 %v8305_v62, %v18205_v45  ;;  %v8364_v47 = vld [vmem:[%s18379_s7] sm:$0x7]  ;;  %v8369_v45 = vpop.permute.xlu0 %8368 }
0x173a   :  { %v8196_v14 = vpop.f32.mrb[180].mxu0  ;;  %v8309_v26 = vpop.f32.mrb[140].mxu1 }
0x173b   :  { %v8348_v34 = vadd.f32 %v8332_v42, %v8196_v14  ;;  %v8350_v38 = vadd.f32 %v8334_v12, %v8309_v26  ;;  %v8198_v41 = vpop.f32.mrb[181].mxu0  ;;  %v8311_v5 = vpop.f32.mrb[141].mxu1 }
0x173c   :  { %v8349_v2 = vadd.f32 %v8333_v28, %v8198_v41  ;;  %v8351_v16 = vadd.f32 %v8335_v8, %v8311_v5 }
0x173e   :  { %v8202_v29 = vpop.f32.mrb[182].mxu0  ;;  %v8315_v32 = vpop.f32.mrb[142].mxu1 }
0x173f   :  { %v8352_v56 = vadd.f32 %v8336_v44, %v8202_v29  ;;  %v8354_v49 = vadd.f32 %v8338_v19, %v8315_v32  ;;  %v8204_v23 = vpop.f32.mrb[183].mxu0  ;;  %v8317_v15 = vpop.f32.mrb[143].mxu1 }
0x1740   :  { %v8353_v46 = vadd.f32 %v8337_v21, %v8204_v23  ;;  %v8355_v27 = vadd.f32 %v8339_v11, %v8317_v15 }
0x1741   :  { %v11416_v55 = vpack.c.bf16 %v8352_v56, %v8348_v34  ;;  %v11424_v6 = vpack.c.bf16 %v8354_v49, %v8350_v38 }
0x1742   :  { %v11414_v36 = vpack.c.bf16 %v8353_v46, %v8349_v2  ;;  %v11422_v30 = vpack.c.bf16 %v8355_v27, %v8351_v16  ;;  %v8208_v0 = vpop.f32.mrb[184].mxu0  ;;  %v8321_v7 = vpop.f32.mrb[144].mxu1 }
0x1743   :  { %v8356_v9 = vadd.f32 %v8340_v13, %v8208_v0  ;;  %v8358_v51 = vadd.f32 %v8342_v3, %v8321_v7  ;;  %v8210_v24 = vpop.f32.mrb[185].mxu0  ;;  %v8323_v58 = vpop.f32.mrb[145].mxu1 }
0x1744   :  { %v8357_v37 = vadd.f32 %v8341_v22, %v8210_v24  ;;  %v8359_v53 = vadd.f32 %v8343_v59, %v8323_v58  ;;  %11415 = vmatprep.subr.bf16.mxu0 %v11414_v36  ;;  %11423 = vmatprep.subr.bf16.mxu1 %v11422_v30 }
0x1745   :  { %11417 = vmatpush1.bf16.msra.mxu0 %v11416_v55  ;;  %11425 = vmatpush1.bf16.msra.mxu1 %v11424_v6 }
0x1746   :  { %v8214_v25 = vpop.f32.mrb[186].mxu0  ;;  %v8327_v20 = vpop.f32.mrb[146].mxu1 }
0x1747   :  { %v8360_v60 = vadd.f32 %v8344_v61, %v8214_v25  ;;  %v8362_v40 = vadd.f32 %v8346_v39, %v8327_v20  ;;  %v8216_v33 = vpop.f32.mrb[187].mxu0  ;;  %v8329_v31 = vpop.f32.mrb[147].mxu1 }
0x1748   :  { %v8361_v4 = vadd.f32 %v8345_v10, %v8216_v33  ;;  %v8363_v35 = vadd.f32 %v8347_v17, %v8329_v31 }
0x1749   :  { %v11420_v43 = vpack.c.bf16 %v8360_v60, %v8356_v9  ;;  %v11428_v54 = vpack.c.bf16 %v8362_v40, %v8358_v51 }
0x174a   :  { %v11418_v63 = vpack.c.bf16 %v8361_v4, %v8357_v37  ;;  %v11426_v52 = vpack.c.bf16 %v8363_v35, %v8359_v53 }
0x174c   :  { %11419 = vmatprep.subr.bf16.mxu0 %v11418_v63  ;;  %11427 = vmatprep.subr.bf16.mxu1 %v11426_v52 }
0x174d   :  { %11421 = vmatpush1.bf16.msra.mxu0 %v11420_v43  ;;  %11429 = vmatpush1.bf16.msra.mxu1 %v11428_v54 }
0x1750   :  { %9047 = vmatmul.mubr.msk.f32.vlgmr.msra.gmra.mrb[188].mxu0 %vm19095_vm6, %v8364_v47  ;;  %9048 = vmatmul.mubr.msk.f32.vlgmr.msra.gmra.mrb[148].mxu1 %vm19096_vm3, %v8364_v47 }
0x1823   :  { %v8440_v1 = vpop.f32.mrb[188].mxu0  ;;  %v8511_v50 = vpop.f32.mrb[148].mxu1 }
0x1824   :  { %v8441_v48 = vadd.f32 %v8440_v1, %v8369_v45  ;;  %v8512_v18 = vadd.f32 %v8511_v50, %v8369_v45  ;;  %v8442_v57 = vpop.f32.mrb[189].mxu0  ;;  %v8513_v62 = vpop.f32.mrb[149].mxu1 }
0x1825   :  { %v8443_v42 = vadd.f32 %v8442_v57, %v8369_v45  ;;  %v8514_v12 = vadd.f32 %v8513_v62, %v8369_v45 }
0x1827   :  { %v8518_v28 = vcombine.low %v8441_v48, %v8443_v42  ;;  %v8523_v8 = vcombine.low %v8512_v18, %v8514_v12 }
0x1829   :  { %8520 = vst [vmem:[%s18380_s15] sm:$0x77] %v8518_v28  ;;  %9049 = vst [vmem:[%s18380_s15 + $0x8] sm:$0x77] %v8523_v8 }

</bundles_post_ra>
